<compile_context>
chip_gen: v7x
topology: tpu7x:2x2x1
jax: 0.10.0
libtpu: 0.0.40
codegen_flags: <defaults>
</compile_context>

<pallas_src>
import functools

import jax
import jax.numpy as jnp
from jax.experimental import pallas as pl
from jax.experimental.pallas import tpu as pltpu

EPS = 1e-5


# ------------------------------ in-kernel math ------------------------------ #

def _dot_bf16(a, b):
    """MXU matmul with bf16 operands and f32 accumulation."""
    return jnp.dot(a.astype(jnp.bfloat16), b.astype(jnp.bfloat16),
                   preferred_element_type=jnp.float32)


def _conv3x3_flat(a_flat, w_ref, b_ref, pad_ref, H, W):
    """Stride-1 3x3 conv with replicate padding, as 9 flat tap matmuls.

    a_flat:  (H*W, Cin) f32 (post BN+ReLU).
    w_ref:   (3, 3, Cin, Cout) ref;  b_ref: (1, Cout) ref.
    pad_ref: (H+2, W+2, Cin) VMEM scratch (padding never touches HBM).
    Returns  (H*W, Cout) f32.
    """
    Cin = a_flat.shape[-1]
    Cout = w_ref.shape[-1]
    # Replicate-pad into the VMEM scratch.
    pad_ref[1:H + 1, 1:W + 1, :] = a_flat.reshape(H, W, Cin)
    pad_ref[0:1, 1:W + 1, :] = pad_ref[1:2, 1:W + 1, :]              # top edge
    pad_ref[H + 1:H + 2, 1:W + 1, :] = pad_ref[H:H + 1, 1:W + 1, :]  # bottom edge
    pad_ref[:, 0:1, :] = pad_ref[:, 1:2, :]                          # left (+corners)
    pad_ref[:, W + 1:W + 2, :] = pad_ref[:, W:W + 1, :]              # right (+corners)
    # 9 tap matmuls over the flattened image: (H*W, Cin) @ (Cin, Cout).
    acc = jnp.zeros((H * W, Cout), jnp.float32)
    for kh in range(3):
        for kw in range(3):
            slab = pad_ref[kh:kh + H, kw:kw + W, :].reshape(H * W, Cin)
            acc = acc + _dot_bf16(slab, w_ref[kh, kw])
    return acc + b_ref[...]                                          # bias added once


def _bottleneck_trunk(xf, s1, t1, w1, b1, s2, t2, w2, b2, s3, t3, w3, b3,
                      pad_ref, sel, H, W):
    """[BN,ReLU,1x1] [BN,ReLU,3x3] (optional stride row-select) [BN,ReLU,1x1->4f].

    xf: (H*W, Cin) f32.  Returns (Mo, 4f) f32 (Mo = sel rows, or H*W).
    """
    h = jnp.maximum(xf * s1[...] + t1[...], 0.0)
    h = _dot_bf16(h, w1[...]) + b1[...]                              # (H*W, f)
    h = jnp.maximum(h * s2[...] + t2[...], 0.0)
    h = _conv3x3_flat(h, w2, b2, pad_ref, H, W)                      # (H*W, f)
    if sel is not None:
        # stride-s conv output == stride-1 output at the selected positions.
        h = jnp.dot(sel, h, preferred_element_type=jnp.float32)      # (Ho*Wo, f)
    h = jnp.maximum(h * s3[...] + t3[...], 0.0)
    return _dot_bf16(h, w3[...]) + b3[...]                           # (Mo, 4f)


# -------------------------------- kernels ---------------------------------- #

def _identity_block_kernel(x_ref, s1, t1, w1, b1, s2, t2, w2, b2,
                           s3, t3, w3, b3, o_ref, pad_ref, *, H, W):
    # x_ref/o_ref block: (1, H*W, 4f).  Bottleneck + residual add, fully fused.
    xf = x_ref[0].astype(jnp.float32)
    out = xf + _bottleneck_trunk(xf, s1, t1, w1, b1, s2, t2, w2, b2,
                                 s3, t3, w3, b3, pad_ref, None, H, W)
    o_ref[0] = out.astype(o_ref.dtype)


def _projection_block_kernel(*refs, H, W, strided):
    # Bottleneck (stride s) + projection shortcut (BN pre-folded 1x1, stride s)
    # + residual add, fully fused.
    if strided:
        (x_ref, sel_ref, s1, t1, w1, b1, s2, t2, w2, b2, s3, t3, w3, b3,
         wsc_ref, bsc_ref, o_ref, pad_ref) = refs
        sel = sel_ref[...]
    else:
        (x_ref, s1, t1, w1, b1, s2, t2, w2, b2, s3, t3, w3, b3,
         wsc_ref, bsc_ref, o_ref, pad_ref) = refs
        sel = None
    xf = x_ref[0].astype(jnp.float32)                                # (H*W, Cin)
    out = _bottleneck_trunk(xf, s1, t1, w1, b1, s2, t2, w2, b2,
                            s3, t3, w3, b3, pad_ref, sel, H, W)
    # Shortcut: 1x1 stride-s conv == subsample rows, then 1x1 conv.
    xs = xf if sel is None else jnp.dot(sel, xf,
                                        preferred_element_type=jnp.float32)
    out = out + _dot_bf16(xs, wsc_ref[...]) + bsc_ref[...]
    o_ref[0] = out.astype(o_ref.dtype)


# -------------------------------- wrappers ---------------------------------- #

_BLOCK_KEYS = ("bn1_scale", "bn1_shift", "w1", "b1",
               "bn2_scale", "bn2_shift", "w2", "b2",
               "bn3_scale", "bn3_shift", "w3", "b3")


def _full_spec(shape):
    nd = len(shape)
    return pl.BlockSpec(shape, lambda *_: (0,) * nd)


def _stride_select(H, W, stride):
    """(Ho*Wo, H*W) 0/1 matrix picking the stride-s output rows of the flat image."""
    rows = (jnp.arange(0, H, stride)[:, None] * W
            + jnp.arange(0, W, stride)[None, :]).reshape(-1)
    return (rows[:, None] == jnp.arange(H * W)[None, :]).astype(jnp.float32)


def identity_block(x, p):
    """x: (N, H, W, 4f) -> (N, H, W, 4f).  One fused pallas_call."""
    N, H, W, C = x.shape
    f = p["w1"].shape[-1]
    params = [p[k] for k in _BLOCK_KEYS]
    xm = x.reshape(N, H * W, C)                        # free XLA reshape
    in_specs = ([pl.BlockSpec((1, H * W, C), lambda n: (n, 0, 0))]
                + [_full_spec(a.shape) for a in params])
    out = pl.pallas_call(
        functools.partial(_identity_block_kernel, H=H, W=W),
        out_shape=jax.ShapeDtypeStruct((N, H * W, C), x.dtype),
        grid=(N,),
        in_specs=in_specs,
        out_specs=pl.BlockSpec((1, H * W, C), lambda n: (n, 0, 0)),
        scratch_shapes=[pltpu.VMEM((H + 2, W + 2, f), jnp.float32)],
        compiler_params=pltpu.CompilerParams(dimension_semantics=("parallel",)),
    )(xm, *params)
    return out.reshape(N, H, W, C)


def projection_block(x, p, shortcut, stride):
    """x: (N, H, W, Cin) -> (N, Ho, Wo, 4f).  One fused pallas_call."""
    N, H, W, Cin = x.shape
    f = p["w1"].shape[-1]
    C4 = 4 * f
    Ho = (H - 1) // stride + 1
    Wo = (W - 1) // stride + 1
    strided = stride > 1
    params = [p[k] for k in _BLOCK_KEYS] + [shortcut["w"], shortcut["b"]]
    xm = x.reshape(N, H * W, Cin)                      # free XLA reshape
    args = [xm]
    in_specs = [pl.BlockSpec((1, H * W, Cin), lambda n: (n, 0, 0))]
    if strided:
        sel = _stride_select(H, W, stride)
        args.append(sel)
        in_specs.append(_full_spec(sel.shape))
    args += params
    in_specs += [_full_spec(a.shape) for a in params]
    out = pl.pallas_call(
        functools.partial(_projection_block_kernel, H=H, W=W, strided=strided),
        out_shape=jax.ShapeDtypeStruct((N, Ho * Wo, C4), x.dtype),
        grid=(N,),
        in_specs=in_specs,
        out_specs=pl.BlockSpec((1, Ho * Wo, C4), lambda n: (n, 0, 0)),
        scratch_shapes=[pltpu.VMEM((H + 2, W + 2, f), jnp.float32)],
        compiler_params=pltpu.CompilerParams(dimension_semantics=("parallel",)),
    )(*args)
    return out.reshape(N, Ho, Wo, C4)


# ------------------------------ parameter init ------------------------------ #

def _init_bn(key, c):
    k1, k2, k3, k4 = jax.random.split(key, 4)
    gamma = 1.0 + 0.1 * jax.random.normal(k1, (c,), jnp.float32)
    beta = 0.1 * jax.random.normal(k2, (c,), jnp.float32)
    mean = 0.1 * jax.random.normal(k3, (c,), jnp.float32)
    var = 1.0 + 0.1 * jax.random.uniform(k4, (c,), jnp.float32)
    scale = gamma / jnp.sqrt(var + EPS)            # folded inference-mode BN
    shift = beta - mean * scale
    return scale.reshape(1, c), shift.reshape(1, c)


def _init_conv1x1(key, cin, cout):
    kw, kb = jax.random.split(key)
    w = jax.random.normal(kw, (cin, cout), jnp.float32) / jnp.sqrt(cin)
    b = 0.01 * jax.random.normal(kb, (1, cout), jnp.float32)
    return w, b


def _init_conv3x3(key, cin, cout):
    kw, kb = jax.random.split(key)
    w = jax.random.normal(kw, (3, 3, cin, cout), jnp.float32) / jnp.sqrt(9 * cin)
    b = 0.01 * jax.random.normal(kb, (1, cout), jnp.float32)
    return w, b


def _build_bottleneck_params(key, trailing, n_filters):
    ks = jax.random.split(key, 6)
    s1, h1 = _init_bn(ks[0], trailing)
    w1, b1 = _init_conv1x1(ks[1], trailing, n_filters)
    s2, h2 = _init_bn(ks[2], n_filters)
    w2, b2 = _init_conv3x3(ks[3], n_filters, n_filters)
    s3, h3 = _init_bn(ks[4], n_filters)
    w3, b3 = _init_conv1x1(ks[5], n_filters, 4 * n_filters)
    params = dict(bn1_scale=s1, bn1_shift=h1, w1=w1, b1=b1,
                  bn2_scale=s2, bn2_shift=h2, w2=w2, b2=b2,
                  bn3_scale=s3, bn3_shift=h3, w3=w3, b3=b3)
    return params, 4 * n_filters


def build_res_learner_params(key, group_parameters, incoming_filters):
    trailing = incoming_filters
    groups = []
    for gi, (n_filters, n_blocks) in enumerate(group_parameters):
        stride = 1 if gi == 0 else 2
        key, k_sc_bn, k_sc_w, k_proj = jax.random.split(key, 4)
        sc_scale, sc_shift = _init_bn(k_sc_bn, trailing)
        sc_w, sc_b = _init_conv1x1(k_sc_w, trailing, 4 * n_filters)
        # Shortcut = BN (no ReLU) then 1x1 conv -> fold BN into the conv:
        #   (x*s + t) @ W + b == x @ (s[:,None]*W) + (t @ W + b)
        shortcut = dict(w=sc_scale.reshape(-1, 1) * sc_w,
                        b=sc_shift @ sc_w + sc_b)
        projection, trailing = _build_bottleneck_params(k_proj, trailing, n_filters)
        identities = []
        for _ in range(n_blocks):
            key, kb = jax.random.split(key)
            blk, trailing = _build_bottleneck_params(kb, trailing, n_filters)
            identities.append(blk)
        groups.append(dict(stride=stride, shortcut=shortcut,
                           projection=projection, identities=identities))
    return groups


# --------------------------------- forward --------------------------------- #

def res_learner_forward(x, groups):
    # Per group: x = projection(x) + shortcut(x); then identity blocks with
    # residual adds (each call below is ONE fused pallas_call).
    for g in groups:
        x = projection_block(x, g["projection"], g["shortcut"], g["stride"])
        for blk in g["identities"]:
            x = identity_block(x, blk)
    return x


# ----------------------------------- main ----------------------------------- #

if __name__ == "__main__":
    key = jax.random.PRNGKey(0)
    k_params, k_input = jax.random.split(key)

    # Small ResLearner config: groups [(16, 2), (32, 2)], incoming_filters=16.
    group_parameters = [(16, 2), (32, 2)]
    incoming_filters = 16
    params = build_res_learner_params(k_params, group_parameters, incoming_filters)

    # Input in NHWC (equivalent PyTorch NCHW shape: (2, 16, 8, 8)).
    x = jax.random.normal(k_input, (2, 8, 8, incoming_filters), jnp.float32)

    fwd = jax.jit(lambda inp: res_learner_forward(inp, params))
    y = jax.block_until_ready(fwd(x))

    expected_shape = (2, 4, 4, 4 * group_parameters[-1][0])  # (2, 4, 4, 128)
    assert y.shape == expected_shape, y.shape
    assert bool(jnp.all(jnp.isfinite(y)))
    print("KERNEL_OK")
</pallas_src>

<mosaic_0001>
module attributes {stable_mosaic.version = 11 : i64} {
  func.func @_projection_block_kernel(%arg0: i32, %arg1: memref<1x64x16xf32, #tpu.memory_space<vmem>>, %arg2: memref<1x16xf32, #tpu.memory_space<vmem>>, %arg3: memref<1x16xf32, #tpu.memory_space<vmem>>, %arg4: memref<16x16xf32, #tpu.memory_space<vmem>>, %arg5: memref<1x16xf32, #tpu.memory_space<vmem>>, %arg6: memref<1x16xf32, #tpu.memory_space<vmem>>, %arg7: memref<1x16xf32, #tpu.memory_space<vmem>>, %arg8: memref<3x3x16x16xf32, #tpu.memory_space<vmem>>, %arg9: memref<1x16xf32, #tpu.memory_space<vmem>>, %arg10: memref<1x16xf32, #tpu.memory_space<vmem>>, %arg11: memref<1x16xf32, #tpu.memory_space<vmem>>, %arg12: memref<16x64xf32, #tpu.memory_space<vmem>>, %arg13: memref<1x64xf32, #tpu.memory_space<vmem>>, %arg14: memref<16x64xf32, #tpu.memory_space<vmem>>, %arg15: memref<1x64xf32, #tpu.memory_space<vmem>>, %arg16: memref<1x64x64xf32, #tpu.memory_space<vmem>>, %arg17: memref<10x10x16xf32, #tpu.memory_space<vmem>>) attributes {dimension_semantics = [#tpu.dimension_semantics<parallel>], iteration_bounds = array<i64: 2>, scalar_prefetch = 0 : i64, scratch_operands = 1 : i64, tpu.core_type = #tpu.core_type<tc>, window_params = [{transform_indices = @transform_0, window_bounds = array<i64: 1, 64, 16>}, {pipeline_mode = #tpu.pipeline_mode<synchronous>, transform_indices = @transform_1, window_bounds = array<i64: 1, 16>}, {pipeline_mode = #tpu.pipeline_mode<synchronous>, transform_indices = @transform_2, window_bounds = array<i64: 1, 16>}, {pipeline_mode = #tpu.pipeline_mode<synchronous>, transform_indices = @transform_3, window_bounds = array<i64: 16, 16>}, {pipeline_mode = #tpu.pipeline_mode<synchronous>, transform_indices = @transform_4, window_bounds = array<i64: 1, 16>}, {pipeline_mode = #tpu.pipeline_mode<synchronous>, transform_indices = @transform_5, window_bounds = array<i64: 1, 16>}, {pipeline_mode = #tpu.pipeline_mode<synchronous>, transform_indices = @transform_6, window_bounds = array<i64: 1, 16>}, {pipeline_mode = #tpu.pipeline_mode<synchronous>, transform_indices = @transform_7, window_bounds = array<i64: 3, 3, 16, 16>}, {pipeline_mode = #tpu.pipeline_mode<synchronous>, transform_indices = @transform_8, window_bounds = array<i64: 1, 16>}, {pipeline_mode = #tpu.pipeline_mode<synchronous>, transform_indices = @transform_9, window_bounds = array<i64: 1, 16>}, {pipeline_mode = #tpu.pipeline_mode<synchronous>, transform_indices = @transform_10, window_bounds = array<i64: 1, 16>}, {pipeline_mode = #tpu.pipeline_mode<synchronous>, transform_indices = @transform_11, window_bounds = array<i64: 16, 64>}, {pipeline_mode = #tpu.pipeline_mode<synchronous>, transform_indices = @transform_12, window_bounds = array<i64: 1, 64>}, {pipeline_mode = #tpu.pipeline_mode<synchronous>, transform_indices = @transform_13, window_bounds = array<i64: 16, 64>}, {pipeline_mode = #tpu.pipeline_mode<synchronous>, transform_indices = @transform_14, window_bounds = array<i64: 1, 64>}, {transform_indices = @transform_15, window_bounds = array<i64: 1, 64, 64>}]} {
    %c0 = arith.constant 0 : index
    %c0_0 = arith.constant 0 : index
    %c0_1 = arith.constant 0 : index
    %0 = vector.load %arg1[%c0, %c0_0, %c0_1] : memref<1x64x16xf32, #tpu.memory_space<vmem>>, vector<1x64x16xf32>
    %1 = vector.shape_cast %0 : vector<1x64x16xf32> to vector<64x16xf32>
    %c0_2 = arith.constant 0 : index
    %c0_3 = arith.constant 0 : index
    %2 = vector.load %arg2[%c0_2, %c0_3] : memref<1x16xf32, #tpu.memory_space<vmem>>, vector<1x16xf32>
    %3 = vector.broadcast %2 : vector<1x16xf32> to vector<64x16xf32>
    %4 = arith.mulf %1, %3 : vector<64x16xf32>
    %c0_4 = arith.constant 0 : index
    %c0_5 = arith.constant 0 : index
    %5 = vector.load %arg3[%c0_4, %c0_5] : memref<1x16xf32, #tpu.memory_space<vmem>>, vector<1x16xf32>
    %6 = vector.broadcast %5 : vector<1x16xf32> to vector<64x16xf32>
    %7 = arith.addf %4, %6 : vector<64x16xf32>
    %cst = arith.constant 0.000000e+00 : f32
    %8 = vector.broadcast %cst : f32 to vector<64x16xf32>
    %9 = arith.maximumf %7, %8 : vector<64x16xf32>
    %c0_6 = arith.constant 0 : index
    %c0_7 = arith.constant 0 : index
    %10 = vector.load %arg4[%c0_6, %c0_7] : memref<16x16xf32, #tpu.memory_space<vmem>>, vector<16x16xf32>
    %11 = arith.truncf %9 : vector<64x16xf32> to vector<64x16xbf16>
    %12 = arith.truncf %10 : vector<16x16xf32> to vector<16x16xbf16>
    %cst_8 = arith.constant dense<0.000000e+00> : vector<64x16xf32>
    %13 = tpu.matmul %11, %12, %cst_8 {dimension_numbers = #tpu.dot_dimension_numbers<[1], [0], [0], [1], [0, 0, 1, 1], [], []>} : vector<64x16xbf16>, vector<16x16xbf16>, vector<64x16xf32> -> vector<64x16xf32>
    %c0_9 = arith.constant 0 : index
    %c0_10 = arith.constant 0 : index
    %14 = vector.load %arg5[%c0_9, %c0_10] : memref<1x16xf32, #tpu.memory_space<vmem>>, vector<1x16xf32>
    %15 = vector.broadcast %14 : vector<1x16xf32> to vector<64x16xf32>
    %16 = arith.addf %13, %15 : vector<64x16xf32>
    %c0_11 = arith.constant 0 : index
    %c0_12 = arith.constant 0 : index
    %17 = vector.load %arg6[%c0_11, %c0_12] : memref<1x16xf32, #tpu.memory_space<vmem>>, vector<1x16xf32>
    %18 = vector.broadcast %17 : vector<1x16xf32> to vector<64x16xf32>
    %19 = arith.mulf %16, %18 : vector<64x16xf32>
    %c0_13 = arith.constant 0 : index
    %c0_14 = arith.constant 0 : index
    %20 = vector.load %arg7[%c0_13, %c0_14] : memref<1x16xf32, #tpu.memory_space<vmem>>, vector<1x16xf32>
    %21 = vector.broadcast %20 : vector<1x16xf32> to vector<64x16xf32>
    %22 = arith.addf %19, %21 : vector<64x16xf32>
    %cst_15 = arith.constant 0.000000e+00 : f32
    %23 = vector.broadcast %cst_15 : f32 to vector<64x16xf32>
    %24 = arith.maximumf %22, %23 : vector<64x16xf32>
    %25 = vector.shape_cast %24 : vector<64x16xf32> to vector<8x8x16xf32>
    %c1 = arith.constant 1 : index
    %c1_16 = arith.constant 1 : index
    %c0_17 = arith.constant 0 : index
    %26 = vector.load %arg17[%c1, %c1_16, %c0_17] : memref<10x10x16xf32, #tpu.memory_space<vmem>>, vector<8x8x16xf32>
    tpu.vector_store %arg17[%c1, %c1_16, %c0_17], %25 {strides = array<i32>} : memref<10x10x16xf32, #tpu.memory_space<vmem>>, vector<8x8x16xf32>,
    %c1_18 = arith.constant 1 : index
    %c1_19 = arith.constant 1 : index
    %c0_20 = arith.constant 0 : index
    %27 = vector.load %arg17[%c1_18, %c1_19, %c0_20] : memref<10x10x16xf32, #tpu.memory_space<vmem>>, vector<1x8x16xf32>
    %c0_21 = arith.constant 0 : index
    %c1_22 = arith.constant 1 : index
    %c0_23 = arith.constant 0 : index
    %28 = vector.load %arg17[%c0_21, %c1_22, %c0_23] : memref<10x10x16xf32, #tpu.memory_space<vmem>>, vector<1x8x16xf32>
    tpu.vector_store %arg17[%c0_21, %c1_22, %c0_23], %27 {strides = array<i32>} : memref<10x10x16xf32, #tpu.memory_space<vmem>>, vector<1x8x16xf32>,
    %c8 = arith.constant 8 : index
    %c1_24 = arith.constant 1 : index
    %c0_25 = arith.constant 0 : index
    %29 = vector.load %arg17[%c8, %c1_24, %c0_25] : memref<10x10x16xf32, #tpu.memory_space<vmem>>, vector<1x8x16xf32>
    %c9 = arith.constant 9 : index
    %c1_26 = arith.constant 1 : index
    %c0_27 = arith.constant 0 : index
    %30 = vector.load %arg17[%c9, %c1_26, %c0_27] : memref<10x10x16xf32, #tpu.memory_space<vmem>>, vector<1x8x16xf32>
    tpu.vector_store %arg17[%c9, %c1_26, %c0_27], %29 {strides = array<i32>} : memref<10x10x16xf32, #tpu.memory_space<vmem>>, vector<1x8x16xf32>,
    %c0_28 = arith.constant 0 : index
    %c1_29 = arith.constant 1 : index
    %c0_30 = arith.constant 0 : index
    %31 = vector.load %arg17[%c0_28, %c1_29, %c0_30] : memref<10x10x16xf32, #tpu.memory_space<vmem>>, vector<10x1x16xf32>
    %c0_31 = arith.constant 0 : index
    %c0_32 = arith.constant 0 : index
    %c0_33 = arith.constant 0 : index
    %32 = vector.load %arg17[%c0_31, %c0_32, %c0_33] : memref<10x10x16xf32, #tpu.memory_space<vmem>>, vector<10x1x16xf32>
    tpu.vector_store %arg17[%c0_31, %c0_32, %c0_33], %31 {strides = array<i32>} : memref<10x10x16xf32, #tpu.memory_space<vmem>>, vector<10x1x16xf32>,
    %c0_34 = arith.constant 0 : index
    %c8_35 = arith.constant 8 : index
    %c0_36 = arith.constant 0 : index
    %33 = vector.load %arg17[%c0_34, %c8_35, %c0_36] : memref<10x10x16xf32, #tpu.memory_space<vmem>>, vector<10x1x16xf32>
    %c0_37 = arith.constant 0 : index
    %c9_38 = arith.constant 9 : index
    %c0_39 = arith.constant 0 : index
    %34 = vector.load %arg17[%c0_37, %c9_38, %c0_39] : memref<10x10x16xf32, #tpu.memory_space<vmem>>, vector<10x1x16xf32>
    tpu.vector_store %arg17[%c0_37, %c9_38, %c0_39], %33 {strides = array<i32>} : memref<10x10x16xf32, #tpu.memory_space<vmem>>, vector<10x1x16xf32>,
    %cst_40 = arith.constant 0.000000e+00 : f32
    %35 = vector.broadcast %cst_40 : f32 to vector<64x16xf32>
    %c0_41 = arith.constant 0 : index
    %c0_42 = arith.constant 0 : index
    %c0_43 = arith.constant 0 : index
    %36 = vector.load %arg17[%c0_41, %c0_42, %c0_43] : memref<10x10x16xf32, #tpu.memory_space<vmem>>, vector<8x8x16xf32>
    %37 = vector.shape_cast %36 : vector<8x8x16xf32> to vector<64x16xf32>
    %c0_44 = arith.constant 0 : index
    %c0_45 = arith.constant 0 : index
    %c0_46 = arith.constant 0 : index
    %c0_47 = arith.constant 0 : index
    %38 = vector.load %arg8[%c0_44, %c0_45, %c0_46, %c0_47] : memref<3x3x16x16xf32, #tpu.memory_space<vmem>>, vector<1x1x16x16xf32>
    %39 = vector.shape_cast %38 : vector<1x1x16x16xf32> to vector<16x16xf32>
    %40 = arith.truncf %37 : vector<64x16xf32> to vector<64x16xbf16>
    %41 = arith.truncf %39 : vector<16x16xf32> to vector<16x16xbf16>
    %cst_48 = arith.constant dense<0.000000e+00> : vector<64x16xf32>
    %42 = tpu.matmul %40, %41, %cst_48 {dimension_numbers = #tpu.dot_dimension_numbers<[1], [0], [0], [1], [0, 0, 1, 1], [], []>} : vector<64x16xbf16>, vector<16x16xbf16>, vector<64x16xf32> -> vector<64x16xf32>
    %43 = arith.addf %35, %42 : vector<64x16xf32>
    %c0_49 = arith.constant 0 : index
    %c1_50 = arith.constant 1 : index
    %c0_51 = arith.constant 0 : index
    %44 = vector.load %arg17[%c0_49, %c1_50, %c0_51] : memref<10x10x16xf32, #tpu.memory_space<vmem>>, vector<8x8x16xf32>
    %45 = vector.shape_cast %44 : vector<8x8x16xf32> to vector<64x16xf32>
    %c0_52 = arith.constant 0 : index
    %c1_53 = arith.constant 1 : index
    %c0_54 = arith.constant 0 : index
    %c0_55 = arith.constant 0 : index
    %46 = vector.load %arg8[%c0_52, %c1_53, %c0_54, %c0_55] : memref<3x3x16x16xf32, #tpu.memory_space<vmem>>, vector<1x1x16x16xf32>
    %47 = vector.shape_cast %46 : vector<1x1x16x16xf32> to vector<16x16xf32>
    %48 = arith.truncf %45 : vector<64x16xf32> to vector<64x16xbf16>
    %49 = arith.truncf %47 : vector<16x16xf32> to vector<16x16xbf16>
    %cst_56 = arith.constant dense<0.000000e+00> : vector<64x16xf32>
    %50 = tpu.matmul %48, %49, %cst_56 {dimension_numbers = #tpu.dot_dimension_numbers<[1], [0], [0], [1], [0, 0, 1, 1], [], []>} : vector<64x16xbf16>, vector<16x16xbf16>, vector<64x16xf32> -> vector<64x16xf32>
    %51 = arith.addf %43, %50 : vector<64x16xf32>
    %c0_57 = arith.constant 0 : index
    %c2 = arith.constant 2 : index
    %c0_58 = arith.constant 0 : index
    %52 = vector.load %arg17[%c0_57, %c2, %c0_58] : memref<10x10x16xf32, #tpu.memory_space<vmem>>, vector<8x8x16xf32>
    %53 = vector.shape_cast %52 : vector<8x8x16xf32> to vector<64x16xf32>
    %c0_59 = arith.constant 0 : index
    %c2_60 = arith.constant 2 : index
    %c0_61 = arith.constant 0 : index
    %c0_62 = arith.constant 0 : index
    %54 = vector.load %arg8[%c0_59, %c2_60, %c0_61, %c0_62] : memref<3x3x16x16xf32, #tpu.memory_space<vmem>>, vector<1x1x16x16xf32>
    %55 = vector.shape_cast %54 : vector<1x1x16x16xf32> to vector<16x16xf32>
    %56 = arith.truncf %53 : vector<64x16xf32> to vector<64x16xbf16>
    %57 = arith.truncf %55 : vector<16x16xf32> to vector<16x16xbf16>
    %cst_63 = arith.constant dense<0.000000e+00> : vector<64x16xf32>
    %58 = tpu.matmul %56, %57, %cst_63 {dimension_numbers = #tpu.dot_dimension_numbers<[1], [0], [0], [1], [0, 0, 1, 1], [], []>} : vector<64x16xbf16>, vector<16x16xbf16>, vector<64x16xf32> -> vector<64x16xf32>
    %59 = arith.addf %51, %58 : vector<64x16xf32>
    %c1_64 = arith.constant 1 : index
    %c0_65 = arith.constant 0 : index
    %c0_66 = arith.constant 0 : index
    %60 = vector.load %arg17[%c1_64, %c0_65, %c0_66] : memref<10x10x16xf32, #tpu.memory_space<vmem>>, vector<8x8x16xf32>
    %61 = vector.shape_cast %60 : vector<8x8x16xf32> to vector<64x16xf32>
    %c1_67 = arith.constant 1 : index
    %c0_68 = arith.constant 0 : index
    %c0_69 = arith.constant 0 : index
    %c0_70 = arith.constant 0 : index
    %62 = vector.load %arg8[%c1_67, %c0_68, %c0_69, %c0_70] : memref<3x3x16x16xf32, #tpu.memory_space<vmem>>, vector<1x1x16x16xf32>
    %63 = vector.shape_cast %62 : vector<1x1x16x16xf32> to vector<16x16xf32>
    %64 = arith.truncf %61 : vector<64x16xf32> to vector<64x16xbf16>
    %65 = arith.truncf %63 : vector<16x16xf32> to vector<16x16xbf16>
    %cst_71 = arith.constant dense<0.000000e+00> : vector<64x16xf32>
    %66 = tpu.matmul %64, %65, %cst_71 {dimension_numbers = #tpu.dot_dimension_numbers<[1], [0], [0], [1], [0, 0, 1, 1], [], []>} : vector<64x16xbf16>, vector<16x16xbf16>, vector<64x16xf32> -> vector<64x16xf32>
    %67 = arith.addf %59, %66 : vector<64x16xf32>
    %c1_72 = arith.constant 1 : index
    %c1_73 = arith.constant 1 : index
    %c0_74 = arith.constant 0 : index
    %68 = vector.load %arg17[%c1_72, %c1_73, %c0_74] : memref<10x10x16xf32, #tpu.memory_space<vmem>>, vector<8x8x16xf32>
    %69 = vector.shape_cast %68 : vector<8x8x16xf32> to vector<64x16xf32>
    %c1_75 = arith.constant 1 : index
    %c1_76 = arith.constant 1 : index
    %c0_77 = arith.constant 0 : index
    %c0_78 = arith.constant 0 : index
    %70 = vector.load %arg8[%c1_75, %c1_76, %c0_77, %c0_78] : memref<3x3x16x16xf32, #tpu.memory_space<vmem>>, vector<1x1x16x16xf32>
    %71 = vector.shape_cast %70 : vector<1x1x16x16xf32> to vector<16x16xf32>
    %72 = arith.truncf %69 : vector<64x16xf32> to vector<64x16xbf16>
    %73 = arith.truncf %71 : vector<16x16xf32> to vector<16x16xbf16>
    %cst_79 = arith.constant dense<0.000000e+00> : vector<64x16xf32>
    %74 = tpu.matmul %72, %73, %cst_79 {dimension_numbers = #tpu.dot_dimension_numbers<[1], [0], [0], [1], [0, 0, 1, 1], [], []>} : vector<64x16xbf16>, vector<16x16xbf16>, vector<64x16xf32> -> vector<64x16xf32>
    %75 = arith.addf %67, %74 : vector<64x16xf32>
    %c1_80 = arith.constant 1 : index
    %c2_81 = arith.constant 2 : index
    %c0_82 = arith.constant 0 : index
    %76 = vector.load %arg17[%c1_80, %c2_81, %c0_82] : memref<10x10x16xf32, #tpu.memory_space<vmem>>, vector<8x8x16xf32>
    %77 = vector.shape_cast %76 : vector<8x8x16xf32> to vector<64x16xf32>
    %c1_83 = arith.constant 1 : index
    %c2_84 = arith.constant 2 : index
    %c0_85 = arith.constant 0 : index
    %c0_86 = arith.constant 0 : index
    %78 = vector.load %arg8[%c1_83, %c2_84, %c0_85, %c0_86] : memref<3x3x16x16xf32, #tpu.memory_space<vmem>>, vector<1x1x16x16xf32>
    %79 = vector.shape_cast %78 : vector<1x1x16x16xf32> to vector<16x16xf32>
    %80 = arith.truncf %77 : vector<64x16xf32> to vector<64x16xbf16>
    %81 = arith.truncf %79 : vector<16x16xf32> to vector<16x16xbf16>
    %cst_87 = arith.constant dense<0.000000e+00> : vector<64x16xf32>
    %82 = tpu.matmul %80, %81, %cst_87 {dimension_numbers = #tpu.dot_dimension_numbers<[1], [0], [0], [1], [0, 0, 1, 1], [], []>} : vector<64x16xbf16>, vector<16x16xbf16>, vector<64x16xf32> -> vector<64x16xf32>
    %83 = arith.addf %75, %82 : vector<64x16xf32>
    %c2_88 = arith.constant 2 : index
    %c0_89 = arith.constant 0 : index
    %c0_90 = arith.constant 0 : index
    %84 = vector.load %arg17[%c2_88, %c0_89, %c0_90] : memref<10x10x16xf32, #tpu.memory_space<vmem>>, vector<8x8x16xf32>
    %85 = vector.shape_cast %84 : vector<8x8x16xf32> to vector<64x16xf32>
    %c2_91 = arith.constant 2 : index
    %c0_92 = arith.constant 0 : index
    %c0_93 = arith.constant 0 : index
    %c0_94 = arith.constant 0 : index
    %86 = vector.load %arg8[%c2_91, %c0_92, %c0_93, %c0_94] : memref<3x3x16x16xf32, #tpu.memory_space<vmem>>, vector<1x1x16x16xf32>
    %87 = vector.shape_cast %86 : vector<1x1x16x16xf32> to vector<16x16xf32>
    %88 = arith.truncf %85 : vector<64x16xf32> to vector<64x16xbf16>
    %89 = arith.truncf %87 : vector<16x16xf32> to vector<16x16xbf16>
    %cst_95 = arith.constant dense<0.000000e+00> : vector<64x16xf32>
    %90 = tpu.matmul %88, %89, %cst_95 {dimension_numbers = #tpu.dot_dimension_numbers<[1], [0], [0], [1], [0, 0, 1, 1], [], []>} : vector<64x16xbf16>, vector<16x16xbf16>, vector<64x16xf32> -> vector<64x16xf32>
    %91 = arith.addf %83, %90 : vector<64x16xf32>
    %c2_96 = arith.constant 2 : index
    %c1_97 = arith.constant 1 : index
    %c0_98 = arith.constant 0 : index
    %92 = vector.load %arg17[%c2_96, %c1_97, %c0_98] : memref<10x10x16xf32, #tpu.memory_space<vmem>>, vector<8x8x16xf32>
    %93 = vector.shape_cast %92 : vector<8x8x16xf32> to vector<64x16xf32>
    %c2_99 = arith.constant 2 : index
    %c1_100 = arith.constant 1 : index
    %c0_101 = arith.constant 0 : index
    %c0_102 = arith.constant 0 : index
    %94 = vector.load %arg8[%c2_99, %c1_100, %c0_101, %c0_102] : memref<3x3x16x16xf32, #tpu.memory_space<vmem>>, vector<1x1x16x16xf32>
    %95 = vector.shape_cast %94 : vector<1x1x16x16xf32> to vector<16x16xf32>
    %96 = arith.truncf %93 : vector<64x16xf32> to vector<64x16xbf16>
    %97 = arith.truncf %95 : vector<16x16xf32> to vector<16x16xbf16>
    %cst_103 = arith.constant dense<0.000000e+00> : vector<64x16xf32>
    %98 = tpu.matmul %96, %97, %cst_103 {dimension_numbers = #tpu.dot_dimension_numbers<[1], [0], [0], [1], [0, 0, 1, 1], [], []>} : vector<64x16xbf16>, vector<16x16xbf16>, vector<64x16xf32> -> vector<64x16xf32>
    %99 = arith.addf %91, %98 : vector<64x16xf32>
    %c2_104 = arith.constant 2 : index
    %c2_105 = arith.constant 2 : index
    %c0_106 = arith.constant 0 : index
    %100 = vector.load %arg17[%c2_104, %c2_105, %c0_106] : memref<10x10x16xf32, #tpu.memory_space<vmem>>, vector<8x8x16xf32>
    %101 = vector.shape_cast %100 : vector<8x8x16xf32> to vector<64x16xf32>
    %c2_107 = arith.constant 2 : index
    %c2_108 = arith.constant 2 : index
    %c0_109 = arith.constant 0 : index
    %c0_110 = arith.constant 0 : index
    %102 = vector.load %arg8[%c2_107, %c2_108, %c0_109, %c0_110] : memref<3x3x16x16xf32, #tpu.memory_space<vmem>>, vector<1x1x16x16xf32>
    %103 = vector.shape_cast %102 : vector<1x1x16x16xf32> to vector<16x16xf32>
    %104 = arith.truncf %101 : vector<64x16xf32> to vector<64x16xbf16>
    %105 = arith.truncf %103 : vector<16x16xf32> to vector<16x16xbf16>
    %cst_111 = arith.constant dense<0.000000e+00> : vector<64x16xf32>
    %106 = tpu.matmul %104, %105, %cst_111 {dimension_numbers = #tpu.dot_dimension_numbers<[1], [0], [0], [1], [0, 0, 1, 1], [], []>} : vector<64x16xbf16>, vector<16x16xbf16>, vector<64x16xf32> -> vector<64x16xf32>
    %107 = arith.addf %99, %106 : vector<64x16xf32>
    %c0_112 = arith.constant 0 : index
    %c0_113 = arith.constant 0 : index
    %108 = vector.load %arg9[%c0_112, %c0_113] : memref<1x16xf32, #tpu.memory_space<vmem>>, vector<1x16xf32>
    %109 = vector.broadcast %108 : vector<1x16xf32> to vector<64x16xf32>
    %110 = arith.addf %107, %109 : vector<64x16xf32>
    %c0_114 = arith.constant 0 : index
    %c0_115 = arith.constant 0 : index
    %111 = vector.load %arg10[%c0_114, %c0_115] : memref<1x16xf32, #tpu.memory_space<vmem>>, vector<1x16xf32>
    %112 = vector.broadcast %111 : vector<1x16xf32> to vector<64x16xf32>
    %113 = arith.mulf %110, %112 : vector<64x16xf32>
    %c0_116 = arith.constant 0 : index
    %c0_117 = arith.constant 0 : index
    %114 = vector.load %arg11[%c0_116, %c0_117] : memref<1x16xf32, #tpu.memory_space<vmem>>, vector<1x16xf32>
    %115 = vector.broadcast %114 : vector<1x16xf32> to vector<64x16xf32>
    %116 = arith.addf %113, %115 : vector<64x16xf32>
    %cst_118 = arith.constant 0.000000e+00 : f32
    %117 = vector.broadcast %cst_118 : f32 to vector<64x16xf32>
    %118 = arith.maximumf %116, %117 : vector<64x16xf32>
    %c0_119 = arith.constant 0 : index
    %c0_120 = arith.constant 0 : index
    %119 = vector.load %arg12[%c0_119, %c0_120] : memref<16x64xf32, #tpu.memory_space<vmem>>, vector<16x64xf32>
    %120 = arith.truncf %118 : vector<64x16xf32> to vector<64x16xbf16>
    %121 = arith.truncf %119 : vector<16x64xf32> to vector<16x64xbf16>
    %cst_121 = arith.constant dense<0.000000e+00> : vector<64x64xf32>
    %122 = tpu.matmul %120, %121, %cst_121 {dimension_numbers = #tpu.dot_dimension_numbers<[1], [0], [0], [1], [0, 0, 1, 1], [], []>} : vector<64x16xbf16>, vector<16x64xbf16>, vector<64x64xf32> -> vector<64x64xf32>
    %c0_122 = arith.constant 0 : index
    %c0_123 = arith.constant 0 : index
    %123 = vector.load %arg13[%c0_122, %c0_123] : memref<1x64xf32, #tpu.memory_space<vmem>>, vector<1x64xf32>
    %124 = vector.broadcast %123 : vector<1x64xf32> to vector<64x64xf32>
    %125 = arith.addf %122, %124 : vector<64x64xf32>
    %c0_124 = arith.constant 0 : index
    %c0_125 = arith.constant 0 : index
    %126 = vector.load %arg14[%c0_124, %c0_125] : memref<16x64xf32, #tpu.memory_space<vmem>>, vector<16x64xf32>
    %127 = arith.truncf %1 : vector<64x16xf32> to vector<64x16xbf16>
    %128 = arith.truncf %126 : vector<16x64xf32> to vector<16x64xbf16>
    %cst_126 = arith.constant dense<0.000000e+00> : vector<64x64xf32>
    %129 = tpu.matmul %127, %128, %cst_126 {dimension_numbers = #tpu.dot_dimension_numbers<[1], [0], [0], [1], [0, 0, 1, 1], [], []>} : vector<64x16xbf16>, vector<16x64xbf16>, vector<64x64xf32> -> vector<64x64xf32>
    %130 = arith.addf %125, %129 : vector<64x64xf32>
    %c0_127 = arith.constant 0 : index
    %c0_128 = arith.constant 0 : index
    %131 = vector.load %arg15[%c0_127, %c0_128] : memref<1x64xf32, #tpu.memory_space<vmem>>, vector<1x64xf32>
    %132 = vector.broadcast %131 : vector<1x64xf32> to vector<64x64xf32>
    %133 = arith.addf %130, %132 : vector<64x64xf32>
    %c0_129 = arith.constant 0 : index
    %c0_130 = arith.constant 0 : index
    %c0_131 = arith.constant 0 : index
    %134 = vector.load %arg16[%c0_129, %c0_130, %c0_131] : memref<1x64x64xf32, #tpu.memory_space<vmem>>, vector<1x64x64xf32>
    %135 = vector.shape_cast %134 : vector<1x64x64xf32> to vector<64x64xf32>
    %136 = vector.shape_cast %133 : vector<64x64xf32> to vector<1x64x64xf32>
    tpu.vector_store %arg16[%c0_129, %c0_130, %c0_131], %136 {strides = array<i32>} : memref<1x64x64xf32, #tpu.memory_space<vmem>>, vector<1x64x64xf32>,
    return
  }
  func.func @transform_0(%arg0: i32) -> (i32, i32, i32) {
    %c0_i32 = arith.constant 0 : i32
    %c0_i32_0 = arith.constant 0 : i32
    %c0_i32_1 = arith.constant 0 : i32
    return %arg0, %c0_i32, %c0_i32_0 : i32, i32, i32
  }
  func.func @transform_1(%arg0: i32) -> (i32, i32) {
    %c0_i32 = arith.constant 0 : i32
    %c0_i32_0 = arith.constant 0 : i32
    %c0_i32_1 = arith.constant 0 : i32
    return %c0_i32, %c0_i32_0 : i32, i32
  }
  func.func @transform_2(%arg0: i32) -> (i32, i32) {
    %c0_i32 = arith.constant 0 : i32
    %c0_i32_0 = arith.constant 0 : i32
    %c0_i32_1 = arith.constant 0 : i32
    return %c0_i32, %c0_i32_0 : i32, i32
  }
  func.func @transform_3(%arg0: i32) -> (i32, i32) {
    %c0_i32 = arith.constant 0 : i32
    %c0_i32_0 = arith.constant 0 : i32
    %c0_i32_1 = arith.constant 0 : i32
    return %c0_i32, %c0_i32_0 : i32, i32
  }
  func.func @transform_4(%arg0: i32) -> (i32, i32) {
    %c0_i32 = arith.constant 0 : i32
    %c0_i32_0 = arith.constant 0 : i32
    %c0_i32_1 = arith.constant 0 : i32
    return %c0_i32, %c0_i32_0 : i32, i32
  }
  func.func @transform_5(%arg0: i32) -> (i32, i32) {
    %c0_i32 = arith.constant 0 : i32
    %c0_i32_0 = arith.constant 0 : i32
    %c0_i32_1 = arith.constant 0 : i32
    return %c0_i32, %c0_i32_0 : i32, i32
  }
  func.func @transform_6(%arg0: i32) -> (i32, i32) {
    %c0_i32 = arith.constant 0 : i32
    %c0_i32_0 = arith.constant 0 : i32
    %c0_i32_1 = arith.constant 0 : i32
    return %c0_i32, %c0_i32_0 : i32, i32
  }
  func.func @transform_7(%arg0: i32) -> (i32, i32, i32, i32) {
    %c0_i32 = arith.constant 0 : i32
    %c0_i32_0 = arith.constant 0 : i32
    %c0_i32_1 = arith.constant 0 : i32
    %c0_i32_2 = arith.constant 0 : i32
    %c0_i32_3 = arith.constant 0 : i32
    return %c0_i32, %c0_i32_0, %c0_i32_1, %c0_i32_2 : i32, i32, i32, i32
  }
  func.func @transform_8(%arg0: i32) -> (i32, i32) {
    %c0_i32 = arith.constant 0 : i32
    %c0_i32_0 = arith.constant 0 : i32
    %c0_i32_1 = arith.constant 0 : i32
    return %c0_i32, %c0_i32_0 : i32, i32
  }
  func.func @transform_9(%arg0: i32) -> (i32, i32) {
    %c0_i32 = arith.constant 0 : i32
    %c0_i32_0 = arith.constant 0 : i32
    %c0_i32_1 = arith.constant 0 : i32
    return %c0_i32, %c0_i32_0 : i32, i32
  }
  func.func @transform_10(%arg0: i32) -> (i32, i32) {
    %c0_i32 = arith.constant 0 : i32
    %c0_i32_0 = arith.constant 0 : i32
    %c0_i32_1 = arith.constant 0 : i32
    return %c0_i32, %c0_i32_0 : i32, i32
  }
  func.func @transform_11(%arg0: i32) -> (i32, i32) {
    %c0_i32 = arith.constant 0 : i32
    %c0_i32_0 = arith.constant 0 : i32
    %c0_i32_1 = arith.constant 0 : i32
    return %c0_i32, %c0_i32_0 : i32, i32
  }
  func.func @transform_12(%arg0: i32) -> (i32, i32) {
    %c0_i32 = arith.constant 0 : i32
    %c0_i32_0 = arith.constant 0 : i32
    %c0_i32_1 = arith.constant 0 : i32
    return %c0_i32, %c0_i32_0 : i32, i32
  }
  func.func @transform_13(%arg0: i32) -> (i32, i32) {
    %c0_i32 = arith.constant 0 : i32
    %c0_i32_0 = arith.constant 0 : i32
    %c0_i32_1 = arith.constant 0 : i32
    return %c0_i32, %c0_i32_0 : i32, i32
  }
  func.func @transform_14(%arg0: i32) -> (i32, i32) {
    %c0_i32 = arith.constant 0 : i32
    %c0_i32_0 = arith.constant 0 : i32
    %c0_i32_1 = arith.constant 0 : i32
    return %c0_i32, %c0_i32_0 : i32, i32
  }
  func.func @transform_15(%arg0: i32) -> (i32, i32, i32) {
    %c0_i32 = arith.constant 0 : i32
    %c0_i32_0 = arith.constant 0 : i32
    %c0_i32_1 = arith.constant 0 : i32
    return %arg0, %c0_i32, %c0_i32_0 : i32, i32, i32
  }
}

module attributes {stable_mosaic.version = 11 : i64} {
  func.func @_identity_block_kernel(%arg0: i32, %arg1: memref<1x64x64xf32, #tpu.memory_space<vmem>>, %arg2: memref<1x64xf32, #tpu.memory_space<vmem>>, %arg3: memref<1x64xf32, #tpu.memory_space<vmem>>, %arg4: memref<64x16xf32, #tpu.memory_space<vmem>>, %arg5: memref<1x16xf32, #tpu.memory_space<vmem>>, %arg6: memref<1x16xf32, #tpu.memory_space<vmem>>, %arg7: memref<1x16xf32, #tpu.memory_space<vmem>>, %arg8: memref<3x3x16x16xf32, #tpu.memory_space<vmem>>, %arg9: memref<1x16xf32, #tpu.memory_space<vmem>>, %arg10: memref<1x16xf32, #tpu.memory_space<vmem>>, %arg11: memref<1x16xf32, #tpu.memory_space<vmem>>, %arg12: memref<16x64xf32, #tpu.memory_space<vmem>>, %arg13: memref<1x64xf32, #tpu.memory_space<vmem>>, %arg14: memref<1x64x64xf32, #tpu.memory_space<vmem>>, %arg15: memref<10x10x16xf32, #tpu.memory_space<vmem>>) attributes {dimension_semantics = [#tpu.dimension_semantics<parallel>], iteration_bounds = array<i64: 2>, scalar_prefetch = 0 : i64, scratch_operands = 1 : i64, tpu.core_type = #tpu.core_type<tc>, window_params = [{transform_indices = @transform_0, window_bounds = array<i64: 1, 64, 64>}, {pipeline_mode = #tpu.pipeline_mode<synchronous>, transform_indices = @transform_1, window_bounds = array<i64: 1, 64>}, {pipeline_mode = #tpu.pipeline_mode<synchronous>, transform_indices = @transform_2, window_bounds = array<i64: 1, 64>}, {pipeline_mode = #tpu.pipeline_mode<synchronous>, transform_indices = @transform_3, window_bounds = array<i64: 64, 16>}, {pipeline_mode = #tpu.pipeline_mode<synchronous>, transform_indices = @transform_4, window_bounds = array<i64: 1, 16>}, {pipeline_mode = #tpu.pipeline_mode<synchronous>, transform_indices = @transform_5, window_bounds = array<i64: 1, 16>}, {pipeline_mode = #tpu.pipeline_mode<synchronous>, transform_indices = @transform_6, window_bounds = array<i64: 1, 16>}, {pipeline_mode = #tpu.pipeline_mode<synchronous>, transform_indices = @transform_7, window_bounds = array<i64: 3, 3, 16, 16>}, {pipeline_mode = #tpu.pipeline_mode<synchronous>, transform_indices = @transform_8, window_bounds = array<i64: 1, 16>}, {pipeline_mode = #tpu.pipeline_mode<synchronous>, transform_indices = @transform_9, window_bounds = array<i64: 1, 16>}, {pipeline_mode = #tpu.pipeline_mode<synchronous>, transform_indices = @transform_10, window_bounds = array<i64: 1, 16>}, {pipeline_mode = #tpu.pipeline_mode<synchronous>, transform_indices = @transform_11, window_bounds = array<i64: 16, 64>}, {pipeline_mode = #tpu.pipeline_mode<synchronous>, transform_indices = @transform_12, window_bounds = array<i64: 1, 64>}, {transform_indices = @transform_13, window_bounds = array<i64: 1, 64, 64>}]} {
    %c0 = arith.constant 0 : index
    %c0_0 = arith.constant 0 : index
    %c0_1 = arith.constant 0 : index
    %0 = vector.load %arg1[%c0, %c0_0, %c0_1] : memref<1x64x64xf32, #tpu.memory_space<vmem>>, vector<1x64x64xf32>
    %1 = vector.shape_cast %0 : vector<1x64x64xf32> to vector<64x64xf32>
    %c0_2 = arith.constant 0 : index
    %c0_3 = arith.constant 0 : index
    %2 = vector.load %arg2[%c0_2, %c0_3] : memref<1x64xf32, #tpu.memory_space<vmem>>, vector<1x64xf32>
    %3 = vector.broadcast %2 : vector<1x64xf32> to vector<64x64xf32>
    %4 = arith.mulf %1, %3 : vector<64x64xf32>
    %c0_4 = arith.constant 0 : index
    %c0_5 = arith.constant 0 : index
    %5 = vector.load %arg3[%c0_4, %c0_5] : memref<1x64xf32, #tpu.memory_space<vmem>>, vector<1x64xf32>
    %6 = vector.broadcast %5 : vector<1x64xf32> to vector<64x64xf32>
    %7 = arith.addf %4, %6 : vector<64x64xf32>
    %cst = arith.constant 0.000000e+00 : f32
    %8 = vector.broadcast %cst : f32 to vector<64x64xf32>
    %9 = arith.maximumf %7, %8 : vector<64x64xf32>
    %c0_6 = arith.constant 0 : index
    %c0_7 = arith.constant 0 : index
    %10 = vector.load %arg4[%c0_6, %c0_7] : memref<64x16xf32, #tpu.memory_space<vmem>>, vector<64x16xf32>
    %11 = arith.truncf %9 : vector<64x64xf32> to vector<64x64xbf16>
    %12 = arith.truncf %10 : vector<64x16xf32> to vector<64x16xbf16>
    %cst_8 = arith.constant dense<0.000000e+00> : vector<64x16xf32>
    %13 = tpu.matmul %11, %12, %cst_8 {dimension_numbers = #tpu.dot_dimension_numbers<[1], [0], [0], [1], [0, 0, 1, 1], [], []>} : vector<64x64xbf16>, vector<64x16xbf16>, vector<64x16xf32> -> vector<64x16xf32>
    %c0_9 = arith.constant 0 : index
    %c0_10 = arith.constant 0 : index
    %14 = vector.load %arg5[%c0_9, %c0_10] : memref<1x16xf32, #tpu.memory_space<vmem>>, vector<1x16xf32>
    %15 = vector.broadcast %14 : vector<1x16xf32> to vector<64x16xf32>
    %16 = arith.addf %13, %15 : vector<64x16xf32>
    %c0_11 = arith.constant 0 : index
    %c0_12 = arith.constant 0 : index
    %17 = vector.load %arg6[%c0_11, %c0_12] : memref<1x16xf32, #tpu.memory_space<vmem>>, vector<1x16xf32>
    %18 = vector.broadcast %17 : vector<1x16xf32> to vector<64x16xf32>
    %19 = arith.mulf %16, %18 : vector<64x16xf32>
    %c0_13 = arith.constant 0 : index
    %c0_14 = arith.constant 0 : index
    %20 = vector.load %arg7[%c0_13, %c0_14] : memref<1x16xf32, #tpu.memory_space<vmem>>, vector<1x16xf32>
    %21 = vector.broadcast %20 : vector<1x16xf32> to vector<64x16xf32>
    %22 = arith.addf %19, %21 : vector<64x16xf32>
    %cst_15 = arith.constant 0.000000e+00 : f32
    %23 = vector.broadcast %cst_15 : f32 to vector<64x16xf32>
    %24 = arith.maximumf %22, %23 : vector<64x16xf32>
    %25 = vector.shape_cast %24 : vector<64x16xf32> to vector<8x8x16xf32>
    %c1 = arith.constant 1 : index
    %c1_16 = arith.constant 1 : index
    %c0_17 = arith.constant 0 : index
    %26 = vector.load %arg15[%c1, %c1_16, %c0_17] : memref<10x10x16xf32, #tpu.memory_space<vmem>>, vector<8x8x16xf32>
    tpu.vector_store %arg15[%c1, %c1_16, %c0_17], %25 {strides = array<i32>} : memref<10x10x16xf32, #tpu.memory_space<vmem>>, vector<8x8x16xf32>,
    %c1_18 = arith.constant 1 : index
    %c1_19 = arith.constant 1 : index
    %c0_20 = arith.constant 0 : index
    %27 = vector.load %arg15[%c1_18, %c1_19, %c0_20] : memref<10x10x16xf32, #tpu.memory_space<vmem>>, vector<1x8x16xf32>
    %c0_21 = arith.constant 0 : index
    %c1_22 = arith.constant 1 : index
    %c0_23 = arith.constant 0 : index
    %28 = vector.load %arg15[%c0_21, %c1_22, %c0_23] : memref<10x10x16xf32, #tpu.memory_space<vmem>>, vector<1x8x16xf32>
    tpu.vector_store %arg15[%c0_21, %c1_22, %c0_23], %27 {strides = array<i32>} : memref<10x10x16xf32, #tpu.memory_space<vmem>>, vector<1x8x16xf32>,
    %c8 = arith.constant 8 : index
    %c1_24 = arith.constant 1 : index
    %c0_25 = arith.constant 0 : index
    %29 = vector.load %arg15[%c8, %c1_24, %c0_25] : memref<10x10x16xf32, #tpu.memory_space<vmem>>, vector<1x8x16xf32>
    %c9 = arith.constant 9 : index
    %c1_26 = arith.constant 1 : index
    %c0_27 = arith.constant 0 : index
    %30 = vector.load %arg15[%c9, %c1_26, %c0_27] : memref<10x10x16xf32, #tpu.memory_space<vmem>>, vector<1x8x16xf32>
    tpu.vector_store %arg15[%c9, %c1_26, %c0_27], %29 {strides = array<i32>} : memref<10x10x16xf32, #tpu.memory_space<vmem>>, vector<1x8x16xf32>,
    %c0_28 = arith.constant 0 : index
    %c1_29 = arith.constant 1 : index
    %c0_30 = arith.constant 0 : index
    %31 = vector.load %arg15[%c0_28, %c1_29, %c0_30] : memref<10x10x16xf32, #tpu.memory_space<vmem>>, vector<10x1x16xf32>
    %c0_31 = arith.constant 0 : index
    %c0_32 = arith.constant 0 : index
    %c0_33 = arith.constant 0 : index
    %32 = vector.load %arg15[%c0_31, %c0_32, %c0_33] : memref<10x10x16xf32, #tpu.memory_space<vmem>>, vector<10x1x16xf32>
    tpu.vector_store %arg15[%c0_31, %c0_32, %c0_33], %31 {strides = array<i32>} : memref<10x10x16xf32, #tpu.memory_space<vmem>>, vector<10x1x16xf32>,
    %c0_34 = arith.constant 0 : index
    %c8_35 = arith.constant 8 : index
    %c0_36 = arith.constant 0 : index
    %33 = vector.load %arg15[%c0_34, %c8_35, %c0_36] : memref<10x10x16xf32, #tpu.memory_space<vmem>>, vector<10x1x16xf32>
    %c0_37 = arith.constant 0 : index
    %c9_38 = arith.constant 9 : index
    %c0_39 = arith.constant 0 : index
    %34 = vector.load %arg15[%c0_37, %c9_38, %c0_39] : memref<10x10x16xf32, #tpu.memory_space<vmem>>, vector<10x1x16xf32>
    tpu.vector_store %arg15[%c0_37, %c9_38, %c0_39], %33 {strides = array<i32>} : memref<10x10x16xf32, #tpu.memory_space<vmem>>, vector<10x1x16xf32>,
    %cst_40 = arith.constant 0.000000e+00 : f32
    %35 = vector.broadcast %cst_40 : f32 to vector<64x16xf32>
    %c0_41 = arith.constant 0 : index
    %c0_42 = arith.constant 0 : index
    %c0_43 = arith.constant 0 : index
    %36 = vector.load %arg15[%c0_41, %c0_42, %c0_43] : memref<10x10x16xf32, #tpu.memory_space<vmem>>, vector<8x8x16xf32>
    %37 = vector.shape_cast %36 : vector<8x8x16xf32> to vector<64x16xf32>
    %c0_44 = arith.constant 0 : index
    %c0_45 = arith.constant 0 : index
    %c0_46 = arith.constant 0 : index
    %c0_47 = arith.constant 0 : index
    %38 = vector.load %arg8[%c0_44, %c0_45, %c0_46, %c0_47] : memref<3x3x16x16xf32, #tpu.memory_space<vmem>>, vector<1x1x16x16xf32>
    %39 = vector.shape_cast %38 : vector<1x1x16x16xf32> to vector<16x16xf32>
    %40 = arith.truncf %37 : vector<64x16xf32> to vector<64x16xbf16>
    %41 = arith.truncf %39 : vector<16x16xf32> to vector<16x16xbf16>
    %cst_48 = arith.constant dense<0.000000e+00> : vector<64x16xf32>
    %42 = tpu.matmul %40, %41, %cst_48 {dimension_numbers = #tpu.dot_dimension_numbers<[1], [0], [0], [1], [0, 0, 1, 1], [], []>} : vector<64x16xbf16>, vector<16x16xbf16>, vector<64x16xf32> -> vector<64x16xf32>
    %43 = arith.addf %35, %42 : vector<64x16xf32>
    %c0_49 = arith.constant 0 : index
    %c1_50 = arith.constant 1 : index
    %c0_51 = arith.constant 0 : index
    %44 = vector.load %arg15[%c0_49, %c1_50, %c0_51] : memref<10x10x16xf32, #tpu.memory_space<vmem>>, vector<8x8x16xf32>
    %45 = vector.shape_cast %44 : vector<8x8x16xf32> to vector<64x16xf32>
    %c0_52 = arith.constant 0 : index
    %c1_53 = arith.constant 1 : index
    %c0_54 = arith.constant 0 : index
    %c0_55 = arith.constant 0 : index
    %46 = vector.load %arg8[%c0_52, %c1_53, %c0_54, %c0_55] : memref<3x3x16x16xf32, #tpu.memory_space<vmem>>, vector<1x1x16x16xf32>
    %47 = vector.shape_cast %46 : vector<1x1x16x16xf32> to vector<16x16xf32>
    %48 = arith.truncf %45 : vector<64x16xf32> to vector<64x16xbf16>
    %49 = arith.truncf %47 : vector<16x16xf32> to vector<16x16xbf16>
    %cst_56 = arith.constant dense<0.000000e+00> : vector<64x16xf32>
    %50 = tpu.matmul %48, %49, %cst_56 {dimension_numbers = #tpu.dot_dimension_numbers<[1], [0], [0], [1], [0, 0, 1, 1], [], []>} : vector<64x16xbf16>, vector<16x16xbf16>, vector<64x16xf32> -> vector<64x16xf32>
    %51 = arith.addf %43, %50 : vector<64x16xf32>
    %c0_57 = arith.constant 0 : index
    %c2 = arith.constant 2 : index
    %c0_58 = arith.constant 0 : index
    %52 = vector.load %arg15[%c0_57, %c2, %c0_58] : memref<10x10x16xf32, #tpu.memory_space<vmem>>, vector<8x8x16xf32>
    %53 = vector.shape_cast %52 : vector<8x8x16xf32> to vector<64x16xf32>
    %c0_59 = arith.constant 0 : index
    %c2_60 = arith.constant 2 : index
    %c0_61 = arith.constant 0 : index
    %c0_62 = arith.constant 0 : index
    %54 = vector.load %arg8[%c0_59, %c2_60, %c0_61, %c0_62] : memref<3x3x16x16xf32, #tpu.memory_space<vmem>>, vector<1x1x16x16xf32>
    %55 = vector.shape_cast %54 : vector<1x1x16x16xf32> to vector<16x16xf32>
    %56 = arith.truncf %53 : vector<64x16xf32> to vector<64x16xbf16>
    %57 = arith.truncf %55 : vector<16x16xf32> to vector<16x16xbf16>
    %cst_63 = arith.constant dense<0.000000e+00> : vector<64x16xf32>
    %58 = tpu.matmul %56, %57, %cst_63 {dimension_numbers = #tpu.dot_dimension_numbers<[1], [0], [0], [1], [0, 0, 1, 1], [], []>} : vector<64x16xbf16>, vector<16x16xbf16>, vector<64x16xf32> -> vector<64x16xf32>
    %59 = arith.addf %51, %58 : vector<64x16xf32>
    %c1_64 = arith.constant 1 : index
    %c0_65 = arith.constant 0 : index
    %c0_66 = arith.constant 0 : index
    %60 = vector.load %arg15[%c1_64, %c0_65, %c0_66] : memref<10x10x16xf32, #tpu.memory_space<vmem>>, vector<8x8x16xf32>
    %61 = vector.shape_cast %60 : vector<8x8x16xf32> to vector<64x16xf32>
    %c1_67 = arith.constant 1 : index
    %c0_68 = arith.constant 0 : index
    %c0_69 = arith.constant 0 : index
    %c0_70 = arith.constant 0 : index
    %62 = vector.load %arg8[%c1_67, %c0_68, %c0_69, %c0_70] : memref<3x3x16x16xf32, #tpu.memory_space<vmem>>, vector<1x1x16x16xf32>
    %63 = vector.shape_cast %62 : vector<1x1x16x16xf32> to vector<16x16xf32>
    %64 = arith.truncf %61 : vector<64x16xf32> to vector<64x16xbf16>
    %65 = arith.truncf %63 : vector<16x16xf32> to vector<16x16xbf16>
    %cst_71 = arith.constant dense<0.000000e+00> : vector<64x16xf32>
    %66 = tpu.matmul %64, %65, %cst_71 {dimension_numbers = #tpu.dot_dimension_numbers<[1], [0], [0], [1], [0, 0, 1, 1], [], []>} : vector<64x16xbf16>, vector<16x16xbf16>, vector<64x16xf32> -> vector<64x16xf32>
    %67 = arith.addf %59, %66 : vector<64x16xf32>
    %c1_72 = arith.constant 1 : index
    %c1_73 = arith.constant 1 : index
    %c0_74 = arith.constant 0 : index
    %68 = vector.load %arg15[%c1_72, %c1_73, %c0_74] : memref<10x10x16xf32, #tpu.memory_space<vmem>>, vector<8x8x16xf32>
    %69 = vector.shape_cast %68 : vector<8x8x16xf32> to vector<64x16xf32>
    %c1_75 = arith.constant 1 : index
    %c1_76 = arith.constant 1 : index
    %c0_77 = arith.constant 0 : index
    %c0_78 = arith.constant 0 : index
    %70 = vector.load %arg8[%c1_75, %c1_76, %c0_77, %c0_78] : memref<3x3x16x16xf32, #tpu.memory_space<vmem>>, vector<1x1x16x16xf32>
    %71 = vector.shape_cast %70 : vector<1x1x16x16xf32> to vector<16x16xf32>
    %72 = arith.truncf %69 : vector<64x16xf32> to vector<64x16xbf16>
    %73 = arith.truncf %71 : vector<16x16xf32> to vector<16x16xbf16>
    %cst_79 = arith.constant dense<0.000000e+00> : vector<64x16xf32>
    %74 = tpu.matmul %72, %73, %cst_79 {dimension_numbers = #tpu.dot_dimension_numbers<[1], [0], [0], [1], [0, 0, 1, 1], [], []>} : vector<64x16xbf16>, vector<16x16xbf16>, vector<64x16xf32> -> vector<64x16xf32>
    %75 = arith.addf %67, %74 : vector<64x16xf32>
    %c1_80 = arith.constant 1 : index
    %c2_81 = arith.constant 2 : index
    %c0_82 = arith.constant 0 : index
    %76 = vector.load %arg15[%c1_80, %c2_81, %c0_82] : memref<10x10x16xf32, #tpu.memory_space<vmem>>, vector<8x8x16xf32>
    %77 = vector.shape_cast %76 : vector<8x8x16xf32> to vector<64x16xf32>
    %c1_83 = arith.constant 1 : index
    %c2_84 = arith.constant 2 : index
    %c0_85 = arith.constant 0 : index
    %c0_86 = arith.constant 0 : index
    %78 = vector.load %arg8[%c1_83, %c2_84, %c0_85, %c0_86] : memref<3x3x16x16xf32, #tpu.memory_space<vmem>>, vector<1x1x16x16xf32>
    %79 = vector.shape_cast %78 : vector<1x1x16x16xf32> to vector<16x16xf32>
    %80 = arith.truncf %77 : vector<64x16xf32> to vector<64x16xbf16>
    %81 = arith.truncf %79 : vector<16x16xf32> to vector<16x16xbf16>
    %cst_87 = arith.constant dense<0.000000e+00> : vector<64x16xf32>
    %82 = tpu.matmul %80, %81, %cst_87 {dimension_numbers = #tpu.dot_dimension_numbers<[1], [0], [0], [1], [0, 0, 1, 1], [], []>} : vector<64x16xbf16>, vector<16x16xbf16>, vector<64x16xf32> -> vector<64x16xf32>
    %83 = arith.addf %75, %82 : vector<64x16xf32>
    %c2_88 = arith.constant 2 : index
    %c0_89 = arith.constant 0 : index
    %c0_90 = arith.constant 0 : index
    %84 = vector.load %arg15[%c2_88, %c0_89, %c0_90] : memref<10x10x16xf32, #tpu.memory_space<vmem>>, vector<8x8x16xf32>
    %85 = vector.shape_cast %84 : vector<8x8x16xf32> to vector<64x16xf32>
    %c2_91 = arith.constant 2 : index
    %c0_92 = arith.constant 0 : index
    %c0_93 = arith.constant 0 : index
    %c0_94 = arith.constant 0 : index
    %86 = vector.load %arg8[%c2_91, %c0_92, %c0_93, %c0_94] : memref<3x3x16x16xf32, #tpu.memory_space<vmem>>, vector<1x1x16x16xf32>
    %87 = vector.shape_cast %86 : vector<1x1x16x16xf32> to vector<16x16xf32>
    %88 = arith.truncf %85 : vector<64x16xf32> to vector<64x16xbf16>
    %89 = arith.truncf %87 : vector<16x16xf32> to vector<16x16xbf16>
    %cst_95 = arith.constant dense<0.000000e+00> : vector<64x16xf32>
    %90 = tpu.matmul %88, %89, %cst_95 {dimension_numbers = #tpu.dot_dimension_numbers<[1], [0], [0], [1], [0, 0, 1, 1], [], []>} : vector<64x16xbf16>, vector<16x16xbf16>, vector<64x16xf32> -> vector<64x16xf32>
    %91 = arith.addf %83, %90 : vector<64x16xf32>
    %c2_96 = arith.constant 2 : index
    %c1_97 = arith.constant 1 : index
    %c0_98 = arith.constant 0 : index
    %92 = vector.load %arg15[%c2_96, %c1_97, %c0_98] : memref<10x10x16xf32, #tpu.memory_space<vmem>>, vector<8x8x16xf32>
    %93 = vector.shape_cast %92 : vector<8x8x16xf32> to vector<64x16xf32>
    %c2_99 = arith.constant 2 : index
    %c1_100 = arith.constant 1 : index
    %c0_101 = arith.constant 0 : index
    %c0_102 = arith.constant 0 : index
    %94 = vector.load %arg8[%c2_99, %c1_100, %c0_101, %c0_102] : memref<3x3x16x16xf32, #tpu.memory_space<vmem>>, vector<1x1x16x16xf32>
    %95 = vector.shape_cast %94 : vector<1x1x16x16xf32> to vector<16x16xf32>
    %96 = arith.truncf %93 : vector<64x16xf32> to vector<64x16xbf16>
    %97 = arith.truncf %95 : vector<16x16xf32> to vector<16x16xbf16>
    %cst_103 = arith.constant dense<0.000000e+00> : vector<64x16xf32>
    %98 = tpu.matmul %96, %97, %cst_103 {dimension_numbers = #tpu.dot_dimension_numbers<[1], [0], [0], [1], [0, 0, 1, 1], [], []>} : vector<64x16xbf16>, vector<16x16xbf16>, vector<64x16xf32> -> vector<64x16xf32>
    %99 = arith.addf %91, %98 : vector<64x16xf32>
    %c2_104 = arith.constant 2 : index
    %c2_105 = arith.constant 2 : index
    %c0_106 = arith.constant 0 : index
    %100 = vector.load %arg15[%c2_104, %c2_105, %c0_106] : memref<10x10x16xf32, #tpu.memory_space<vmem>>, vector<8x8x16xf32>
    %101 = vector.shape_cast %100 : vector<8x8x16xf32> to vector<64x16xf32>
    %c2_107 = arith.constant 2 : index
    %c2_108 = arith.constant 2 : index
    %c0_109 = arith.constant 0 : index
    %c0_110 = arith.constant 0 : index
    %102 = vector.load %arg8[%c2_107, %c2_108, %c0_109, %c0_110] : memref<3x3x16x16xf32, #tpu.memory_space<vmem>>, vector<1x1x16x16xf32>
    %103 = vector.shape_cast %102 : vector<1x1x16x16xf32> to vector<16x16xf32>
    %104 = arith.truncf %101 : vector<64x16xf32> to vector<64x16xbf16>
    %105 = arith.truncf %103 : vector<16x16xf32> to vector<16x16xbf16>
    %cst_111 = arith.constant dense<0.000000e+00> : vector<64x16xf32>
    %106 = tpu.matmul %104, %105, %cst_111 {dimension_numbers = #tpu.dot_dimension_numbers<[1], [0], [0], [1], [0, 0, 1, 1], [], []>} : vector<64x16xbf16>, vector<16x16xbf16>, vector<64x16xf32> -> vector<64x16xf32>
    %107 = arith.addf %99, %106 : vector<64x16xf32>
    %c0_112 = arith.constant 0 : index
    %c0_113 = arith.constant 0 : index
    %108 = vector.load %arg9[%c0_112, %c0_113] : memref<1x16xf32, #tpu.memory_space<vmem>>, vector<1x16xf32>
    %109 = vector.broadcast %108 : vector<1x16xf32> to vector<64x16xf32>
    %110 = arith.addf %107, %109 : vector<64x16xf32>
    %c0_114 = arith.constant 0 : index
    %c0_115 = arith.constant 0 : index
    %111 = vector.load %arg10[%c0_114, %c0_115] : memref<1x16xf32, #tpu.memory_space<vmem>>, vector<1x16xf32>
    %112 = vector.broadcast %111 : vector<1x16xf32> to vector<64x16xf32>
    %113 = arith.mulf %110, %112 : vector<64x16xf32>
    %c0_116 = arith.constant 0 : index
    %c0_117 = arith.constant 0 : index
    %114 = vector.load %arg11[%c0_116, %c0_117] : memref<1x16xf32, #tpu.memory_space<vmem>>, vector<1x16xf32>
    %115 = vector.broadcast %114 : vector<1x16xf32> to vector<64x16xf32>
    %116 = arith.addf %113, %115 : vector<64x16xf32>
    %cst_118 = arith.constant 0.000000e+00 : f32
    %117 = vector.broadcast %cst_118 : f32 to vector<64x16xf32>
    %118 = arith.maximumf %116, %117 : vector<64x16xf32>
    %c0_119 = arith.constant 0 : index
    %c0_120 = arith.constant 0 : index
    %119 = vector.load %arg12[%c0_119, %c0_120] : memref<16x64xf32, #tpu.memory_space<vmem>>, vector<16x64xf32>
    %120 = arith.truncf %118 : vector<64x16xf32> to vector<64x16xbf16>
    %121 = arith.truncf %119 : vector<16x64xf32> to vector<16x64xbf16>
    %cst_121 = arith.constant dense<0.000000e+00> : vector<64x64xf32>
    %122 = tpu.matmul %120, %121, %cst_121 {dimension_numbers = #tpu.dot_dimension_numbers<[1], [0], [0], [1], [0, 0, 1, 1], [], []>} : vector<64x16xbf16>, vector<16x64xbf16>, vector<64x64xf32> -> vector<64x64xf32>
    %c0_122 = arith.constant 0 : index
    %c0_123 = arith.constant 0 : index
    %123 = vector.load %arg13[%c0_122, %c0_123] : memref<1x64xf32, #tpu.memory_space<vmem>>, vector<1x64xf32>
    %124 = vector.broadcast %123 : vector<1x64xf32> to vector<64x64xf32>
    %125 = arith.addf %122, %124 : vector<64x64xf32>
    %126 = arith.addf %1, %125 : vector<64x64xf32>
    %c0_124 = arith.constant 0 : index
    %c0_125 = arith.constant 0 : index
    %c0_126 = arith.constant 0 : index
    %127 = vector.load %arg14[%c0_124, %c0_125, %c0_126] : memref<1x64x64xf32, #tpu.memory_space<vmem>>, vector<1x64x64xf32>
    %128 = vector.shape_cast %127 : vector<1x64x64xf32> to vector<64x64xf32>
    %129 = vector.shape_cast %126 : vector<64x64xf32> to vector<1x64x64xf32>
    tpu.vector_store %arg14[%c0_124, %c0_125, %c0_126], %129 {strides = array<i32>} : memref<1x64x64xf32, #tpu.memory_space<vmem>>, vector<1x64x64xf32>,
    return
  }
  func.func @transform_0(%arg0: i32) -> (i32, i32, i32) {
    %c0_i32 = arith.constant 0 : i32
    %c0_i32_0 = arith.constant 0 : i32
    %c0_i32_1 = arith.constant 0 : i32
    return %arg0, %c0_i32, %c0_i32_0 : i32, i32, i32
  }
  func.func @transform_1(%arg0: i32) -> (i32, i32) {
    %c0_i32 = arith.constant 0 : i32
    %c0_i32_0 = arith.constant 0 : i32
    %c0_i32_1 = arith.constant 0 : i32
    return %c0_i32, %c0_i32_0 : i32, i32
  }
  func.func @transform_2(%arg0: i32) -> (i32, i32) {
    %c0_i32 = arith.constant 0 : i32
    %c0_i32_0 = arith.constant 0 : i32
    %c0_i32_1 = arith.constant 0 : i32
    return %c0_i32, %c0_i32_0 : i32, i32
  }
  func.func @transform_3(%arg0: i32) -> (i32, i32) {
    %c0_i32 = arith.constant 0 : i32
    %c0_i32_0 = arith.constant 0 : i32
    %c0_i32_1 = arith.constant 0 : i32
    return %c0_i32, %c0_i32_0 : i32, i32
  }
  func.func @transform_4(%arg0: i32) -> (i32, i32) {
    %c0_i32 = arith.constant 0 : i32
    %c0_i32_0 = arith.constant 0 : i32
    %c0_i32_1 = arith.constant 0 : i32
    return %c0_i32, %c0_i32_0 : i32, i32
  }
  func.func @transform_5(%arg0: i32) -> (i32, i32) {
    %c0_i32 = arith.constant 0 : i32
    %c0_i32_0 = arith.constant 0 : i32
    %c0_i32_1 = arith.constant 0 : i32
    return %c0_i32, %c0_i32_0 : i32, i32
  }
  func.func @transform_6(%arg0: i32) -> (i32, i32) {
    %c0_i32 = arith.constant 0 : i32
    %c0_i32_0 = arith.constant 0 : i32
    %c0_i32_1 = arith.constant 0 : i32
    return %c0_i32, %c0_i32_0 : i32, i32
  }
  func.func @transform_7(%arg0: i32) -> (i32, i32, i32, i32) {
    %c0_i32 = arith.constant 0 : i32
    %c0_i32_0 = arith.constant 0 : i32
    %c0_i32_1 = arith.constant 0 : i32
    %c0_i32_2 = arith.constant 0 : i32
    %c0_i32_3 = arith.constant 0 : i32
    return %c0_i32, %c0_i32_0, %c0_i32_1, %c0_i32_2 : i32, i32, i32, i32
  }
  func.func @transform_8(%arg0: i32) -> (i32, i32) {
    %c0_i32 = arith.constant 0 : i32
    %c0_i32_0 = arith.constant 0 : i32
    %c0_i32_1 = arith.constant 0 : i32
    return %c0_i32, %c0_i32_0 : i32, i32
  }
  func.func @transform_9(%arg0: i32) -> (i32, i32) {
    %c0_i32 = arith.constant 0 : i32
    %c0_i32_0 = arith.constant 0 : i32
    %c0_i32_1 = arith.constant 0 : i32
    return %c0_i32, %c0_i32_0 : i32, i32
  }
  func.func @transform_10(%arg0: i32) -> (i32, i32) {
    %c0_i32 = arith.constant 0 : i32
    %c0_i32_0 = arith.constant 0 : i32
    %c0_i32_1 = arith.constant 0 : i32
    return %c0_i32, %c0_i32_0 : i32, i32
  }
  func.func @transform_11(%arg0: i32) -> (i32, i32) {
    %c0_i32 = arith.constant 0 : i32
    %c0_i32_0 = arith.constant 0 : i32
    %c0_i32_1 = arith.constant 0 : i32
    return %c0_i32, %c0_i32_0 : i32, i32
  }
  func.func @transform_12(%arg0: i32) -> (i32, i32) {
    %c0_i32 = arith.constant 0 : i32
    %c0_i32_0 = arith.constant 0 : i32
    %c0_i32_1 = arith.constant 0 : i32
    return %c0_i32, %c0_i32_0 : i32, i32
  }
  func.func @transform_13(%arg0: i32) -> (i32, i32, i32) {
    %c0_i32 = arith.constant 0 : i32
    %c0_i32_0 = arith.constant 0 : i32
    %c0_i32_1 = arith.constant 0 : i32
    return %arg0, %c0_i32, %c0_i32_0 : i32, i32, i32
  }
}

module attributes {stable_mosaic.version = 11 : i64} {
  func.func @_projection_block_kernel(%arg0: i32, %arg1: memref<1x64x64xf32, #tpu.memory_space<vmem>>, %arg2: memref<16x64xf32, #tpu.memory_space<vmem>>, %arg3: memref<1x64xf32, #tpu.memory_space<vmem>>, %arg4: memref<1x64xf32, #tpu.memory_space<vmem>>, %arg5: memref<64x32xf32, #tpu.memory_space<vmem>>, %arg6: memref<1x32xf32, #tpu.memory_space<vmem>>, %arg7: memref<1x32xf32, #tpu.memory_space<vmem>>, %arg8: memref<1x32xf32, #tpu.memory_space<vmem>>, %arg9: memref<3x3x32x32xf32, #tpu.memory_space<vmem>>, %arg10: memref<1x32xf32, #tpu.memory_space<vmem>>, %arg11: memref<1x32xf32, #tpu.memory_space<vmem>>, %arg12: memref<1x32xf32, #tpu.memory_space<vmem>>, %arg13: memref<32x128xf32, #tpu.memory_space<vmem>>, %arg14: memref<1x128xf32, #tpu.memory_space<vmem>>, %arg15: memref<64x128xf32, #tpu.memory_space<vmem>>, %arg16: memref<1x128xf32, #tpu.memory_space<vmem>>, %arg17: memref<1x16x128xf32, #tpu.memory_space<vmem>>, %arg18: memref<10x10x32xf32, #tpu.memory_space<vmem>>) attributes {dimension_semantics = [#tpu.dimension_semantics<parallel>], iteration_bounds = array<i64: 2>, scalar_prefetch = 0 : i64, scratch_operands = 1 : i64, tpu.core_type = #tpu.core_type<tc>, window_params = [{transform_indices = @transform_0, window_bounds = array<i64: 1, 64, 64>}, {pipeline_mode = #tpu.pipeline_mode<synchronous>, transform_indices = @transform_1, window_bounds = array<i64: 16, 64>}, {pipeline_mode = #tpu.pipeline_mode<synchronous>, transform_indices = @transform_2, window_bounds = array<i64: 1, 64>}, {pipeline_mode = #tpu.pipeline_mode<synchronous>, transform_indices = @transform_3, window_bounds = array<i64: 1, 64>}, {pipeline_mode = #tpu.pipeline_mode<synchronous>, transform_indices = @transform_4, window_bounds = array<i64: 64, 32>}, {pipeline_mode = #tpu.pipeline_mode<synchronous>, transform_indices = @transform_5, window_bounds = array<i64: 1, 32>}, {pipeline_mode = #tpu.pipeline_mode<synchronous>, transform_indices = @transform_6, window_bounds = array<i64: 1, 32>}, {pipeline_mode = #tpu.pipeline_mode<synchronous>, transform_indices = @transform_7, window_bounds = array<i64: 1, 32>}, {pipeline_mode = #tpu.pipeline_mode<synchronous>, transform_indices = @transform_8, window_bounds = array<i64: 3, 3, 32, 32>}, {pipeline_mode = #tpu.pipeline_mode<synchronous>, transform_indices = @transform_9, window_bounds = array<i64: 1, 32>}, {pipeline_mode = #tpu.pipeline_mode<synchronous>, transform_indices = @transform_10, window_bounds = array<i64: 1, 32>}, {pipeline_mode = #tpu.pipeline_mode<synchronous>, transform_indices = @transform_11, window_bounds = array<i64: 1, 32>}, {pipeline_mode = #tpu.pipeline_mode<synchronous>, transform_indices = @transform_12, window_bounds = array<i64: 32, 128>}, {pipeline_mode = #tpu.pipeline_mode<synchronous>, transform_indices = @transform_13, window_bounds = array<i64: 1, 128>}, {pipeline_mode = #tpu.pipeline_mode<synchronous>, transform_indices = @transform_14, window_bounds = array<i64: 64, 128>}, {pipeline_mode = #tpu.pipeline_mode<synchronous>, transform_indices = @transform_15, window_bounds = array<i64: 1, 128>}, {transform_indices = @transform_16, window_bounds = array<i64: 1, 16, 128>}]} {
    %c0 = arith.constant 0 : index
    %c0_0 = arith.constant 0 : index
    %0 = vector.load %arg2[%c0, %c0_0] : memref<16x64xf32, #tpu.memory_space<vmem>>, vector<16x64xf32>
    %c0_1 = arith.constant 0 : index
    %c0_2 = arith.constant 0 : index
    %c0_3 = arith.constant 0 : index
    %1 = vector.load %arg1[%c0_1, %c0_2, %c0_3] : memref<1x64x64xf32, #tpu.memory_space<vmem>>, vector<1x64x64xf32>
    %2 = vector.shape_cast %1 : vector<1x64x64xf32> to vector<64x64xf32>
    %c0_4 = arith.constant 0 : index
    %c0_5 = arith.constant 0 : index
    %3 = vector.load %arg3[%c0_4, %c0_5] : memref<1x64xf32, #tpu.memory_space<vmem>>, vector<1x64xf32>
    %4 = vector.broadcast %3 : vector<1x64xf32> to vector<64x64xf32>
    %5 = arith.mulf %2, %4 : vector<64x64xf32>
    %c0_6 = arith.constant 0 : index
    %c0_7 = arith.constant 0 : index
    %6 = vector.load %arg4[%c0_6, %c0_7] : memref<1x64xf32, #tpu.memory_space<vmem>>, vector<1x64xf32>
    %7 = vector.broadcast %6 : vector<1x64xf32> to vector<64x64xf32>
    %8 = arith.addf %5, %7 : vector<64x64xf32>
    %cst = arith.constant 0.000000e+00 : f32
    %9 = vector.broadcast %cst : f32 to vector<64x64xf32>
    %10 = arith.maximumf %8, %9 : vector<64x64xf32>
    %c0_8 = arith.constant 0 : index
    %c0_9 = arith.constant 0 : index
    %11 = vector.load %arg5[%c0_8, %c0_9] : memref<64x32xf32, #tpu.memory_space<vmem>>, vector<64x32xf32>
    %12 = arith.truncf %10 : vector<64x64xf32> to vector<64x64xbf16>
    %13 = arith.truncf %11 : vector<64x32xf32> to vector<64x32xbf16>
    %cst_10 = arith.constant dense<0.000000e+00> : vector<64x32xf32>
    %14 = tpu.matmul %12, %13, %cst_10 {dimension_numbers = #tpu.dot_dimension_numbers<[1], [0], [0], [1], [0, 0, 1, 1], [], []>} : vector<64x64xbf16>, vector<64x32xbf16>, vector<64x32xf32> -> vector<64x32xf32>
    %c0_11 = arith.constant 0 : index
    %c0_12 = arith.constant 0 : index
    %15 = vector.load %arg6[%c0_11, %c0_12] : memref<1x32xf32, #tpu.memory_space<vmem>>, vector<1x32xf32>
    %16 = vector.broadcast %15 : vector<1x32xf32> to vector<64x32xf32>
    %17 = arith.addf %14, %16 : vector<64x32xf32>
    %c0_13 = arith.constant 0 : index
    %c0_14 = arith.constant 0 : index
    %18 = vector.load %arg7[%c0_13, %c0_14] : memref<1x32xf32, #tpu.memory_space<vmem>>, vector<1x32xf32>
    %19 = vector.broadcast %18 : vector<1x32xf32> to vector<64x32xf32>
    %20 = arith.mulf %17, %19 : vector<64x32xf32>
    %c0_15 = arith.constant 0 : index
    %c0_16 = arith.constant 0 : index
    %21 = vector.load %arg8[%c0_15, %c0_16] : memref<1x32xf32, #tpu.memory_space<vmem>>, vector<1x32xf32>
    %22 = vector.broadcast %21 : vector<1x32xf32> to vector<64x32xf32>
    %23 = arith.addf %20, %22 : vector<64x32xf32>
    %cst_17 = arith.constant 0.000000e+00 : f32
    %24 = vector.broadcast %cst_17 : f32 to vector<64x32xf32>
    %25 = arith.maximumf %23, %24 : vector<64x32xf32>
    %26 = vector.shape_cast %25 : vector<64x32xf32> to vector<8x8x32xf32>
    %c1 = arith.constant 1 : index
    %c1_18 = arith.constant 1 : index
    %c0_19 = arith.constant 0 : index
    %27 = vector.load %arg18[%c1, %c1_18, %c0_19] : memref<10x10x32xf32, #tpu.memory_space<vmem>>, vector<8x8x32xf32>
    tpu.vector_store %arg18[%c1, %c1_18, %c0_19], %26 {strides = array<i32>} : memref<10x10x32xf32, #tpu.memory_space<vmem>>, vector<8x8x32xf32>,
    %c1_20 = arith.constant 1 : index
    %c1_21 = arith.constant 1 : index
    %c0_22 = arith.constant 0 : index
    %28 = vector.load %arg18[%c1_20, %c1_21, %c0_22] : memref<10x10x32xf32, #tpu.memory_space<vmem>>, vector<1x8x32xf32>
    %c0_23 = arith.constant 0 : index
    %c1_24 = arith.constant 1 : index
    %c0_25 = arith.constant 0 : index
    %29 = vector.load %arg18[%c0_23, %c1_24, %c0_25] : memref<10x10x32xf32, #tpu.memory_space<vmem>>, vector<1x8x32xf32>
    tpu.vector_store %arg18[%c0_23, %c1_24, %c0_25], %28 {strides = array<i32>} : memref<10x10x32xf32, #tpu.memory_space<vmem>>, vector<1x8x32xf32>,
    %c8 = arith.constant 8 : index
    %c1_26 = arith.constant 1 : index
    %c0_27 = arith.constant 0 : index
    %30 = vector.load %arg18[%c8, %c1_26, %c0_27] : memref<10x10x32xf32, #tpu.memory_space<vmem>>, vector<1x8x32xf32>
    %c9 = arith.constant 9 : index
    %c1_28 = arith.constant 1 : index
    %c0_29 = arith.constant 0 : index
    %31 = vector.load %arg18[%c9, %c1_28, %c0_29] : memref<10x10x32xf32, #tpu.memory_space<vmem>>, vector<1x8x32xf32>
    tpu.vector_store %arg18[%c9, %c1_28, %c0_29], %30 {strides = array<i32>} : memref<10x10x32xf32, #tpu.memory_space<vmem>>, vector<1x8x32xf32>,
    %c0_30 = arith.constant 0 : index
    %c1_31 = arith.constant 1 : index
    %c0_32 = arith.constant 0 : index
    %32 = vector.load %arg18[%c0_30, %c1_31, %c0_32] : memref<10x10x32xf32, #tpu.memory_space<vmem>>, vector<10x1x32xf32>
    %c0_33 = arith.constant 0 : index
    %c0_34 = arith.constant 0 : index
    %c0_35 = arith.constant 0 : index
    %33 = vector.load %arg18[%c0_33, %c0_34, %c0_35] : memref<10x10x32xf32, #tpu.memory_space<vmem>>, vector<10x1x32xf32>
    tpu.vector_store %arg18[%c0_33, %c0_34, %c0_35], %32 {strides = array<i32>} : memref<10x10x32xf32, #tpu.memory_space<vmem>>, vector<10x1x32xf32>,
    %c0_36 = arith.constant 0 : index
    %c8_37 = arith.constant 8 : index
    %c0_38 = arith.constant 0 : index
    %34 = vector.load %arg18[%c0_36, %c8_37, %c0_38] : memref<10x10x32xf32, #tpu.memory_space<vmem>>, vector<10x1x32xf32>
    %c0_39 = arith.constant 0 : index
    %c9_40 = arith.constant 9 : index
    %c0_41 = arith.constant 0 : index
    %35 = vector.load %arg18[%c0_39, %c9_40, %c0_41] : memref<10x10x32xf32, #tpu.memory_space<vmem>>, vector<10x1x32xf32>
    tpu.vector_store %arg18[%c0_39, %c9_40, %c0_41], %34 {strides = array<i32>} : memref<10x10x32xf32, #tpu.memory_space<vmem>>, vector<10x1x32xf32>,
    %cst_42 = arith.constant 0.000000e+00 : f32
    %36 = vector.broadcast %cst_42 : f32 to vector<64x32xf32>
    %c0_43 = arith.constant 0 : index
    %c0_44 = arith.constant 0 : index
    %c0_45 = arith.constant 0 : index
    %37 = vector.load %arg18[%c0_43, %c0_44, %c0_45] : memref<10x10x32xf32, #tpu.memory_space<vmem>>, vector<8x8x32xf32>
    %38 = vector.shape_cast %37 : vector<8x8x32xf32> to vector<64x32xf32>
    %c0_46 = arith.constant 0 : index
    %c0_47 = arith.constant 0 : index
    %c0_48 = arith.constant 0 : index
    %c0_49 = arith.constant 0 : index
    %39 = vector.load %arg9[%c0_46, %c0_47, %c0_48, %c0_49] : memref<3x3x32x32xf32, #tpu.memory_space<vmem>>, vector<1x1x32x32xf32>
    %40 = vector.shape_cast %39 : vector<1x1x32x32xf32> to vector<32x32xf32>
    %41 = arith.truncf %38 : vector<64x32xf32> to vector<64x32xbf16>
    %42 = arith.truncf %40 : vector<32x32xf32> to vector<32x32xbf16>
    %cst_50 = arith.constant dense<0.000000e+00> : vector<64x32xf32>
    %43 = tpu.matmul %41, %42, %cst_50 {dimension_numbers = #tpu.dot_dimension_numbers<[1], [0], [0], [1], [0, 0, 1, 1], [], []>} : vector<64x32xbf16>, vector<32x32xbf16>, vector<64x32xf32> -> vector<64x32xf32>
    %44 = arith.addf %36, %43 : vector<64x32xf32>
    %c0_51 = arith.constant 0 : index
    %c1_52 = arith.constant 1 : index
    %c0_53 = arith.constant 0 : index
    %45 = vector.load %arg18[%c0_51, %c1_52, %c0_53] : memref<10x10x32xf32, #tpu.memory_space<vmem>>, vector<8x8x32xf32>
    %46 = vector.shape_cast %45 : vector<8x8x32xf32> to vector<64x32xf32>
    %c0_54 = arith.constant 0 : index
    %c1_55 = arith.constant 1 : index
    %c0_56 = arith.constant 0 : index
    %c0_57 = arith.constant 0 : index
    %47 = vector.load %arg9[%c0_54, %c1_55, %c0_56, %c0_57] : memref<3x3x32x32xf32, #tpu.memory_space<vmem>>, vector<1x1x32x32xf32>
    %48 = vector.shape_cast %47 : vector<1x1x32x32xf32> to vector<32x32xf32>
    %49 = arith.truncf %46 : vector<64x32xf32> to vector<64x32xbf16>
    %50 = arith.truncf %48 : vector<32x32xf32> to vector<32x32xbf16>
    %cst_58 = arith.constant dense<0.000000e+00> : vector<64x32xf32>
    %51 = tpu.matmul %49, %50, %cst_58 {dimension_numbers = #tpu.dot_dimension_numbers<[1], [0], [0], [1], [0, 0, 1, 1], [], []>} : vector<64x32xbf16>, vector<32x32xbf16>, vector<64x32xf32> -> vector<64x32xf32>
    %52 = arith.addf %44, %51 : vector<64x32xf32>
    %c0_59 = arith.constant 0 : index
    %c2 = arith.constant 2 : index
    %c0_60 = arith.constant 0 : index
    %53 = vector.load %arg18[%c0_59, %c2, %c0_60] : memref<10x10x32xf32, #tpu.memory_space<vmem>>, vector<8x8x32xf32>
    %54 = vector.shape_cast %53 : vector<8x8x32xf32> to vector<64x32xf32>
    %c0_61 = arith.constant 0 : index
    %c2_62 = arith.constant 2 : index
    %c0_63 = arith.constant 0 : index
    %c0_64 = arith.constant 0 : index
    %55 = vector.load %arg9[%c0_61, %c2_62, %c0_63, %c0_64] : memref<3x3x32x32xf32, #tpu.memory_space<vmem>>, vector<1x1x32x32xf32>
    %56 = vector.shape_cast %55 : vector<1x1x32x32xf32> to vector<32x32xf32>
    %57 = arith.truncf %54 : vector<64x32xf32> to vector<64x32xbf16>
    %58 = arith.truncf %56 : vector<32x32xf32> to vector<32x32xbf16>
    %cst_65 = arith.constant dense<0.000000e+00> : vector<64x32xf32>
    %59 = tpu.matmul %57, %58, %cst_65 {dimension_numbers = #tpu.dot_dimension_numbers<[1], [0], [0], [1], [0, 0, 1, 1], [], []>} : vector<64x32xbf16>, vector<32x32xbf16>, vector<64x32xf32> -> vector<64x32xf32>
    %60 = arith.addf %52, %59 : vector<64x32xf32>
    %c1_66 = arith.constant 1 : index
    %c0_67 = arith.constant 0 : index
    %c0_68 = arith.constant 0 : index
    %61 = vector.load %arg18[%c1_66, %c0_67, %c0_68] : memref<10x10x32xf32, #tpu.memory_space<vmem>>, vector<8x8x32xf32>
    %62 = vector.shape_cast %61 : vector<8x8x32xf32> to vector<64x32xf32>
    %c1_69 = arith.constant 1 : index
    %c0_70 = arith.constant 0 : index
    %c0_71 = arith.constant 0 : index
    %c0_72 = arith.constant 0 : index
    %63 = vector.load %arg9[%c1_69, %c0_70, %c0_71, %c0_72] : memref<3x3x32x32xf32, #tpu.memory_space<vmem>>, vector<1x1x32x32xf32>
    %64 = vector.shape_cast %63 : vector<1x1x32x32xf32> to vector<32x32xf32>
    %65 = arith.truncf %62 : vector<64x32xf32> to vector<64x32xbf16>
    %66 = arith.truncf %64 : vector<32x32xf32> to vector<32x32xbf16>
    %cst_73 = arith.constant dense<0.000000e+00> : vector<64x32xf32>
    %67 = tpu.matmul %65, %66, %cst_73 {dimension_numbers = #tpu.dot_dimension_numbers<[1], [0], [0], [1], [0, 0, 1, 1], [], []>} : vector<64x32xbf16>, vector<32x32xbf16>, vector<64x32xf32> -> vector<64x32xf32>
    %68 = arith.addf %60, %67 : vector<64x32xf32>
    %c1_74 = arith.constant 1 : index
    %c1_75 = arith.constant 1 : index
    %c0_76 = arith.constant 0 : index
    %69 = vector.load %arg18[%c1_74, %c1_75, %c0_76] : memref<10x10x32xf32, #tpu.memory_space<vmem>>, vector<8x8x32xf32>
    %70 = vector.shape_cast %69 : vector<8x8x32xf32> to vector<64x32xf32>
    %c1_77 = arith.constant 1 : index
    %c1_78 = arith.constant 1 : index
    %c0_79 = arith.constant 0 : index
    %c0_80 = arith.constant 0 : index
    %71 = vector.load %arg9[%c1_77, %c1_78, %c0_79, %c0_80] : memref<3x3x32x32xf32, #tpu.memory_space<vmem>>, vector<1x1x32x32xf32>
    %72 = vector.shape_cast %71 : vector<1x1x32x32xf32> to vector<32x32xf32>
    %73 = arith.truncf %70 : vector<64x32xf32> to vector<64x32xbf16>
    %74 = arith.truncf %72 : vector<32x32xf32> to vector<32x32xbf16>
    %cst_81 = arith.constant dense<0.000000e+00> : vector<64x32xf32>
    %75 = tpu.matmul %73, %74, %cst_81 {dimension_numbers = #tpu.dot_dimension_numbers<[1], [0], [0], [1], [0, 0, 1, 1], [], []>} : vector<64x32xbf16>, vector<32x32xbf16>, vector<64x32xf32> -> vector<64x32xf32>
    %76 = arith.addf %68, %75 : vector<64x32xf32>
    %c1_82 = arith.constant 1 : index
    %c2_83 = arith.constant 2 : index
    %c0_84 = arith.constant 0 : index
    %77 = vector.load %arg18[%c1_82, %c2_83, %c0_84] : memref<10x10x32xf32, #tpu.memory_space<vmem>>, vector<8x8x32xf32>
    %78 = vector.shape_cast %77 : vector<8x8x32xf32> to vector<64x32xf32>
    %c1_85 = arith.constant 1 : index
    %c2_86 = arith.constant 2 : index
    %c0_87 = arith.constant 0 : index
    %c0_88 = arith.constant 0 : index
    %79 = vector.load %arg9[%c1_85, %c2_86, %c0_87, %c0_88] : memref<3x3x32x32xf32, #tpu.memory_space<vmem>>, vector<1x1x32x32xf32>
    %80 = vector.shape_cast %79 : vector<1x1x32x32xf32> to vector<32x32xf32>
    %81 = arith.truncf %78 : vector<64x32xf32> to vector<64x32xbf16>
    %82 = arith.truncf %80 : vector<32x32xf32> to vector<32x32xbf16>
    %cst_89 = arith.constant dense<0.000000e+00> : vector<64x32xf32>
    %83 = tpu.matmul %81, %82, %cst_89 {dimension_numbers = #tpu.dot_dimension_numbers<[1], [0], [0], [1], [0, 0, 1, 1], [], []>} : vector<64x32xbf16>, vector<32x32xbf16>, vector<64x32xf32> -> vector<64x32xf32>
    %84 = arith.addf %76, %83 : vector<64x32xf32>
    %c2_90 = arith.constant 2 : index
    %c0_91 = arith.constant 0 : index
    %c0_92 = arith.constant 0 : index
    %85 = vector.load %arg18[%c2_90, %c0_91, %c0_92] : memref<10x10x32xf32, #tpu.memory_space<vmem>>, vector<8x8x32xf32>
    %86 = vector.shape_cast %85 : vector<8x8x32xf32> to vector<64x32xf32>
    %c2_93 = arith.constant 2 : index
    %c0_94 = arith.constant 0 : index
    %c0_95 = arith.constant 0 : index
    %c0_96 = arith.constant 0 : index
    %87 = vector.load %arg9[%c2_93, %c0_94, %c0_95, %c0_96] : memref<3x3x32x32xf32, #tpu.memory_space<vmem>>, vector<1x1x32x32xf32>
    %88 = vector.shape_cast %87 : vector<1x1x32x32xf32> to vector<32x32xf32>
    %89 = arith.truncf %86 : vector<64x32xf32> to vector<64x32xbf16>
    %90 = arith.truncf %88 : vector<32x32xf32> to vector<32x32xbf16>
    %cst_97 = arith.constant dense<0.000000e+00> : vector<64x32xf32>
    %91 = tpu.matmul %89, %90, %cst_97 {dimension_numbers = #tpu.dot_dimension_numbers<[1], [0], [0], [1], [0, 0, 1, 1], [], []>} : vector<64x32xbf16>, vector<32x32xbf16>, vector<64x32xf32> -> vector<64x32xf32>
    %92 = arith.addf %84, %91 : vector<64x32xf32>
    %c2_98 = arith.constant 2 : index
    %c1_99 = arith.constant 1 : index
    %c0_100 = arith.constant 0 : index
    %93 = vector.load %arg18[%c2_98, %c1_99, %c0_100] : memref<10x10x32xf32, #tpu.memory_space<vmem>>, vector<8x8x32xf32>
    %94 = vector.shape_cast %93 : vector<8x8x32xf32> to vector<64x32xf32>
    %c2_101 = arith.constant 2 : index
    %c1_102 = arith.constant 1 : index
    %c0_103 = arith.constant 0 : index
    %c0_104 = arith.constant 0 : index
    %95 = vector.load %arg9[%c2_101, %c1_102, %c0_103, %c0_104] : memref<3x3x32x32xf32, #tpu.memory_space<vmem>>, vector<1x1x32x32xf32>
    %96 = vector.shape_cast %95 : vector<1x1x32x32xf32> to vector<32x32xf32>
    %97 = arith.truncf %94 : vector<64x32xf32> to vector<64x32xbf16>
    %98 = arith.truncf %96 : vector<32x32xf32> to vector<32x32xbf16>
    %cst_105 = arith.constant dense<0.000000e+00> : vector<64x32xf32>
    %99 = tpu.matmul %97, %98, %cst_105 {dimension_numbers = #tpu.dot_dimension_numbers<[1], [0], [0], [1], [0, 0, 1, 1], [], []>} : vector<64x32xbf16>, vector<32x32xbf16>, vector<64x32xf32> -> vector<64x32xf32>
    %100 = arith.addf %92, %99 : vector<64x32xf32>
    %c2_106 = arith.constant 2 : index
    %c2_107 = arith.constant 2 : index
    %c0_108 = arith.constant 0 : index
    %101 = vector.load %arg18[%c2_106, %c2_107, %c0_108] : memref<10x10x32xf32, #tpu.memory_space<vmem>>, vector<8x8x32xf32>
    %102 = vector.shape_cast %101 : vector<8x8x32xf32> to vector<64x32xf32>
    %c2_109 = arith.constant 2 : index
    %c2_110 = arith.constant 2 : index
    %c0_111 = arith.constant 0 : index
    %c0_112 = arith.constant 0 : index
    %103 = vector.load %arg9[%c2_109, %c2_110, %c0_111, %c0_112] : memref<3x3x32x32xf32, #tpu.memory_space<vmem>>, vector<1x1x32x32xf32>
    %104 = vector.shape_cast %103 : vector<1x1x32x32xf32> to vector<32x32xf32>
    %105 = arith.truncf %102 : vector<64x32xf32> to vector<64x32xbf16>
    %106 = arith.truncf %104 : vector<32x32xf32> to vector<32x32xbf16>
    %cst_113 = arith.constant dense<0.000000e+00> : vector<64x32xf32>
    %107 = tpu.matmul %105, %106, %cst_113 {dimension_numbers = #tpu.dot_dimension_numbers<[1], [0], [0], [1], [0, 0, 1, 1], [], []>} : vector<64x32xbf16>, vector<32x32xbf16>, vector<64x32xf32> -> vector<64x32xf32>
    %108 = arith.addf %100, %107 : vector<64x32xf32>
    %c0_114 = arith.constant 0 : index
    %c0_115 = arith.constant 0 : index
    %109 = vector.load %arg10[%c0_114, %c0_115] : memref<1x32xf32, #tpu.memory_space<vmem>>, vector<1x32xf32>
    %110 = vector.broadcast %109 : vector<1x32xf32> to vector<64x32xf32>
    %111 = arith.addf %108, %110 : vector<64x32xf32>
    %cst_116 = arith.constant dense<0.000000e+00> : vector<16x32xf32>
    %112 = tpu.matmul %0, %111, %cst_116 {dimension_numbers = #tpu.dot_dimension_numbers<[1], [0], [0], [1], [0, 0, 1, 1], [], []>} : vector<16x64xf32>, vector<64x32xf32>, vector<16x32xf32> -> vector<16x32xf32>
    %c0_117 = arith.constant 0 : index
    %c0_118 = arith.constant 0 : index
    %113 = vector.load %arg11[%c0_117, %c0_118] : memref<1x32xf32, #tpu.memory_space<vmem>>, vector<1x32xf32>
    %114 = vector.broadcast %113 : vector<1x32xf32> to vector<16x32xf32>
    %115 = arith.mulf %112, %114 : vector<16x32xf32>
    %c0_119 = arith.constant 0 : index
    %c0_120 = arith.constant 0 : index
    %116 = vector.load %arg12[%c0_119, %c0_120] : memref<1x32xf32, #tpu.memory_space<vmem>>, vector<1x32xf32>
    %117 = vector.broadcast %116 : vector<1x32xf32> to vector<16x32xf32>
    %118 = arith.addf %115, %117 : vector<16x32xf32>
    %cst_121 = arith.constant 0.000000e+00 : f32
    %119 = vector.broadcast %cst_121 : f32 to vector<16x32xf32>
    %120 = arith.maximumf %118, %119 : vector<16x32xf32>
    %c0_122 = arith.constant 0 : index
    %c0_123 = arith.constant 0 : index
    %121 = vector.load %arg13[%c0_122, %c0_123] : memref<32x128xf32, #tpu.memory_space<vmem>>, vector<32x128xf32>
    %122 = arith.truncf %120 : vector<16x32xf32> to vector<16x32xbf16>
    %123 = arith.truncf %121 : vector<32x128xf32> to vector<32x128xbf16>
    %cst_124 = arith.constant dense<0.000000e+00> : vector<16x128xf32>
    %124 = tpu.matmul %122, %123, %cst_124 {dimension_numbers = #tpu.dot_dimension_numbers<[1], [0], [0], [1], [0, 0, 1, 1], [], []>} : vector<16x32xbf16>, vector<32x128xbf16>, vector<16x128xf32> -> vector<16x128xf32>
    %c0_125 = arith.constant 0 : index
    %c0_126 = arith.constant 0 : index
    %125 = vector.load %arg14[%c0_125, %c0_126] : memref<1x128xf32, #tpu.memory_space<vmem>>, vector<1x128xf32>
    %126 = vector.broadcast %125 : vector<1x128xf32> to vector<16x128xf32>
    %127 = arith.addf %124, %126 : vector<16x128xf32>
    %cst_127 = arith.constant dense<0.000000e+00> : vector<16x64xf32>
    %128 = tpu.matmul %0, %2, %cst_127 {dimension_numbers = #tpu.dot_dimension_numbers<[1], [0], [0], [1], [0, 0, 1, 1], [], []>} : vector<16x64xf32>, vector<64x64xf32>, vector<16x64xf32> -> vector<16x64xf32>
    %c0_128 = arith.constant 0 : index
    %c0_129 = arith.constant 0 : index
    %129 = vector.load %arg15[%c0_128, %c0_129] : memref<64x128xf32, #tpu.memory_space<vmem>>, vector<64x128xf32>
    %130 = arith.truncf %128 : vector<16x64xf32> to vector<16x64xbf16>
    %131 = arith.truncf %129 : vector<64x128xf32> to vector<64x128xbf16>
    %cst_130 = arith.constant dense<0.000000e+00> : vector<16x128xf32>
    %132 = tpu.matmul %130, %131, %cst_130 {dimension_numbers = #tpu.dot_dimension_numbers<[1], [0], [0], [1], [0, 0, 1, 1], [], []>} : vector<16x64xbf16>, vector<64x128xbf16>, vector<16x128xf32> -> vector<16x128xf32>
    %133 = arith.addf %127, %132 : vector<16x128xf32>
    %c0_131 = arith.constant 0 : index
    %c0_132 = arith.constant 0 : index
    %134 = vector.load %arg16[%c0_131, %c0_132] : memref<1x128xf32, #tpu.memory_space<vmem>>, vector<1x128xf32>
    %135 = vector.broadcast %134 : vector<1x128xf32> to vector<16x128xf32>
    %136 = arith.addf %133, %135 : vector<16x128xf32>
    %c0_133 = arith.constant 0 : index
    %c0_134 = arith.constant 0 : index
    %c0_135 = arith.constant 0 : index
    %137 = vector.load %arg17[%c0_133, %c0_134, %c0_135] : memref<1x16x128xf32, #tpu.memory_space<vmem>>, vector<1x16x128xf32>
    %138 = vector.shape_cast %137 : vector<1x16x128xf32> to vector<16x128xf32>
    %139 = vector.shape_cast %136 : vector<16x128xf32> to vector<1x16x128xf32>
    tpu.vector_store %arg17[%c0_133, %c0_134, %c0_135], %139 {strides = array<i32>} : memref<1x16x128xf32, #tpu.memory_space<vmem>>, vector<1x16x128xf32>,
    return
  }
  func.func @transform_0(%arg0: i32) -> (i32, i32, i32) {
    %c0_i32 = arith.constant 0 : i32
    %c0_i32_0 = arith.constant 0 : i32
    %c0_i32_1 = arith.constant 0 : i32
    return %arg0, %c0_i32, %c0_i32_0 : i32, i32, i32
  }
  func.func @transform_1(%arg0: i32) -> (i32, i32) {
    %c0_i32 = arith.constant 0 : i32
    %c0_i32_0 = arith.constant 0 : i32
    %c0_i32_1 = arith.constant 0 : i32
    return %c0_i32, %c0_i32_0 : i32, i32
  }
  func.func @transform_2(%arg0: i32) -> (i32, i32) {
    %c0_i32 = arith.constant 0 : i32
    %c0_i32_0 = arith.constant 0 : i32
    %c0_i32_1 = arith.constant 0 : i32
    return %c0_i32, %c0_i32_0 : i32, i32
  }
  func.func @transform_3(%arg0: i32) -> (i32, i32) {
    %c0_i32 = arith.constant 0 : i32
    %c0_i32_0 = arith.constant 0 : i32
    %c0_i32_1 = arith.constant 0 : i32
    return %c0_i32, %c0_i32_0 : i32, i32
  }
  func.func @transform_4(%arg0: i32) -> (i32, i32) {
    %c0_i32 = arith.constant 0 : i32
    %c0_i32_0 = arith.constant 0 : i32
    %c0_i32_1 = arith.constant 0 : i32
    return %c0_i32, %c0_i32_0 : i32, i32
  }
  func.func @transform_5(%arg0: i32) -> (i32, i32) {
    %c0_i32 = arith.constant 0 : i32
    %c0_i32_0 = arith.constant 0 : i32
    %c0_i32_1 = arith.constant 0 : i32
    return %c0_i32, %c0_i32_0 : i32, i32
  }
  func.func @transform_6(%arg0: i32) -> (i32, i32) {
    %c0_i32 = arith.constant 0 : i32
    %c0_i32_0 = arith.constant 0 : i32
    %c0_i32_1 = arith.constant 0 : i32
    return %c0_i32, %c0_i32_0 : i32, i32
  }
  func.func @transform_7(%arg0: i32) -> (i32, i32) {
    %c0_i32 = arith.constant 0 : i32
    %c0_i32_0 = arith.constant 0 : i32
    %c0_i32_1 = arith.constant 0 : i32
    return %c0_i32, %c0_i32_0 : i32, i32
  }
  func.func @transform_8(%arg0: i32) -> (i32, i32, i32, i32) {
    %c0_i32 = arith.constant 0 : i32
    %c0_i32_0 = arith.constant 0 : i32
    %c0_i32_1 = arith.constant 0 : i32
    %c0_i32_2 = arith.constant 0 : i32
    %c0_i32_3 = arith.constant 0 : i32
    return %c0_i32, %c0_i32_0, %c0_i32_1, %c0_i32_2 : i32, i32, i32, i32
  }
  func.func @transform_9(%arg0: i32) -> (i32, i32) {
    %c0_i32 = arith.constant 0 : i32
    %c0_i32_0 = arith.constant 0 : i32
    %c0_i32_1 = arith.constant 0 : i32
    return %c0_i32, %c0_i32_0 : i32, i32
  }
  func.func @transform_10(%arg0: i32) -> (i32, i32) {
    %c0_i32 = arith.constant 0 : i32
    %c0_i32_0 = arith.constant 0 : i32
    %c0_i32_1 = arith.constant 0 : i32
    return %c0_i32, %c0_i32_0 : i32, i32
  }
  func.func @transform_11(%arg0: i32) -> (i32, i32) {
    %c0_i32 = arith.constant 0 : i32
    %c0_i32_0 = arith.constant 0 : i32
    %c0_i32_1 = arith.constant 0 : i32
    return %c0_i32, %c0_i32_0 : i32, i32
  }
  func.func @transform_12(%arg0: i32) -> (i32, i32) {
    %c0_i32 = arith.constant 0 : i32
    %c0_i32_0 = arith.constant 0 : i32
    %c0_i32_1 = arith.constant 0 : i32
    return %c0_i32, %c0_i32_0 : i32, i32
  }
  func.func @transform_13(%arg0: i32) -> (i32, i32) {
    %c0_i32 = arith.constant 0 : i32
    %c0_i32_0 = arith.constant 0 : i32
    %c0_i32_1 = arith.constant 0 : i32
    return %c0_i32, %c0_i32_0 : i32, i32
  }
  func.func @transform_14(%arg0: i32) -> (i32, i32) {
    %c0_i32 = arith.constant 0 : i32
    %c0_i32_0 = arith.constant 0 : i32
    %c0_i32_1 = arith.constant 0 : i32
    return %c0_i32, %c0_i32_0 : i32, i32
  }
  func.func @transform_15(%arg0: i32) -> (i32, i32) {
    %c0_i32 = arith.constant 0 : i32
    %c0_i32_0 = arith.constant 0 : i32
    %c0_i32_1 = arith.constant 0 : i32
    return %c0_i32, %c0_i32_0 : i32, i32
  }
  func.func @transform_16(%arg0: i32) -> (i32, i32, i32) {
    %c0_i32 = arith.constant 0 : i32
    %c0_i32_0 = arith.constant 0 : i32
    %c0_i32_1 = arith.constant 0 : i32
    return %arg0, %c0_i32, %c0_i32_0 : i32, i32, i32
  }
}

module attributes {stable_mosaic.version = 11 : i64} {
  func.func @_identity_block_kernel(%arg0: i32, %arg1: memref<1x16x128xf32, #tpu.memory_space<vmem>>, %arg2: memref<1x128xf32, #tpu.memory_space<vmem>>, %arg3: memref<1x128xf32, #tpu.memory_space<vmem>>, %arg4: memref<128x32xf32, #tpu.memory_space<vmem>>, %arg5: memref<1x32xf32, #tpu.memory_space<vmem>>, %arg6: memref<1x32xf32, #tpu.memory_space<vmem>>, %arg7: memref<1x32xf32, #tpu.memory_space<vmem>>, %arg8: memref<3x3x32x32xf32, #tpu.memory_space<vmem>>, %arg9: memref<1x32xf32, #tpu.memory_space<vmem>>, %arg10: memref<1x32xf32, #tpu.memory_space<vmem>>, %arg11: memref<1x32xf32, #tpu.memory_space<vmem>>, %arg12: memref<32x128xf32, #tpu.memory_space<vmem>>, %arg13: memref<1x128xf32, #tpu.memory_space<vmem>>, %arg14: memref<1x16x128xf32, #tpu.memory_space<vmem>>, %arg15: memref<6x6x32xf32, #tpu.memory_space<vmem>>) attributes {dimension_semantics = [#tpu.dimension_semantics<parallel>], iteration_bounds = array<i64: 2>, scalar_prefetch = 0 : i64, scratch_operands = 1 : i64, tpu.core_type = #tpu.core_type<tc>, window_params = [{transform_indices = @transform_0, window_bounds = array<i64: 1, 16, 128>}, {pipeline_mode = #tpu.pipeline_mode<synchronous>, transform_indices = @transform_1, window_bounds = array<i64: 1, 128>}, {pipeline_mode = #tpu.pipeline_mode<synchronous>, transform_indices = @transform_2, window_bounds = array<i64: 1, 128>}, {pipeline_mode = #tpu.pipeline_mode<synchronous>, transform_indices = @transform_3, window_bounds = array<i64: 128, 32>}, {pipeline_mode = #tpu.pipeline_mode<synchronous>, transform_indices = @transform_4, window_bounds = array<i64: 1, 32>}, {pipeline_mode = #tpu.pipeline_mode<synchronous>, transform_indices = @transform_5, window_bounds = array<i64: 1, 32>}, {pipeline_mode = #tpu.pipeline_mode<synchronous>, transform_indices = @transform_6, window_bounds = array<i64: 1, 32>}, {pipeline_mode = #tpu.pipeline_mode<synchronous>, transform_indices = @transform_7, window_bounds = array<i64: 3, 3, 32, 32>}, {pipeline_mode = #tpu.pipeline_mode<synchronous>, transform_indices = @transform_8, window_bounds = array<i64: 1, 32>}, {pipeline_mode = #tpu.pipeline_mode<synchronous>, transform_indices = @transform_9, window_bounds = array<i64: 1, 32>}, {pipeline_mode = #tpu.pipeline_mode<synchronous>, transform_indices = @transform_10, window_bounds = array<i64: 1, 32>}, {pipeline_mode = #tpu.pipeline_mode<synchronous>, transform_indices = @transform_11, window_bounds = array<i64: 32, 128>}, {pipeline_mode = #tpu.pipeline_mode<synchronous>, transform_indices = @transform_12, window_bounds = array<i64: 1, 128>}, {transform_indices = @transform_13, window_bounds = array<i64: 1, 16, 128>}]} {
    %c0 = arith.constant 0 : index
    %c0_0 = arith.constant 0 : index
    %c0_1 = arith.constant 0 : index
    %0 = vector.load %arg1[%c0, %c0_0, %c0_1] : memref<1x16x128xf32, #tpu.memory_space<vmem>>, vector<1x16x128xf32>
    %1 = vector.shape_cast %0 : vector<1x16x128xf32> to vector<16x128xf32>
    %c0_2 = arith.constant 0 : index
    %c0_3 = arith.constant 0 : index
    %2 = vector.load %arg2[%c0_2, %c0_3] : memref<1x128xf32, #tpu.memory_space<vmem>>, vector<1x128xf32>
    %3 = vector.broadcast %2 : vector<1x128xf32> to vector<16x128xf32>
    %4 = arith.mulf %1, %3 : vector<16x128xf32>
    %c0_4 = arith.constant 0 : index
    %c0_5 = arith.constant 0 : index
    %5 = vector.load %arg3[%c0_4, %c0_5] : memref<1x128xf32, #tpu.memory_space<vmem>>, vector<1x128xf32>
    %6 = vector.broadcast %5 : vector<1x128xf32> to vector<16x128xf32>
    %7 = arith.addf %4, %6 : vector<16x128xf32>
    %cst = arith.constant 0.000000e+00 : f32
    %8 = vector.broadcast %cst : f32 to vector<16x128xf32>
    %9 = arith.maximumf %7, %8 : vector<16x128xf32>
    %c0_6 = arith.constant 0 : index
    %c0_7 = arith.constant 0 : index
    %10 = vector.load %arg4[%c0_6, %c0_7] : memref<128x32xf32, #tpu.memory_space<vmem>>, vector<128x32xf32>
    %11 = arith.truncf %9 : vector<16x128xf32> to vector<16x128xbf16>
    %12 = arith.truncf %10 : vector<128x32xf32> to vector<128x32xbf16>
    %cst_8 = arith.constant dense<0.000000e+00> : vector<16x32xf32>
    %13 = tpu.matmul %11, %12, %cst_8 {dimension_numbers = #tpu.dot_dimension_numbers<[1], [0], [0], [1], [0, 0, 1, 1], [], []>} : vector<16x128xbf16>, vector<128x32xbf16>, vector<16x32xf32> -> vector<16x32xf32>
    %c0_9 = arith.constant 0 : index
    %c0_10 = arith.constant 0 : index
    %14 = vector.load %arg5[%c0_9, %c0_10] : memref<1x32xf32, #tpu.memory_space<vmem>>, vector<1x32xf32>
    %15 = vector.broadcast %14 : vector<1x32xf32> to vector<16x32xf32>
    %16 = arith.addf %13, %15 : vector<16x32xf32>
    %c0_11 = arith.constant 0 : index
    %c0_12 = arith.constant 0 : index
    %17 = vector.load %arg6[%c0_11, %c0_12] : memref<1x32xf32, #tpu.memory_space<vmem>>, vector<1x32xf32>
    %18 = vector.broadcast %17 : vector<1x32xf32> to vector<16x32xf32>
    %19 = arith.mulf %16, %18 : vector<16x32xf32>
    %c0_13 = arith.constant 0 : index
    %c0_14 = arith.constant 0 : index
    %20 = vector.load %arg7[%c0_13, %c0_14] : memref<1x32xf32, #tpu.memory_space<vmem>>, vector<1x32xf32>
    %21 = vector.broadcast %20 : vector<1x32xf32> to vector<16x32xf32>
    %22 = arith.addf %19, %21 : vector<16x32xf32>
    %cst_15 = arith.constant 0.000000e+00 : f32
    %23 = vector.broadcast %cst_15 : f32 to vector<16x32xf32>
    %24 = arith.maximumf %22, %23 : vector<16x32xf32>
    %25 = vector.shape_cast %24 : vector<16x32xf32> to vector<4x4x32xf32>
    %c1 = arith.constant 1 : index
    %c1_16 = arith.constant 1 : index
    %c0_17 = arith.constant 0 : index
    %26 = vector.load %arg15[%c1, %c1_16, %c0_17] : memref<6x6x32xf32, #tpu.memory_space<vmem>>, vector<4x4x32xf32>
    tpu.vector_store %arg15[%c1, %c1_16, %c0_17], %25 {strides = array<i32>} : memref<6x6x32xf32, #tpu.memory_space<vmem>>, vector<4x4x32xf32>,
    %c1_18 = arith.constant 1 : index
    %c1_19 = arith.constant 1 : index
    %c0_20 = arith.constant 0 : index
    %27 = vector.load %arg15[%c1_18, %c1_19, %c0_20] : memref<6x6x32xf32, #tpu.memory_space<vmem>>, vector<1x4x32xf32>
    %c0_21 = arith.constant 0 : index
    %c1_22 = arith.constant 1 : index
    %c0_23 = arith.constant 0 : index
    %28 = vector.load %arg15[%c0_21, %c1_22, %c0_23] : memref<6x6x32xf32, #tpu.memory_space<vmem>>, vector<1x4x32xf32>
    tpu.vector_store %arg15[%c0_21, %c1_22, %c0_23], %27 {strides = array<i32>} : memref<6x6x32xf32, #tpu.memory_space<vmem>>, vector<1x4x32xf32>,
    %c4 = arith.constant 4 : index
    %c1_24 = arith.constant 1 : index
    %c0_25 = arith.constant 0 : index
    %29 = vector.load %arg15[%c4, %c1_24, %c0_25] : memref<6x6x32xf32, #tpu.memory_space<vmem>>, vector<1x4x32xf32>
    %c5 = arith.constant 5 : index
    %c1_26 = arith.constant 1 : index
    %c0_27 = arith.constant 0 : index
    %30 = vector.load %arg15[%c5, %c1_26, %c0_27] : memref<6x6x32xf32, #tpu.memory_space<vmem>>, vector<1x4x32xf32>
    tpu.vector_store %arg15[%c5, %c1_26, %c0_27], %29 {strides = array<i32>} : memref<6x6x32xf32, #tpu.memory_space<vmem>>, vector<1x4x32xf32>,
    %c0_28 = arith.constant 0 : index
    %c1_29 = arith.constant 1 : index
    %c0_30 = arith.constant 0 : index
    %31 = vector.load %arg15[%c0_28, %c1_29, %c0_30] : memref<6x6x32xf32, #tpu.memory_space<vmem>>, vector<6x1x32xf32>
    %c0_31 = arith.constant 0 : index
    %c0_32 = arith.constant 0 : index
    %c0_33 = arith.constant 0 : index
    %32 = vector.load %arg15[%c0_31, %c0_32, %c0_33] : memref<6x6x32xf32, #tpu.memory_space<vmem>>, vector<6x1x32xf32>
    tpu.vector_store %arg15[%c0_31, %c0_32, %c0_33], %31 {strides = array<i32>} : memref<6x6x32xf32, #tpu.memory_space<vmem>>, vector<6x1x32xf32>,
    %c0_34 = arith.constant 0 : index
    %c4_35 = arith.constant 4 : index
    %c0_36 = arith.constant 0 : index
    %33 = vector.load %arg15[%c0_34, %c4_35, %c0_36] : memref<6x6x32xf32, #tpu.memory_space<vmem>>, vector<6x1x32xf32>
    %c0_37 = arith.constant 0 : index
    %c5_38 = arith.constant 5 : index
    %c0_39 = arith.constant 0 : index
    %34 = vector.load %arg15[%c0_37, %c5_38, %c0_39] : memref<6x6x32xf32, #tpu.memory_space<vmem>>, vector<6x1x32xf32>
    tpu.vector_store %arg15[%c0_37, %c5_38, %c0_39], %33 {strides = array<i32>} : memref<6x6x32xf32, #tpu.memory_space<vmem>>, vector<6x1x32xf32>,
    %cst_40 = arith.constant 0.000000e+00 : f32
    %35 = vector.broadcast %cst_40 : f32 to vector<16x32xf32>
    %c0_41 = arith.constant 0 : index
    %c0_42 = arith.constant 0 : index
    %c0_43 = arith.constant 0 : index
    %36 = vector.load %arg15[%c0_41, %c0_42, %c0_43] : memref<6x6x32xf32, #tpu.memory_space<vmem>>, vector<4x4x32xf32>
    %37 = vector.shape_cast %36 : vector<4x4x32xf32> to vector<16x32xf32>
    %c0_44 = arith.constant 0 : index
    %c0_45 = arith.constant 0 : index
    %c0_46 = arith.constant 0 : index
    %c0_47 = arith.constant 0 : index
    %38 = vector.load %arg8[%c0_44, %c0_45, %c0_46, %c0_47] : memref<3x3x32x32xf32, #tpu.memory_space<vmem>>, vector<1x1x32x32xf32>
    %39 = vector.shape_cast %38 : vector<1x1x32x32xf32> to vector<32x32xf32>
    %40 = arith.truncf %37 : vector<16x32xf32> to vector<16x32xbf16>
    %41 = arith.truncf %39 : vector<32x32xf32> to vector<32x32xbf16>
    %cst_48 = arith.constant dense<0.000000e+00> : vector<16x32xf32>
    %42 = tpu.matmul %40, %41, %cst_48 {dimension_numbers = #tpu.dot_dimension_numbers<[1], [0], [0], [1], [0, 0, 1, 1], [], []>} : vector<16x32xbf16>, vector<32x32xbf16>, vector<16x32xf32> -> vector<16x32xf32>
    %43 = arith.addf %35, %42 : vector<16x32xf32>
    %c0_49 = arith.constant 0 : index
    %c1_50 = arith.constant 1 : index
    %c0_51 = arith.constant 0 : index
    %44 = vector.load %arg15[%c0_49, %c1_50, %c0_51] : memref<6x6x32xf32, #tpu.memory_space<vmem>>, vector<4x4x32xf32>
    %45 = vector.shape_cast %44 : vector<4x4x32xf32> to vector<16x32xf32>
    %c0_52 = arith.constant 0 : index
    %c1_53 = arith.constant 1 : index
    %c0_54 = arith.constant 0 : index
    %c0_55 = arith.constant 0 : index
    %46 = vector.load %arg8[%c0_52, %c1_53, %c0_54, %c0_55] : memref<3x3x32x32xf32, #tpu.memory_space<vmem>>, vector<1x1x32x32xf32>
    %47 = vector.shape_cast %46 : vector<1x1x32x32xf32> to vector<32x32xf32>
    %48 = arith.truncf %45 : vector<16x32xf32> to vector<16x32xbf16>
    %49 = arith.truncf %47 : vector<32x32xf32> to vector<32x32xbf16>
    %cst_56 = arith.constant dense<0.000000e+00> : vector<16x32xf32>
    %50 = tpu.matmul %48, %49, %cst_56 {dimension_numbers = #tpu.dot_dimension_numbers<[1], [0], [0], [1], [0, 0, 1, 1], [], []>} : vector<16x32xbf16>, vector<32x32xbf16>, vector<16x32xf32> -> vector<16x32xf32>
    %51 = arith.addf %43, %50 : vector<16x32xf32>
    %c0_57 = arith.constant 0 : index
    %c2 = arith.constant 2 : index
    %c0_58 = arith.constant 0 : index
    %52 = vector.load %arg15[%c0_57, %c2, %c0_58] : memref<6x6x32xf32, #tpu.memory_space<vmem>>, vector<4x4x32xf32>
    %53 = vector.shape_cast %52 : vector<4x4x32xf32> to vector<16x32xf32>
    %c0_59 = arith.constant 0 : index
    %c2_60 = arith.constant 2 : index
    %c0_61 = arith.constant 0 : index
    %c0_62 = arith.constant 0 : index
    %54 = vector.load %arg8[%c0_59, %c2_60, %c0_61, %c0_62] : memref<3x3x32x32xf32, #tpu.memory_space<vmem>>, vector<1x1x32x32xf32>
    %55 = vector.shape_cast %54 : vector<1x1x32x32xf32> to vector<32x32xf32>
    %56 = arith.truncf %53 : vector<16x32xf32> to vector<16x32xbf16>
    %57 = arith.truncf %55 : vector<32x32xf32> to vector<32x32xbf16>
    %cst_63 = arith.constant dense<0.000000e+00> : vector<16x32xf32>
    %58 = tpu.matmul %56, %57, %cst_63 {dimension_numbers = #tpu.dot_dimension_numbers<[1], [0], [0], [1], [0, 0, 1, 1], [], []>} : vector<16x32xbf16>, vector<32x32xbf16>, vector<16x32xf32> -> vector<16x32xf32>
    %59 = arith.addf %51, %58 : vector<16x32xf32>
    %c1_64 = arith.constant 1 : index
    %c0_65 = arith.constant 0 : index
    %c0_66 = arith.constant 0 : index
    %60 = vector.load %arg15[%c1_64, %c0_65, %c0_66] : memref<6x6x32xf32, #tpu.memory_space<vmem>>, vector<4x4x32xf32>
    %61 = vector.shape_cast %60 : vector<4x4x32xf32> to vector<16x32xf32>
    %c1_67 = arith.constant 1 : index
    %c0_68 = arith.constant 0 : index
    %c0_69 = arith.constant 0 : index
    %c0_70 = arith.constant 0 : index
    %62 = vector.load %arg8[%c1_67, %c0_68, %c0_69, %c0_70] : memref<3x3x32x32xf32, #tpu.memory_space<vmem>>, vector<1x1x32x32xf32>
    %63 = vector.shape_cast %62 : vector<1x1x32x32xf32> to vector<32x32xf32>
    %64 = arith.truncf %61 : vector<16x32xf32> to vector<16x32xbf16>
    %65 = arith.truncf %63 : vector<32x32xf32> to vector<32x32xbf16>
    %cst_71 = arith.constant dense<0.000000e+00> : vector<16x32xf32>
    %66 = tpu.matmul %64, %65, %cst_71 {dimension_numbers = #tpu.dot_dimension_numbers<[1], [0], [0], [1], [0, 0, 1, 1], [], []>} : vector<16x32xbf16>, vector<32x32xbf16>, vector<16x32xf32> -> vector<16x32xf32>
    %67 = arith.addf %59, %66 : vector<16x32xf32>
    %c1_72 = arith.constant 1 : index
    %c1_73 = arith.constant 1 : index
    %c0_74 = arith.constant 0 : index
    %68 = vector.load %arg15[%c1_72, %c1_73, %c0_74] : memref<6x6x32xf32, #tpu.memory_space<vmem>>, vector<4x4x32xf32>
    %69 = vector.shape_cast %68 : vector<4x4x32xf32> to vector<16x32xf32>
    %c1_75 = arith.constant 1 : index
    %c1_76 = arith.constant 1 : index
    %c0_77 = arith.constant 0 : index
    %c0_78 = arith.constant 0 : index
    %70 = vector.load %arg8[%c1_75, %c1_76, %c0_77, %c0_78] : memref<3x3x32x32xf32, #tpu.memory_space<vmem>>, vector<1x1x32x32xf32>
    %71 = vector.shape_cast %70 : vector<1x1x32x32xf32> to vector<32x32xf32>
    %72 = arith.truncf %69 : vector<16x32xf32> to vector<16x32xbf16>
    %73 = arith.truncf %71 : vector<32x32xf32> to vector<32x32xbf16>
    %cst_79 = arith.constant dense<0.000000e+00> : vector<16x32xf32>
    %74 = tpu.matmul %72, %73, %cst_79 {dimension_numbers = #tpu.dot_dimension_numbers<[1], [0], [0], [1], [0, 0, 1, 1], [], []>} : vector<16x32xbf16>, vector<32x32xbf16>, vector<16x32xf32> -> vector<16x32xf32>
    %75 = arith.addf %67, %74 : vector<16x32xf32>
    %c1_80 = arith.constant 1 : index
    %c2_81 = arith.constant 2 : index
    %c0_82 = arith.constant 0 : index
    %76 = vector.load %arg15[%c1_80, %c2_81, %c0_82] : memref<6x6x32xf32, #tpu.memory_space<vmem>>, vector<4x4x32xf32>
    %77 = vector.shape_cast %76 : vector<4x4x32xf32> to vector<16x32xf32>
    %c1_83 = arith.constant 1 : index
    %c2_84 = arith.constant 2 : index
    %c0_85 = arith.constant 0 : index
    %c0_86 = arith.constant 0 : index
    %78 = vector.load %arg8[%c1_83, %c2_84, %c0_85, %c0_86] : memref<3x3x32x32xf32, #tpu.memory_space<vmem>>, vector<1x1x32x32xf32>
    %79 = vector.shape_cast %78 : vector<1x1x32x32xf32> to vector<32x32xf32>
    %80 = arith.truncf %77 : vector<16x32xf32> to vector<16x32xbf16>
    %81 = arith.truncf %79 : vector<32x32xf32> to vector<32x32xbf16>
    %cst_87 = arith.constant dense<0.000000e+00> : vector<16x32xf32>
    %82 = tpu.matmul %80, %81, %cst_87 {dimension_numbers = #tpu.dot_dimension_numbers<[1], [0], [0], [1], [0, 0, 1, 1], [], []>} : vector<16x32xbf16>, vector<32x32xbf16>, vector<16x32xf32> -> vector<16x32xf32>
    %83 = arith.addf %75, %82 : vector<16x32xf32>
    %c2_88 = arith.constant 2 : index
    %c0_89 = arith.constant 0 : index
    %c0_90 = arith.constant 0 : index
    %84 = vector.load %arg15[%c2_88, %c0_89, %c0_90] : memref<6x6x32xf32, #tpu.memory_space<vmem>>, vector<4x4x32xf32>
    %85 = vector.shape_cast %84 : vector<4x4x32xf32> to vector<16x32xf32>
    %c2_91 = arith.constant 2 : index
    %c0_92 = arith.constant 0 : index
    %c0_93 = arith.constant 0 : index
    %c0_94 = arith.constant 0 : index
    %86 = vector.load %arg8[%c2_91, %c0_92, %c0_93, %c0_94] : memref<3x3x32x32xf32, #tpu.memory_space<vmem>>, vector<1x1x32x32xf32>
    %87 = vector.shape_cast %86 : vector<1x1x32x32xf32> to vector<32x32xf32>
    %88 = arith.truncf %85 : vector<16x32xf32> to vector<16x32xbf16>
    %89 = arith.truncf %87 : vector<32x32xf32> to vector<32x32xbf16>
    %cst_95 = arith.constant dense<0.000000e+00> : vector<16x32xf32>
    %90 = tpu.matmul %88, %89, %cst_95 {dimension_numbers = #tpu.dot_dimension_numbers<[1], [0], [0], [1], [0, 0, 1, 1], [], []>} : vector<16x32xbf16>, vector<32x32xbf16>, vector<16x32xf32> -> vector<16x32xf32>
    %91 = arith.addf %83, %90 : vector<16x32xf32>
    %c2_96 = arith.constant 2 : index
    %c1_97 = arith.constant 1 : index
    %c0_98 = arith.constant 0 : index
    %92 = vector.load %arg15[%c2_96, %c1_97, %c0_98] : memref<6x6x32xf32, #tpu.memory_space<vmem>>, vector<4x4x32xf32>
    %93 = vector.shape_cast %92 : vector<4x4x32xf32> to vector<16x32xf32>
    %c2_99 = arith.constant 2 : index
    %c1_100 = arith.constant 1 : index
    %c0_101 = arith.constant 0 : index
    %c0_102 = arith.constant 0 : index
    %94 = vector.load %arg8[%c2_99, %c1_100, %c0_101, %c0_102] : memref<3x3x32x32xf32, #tpu.memory_space<vmem>>, vector<1x1x32x32xf32>
    %95 = vector.shape_cast %94 : vector<1x1x32x32xf32> to vector<32x32xf32>
    %96 = arith.truncf %93 : vector<16x32xf32> to vector<16x32xbf16>
    %97 = arith.truncf %95 : vector<32x32xf32> to vector<32x32xbf16>
    %cst_103 = arith.constant dense<0.000000e+00> : vector<16x32xf32>
    %98 = tpu.matmul %96, %97, %cst_103 {dimension_numbers = #tpu.dot_dimension_numbers<[1], [0], [0], [1], [0, 0, 1, 1], [], []>} : vector<16x32xbf16>, vector<32x32xbf16>, vector<16x32xf32> -> vector<16x32xf32>
    %99 = arith.addf %91, %98 : vector<16x32xf32>
    %c2_104 = arith.constant 2 : index
    %c2_105 = arith.constant 2 : index
    %c0_106 = arith.constant 0 : index
    %100 = vector.load %arg15[%c2_104, %c2_105, %c0_106] : memref<6x6x32xf32, #tpu.memory_space<vmem>>, vector<4x4x32xf32>
    %101 = vector.shape_cast %100 : vector<4x4x32xf32> to vector<16x32xf32>
    %c2_107 = arith.constant 2 : index
    %c2_108 = arith.constant 2 : index
    %c0_109 = arith.constant 0 : index
    %c0_110 = arith.constant 0 : index
    %102 = vector.load %arg8[%c2_107, %c2_108, %c0_109, %c0_110] : memref<3x3x32x32xf32, #tpu.memory_space<vmem>>, vector<1x1x32x32xf32>
    %103 = vector.shape_cast %102 : vector<1x1x32x32xf32> to vector<32x32xf32>
    %104 = arith.truncf %101 : vector<16x32xf32> to vector<16x32xbf16>
    %105 = arith.truncf %103 : vector<32x32xf32> to vector<32x32xbf16>
    %cst_111 = arith.constant dense<0.000000e+00> : vector<16x32xf32>
    %106 = tpu.matmul %104, %105, %cst_111 {dimension_numbers = #tpu.dot_dimension_numbers<[1], [0], [0], [1], [0, 0, 1, 1], [], []>} : vector<16x32xbf16>, vector<32x32xbf16>, vector<16x32xf32> -> vector<16x32xf32>
    %107 = arith.addf %99, %106 : vector<16x32xf32>
    %c0_112 = arith.constant 0 : index
    %c0_113 = arith.constant 0 : index
    %108 = vector.load %arg9[%c0_112, %c0_113] : memref<1x32xf32, #tpu.memory_space<vmem>>, vector<1x32xf32>
    %109 = vector.broadcast %108 : vector<1x32xf32> to vector<16x32xf32>
    %110 = arith.addf %107, %109 : vector<16x32xf32>
    %c0_114 = arith.constant 0 : index
    %c0_115 = arith.constant 0 : index
    %111 = vector.load %arg10[%c0_114, %c0_115] : memref<1x32xf32, #tpu.memory_space<vmem>>, vector<1x32xf32>
    %112 = vector.broadcast %111 : vector<1x32xf32> to vector<16x32xf32>
    %113 = arith.mulf %110, %112 : vector<16x32xf32>
    %c0_116 = arith.constant 0 : index
    %c0_117 = arith.constant 0 : index
    %114 = vector.load %arg11[%c0_116, %c0_117] : memref<1x32xf32, #tpu.memory_space<vmem>>, vector<1x32xf32>
    %115 = vector.broadcast %114 : vector<1x32xf32> to vector<16x32xf32>
    %116 = arith.addf %113, %115 : vector<16x32xf32>
    %cst_118 = arith.constant 0.000000e+00 : f32
    %117 = vector.broadcast %cst_118 : f32 to vector<16x32xf32>
    %118 = arith.maximumf %116, %117 : vector<16x32xf32>
    %c0_119 = arith.constant 0 : index
    %c0_120 = arith.constant 0 : index
    %119 = vector.load %arg12[%c0_119, %c0_120] : memref<32x128xf32, #tpu.memory_space<vmem>>, vector<32x128xf32>
    %120 = arith.truncf %118 : vector<16x32xf32> to vector<16x32xbf16>
    %121 = arith.truncf %119 : vector<32x128xf32> to vector<32x128xbf16>
    %cst_121 = arith.constant dense<0.000000e+00> : vector<16x128xf32>
    %122 = tpu.matmul %120, %121, %cst_121 {dimension_numbers = #tpu.dot_dimension_numbers<[1], [0], [0], [1], [0, 0, 1, 1], [], []>} : vector<16x32xbf16>, vector<32x128xbf16>, vector<16x128xf32> -> vector<16x128xf32>
    %c0_122 = arith.constant 0 : index
    %c0_123 = arith.constant 0 : index
    %123 = vector.load %arg13[%c0_122, %c0_123] : memref<1x128xf32, #tpu.memory_space<vmem>>, vector<1x128xf32>
    %124 = vector.broadcast %123 : vector<1x128xf32> to vector<16x128xf32>
    %125 = arith.addf %122, %124 : vector<16x128xf32>
    %126 = arith.addf %1, %125 : vector<16x128xf32>
    %c0_124 = arith.constant 0 : index
    %c0_125 = arith.constant 0 : index
    %c0_126 = arith.constant 0 : index
    %127 = vector.load %arg14[%c0_124, %c0_125, %c0_126] : memref<1x16x128xf32, #tpu.memory_space<vmem>>, vector<1x16x128xf32>
    %128 = vector.shape_cast %127 : vector<1x16x128xf32> to vector<16x128xf32>
    %129 = vector.shape_cast %126 : vector<16x128xf32> to vector<1x16x128xf32>
    tpu.vector_store %arg14[%c0_124, %c0_125, %c0_126], %129 {strides = array<i32>} : memref<1x16x128xf32, #tpu.memory_space<vmem>>, vector<1x16x128xf32>,
    return
  }
  func.func @transform_0(%arg0: i32) -> (i32, i32, i32) {
    %c0_i32 = arith.constant 0 : i32
    %c0_i32_0 = arith.constant 0 : i32
    %c0_i32_1 = arith.constant 0 : i32
    return %arg0, %c0_i32, %c0_i32_0 : i32, i32, i32
  }
  func.func @transform_1(%arg0: i32) -> (i32, i32) {
    %c0_i32 = arith.constant 0 : i32
    %c0_i32_0 = arith.constant 0 : i32
    %c0_i32_1 = arith.constant 0 : i32
    return %c0_i32, %c0_i32_0 : i32, i32
  }
  func.func @transform_2(%arg0: i32) -> (i32, i32) {
    %c0_i32 = arith.constant 0 : i32
    %c0_i32_0 = arith.constant 0 : i32
    %c0_i32_1 = arith.constant 0 : i32
    return %c0_i32, %c0_i32_0 : i32, i32
  }
  func.func @transform_3(%arg0: i32) -> (i32, i32) {
    %c0_i32 = arith.constant 0 : i32
    %c0_i32_0 = arith.constant 0 : i32
    %c0_i32_1 = arith.constant 0 : i32
    return %c0_i32, %c0_i32_0 : i32, i32
  }
  func.func @transform_4(%arg0: i32) -> (i32, i32) {
    %c0_i32 = arith.constant 0 : i32
    %c0_i32_0 = arith.constant 0 : i32
    %c0_i32_1 = arith.constant 0 : i32
    return %c0_i32, %c0_i32_0 : i32, i32
  }
  func.func @transform_5(%arg0: i32) -> (i32, i32) {
    %c0_i32 = arith.constant 0 : i32
    %c0_i32_0 = arith.constant 0 : i32
    %c0_i32_1 = arith.constant 0 : i32
    return %c0_i32, %c0_i32_0 : i32, i32
  }
  func.func @transform_6(%arg0: i32) -> (i32, i32) {
    %c0_i32 = arith.constant 0 : i32
    %c0_i32_0 = arith.constant 0 : i32
    %c0_i32_1 = arith.constant 0 : i32
    return %c0_i32, %c0_i32_0 : i32, i32
  }
  func.func @transform_7(%arg0: i32) -> (i32, i32, i32, i32) {
    %c0_i32 = arith.constant 0 : i32
    %c0_i32_0 = arith.constant 0 : i32
    %c0_i32_1 = arith.constant 0 : i32
    %c0_i32_2 = arith.constant 0 : i32
    %c0_i32_3 = arith.constant 0 : i32
    return %c0_i32, %c0_i32_0, %c0_i32_1, %c0_i32_2 : i32, i32, i32, i32
  }
  func.func @transform_8(%arg0: i32) -> (i32, i32) {
    %c0_i32 = arith.constant 0 : i32
    %c0_i32_0 = arith.constant 0 : i32
    %c0_i32_1 = arith.constant 0 : i32
    return %c0_i32, %c0_i32_0 : i32, i32
  }
  func.func @transform_9(%arg0: i32) -> (i32, i32) {
    %c0_i32 = arith.constant 0 : i32
    %c0_i32_0 = arith.constant 0 : i32
    %c0_i32_1 = arith.constant 0 : i32
    return %c0_i32, %c0_i32_0 : i32, i32
  }
  func.func @transform_10(%arg0: i32) -> (i32, i32) {
    %c0_i32 = arith.constant 0 : i32
    %c0_i32_0 = arith.constant 0 : i32
    %c0_i32_1 = arith.constant 0 : i32
    return %c0_i32, %c0_i32_0 : i32, i32
  }
  func.func @transform_11(%arg0: i32) -> (i32, i32) {
    %c0_i32 = arith.constant 0 : i32
    %c0_i32_0 = arith.constant 0 : i32
    %c0_i32_1 = arith.constant 0 : i32
    return %c0_i32, %c0_i32_0 : i32, i32
  }
  func.func @transform_12(%arg0: i32) -> (i32, i32) {
    %c0_i32 = arith.constant 0 : i32
    %c0_i32_0 = arith.constant 0 : i32
    %c0_i32_1 = arith.constant 0 : i32
    return %c0_i32, %c0_i32_0 : i32, i32
  }
  func.func @transform_13(%arg0: i32) -> (i32, i32, i32) {
    %c0_i32 = arith.constant 0 : i32
    %c0_i32_0 = arith.constant 0 : i32
    %c0_i32_1 = arith.constant 0 : i32
    return %arg0, %c0_i32, %c0_i32_0 : i32, i32, i32
  }
}

module attributes {stable_mosaic.version = 11 : i64} {
  func.func @_identity_block_kernel(%arg0: i32, %arg1: memref<1x16x128xf32, #tpu.memory_space<vmem>>, %arg2: memref<1x128xf32, #tpu.memory_space<vmem>>, %arg3: memref<1x128xf32, #tpu.memory_space<vmem>>, %arg4: memref<128x32xf32, #tpu.memory_space<vmem>>, %arg5: memref<1x32xf32, #tpu.memory_space<vmem>>, %arg6: memref<1x32xf32, #tpu.memory_space<vmem>>, %arg7: memref<1x32xf32, #tpu.memory_space<vmem>>, %arg8: memref<3x3x32x32xf32, #tpu.memory_space<vmem>>, %arg9: memref<1x32xf32, #tpu.memory_space<vmem>>, %arg10: memref<1x32xf32, #tpu.memory_space<vmem>>, %arg11: memref<1x32xf32, #tpu.memory_space<vmem>>, %arg12: memref<32x128xf32, #tpu.memory_space<vmem>>, %arg13: memref<1x128xf32, #tpu.memory_space<vmem>>, %arg14: memref<1x16x128xf32, #tpu.memory_space<vmem>>, %arg15: memref<6x6x32xf32, #tpu.memory_space<vmem>>) attributes {dimension_semantics = [#tpu.dimension_semantics<parallel>], iteration_bounds = array<i64: 2>, scalar_prefetch = 0 : i64, scratch_operands = 1 : i64, tpu.core_type = #tpu.core_type<tc>, window_params = [{transform_indices = @transform_0, window_bounds = array<i64: 1, 16, 128>}, {pipeline_mode = #tpu.pipeline_mode<synchronous>, transform_indices = @transform_1, window_bounds = array<i64: 1, 128>}, {pipeline_mode = #tpu.pipeline_mode<synchronous>, transform_indices = @transform_2, window_bounds = array<i64: 1, 128>}, {pipeline_mode = #tpu.pipeline_mode<synchronous>, transform_indices = @transform_3, window_bounds = array<i64: 128, 32>}, {pipeline_mode = #tpu.pipeline_mode<synchronous>, transform_indices = @transform_4, window_bounds = array<i64: 1, 32>}, {pipeline_mode = #tpu.pipeline_mode<synchronous>, transform_indices = @transform_5, window_bounds = array<i64: 1, 32>}, {pipeline_mode = #tpu.pipeline_mode<synchronous>, transform_indices = @transform_6, window_bounds = array<i64: 1, 32>}, {pipeline_mode = #tpu.pipeline_mode<synchronous>, transform_indices = @transform_7, window_bounds = array<i64: 3, 3, 32, 32>}, {pipeline_mode = #tpu.pipeline_mode<synchronous>, transform_indices = @transform_8, window_bounds = array<i64: 1, 32>}, {pipeline_mode = #tpu.pipeline_mode<synchronous>, transform_indices = @transform_9, window_bounds = array<i64: 1, 32>}, {pipeline_mode = #tpu.pipeline_mode<synchronous>, transform_indices = @transform_10, window_bounds = array<i64: 1, 32>}, {pipeline_mode = #tpu.pipeline_mode<synchronous>, transform_indices = @transform_11, window_bounds = array<i64: 32, 128>}, {pipeline_mode = #tpu.pipeline_mode<synchronous>, transform_indices = @transform_12, window_bounds = array<i64: 1, 128>}, {transform_indices = @transform_13, window_bounds = array<i64: 1, 16, 128>}]} {
    %c0 = arith.constant 0 : index
    %c0_0 = arith.constant 0 : index
    %c0_1 = arith.constant 0 : index
    %0 = vector.load %arg1[%c0, %c0_0, %c0_1] : memref<1x16x128xf32, #tpu.memory_space<vmem>>, vector<1x16x128xf32>
    %1 = vector.shape_cast %0 : vector<1x16x128xf32> to vector<16x128xf32>
    %c0_2 = arith.constant 0 : index
    %c0_3 = arith.constant 0 : index
    %2 = vector.load %arg2[%c0_2, %c0_3] : memref<1x128xf32, #tpu.memory_space<vmem>>, vector<1x128xf32>
    %3 = vector.broadcast %2 : vector<1x128xf32> to vector<16x128xf32>
    %4 = arith.mulf %1, %3 : vector<16x128xf32>
    %c0_4 = arith.constant 0 : index
    %c0_5 = arith.constant 0 : index
    %5 = vector.load %arg3[%c0_4, %c0_5] : memref<1x128xf32, #tpu.memory_space<vmem>>, vector<1x128xf32>
    %6 = vector.broadcast %5 : vector<1x128xf32> to vector<16x128xf32>
    %7 = arith.addf %4, %6 : vector<16x128xf32>
    %cst = arith.constant 0.000000e+00 : f32
    %8 = vector.broadcast %cst : f32 to vector<16x128xf32>
    %9 = arith.maximumf %7, %8 : vector<16x128xf32>
    %c0_6 = arith.constant 0 : index
    %c0_7 = arith.constant 0 : index
    %10 = vector.load %arg4[%c0_6, %c0_7] : memref<128x32xf32, #tpu.memory_space<vmem>>, vector<128x32xf32>
    %11 = arith.truncf %9 : vector<16x128xf32> to vector<16x128xbf16>
    %12 = arith.truncf %10 : vector<128x32xf32> to vector<128x32xbf16>
    %cst_8 = arith.constant dense<0.000000e+00> : vector<16x32xf32>
    %13 = tpu.matmul %11, %12, %cst_8 {dimension_numbers = #tpu.dot_dimension_numbers<[1], [0], [0], [1], [0, 0, 1, 1], [], []>} : vector<16x128xbf16>, vector<128x32xbf16>, vector<16x32xf32> -> vector<16x32xf32>
    %c0_9 = arith.constant 0 : index
    %c0_10 = arith.constant 0 : index
    %14 = vector.load %arg5[%c0_9, %c0_10] : memref<1x32xf32, #tpu.memory_space<vmem>>, vector<1x32xf32>
    %15 = vector.broadcast %14 : vector<1x32xf32> to vector<16x32xf32>
    %16 = arith.addf %13, %15 : vector<16x32xf32>
    %c0_11 = arith.constant 0 : index
    %c0_12 = arith.constant 0 : index
    %17 = vector.load %arg6[%c0_11, %c0_12] : memref<1x32xf32, #tpu.memory_space<vmem>>, vector<1x32xf32>
    %18 = vector.broadcast %17 : vector<1x32xf32> to vector<16x32xf32>
    %19 = arith.mulf %16, %18 : vector<16x32xf32>
    %c0_13 = arith.constant 0 : index
    %c0_14 = arith.constant 0 : index
    %20 = vector.load %arg7[%c0_13, %c0_14] : memref<1x32xf32, #tpu.memory_space<vmem>>, vector<1x32xf32>
    %21 = vector.broadcast %20 : vector<1x32xf32> to vector<16x32xf32>
    %22 = arith.addf %19, %21 : vector<16x32xf32>
    %cst_15 = arith.constant 0.000000e+00 : f32
    %23 = vector.broadcast %cst_15 : f32 to vector<16x32xf32>
    %24 = arith.maximumf %22, %23 : vector<16x32xf32>
    %25 = vector.shape_cast %24 : vector<16x32xf32> to vector<4x4x32xf32>
    %c1 = arith.constant 1 : index
    %c1_16 = arith.constant 1 : index
    %c0_17 = arith.constant 0 : index
    %26 = vector.load %arg15[%c1, %c1_16, %c0_17] : memref<6x6x32xf32, #tpu.memory_space<vmem>>, vector<4x4x32xf32>
    tpu.vector_store %arg15[%c1, %c1_16, %c0_17], %25 {strides = array<i32>} : memref<6x6x32xf32, #tpu.memory_space<vmem>>, vector<4x4x32xf32>,
    %c1_18 = arith.constant 1 : index
    %c1_19 = arith.constant 1 : index
    %c0_20 = arith.constant 0 : index
    %27 = vector.load %arg15[%c1_18, %c1_19, %c0_20] : memref<6x6x32xf32, #tpu.memory_space<vmem>>, vector<1x4x32xf32>
    %c0_21 = arith.constant 0 : index
    %c1_22 = arith.constant 1 : index
    %c0_23 = arith.constant 0 : index
    %28 = vector.load %arg15[%c0_21, %c1_22, %c0_23] : memref<6x6x32xf32, #tpu.memory_space<vmem>>, vector<1x4x32xf32>
    tpu.vector_store %arg15[%c0_21, %c1_22, %c0_23], %27 {strides = array<i32>} : memref<6x6x32xf32, #tpu.memory_space<vmem>>, vector<1x4x32xf32>,
    %c4 = arith.constant 4 : index
    %c1_24 = arith.constant 1 : index
    %c0_25 = arith.constant 0 : index
    %29 = vector.load %arg15[%c4, %c1_24, %c0_25] : memref<6x6x32xf32, #tpu.memory_space<vmem>>, vector<1x4x32xf32>
    %c5 = arith.constant 5 : index
    %c1_26 = arith.constant 1 : index
    %c0_27 = arith.constant 0 : index
    %30 = vector.load %arg15[%c5, %c1_26, %c0_27] : memref<6x6x32xf32, #tpu.memory_space<vmem>>, vector<1x4x32xf32>
    tpu.vector_store %arg15[%c5, %c1_26, %c0_27], %29 {strides = array<i32>} : memref<6x6x32xf32, #tpu.memory_space<vmem>>, vector<1x4x32xf32>,
    %c0_28 = arith.constant 0 : index
    %c1_29 = arith.constant 1 : index
    %c0_30 = arith.constant 0 : index
    %31 = vector.load %arg15[%c0_28, %c1_29, %c0_30] : memref<6x6x32xf32, #tpu.memory_space<vmem>>, vector<6x1x32xf32>
    %c0_31 = arith.constant 0 : index
    %c0_32 = arith.constant 0 : index
    %c0_33 = arith.constant 0 : index
    %32 = vector.load %arg15[%c0_31, %c0_32, %c0_33] : memref<6x6x32xf32, #tpu.memory_space<vmem>>, vector<6x1x32xf32>
    tpu.vector_store %arg15[%c0_31, %c0_32, %c0_33], %31 {strides = array<i32>} : memref<6x6x32xf32, #tpu.memory_space<vmem>>, vector<6x1x32xf32>,
    %c0_34 = arith.constant 0 : index
    %c4_35 = arith.constant 4 : index
    %c0_36 = arith.constant 0 : index
    %33 = vector.load %arg15[%c0_34, %c4_35, %c0_36] : memref<6x6x32xf32, #tpu.memory_space<vmem>>, vector<6x1x32xf32>
    %c0_37 = arith.constant 0 : index
    %c5_38 = arith.constant 5 : index
    %c0_39 = arith.constant 0 : index
    %34 = vector.load %arg15[%c0_37, %c5_38, %c0_39] : memref<6x6x32xf32, #tpu.memory_space<vmem>>, vector<6x1x32xf32>
    tpu.vector_store %arg15[%c0_37, %c5_38, %c0_39], %33 {strides = array<i32>} : memref<6x6x32xf32, #tpu.memory_space<vmem>>, vector<6x1x32xf32>,
    %cst_40 = arith.constant 0.000000e+00 : f32
    %35 = vector.broadcast %cst_40 : f32 to vector<16x32xf32>
    %c0_41 = arith.constant 0 : index
    %c0_42 = arith.constant 0 : index
    %c0_43 = arith.constant 0 : index
    %36 = vector.load %arg15[%c0_41, %c0_42, %c0_43] : memref<6x6x32xf32, #tpu.memory_space<vmem>>, vector<4x4x32xf32>
    %37 = vector.shape_cast %36 : vector<4x4x32xf32> to vector<16x32xf32>
    %c0_44 = arith.constant 0 : index
    %c0_45 = arith.constant 0 : index
    %c0_46 = arith.constant 0 : index
    %c0_47 = arith.constant 0 : index
    %38 = vector.load %arg8[%c0_44, %c0_45, %c0_46, %c0_47] : memref<3x3x32x32xf32, #tpu.memory_space<vmem>>, vector<1x1x32x32xf32>
    %39 = vector.shape_cast %38 : vector<1x1x32x32xf32> to vector<32x32xf32>
    %40 = arith.truncf %37 : vector<16x32xf32> to vector<16x32xbf16>
    %41 = arith.truncf %39 : vector<32x32xf32> to vector<32x32xbf16>
    %cst_48 = arith.constant dense<0.000000e+00> : vector<16x32xf32>
    %42 = tpu.matmul %40, %41, %cst_48 {dimension_numbers = #tpu.dot_dimension_numbers<[1], [0], [0], [1], [0, 0, 1, 1], [], []>} : vector<16x32xbf16>, vector<32x32xbf16>, vector<16x32xf32> -> vector<16x32xf32>
    %43 = arith.addf %35, %42 : vector<16x32xf32>
    %c0_49 = arith.constant 0 : index
    %c1_50 = arith.constant 1 : index
    %c0_51 = arith.constant 0 : index
    %44 = vector.load %arg15[%c0_49, %c1_50, %c0_51] : memref<6x6x32xf32, #tpu.memory_space<vmem>>, vector<4x4x32xf32>
    %45 = vector.shape_cast %44 : vector<4x4x32xf32> to vector<16x32xf32>
    %c0_52 = arith.constant 0 : index
    %c1_53 = arith.constant 1 : index
    %c0_54 = arith.constant 0 : index
    %c0_55 = arith.constant 0 : index
    %46 = vector.load %arg8[%c0_52, %c1_53, %c0_54, %c0_55] : memref<3x3x32x32xf32, #tpu.memory_space<vmem>>, vector<1x1x32x32xf32>
    %47 = vector.shape_cast %46 : vector<1x1x32x32xf32> to vector<32x32xf32>
    %48 = arith.truncf %45 : vector<16x32xf32> to vector<16x32xbf16>
    %49 = arith.truncf %47 : vector<32x32xf32> to vector<32x32xbf16>
    %cst_56 = arith.constant dense<0.000000e+00> : vector<16x32xf32>
    %50 = tpu.matmul %48, %49, %cst_56 {dimension_numbers = #tpu.dot_dimension_numbers<[1], [0], [0], [1], [0, 0, 1, 1], [], []>} : vector<16x32xbf16>, vector<32x32xbf16>, vector<16x32xf32> -> vector<16x32xf32>
    %51 = arith.addf %43, %50 : vector<16x32xf32>
    %c0_57 = arith.constant 0 : index
    %c2 = arith.constant 2 : index
    %c0_58 = arith.constant 0 : index
    %52 = vector.load %arg15[%c0_57, %c2, %c0_58] : memref<6x6x32xf32, #tpu.memory_space<vmem>>, vector<4x4x32xf32>
    %53 = vector.shape_cast %52 : vector<4x4x32xf32> to vector<16x32xf32>
    %c0_59 = arith.constant 0 : index
    %c2_60 = arith.constant 2 : index
    %c0_61 = arith.constant 0 : index
    %c0_62 = arith.constant 0 : index
    %54 = vector.load %arg8[%c0_59, %c2_60, %c0_61, %c0_62] : memref<3x3x32x32xf32, #tpu.memory_space<vmem>>, vector<1x1x32x32xf32>
    %55 = vector.shape_cast %54 : vector<1x1x32x32xf32> to vector<32x32xf32>
    %56 = arith.truncf %53 : vector<16x32xf32> to vector<16x32xbf16>
    %57 = arith.truncf %55 : vector<32x32xf32> to vector<32x32xbf16>
    %cst_63 = arith.constant dense<0.000000e+00> : vector<16x32xf32>
    %58 = tpu.matmul %56, %57, %cst_63 {dimension_numbers = #tpu.dot_dimension_numbers<[1], [0], [0], [1], [0, 0, 1, 1], [], []>} : vector<16x32xbf16>, vector<32x32xbf16>, vector<16x32xf32> -> vector<16x32xf32>
    %59 = arith.addf %51, %58 : vector<16x32xf32>
    %c1_64 = arith.constant 1 : index
    %c0_65 = arith.constant 0 : index
    %c0_66 = arith.constant 0 : index
    %60 = vector.load %arg15[%c1_64, %c0_65, %c0_66] : memref<6x6x32xf32, #tpu.memory_space<vmem>>, vector<4x4x32xf32>
    %61 = vector.shape_cast %60 : vector<4x4x32xf32> to vector<16x32xf32>
    %c1_67 = arith.constant 1 : index
    %c0_68 = arith.constant 0 : index
    %c0_69 = arith.constant 0 : index
    %c0_70 = arith.constant 0 : index
    %62 = vector.load %arg8[%c1_67, %c0_68, %c0_69, %c0_70] : memref<3x3x32x32xf32, #tpu.memory_space<vmem>>, vector<1x1x32x32xf32>
    %63 = vector.shape_cast %62 : vector<1x1x32x32xf32> to vector<32x32xf32>
    %64 = arith.truncf %61 : vector<16x32xf32> to vector<16x32xbf16>
    %65 = arith.truncf %63 : vector<32x32xf32> to vector<32x32xbf16>
    %cst_71 = arith.constant dense<0.000000e+00> : vector<16x32xf32>
    %66 = tpu.matmul %64, %65, %cst_71 {dimension_numbers = #tpu.dot_dimension_numbers<[1], [0], [0], [1], [0, 0, 1, 1], [], []>} : vector<16x32xbf16>, vector<32x32xbf16>, vector<16x32xf32> -> vector<16x32xf32>
    %67 = arith.addf %59, %66 : vector<16x32xf32>
    %c1_72 = arith.constant 1 : index
    %c1_73 = arith.constant 1 : index
    %c0_74 = arith.constant 0 : index
    %68 = vector.load %arg15[%c1_72, %c1_73, %c0_74] : memref<6x6x32xf32, #tpu.memory_space<vmem>>, vector<4x4x32xf32>
    %69 = vector.shape_cast %68 : vector<4x4x32xf32> to vector<16x32xf32>
    %c1_75 = arith.constant 1 : index
    %c1_76 = arith.constant 1 : index
    %c0_77 = arith.constant 0 : index
    %c0_78 = arith.constant 0 : index
    %70 = vector.load %arg8[%c1_75, %c1_76, %c0_77, %c0_78] : memref<3x3x32x32xf32, #tpu.memory_space<vmem>>, vector<1x1x32x32xf32>
    %71 = vector.shape_cast %70 : vector<1x1x32x32xf32> to vector<32x32xf32>
    %72 = arith.truncf %69 : vector<16x32xf32> to vector<16x32xbf16>
    %73 = arith.truncf %71 : vector<32x32xf32> to vector<32x32xbf16>
    %cst_79 = arith.constant dense<0.000000e+00> : vector<16x32xf32>
    %74 = tpu.matmul %72, %73, %cst_79 {dimension_numbers = #tpu.dot_dimension_numbers<[1], [0], [0], [1], [0, 0, 1, 1], [], []>} : vector<16x32xbf16>, vector<32x32xbf16>, vector<16x32xf32> -> vector<16x32xf32>
    %75 = arith.addf %67, %74 : vector<16x32xf32>
    %c1_80 = arith.constant 1 : index
    %c2_81 = arith.constant 2 : index
    %c0_82 = arith.constant 0 : index
    %76 = vector.load %arg15[%c1_80, %c2_81, %c0_82] : memref<6x6x32xf32, #tpu.memory_space<vmem>>, vector<4x4x32xf32>
    %77 = vector.shape_cast %76 : vector<4x4x32xf32> to vector<16x32xf32>
    %c1_83 = arith.constant 1 : index
    %c2_84 = arith.constant 2 : index
    %c0_85 = arith.constant 0 : index
    %c0_86 = arith.constant 0 : index
    %78 = vector.load %arg8[%c1_83, %c2_84, %c0_85, %c0_86] : memref<3x3x32x32xf32, #tpu.memory_space<vmem>>, vector<1x1x32x32xf32>
    %79 = vector.shape_cast %78 : vector<1x1x32x32xf32> to vector<32x32xf32>
    %80 = arith.truncf %77 : vector<16x32xf32> to vector<16x32xbf16>
    %81 = arith.truncf %79 : vector<32x32xf32> to vector<32x32xbf16>
    %cst_87 = arith.constant dense<0.000000e+00> : vector<16x32xf32>
    %82 = tpu.matmul %80, %81, %cst_87 {dimension_numbers = #tpu.dot_dimension_numbers<[1], [0], [0], [1], [0, 0, 1, 1], [], []>} : vector<16x32xbf16>, vector<32x32xbf16>, vector<16x32xf32> -> vector<16x32xf32>
    %83 = arith.addf %75, %82 : vector<16x32xf32>
    %c2_88 = arith.constant 2 : index
    %c0_89 = arith.constant 0 : index
    %c0_90 = arith.constant 0 : index
    %84 = vector.load %arg15[%c2_88, %c0_89, %c0_90] : memref<6x6x32xf32, #tpu.memory_space<vmem>>, vector<4x4x32xf32>
    %85 = vector.shape_cast %84 : vector<4x4x32xf32> to vector<16x32xf32>
    %c2_91 = arith.constant 2 : index
    %c0_92 = arith.constant 0 : index
    %c0_93 = arith.constant 0 : index
    %c0_94 = arith.constant 0 : index
    %86 = vector.load %arg8[%c2_91, %c0_92, %c0_93, %c0_94] : memref<3x3x32x32xf32, #tpu.memory_space<vmem>>, vector<1x1x32x32xf32>
    %87 = vector.shape_cast %86 : vector<1x1x32x32xf32> to vector<32x32xf32>
    %88 = arith.truncf %85 : vector<16x32xf32> to vector<16x32xbf16>
    %89 = arith.truncf %87 : vector<32x32xf32> to vector<32x32xbf16>
    %cst_95 = arith.constant dense<0.000000e+00> : vector<16x32xf32>
    %90 = tpu.matmul %88, %89, %cst_95 {dimension_numbers = #tpu.dot_dimension_numbers<[1], [0], [0], [1], [0, 0, 1, 1], [], []>} : vector<16x32xbf16>, vector<32x32xbf16>, vector<16x32xf32> -> vector<16x32xf32>
    %91 = arith.addf %83, %90 : vector<16x32xf32>
    %c2_96 = arith.constant 2 : index
    %c1_97 = arith.constant 1 : index
    %c0_98 = arith.constant 0 : index
    %92 = vector.load %arg15[%c2_96, %c1_97, %c0_98] : memref<6x6x32xf32, #tpu.memory_space<vmem>>, vector<4x4x32xf32>
    %93 = vector.shape_cast %92 : vector<4x4x32xf32> to vector<16x32xf32>
    %c2_99 = arith.constant 2 : index
    %c1_100 = arith.constant 1 : index
    %c0_101 = arith.constant 0 : index
    %c0_102 = arith.constant 0 : index
    %94 = vector.load %arg8[%c2_99, %c1_100, %c0_101, %c0_102] : memref<3x3x32x32xf32, #tpu.memory_space<vmem>>, vector<1x1x32x32xf32>
    %95 = vector.shape_cast %94 : vector<1x1x32x32xf32> to vector<32x32xf32>
    %96 = arith.truncf %93 : vector<16x32xf32> to vector<16x32xbf16>
    %97 = arith.truncf %95 : vector<32x32xf32> to vector<32x32xbf16>
    %cst_103 = arith.constant dense<0.000000e+00> : vector<16x32xf32>
    %98 = tpu.matmul %96, %97, %cst_103 {dimension_numbers = #tpu.dot_dimension_numbers<[1], [0], [0], [1], [0, 0, 1, 1], [], []>} : vector<16x32xbf16>, vector<32x32xbf16>, vector<16x32xf32> -> vector<16x32xf32>
    %99 = arith.addf %91, %98 : vector<16x32xf32>
    %c2_104 = arith.constant 2 : index
    %c2_105 = arith.constant 2 : index
    %c0_106 = arith.constant 0 : index
    %100 = vector.load %arg15[%c2_104, %c2_105, %c0_106] : memref<6x6x32xf32, #tpu.memory_space<vmem>>, vector<4x4x32xf32>
    %101 = vector.shape_cast %100 : vector<4x4x32xf32> to vector<16x32xf32>
    %c2_107 = arith.constant 2 : index
    %c2_108 = arith.constant 2 : index
    %c0_109 = arith.constant 0 : index
    %c0_110 = arith.constant 0 : index
    %102 = vector.load %arg8[%c2_107, %c2_108, %c0_109, %c0_110] : memref<3x3x32x32xf32, #tpu.memory_space<vmem>>, vector<1x1x32x32xf32>
    %103 = vector.shape_cast %102 : vector<1x1x32x32xf32> to vector<32x32xf32>
    %104 = arith.truncf %101 : vector<16x32xf32> to vector<16x32xbf16>
    %105 = arith.truncf %103 : vector<32x32xf32> to vector<32x32xbf16>
    %cst_111 = arith.constant dense<0.000000e+00> : vector<16x32xf32>
    %106 = tpu.matmul %104, %105, %cst_111 {dimension_numbers = #tpu.dot_dimension_numbers<[1], [0], [0], [1], [0, 0, 1, 1], [], []>} : vector<16x32xbf16>, vector<32x32xbf16>, vector<16x32xf32> -> vector<16x32xf32>
    %107 = arith.addf %99, %106 : vector<16x32xf32>
    %c0_112 = arith.constant 0 : index
    %c0_113 = arith.constant 0 : index
    %108 = vector.load %arg9[%c0_112, %c0_113] : memref<1x32xf32, #tpu.memory_space<vmem>>, vector<1x32xf32>
    %109 = vector.broadcast %108 : vector<1x32xf32> to vector<16x32xf32>
    %110 = arith.addf %107, %109 : vector<16x32xf32>
    %c0_114 = arith.constant 0 : index
    %c0_115 = arith.constant 0 : index
    %111 = vector.load %arg10[%c0_114, %c0_115] : memref<1x32xf32, #tpu.memory_space<vmem>>, vector<1x32xf32>
    %112 = vector.broadcast %111 : vector<1x32xf32> to vector<16x32xf32>
    %113 = arith.mulf %110, %112 : vector<16x32xf32>
    %c0_116 = arith.constant 0 : index
    %c0_117 = arith.constant 0 : index
    %114 = vector.load %arg11[%c0_116, %c0_117] : memref<1x32xf32, #tpu.memory_space<vmem>>, vector<1x32xf32>
    %115 = vector.broadcast %114 : vector<1x32xf32> to vector<16x32xf32>
    %116 = arith.addf %113, %115 : vector<16x32xf32>
    %cst_118 = arith.constant 0.000000e+00 : f32
    %117 = vector.broadcast %cst_118 : f32 to vector<16x32xf32>
    %118 = arith.maximumf %116, %117 : vector<16x32xf32>
    %c0_119 = arith.constant 0 : index
    %c0_120 = arith.constant 0 : index
    %119 = vector.load %arg12[%c0_119, %c0_120] : memref<32x128xf32, #tpu.memory_space<vmem>>, vector<32x128xf32>
    %120 = arith.truncf %118 : vector<16x32xf32> to vector<16x32xbf16>
    %121 = arith.truncf %119 : vector<32x128xf32> to vector<32x128xbf16>
    %cst_121 = arith.constant dense<0.000000e+00> : vector<16x128xf32>
    %122 = tpu.matmul %120, %121, %cst_121 {dimension_numbers = #tpu.dot_dimension_numbers<[1], [0], [0], [1], [0, 0, 1, 1], [], []>} : vector<16x32xbf16>, vector<32x128xbf16>, vector<16x128xf32> -> vector<16x128xf32>
    %c0_122 = arith.constant 0 : index
    %c0_123 = arith.constant 0 : index
    %123 = vector.load %arg13[%c0_122, %c0_123] : memref<1x128xf32, #tpu.memory_space<vmem>>, vector<1x128xf32>
    %124 = vector.broadcast %123 : vector<1x128xf32> to vector<16x128xf32>
    %125 = arith.addf %122, %124 : vector<16x128xf32>
    %126 = arith.addf %1, %125 : vector<16x128xf32>
    %c0_124 = arith.constant 0 : index
    %c0_125 = arith.constant 0 : index
    %c0_126 = arith.constant 0 : index
    %127 = vector.load %arg14[%c0_124, %c0_125, %c0_126] : memref<1x16x128xf32, #tpu.memory_space<vmem>>, vector<1x16x128xf32>
    %128 = vector.shape_cast %127 : vector<1x16x128xf32> to vector<16x128xf32>
    %129 = vector.shape_cast %126 : vector<16x128xf32> to vector<1x16x128xf32>
    tpu.vector_store %arg14[%c0_124, %c0_125, %c0_126], %129 {strides = array<i32>} : memref<1x16x128xf32, #tpu.memory_space<vmem>>, vector<1x16x128xf32>,
    return
  }
  func.func @transform_0(%arg0: i32) -> (i32, i32, i32) {
    %c0_i32 = arith.constant 0 : i32
    %c0_i32_0 = arith.constant 0 : i32
    %c0_i32_1 = arith.constant 0 : i32
    return %arg0, %c0_i32, %c0_i32_0 : i32, i32, i32
  }
  func.func @transform_1(%arg0: i32) -> (i32, i32) {
    %c0_i32 = arith.constant 0 : i32
    %c0_i32_0 = arith.constant 0 : i32
    %c0_i32_1 = arith.constant 0 : i32
    return %c0_i32, %c0_i32_0 : i32, i32
  }
  func.func @transform_2(%arg0: i32) -> (i32, i32) {
    %c0_i32 = arith.constant 0 : i32
    %c0_i32_0 = arith.constant 0 : i32
    %c0_i32_1 = arith.constant 0 : i32
    return %c0_i32, %c0_i32_0 : i32, i32
  }
  func.func @transform_3(%arg0: i32) -> (i32, i32) {
    %c0_i32 = arith.constant 0 : i32
    %c0_i32_0 = arith.constant 0 : i32
    %c0_i32_1 = arith.constant 0 : i32
    return %c0_i32, %c0_i32_0 : i32, i32
  }
  func.func @transform_4(%arg0: i32) -> (i32, i32) {
    %c0_i32 = arith.constant 0 : i32
    %c0_i32_0 = arith.constant 0 : i32
    %c0_i32_1 = arith.constant 0 : i32
    return %c0_i32, %c0_i32_0 : i32, i32
  }
  func.func @transform_5(%arg0: i32) -> (i32, i32) {
    %c0_i32 = arith.constant 0 : i32
    %c0_i32_0 = arith.constant 0 : i32
    %c0_i32_1 = arith.constant 0 : i32
    return %c0_i32, %c0_i32_0 : i32, i32
  }
  func.func @transform_6(%arg0: i32) -> (i32, i32) {
    %c0_i32 = arith.constant 0 : i32
    %c0_i32_0 = arith.constant 0 : i32
    %c0_i32_1 = arith.constant 0 : i32
    return %c0_i32, %c0_i32_0 : i32, i32
  }
  func.func @transform_7(%arg0: i32) -> (i32, i32, i32, i32) {
    %c0_i32 = arith.constant 0 : i32
    %c0_i32_0 = arith.constant 0 : i32
    %c0_i32_1 = arith.constant 0 : i32
    %c0_i32_2 = arith.constant 0 : i32
    %c0_i32_3 = arith.constant 0 : i32
    return %c0_i32, %c0_i32_0, %c0_i32_1, %c0_i32_2 : i32, i32, i32, i32
  }
  func.func @transform_8(%arg0: i32) -> (i32, i32) {
    %c0_i32 = arith.constant 0 : i32
    %c0_i32_0 = arith.constant 0 : i32
    %c0_i32_1 = arith.constant 0 : i32
    return %c0_i32, %c0_i32_0 : i32, i32
  }
  func.func @transform_9(%arg0: i32) -> (i32, i32) {
    %c0_i32 = arith.constant 0 : i32
    %c0_i32_0 = arith.constant 0 : i32
    %c0_i32_1 = arith.constant 0 : i32
    return %c0_i32, %c0_i32_0 : i32, i32
  }
  func.func @transform_10(%arg0: i32) -> (i32, i32) {
    %c0_i32 = arith.constant 0 : i32
    %c0_i32_0 = arith.constant 0 : i32
    %c0_i32_1 = arith.constant 0 : i32
    return %c0_i32, %c0_i32_0 : i32, i32
  }
  func.func @transform_11(%arg0: i32) -> (i32, i32) {
    %c0_i32 = arith.constant 0 : i32
    %c0_i32_0 = arith.constant 0 : i32
    %c0_i32_1 = arith.constant 0 : i32
    return %c0_i32, %c0_i32_0 : i32, i32
  }
  func.func @transform_12(%arg0: i32) -> (i32, i32) {
    %c0_i32 = arith.constant 0 : i32
    %c0_i32_0 = arith.constant 0 : i32
    %c0_i32_1 = arith.constant 0 : i32
    return %c0_i32, %c0_i32_0 : i32, i32
  }
  func.func @transform_13(%arg0: i32) -> (i32, i32, i32) {
    %c0_i32 = arith.constant 0 : i32
    %c0_i32_0 = arith.constant 0 : i32
    %c0_i32_1 = arith.constant 0 : i32
    return %arg0, %c0_i32, %c0_i32_0 : i32, i32, i32
  }
}

</mosaic_0001>

<bundles_post_ra>
// kernel: _lambda_.7
= control target key start
LH: loop header
LB: loop body
LE: loop exit
PB: predicated region body
PF: predicated region fallthrough
CT: control target
= control target key end

     0   :  { %s2198_s25 = smov 0   ;;  %s2493_s0 = inlined_call_operand.vmem [shape: f32[2,64,64], index: 0, kind: input, shape index: {}]   ;;  %s2494_s1 = inlined_call_operand.vmem [shape: f32[1,64], index: 1, kind: input, shape index: {}]   ;;  %s2495_s2 = inlined_call_operand.vmem [shape: f32[1,64], index: 2, kind: input, shape index: {}]   ;;  %s2496_s3 = inlined_call_operand.vmem [shape: f32[64,16], index: 3, kind: input, shape index: {}]   ;;  %s2497_s4 = inlined_call_operand.vmem [shape: f32[1,16], index: 4, kind: input, shape index: {}]   ;;  %s2498_s5 = inlined_call_operand.vmem [shape: f32[1,16], index: 5, kind: input, shape index: {}]   ;;  %s2499_s6 = inlined_call_operand.vmem [shape: f32[1,16], index: 6, kind: input, shape index: {}]   ;;  %s2500_s7 = inlined_call_operand.vmem [shape: f32[3,3,16,16], index: 7, kind: input, shape index: {}]   ;;  %s2501_s8 = inlined_call_operand.vmem [shape: f32[1,16], index: 8, kind: input, shape index: {}]   ;;  %s2502_s9 = inlined_call_operand.vmem [shape: f32[1,16], index: 9, kind: input, shape index: {}]   ;;  %s2503_s10 = inlined_call_operand.vmem [shape: f32[1,16], index: 10, kind: input, shape index: {}]   ;;  %s2504_s11 = inlined_call_operand.vmem [shape: f32[16,64], index: 11, kind: input, shape index: {}]   ;;  %s2505_s12 = inlined_call_operand.vmem [shape: f32[1,64], index: 12, kind: input, shape index: {}]   ;;  %s2506_s13 = inlined_call_operand.vmem [shape: f32[2,64,64], index: 13, kind: output, shape index: {}]  }
   0x1 LB: > { %s1792_s26 = sadd.s32 4294967295, %s2126_s25   ;;  %p1796_p0 = scmp.ge.s32.totalorder %s2126_s25, 1  ;;  %s2126_s25 = sphi %s2198_s25, %s23_s25  }
   0x2   : > { %p387_p1 = scmp.lt.s32.totalorder %s2126_s25, 3 }
   0x4   : > { %p388_p2 = pnand %p1796_p0, %p387_p1 }
   0x5   : > { %v488_v0 = vld [vmem:[%s2496_s3] sm:$0xff] (!%p388_p2)  ;;  %v489_v1 = vld [vmem:[%s2496_s3 + $0x8] sm:$0xff] (!%p388_p2)  ;;  %v490_v2 = vld [vmem:[%s2496_s3 + $0x10] sm:$0xff] (!%p388_p2)  ;;  %p431_p3 = scmp.lt.s32.totalorder (!%p388_p2), %s1792_s26, 1  ;;  %vm511_vm0 = vcmask (!%p388_p2), 523264   ;;  %vm628_vm1 = vcmask (!%p388_p2), 130048  }
   0x6   : > { %391 = sbr.rel (%p388_p2) target bundleno = 808 (0x328), region = 72  ;;  %v500_v3 = vpack.c.bf16 (!%p388_p2), %v489_v1, %v488_v0  ;;  %v491_v4 = vld [vmem:[%s2496_s3 + $0x18] sm:$0xff] (!%p388_p2)  ;;  %v492_v6 = vld [vmem:[%s2496_s3 + $0x20] sm:$0xff] (!%p388_p2)  ;;  %v493_v7 = vld [vmem:[%s2496_s3 + $0x28] sm:$0xff] (!%p388_p2)  ;;  %vm653_vm2 = vcmask (!%p388_p2), 122880  }
   0x7   : > { %v501_v5 = vpack.c.bf16 (!%p388_p2), %v491_v4, %v490_v2  ;;  %v1801_v8 = vld [vmem:[%s2494_s1] ss:$0 sm:$0xff] (!%p388_p2)  ;;  %v502_v9 = vpack.c.bf16 (!%p388_p2), %v493_v7, %v492_v6  ;;  %v494_v10 = vld [vmem:[%s2496_s3 + $0x30] sm:$0xff] (!%p388_p2)  ;;  %v495_v11 = vld [vmem:[%s2496_s3 + $0x38] sm:$0xff] (!%p388_p2) }
   0x8   : > { %1932 = vmatprep.subr.bf16.mxu0 (!%p388_p2), %v500_v3  ;;  %v1802_v12 = vld [vmem:[%s2495_s2] ss:$0 sm:$0xff] (!%p388_p2)  ;;  %v503_v27 = vpack.c.bf16 (!%p388_p2), %v495_v11, %v494_v10  ;;  %v1810_v50 = vld [vmem:[%s2500_s7 + $0x10] sm:$0xff] (!%p388_p2)  ;;  %v1811_v51 = vld [vmem:[%s2500_s7 + $0x18] sm:$0xff] (!%p388_p2) }
   0x9   : > { %1933 = vmatpush3.bf16.msra.mxu0 (!%p388_p2), %v500_v3  ;;  %v714_v52 = vpack.c.bf16 (!%p388_p2), %v1811_v51, %v1810_v50  ;;  %v1826_v53 = vld [vmem:[%s2500_s7 + $0x30] sm:$0xff] (!%p388_p2)  ;;  %v1827_v54 = vld [vmem:[%s2500_s7 + $0x38] sm:$0xff] (!%p388_p2)  ;;  %v1832_v56 = vld [vmem:[%s2500_s7 + $0x40] sm:$0xff] (!%p388_p2) }
   0xa   : > { %1934 = vmatprep.subr.bf16.mxu0 (!%p388_p2), %v501_v5  ;;  %v985_v55 = vpack.c.bf16 (!%p388_p2), %v1827_v54, %v1826_v53  ;;  %v1833_v57 = vld [vmem:[%s2500_s7 + $0x48] sm:$0xff] (!%p388_p2)  ;;  %v692_v59 = vld [vmem:[%s2500_s7] sm:$0xff] (!%p388_p2) }
   0xb   : > { %v2290_v58 = vpack.c.bf16 (!%p388_p2), %v1833_v57, %v1832_v56  ;;  %v693_v60 = vld [vmem:[%s2500_s7 + $0x8] sm:$0xff] (!%p388_p2)  ;;  %v1803_v62 = vld [vmem:[%s2497_s4] ss:$0 sm:$0xff] (!%p388_p2) }
   0xc   : > { %1978 = vmatprep.subr.bf16.mxu1 (!%p388_p2), %v985_v55  ;;  %v2299_v61 = vpack.c.bf16 (!%p388_p2), %v693_v60, %v692_v59  ;;  %v1808_v0 = vld [vmem:[%s2498_s5] ss:$0 sm:$0xff] (!%p388_p2)  ;;  %v1821_v60 = vld [vmem:[%s2500_s7 + $0x28] sm:$0xff] (!%p388_p2) }
   0xd   : > { %s2508_s26 = smov (!%p431_p3, %s1792_s26), 1  ;;  %1935 = vmatpush3.bf16.msra.mxu0 %v501_v5  ;;  %1979 = vmatpush3.bf16.msra.mxu1 %v985_v55  ;;  %v1809_v3 = vld [vmem:[%s2499_s6] ss:$0 sm:$0xff] }
   0xe   : > { %s1872_s22 = sshll.u32 %s2508_s26, 6  ;;  %1936 = vmatprep.subr.bf16.mxu0 %v502_v9  ;;  %1988 = vmatprep.subr.bf16.mxu1 %v2290_v58  ;;  %v1820_v59 = vld [vmem:[%s2500_s7 + $0x20] sm:$0xff] }
   0xf   : > { %s435_s16 = scalar_lea.vmem %s2493_s0, %s1872_s22  ;;  %s440_s19 = scalar_lea.vmem %s2506_s13, %s1872_s22 }
  0x10   : > { %v2244_v13 = vld [vmem:[%s435_s16] sm:$0xff]  ;;  %v2246_v14 = vld [vmem:[%s435_s16 + $0x8] sm:$0xff]  ;;  %v2248_v15 = vld [vmem:[%s435_s16 + $0x10] sm:$0xff] }
  0x11   : > { %v457_v16 = vmul.f32 %v1801_v8, %v2244_v13  ;;  %v458_v17 = vmul.f32 %v1801_v8, %v2246_v14  ;;  %v2252_v18 = vld [vmem:[%s435_s16 + $0x18] sm:$0xff]  ;;  %v459_v19 = vmul.f32 %v1801_v8, %v2248_v15  ;;  %v2255_v20 = vld [vmem:[%s435_s16 + $0x20] sm:$0xff]  ;;  %v2257_v21 = vld [vmem:[%s435_s16 + $0x28] sm:$0xff]  ;;  %1937 = vmatpush3.bf16.msra.mxu0 %v502_v9 }
  0x12   : > { %v460_v22 = vmul.f32 %v1801_v8, %v2252_v18  ;;  %v461_v23 = vmul.f32 %v1801_v8, %v2255_v20  ;;  %v462_v24 = vmul.f32 %v1801_v8, %v2257_v21  ;;  %v2262_v25 = vld [vmem:[%s435_s16 + $0x30] sm:$0xff]  ;;  %v2264_v26 = vld [vmem:[%s435_s16 + $0x38] sm:$0xff]  ;;  %1938 = vmatprep.subr.bf16.mxu0 %v503_v27 }
  0x13   : > { %v472_v28 = vadd.f32 %v1802_v12, %v457_v16  ;;  %v473_v29 = vadd.f32 %v1802_v12, %v458_v17  ;;  %v474_v30 = vadd.f32 %v1802_v12, %v459_v19  ;;  %v463_v34 = vmul.f32 %v1801_v8, %v2262_v25 }
  0x14   : > { %v475_v31 = vadd.f32 %v1802_v12, %v460_v22  ;;  %v476_v32 = vadd.f32 %v1802_v12, %v461_v23  ;;  %v477_v33 = vadd.f32 %v1802_v12, %v462_v24  ;;  %v464_v38 = vmul.f32 %v1801_v8, %v2264_v26 }
  0x15   : > { %v480_v35 = vmax.f32 %v472_v28, 0.0  ;;  %v481_v36 = vmax.f32 %v473_v29, 0.0  ;;  %v482_v37 = vmax.f32 %v474_v30, 0.0  ;;  %v478_v44 = vadd.f32 %v1802_v12, %v463_v34  ;;  %1939 = vmatpush3.bf16.msra.mxu0 %v503_v27 }
  0x16   : > { %v483_v39 = vmax.f32 %v475_v31, 0.0  ;;  %v484_v40 = vmax.f32 %v476_v32, 0.0  ;;  %v485_v41 = vmax.f32 %v477_v33, 0.0  ;;  %v479_v45 = vadd.f32 %v1802_v12, %v464_v38  ;;  %1948 = vmatprep.subr.bf16.mxu0 %v714_v52 }
  0x17   : > { %v496_v42 = vpack.c.bf16 %v481_v36, %v480_v35  ;;  %v486_v47 = vmax.f32 %v478_v44, 0.0 }
  0x18   : > { %v497_v43 = vpack.c.bf16 %v483_v39, %v482_v37  ;;  %v498_v46 = vpack.c.bf16 %v485_v41, %v484_v40  ;;  %v487_v48 = vmax.f32 %v479_v45, 0.0 }
  0x19   : > { %1940 = vmatprep.mubr.msk.bf16.mxu0 %vm511_vm0, %v496_v42 }
  0x1a   : > { %1941 = vmatmul.mubr.msk.bf16.vlgmr.msra.gmra.mrb[0].mxu0 %vm511_vm0, %v497_v43  ;;  %v499_v49 = vpack.c.bf16 %v487_v48, %v486_v47 }
  0x1b   : > { %1944 = vmatprep.mubr.msk.bf16.mxu0 %vm511_vm0, %v498_v46  ;;  %1949 = vmatpush3.bf16.msra.mxu0 %v714_v52 }
  0x1c   : > { %1958 = vmatprep.subr.bf16.mxu0 %v2299_v61 }
  0x22   : > { %1945 = vmatmul.mubr.msk.bf16.gmra.mrb[4].mxu0 %vm511_vm0, %v499_v49 }
  0xed   : > { %v1942_v63 = vpop.f32.mrb[0].mxu0 }
  0xee   : > { %v567_v1 = vadd.f32 %v1942_v63, %v1803_v62  ;;  %v558_v2 = vpop.f32.mrb[1].mxu0 }
  0xef   : > { %v559_v4 = vadd.f32 %v1803_v62, %v558_v2  ;;  %v1943_v5 = vpop.f32.mrb[2].mxu0 }
  0xf0   : > { %v598_v6 = vmul.f32 %v1808_v0, %v567_v1  ;;  %v570_v7 = vadd.f32 %v1943_v5, %v1803_v62  ;;  %v561_v8 = vpop.f32.mrb[3].mxu0 }
  0xf1   : > { %v596_v9 = vmul.f32 %v1808_v0, %v559_v4  ;;  %v562_v10 = vadd.f32 %v1803_v62, %v561_v8 }
  0xf2   : > { %v613_v11 = vadd.f32 %v1809_v3, %v598_v6  ;;  %v599_v12 = vmul.f32 %v1808_v0, %v570_v7  ;;  %v1838_v6 = vld [vmem:[%s2500_s7 + $0x50] sm:$0xff]  ;;  %v1839_v7 = vld [vmem:[%s2500_s7 + $0x58] sm:$0xff] }
  0xf3   : > { %v611_v16 = vadd.f32 %v1809_v3, %v596_v9  ;;  %v597_v17 = vmul.f32 %v1808_v0, %v562_v10 }
  0xf4   : > { %v621_v19 = vmax.f32 %v613_v11, 0.0  ;;  %v614_v22 = vadd.f32 %v1809_v3, %v599_v12 }
  0xf5   : > { %v619_v23 = vmax.f32 %v611_v16, 0.0  ;;  %v612_v24 = vadd.f32 %v1809_v3, %v597_v17  ;;  %v1946_v27 = vpop.f32.mrb[4].mxu0 }
  0xf6   : > { %631 = vst.msk [vmem:[#allocation2 + $0x31] sm:$0xff] %vm628_vm1, %v621_v19  ;;  %v622_v28 = vmax.f32 %v614_v22, 0.0  ;;  %v583_v29 = vadd.f32 %v1946_v27, %v1803_v62  ;;  %v574_v30 = vpop.f32.mrb[5].mxu0  ;;  %v884_v22 = vpack.c.bf16 %v1821_v60, %v1820_v59 }
  0xf7   : > { %629 = vst.msk [vmem:[#allocation2 + $0x11] sm:$0xff] %vm628_vm1, %v619_v23  ;;  %v620_v31 = vmax.f32 %v612_v24, 0.0  ;;  %v575_v32 = vadd.f32 %v1803_v62, %v574_v30  ;;  %v1947_v33 = vpop.f32.mrb[6].mxu0 }
  0xf8   : > { %632 = vst.msk [vmem:[#allocation2 + $0x41] sm:$0xff] %vm628_vm1, %v622_v28  ;;  %v602_v34 = vmul.f32 %v1808_v0, %v583_v29  ;;  %v586_v35 = vadd.f32 %v1947_v33, %v1803_v62  ;;  %v577_v36 = vpop.f32.mrb[7].mxu0  ;;  %v1187_v33 = vpack.c.bf16 %v1839_v7, %v1838_v6 }
  0xf9   : > { %630 = vst.msk [vmem:[#allocation2 + $0x21] sm:$0xff] %vm628_vm1, %v620_v31  ;;  %v600_v37 = vmul.f32 %v1808_v0, %v575_v32  ;;  %v578_v38 = vadd.f32 %v1803_v62, %v577_v36 }
  0xfa   : > { %v617_v39 = vadd.f32 %v1809_v3, %v602_v34  ;;  %v603_v40 = vmul.f32 %v1808_v0, %v586_v35 }
  0xfb   : > { %v615_v41 = vadd.f32 %v1809_v3, %v600_v37  ;;  %v601_v42 = vmul.f32 %v1808_v0, %v578_v38 }
  0xfc   : > { %v625_v43 = vmax.f32 %v617_v39, 0.0  ;;  %v618_v44 = vadd.f32 %v1809_v3, %v603_v40 }
  0xfd   : > { %v646_v45 = vld [vmem:[#allocation2 + $0x31] sm:$0x1]  ;;  %v667_v46 = vld [vmem:[#allocation2 + $0x38] sm:$0x1]  ;;  %v623_v47 = vmax.f32 %v615_v41, 0.0  ;;  %v616_v48 = vadd.f32 %v1809_v3, %v601_v42 }
  0xfe   : > { %657 = vst.msk [vmem:[#allocation2 + $0x30] sm:$0x1] %vm653_vm2, %v646_v45  ;;  %677 = vst.msk [vmem:[#allocation2 + $0x39] sm:$0x1] %vm653_vm2, %v667_v46  ;;  %v2317_v49 = vld [vmem:[#allocation2 + $0x11] sm:$0xff]  ;;  %v626_v51 = vmax.f32 %v618_v44, 0.0 }
  0xff   : > { %v665_v50 = vld [vmem:[#allocation2 + $0x18] sm:$0x1]  ;;  %635 = vst.msk [vmem:[#allocation2 + $0x71] sm:$0xff] %vm628_vm1, %v625_v43  ;;  %v644_v52 = vld [vmem:[#allocation2 + $0x11] sm:$0x1]  ;;  %638 = vst.msk [vmem:[#allocation2 + $0x1] sm:$0xff] %vm628_vm1, %v2317_v49 }
 0x100   : > { %675 = vst.msk [vmem:[#allocation2 + $0x19] sm:$0x1] %vm653_vm2, %v665_v50  ;;  %v647_v53 = vld [vmem:[#allocation2 + $0x41] sm:$0x1]  ;;  %v668_v54 = vld [vmem:[#allocation2 + $0x48] sm:$0x1] }
 0x101   : > { %633 = vst.msk [vmem:[#allocation2 + $0x51] sm:$0xff] %vm628_vm1, %v623_v47  ;;  %v624_v55 = vmax.f32 %v616_v48, 0.0  ;;  %v666_v56 = vld [vmem:[#allocation2 + $0x28] sm:$0x1]  ;;  %636 = vst.msk [vmem:[#allocation2 + $0x81] sm:$0xff] %vm628_vm1, %v626_v51  ;;  %v2339_v1 = vld [vmem:[#allocation2 + $0x31] sm:$0xff] }
 0x102   : > { %655 = vst.msk [vmem:[#allocation2 + $0x10] sm:$0x1] %vm653_vm2, %v644_v52  ;;  %658 = vst.msk [vmem:[#allocation2 + $0x40] sm:$0x1] %vm653_vm2, %v647_v53  ;;  %v645_v57 = vld [vmem:[#allocation2 + $0x21] sm:$0x1] }
 0x103   : > { %678 = vst.msk [vmem:[#allocation2 + $0x49] sm:$0x1] %vm653_vm2, %v668_v54  ;;  %676 = vst.msk [vmem:[#allocation2 + $0x29] sm:$0x1] %vm653_vm2, %v666_v56  ;;  %v2337_v0 = vld [vmem:[#allocation2 + $0x21] sm:$0xff] }
 0x104   : > { %634 = vst.msk [vmem:[#allocation2 + $0x61] sm:$0xff] %vm628_vm1, %v624_v55  ;;  %v2343_v5 = vld [vmem:[#allocation2 + $0x41] sm:$0xff]  ;;  %v2362_v17 = vpack.c.bf16 %v2339_v1, %v2337_v0  ;;  %v1082_v46 = vpack.c.bf16 %v2337_v0, %v2317_v49 }
 0x105   : > { %656 = vst.msk [vmem:[#allocation2 + $0x20] sm:$0x1] %vm653_vm2, %v645_v57  ;;  %v972_v30 = vld [vmem:[#allocation2 + $0x30] sm:$0xff]  ;;  %v1844_v48 = vld [vmem:[%s2500_s7 + $0x60] sm:$0xff]  ;;  %v1845_v50 = vld [vmem:[%s2500_s7 + $0x68] sm:$0xff] }
 0x106   : > { %v650_v62 = vld [vmem:[#allocation2 + $0x71] sm:$0x1]  ;;  %v671_v63 = vld [vmem:[#allocation2 + $0x78] sm:$0x1]  ;;  %v699_v4 = vld [vmem:[#allocation2 + $0x1] sm:$0xff]  ;;  %v1289_v52 = vpack.c.bf16 %v1845_v50, %v1844_v48 }
 0x107   : > { %661 = vst.msk [vmem:[#allocation2 + $0x70] sm:$0x1] %vm653_vm2, %v650_v62  ;;  %681 = vst.msk [vmem:[#allocation2 + $0x79] sm:$0x1] %vm653_vm2, %v671_v63  ;;  %v710_v11 = vpack.c.bf16 %v2317_v49, %v699_v4  ;;  %v643_v31 = vld [vmem:[#allocation2 + $0x1] sm:$0x1]  ;;  %v1083_v49 = vpack.c.bf16 %v2343_v5, %v2339_v1 }
 0x108   : > { %v648_v2 = vld [vmem:[#allocation2 + $0x51] sm:$0x1]  ;;  %v669_v3 = vld [vmem:[#allocation2 + $0x58] sm:$0x1]  ;;  %v2353_v8 = vld [vmem:[#allocation2 + $0x81] sm:$0xff] }
 0x109   : > { %659 = vst.msk [vmem:[#allocation2 + $0x50] sm:$0x1] %vm653_vm2, %v648_v2  ;;  %679 = vst.msk [vmem:[#allocation2 + $0x59] sm:$0x1] %vm653_vm2, %v669_v3  ;;  %v651_v9 = vld [vmem:[#allocation2 + $0x81] sm:$0x1]  ;;  %1950 = vmatprep.mubr.msk.bf16.mxu0 %vm628_vm1, %v710_v11 }
 0x10a   : > { %v672_v10 = vld [vmem:[#allocation2 + $0x88] sm:$0x1]  ;;  %642 = vst.msk [vmem:[#allocation2 + $0x91] sm:$0xff] %vm628_vm1, %v2353_v8  ;;  %v704_v19 = vld [vmem:[#allocation2 + $0x51] sm:$0xff]  ;;  %v973_v28 = vld [vmem:[#allocation2 + $0x40] sm:$0xff]  ;;  %1951 = vmatmul.mubr.msk.bf16.vlgmr.msra.gmra.mrb[8].mxu0 %vm628_vm1, %v2362_v17 }
 0x10b   : > { %662 = vst.msk [vmem:[#allocation2 + $0x80] sm:$0x1] %vm653_vm2, %v651_v9  ;;  %682 = vst.msk [vmem:[#allocation2 + $0x89] sm:$0x1] %vm653_vm2, %v672_v10  ;;  %v649_v12 = vld [vmem:[#allocation2 + $0x61] sm:$0x1]  ;;  %v2368_v23 = vpack.c.bf16 %v704_v19, %v2343_v5  ;;  %v982_v32 = vpack.c.bf16 %v973_v28, %v972_v30  ;;  %1959 = vmatpush3.bf16.msra.mxu0 %v2299_v61 }
 0x10c   : > { %v670_v16 = vld [vmem:[#allocation2 + $0x68] sm:$0x1]  ;;  %660 = vst.msk [vmem:[#allocation2 + $0x60] sm:$0x1] %vm653_vm2, %v649_v12  ;;  %v970_v24 = vld [vmem:[#allocation2 + $0x10] sm:$0xff]  ;;  %v971_v27 = vld [vmem:[#allocation2 + $0x20] sm:$0xff]  ;;  %1968 = vmatprep.subr.bf16.mxu0 %v884_v22 }
 0x10d   : > { %680 = vst.msk [vmem:[#allocation2 + $0x69] sm:$0x1] %vm653_vm2, %v670_v16  ;;  %v981_v29 = vpack.c.bf16 %v971_v27, %v970_v24  ;;  %1954 = vmatprep.mubr.msk.bf16.mxu0 %vm628_vm1, %v2368_v23  ;;  %654 = vst.msk [vmem:[#allocation2] sm:$0x1] %vm653_vm2, %v643_v31  ;;  %v664_v34 = vld [vmem:[#allocation2 + $0x8] sm:$0x1]  ;;  %v695_v47 = vpack.c.bf16 %v972_v30, %v971_v27 }
 0x10e   : > { %674 = vst.msk [vmem:[#allocation2 + $0x9] sm:$0x1] %vm653_vm2, %v664_v34  ;;  %v705_v35 = vld [vmem:[#allocation2 + $0x61] sm:$0xff]  ;;  %v706_v36 = vld [vmem:[#allocation2 + $0x71] sm:$0xff] }
 0x10f   : > { %1980 = vmatprep.mubr.msk.bf16.mxu1 %vm628_vm1, %v981_v29  ;;  %v2380_v38 = vpack.c.bf16 %v706_v36, %v705_v35  ;;  %v976_v44 = vld [vmem:[#allocation2 + $0x70] sm:$0xff]  ;;  %v1084_v53 = vpack.c.bf16 %v705_v35, %v704_v19  ;;  %v1173_v59 = vld [vmem:[#allocation2 + $0x22] sm:$0xff]  ;;  %v1085_v60 = vpack.c.bf16 %v2353_v8, %v706_v36  ;;  %v1851_v4 = vld [vmem:[%s2500_s7 + $0x78] sm:$0xff] }
 0x110   : > { %1981 = vmatmul.mubr.msk.bf16.vlgmr.msra.gmra.mrb[0].mxu1 %vm628_vm1, %v982_v32  ;;  %v974_v39 = vld [vmem:[#allocation2 + $0x50] sm:$0xff]  ;;  %v873_v2 = vld [vmem:[#allocation2 + $0x42] sm:$0xff] }
 0x111   : > { %1989 = vmatpush3.bf16.msra.mxu1 %v2290_v58  ;;  %v652_v37 = vld [vmem:[#allocation2 + $0x91] sm:$0x1]  ;;  %v673_v42 = vld [vmem:[#allocation2 + $0x98] sm:$0x1]  ;;  %v696_v51 = vpack.c.bf16 %v974_v39, %v973_v28 }
 0x112   : > { %1998 = vmatprep.subr.bf16.mxu1 %v1187_v33  ;;  %v2382_v61 = vld [vmem:[#allocation2 + $0x80] sm:$0xff]  ;;  %663 = vst.msk [vmem:[#allocation2 + $0x90] sm:$0x1] %vm653_vm2, %v652_v37  ;;  %1955 = vmatmul.mubr.msk.bf16.gmra.mrb[12].mxu0 %vm628_vm1, %v2380_v38  ;;  %683 = vst.msk [vmem:[#allocation2 + $0x99] sm:$0x1] %vm653_vm2, %v673_v42  ;;  %v870_v56 = vld [vmem:[#allocation2 + $0x12] sm:$0xff] }
 0x113   : > { %v975_v40 = vld [vmem:[#allocation2 + $0x60] sm:$0xff]  ;;  %v984_v45 = vpack.c.bf16 %v2382_v61, %v976_v44  ;;  %v1183_v62 = vpack.c.bf16 %v1173_v59, %v870_v56  ;;  %v874_v63 = vld [vmem:[#allocation2 + $0x52] sm:$0xff] }
 0x114   : > { %v983_v41 = vpack.c.bf16 %v975_v40, %v974_v39  ;;  %v684_v43 = vld [vmem:[#allocation2] sm:$0xff]  ;;  %v697_v55 = vpack.c.bf16 %v976_v44, %v975_v40  ;;  %v872_v0 = vld [vmem:[#allocation2 + $0x32] sm:$0xff]  ;;  %v882_v5 = vpack.c.bf16 %v874_v63, %v873_v2 }
 0x115   : > { %v694_v58 = vpack.c.bf16 %v970_v24, %v684_v43  ;;  %v869_v54 = vld [vmem:[#allocation2 + $0x2] sm:$0xff]  ;;  %v881_v1 = vpack.c.bf16 %v872_v0, %v1173_v59  ;;  %v1850_v3 = vld [vmem:[%s2500_s7 + $0x70] sm:$0xff]  ;;  %v1184_v7 = vpack.c.bf16 %v873_v2, %v872_v0  ;;  %v1862_v42 = vld [vmem:[%s2501_s8] ss:$0 sm:$0xff] }
 0x116   : > { %1984 = vmatprep.mubr.msk.bf16.mxu1 %vm628_vm1, %v983_v41  ;;  %v880_v57 = vpack.c.bf16 %v870_v56, %v869_v54  ;;  %v1177_v6 = vld [vmem:[#allocation2 + $0x62] sm:$0xff]  ;;  %v1390_v9 = vpack.c.bf16 %v1851_v4, %v1850_v3  ;;  %v876_v11 = vld [vmem:[#allocation2 + $0x72] sm:$0xff] }
 0x117   : > { %1960 = vmatprep.mubr.msk.bf16.mxu0 %vm628_vm1, %v694_v58  ;;  %v1185_v10 = vpack.c.bf16 %v1177_v6, %v874_v63  ;;  %v883_v12 = vpack.c.bf16 %v876_v11, %v1177_v6  ;;  %v1179_v16 = vld [vmem:[#allocation2 + $0x82] sm:$0xff]  ;;  %v1382_v30 = vld [vmem:[#allocation2 + $0x91] sm:$0xff]  ;;  %v1863_v58 = vld [vmem:[%s2502_s9] ss:$0 sm:$0xff] }
 0x118   : > { %1985 = vmatmul.mubr.msk.bf16.gmra.mrb[4].mxu1 %vm628_vm1, %v984_v45  ;;  %v1186_v19 = vpack.c.bf16 %v1179_v16, %v876_v11  ;;  %v1857_v24 = vld [vmem:[%s2500_s7 + $0x88] sm:$0xff]  ;;  %v1389_v31 = vpack.c.bf16 %v1382_v30, %v2353_v8 }
 0x119   : > { %1990 = vmatprep.mubr.msk.bf16.mxu1 %vm628_vm1, %v1082_v46  ;;  %v1281_v28 = vld [vmem:[#allocation2 + $0x90] sm:$0xff]  ;;  %v1631_v8 = vld [vmem:[%s2504_s11 + $0x8] sm:$0xff] }
 0x11a   : > { %1961 = vmatmul.mubr.msk.bf16.vlgmr.msra.gmra.mrb[8].mxu0 %vm628_vm1, %v695_v47  ;;  %v1288_v29 = vpack.c.bf16 %v1281_v28, %v2382_v61  ;;  %v1483_v32 = vld [vmem:[#allocation2 + $0x92] sm:$0xff] }
 0x11b   : > { %1964 = vmatprep.mubr.msk.bf16.mxu0 %vm628_vm1, %v696_v51  ;;  %1969 = vmatpush3.bf16.msra.mxu0 %v884_v22  ;;  %v1856_v22 = vld [vmem:[%s2500_s7 + $0x80] sm:$0xff] }
 0x11c   : > { %v1491_v27 = vpack.c.bf16 %v1857_v24, %v1856_v22 }
 0x120   : > { %1991 = vmatmul.mubr.msk.bf16.vlgmr.msra.gmra.mrb[0].mxu1 %vm628_vm1, %v1083_v49 }
 0x121   : > { %1999 = vmatpush3.bf16.msra.mxu1 %v1187_v33  ;;  %1994 = vmatprep.mubr.msk.bf16.mxu1 %vm628_vm1, %v1084_v53 }
 0x122   : > { %2008 = vmatprep.subr.bf16.mxu1 %v1289_v52  ;;  %1965 = vmatmul.mubr.msk.bf16.gmra.mrb[12].mxu0 %vm628_vm1, %v697_v55 }
 0x123   : > { %1970 = vmatprep.mubr.msk.bf16.mxu0 %vm628_vm1, %v880_v57 }
 0x128   : > { %1995 = vmatmul.mubr.msk.bf16.gmra.mrb[4].mxu1 %vm628_vm1, %v1085_v60 }
 0x129   : > { %2000 = vmatprep.mubr.msk.bf16.mxu1 %vm628_vm1, %v1183_v62 }
 0x12a   : > { %1971 = vmatmul.mubr.msk.bf16.vlgmr.msra.gmra.mrb[8].mxu0 %vm628_vm1, %v881_v1 }
 0x12b   : > { %1974 = vmatprep.mubr.msk.bf16.mxu0 %vm628_vm1, %v882_v5 }
 0x130   : > { %2001 = vmatmul.mubr.msk.bf16.vlgmr.msra.gmra.mrb[0].mxu1 %vm628_vm1, %v1184_v7 }
 0x131   : > { %2009 = vmatpush3.bf16.msra.mxu1 %v1289_v52  ;;  %2004 = vmatprep.mubr.msk.bf16.mxu1 %vm628_vm1, %v1185_v10 }
 0x132   : > { %2018 = vmatprep.subr.bf16.mxu1 %v1390_v9  ;;  %1975 = vmatmul.mubr.msk.bf16.gmra.mrb[12].mxu0 %vm628_vm1, %v883_v12 }
 0x138   : > { %2005 = vmatmul.mubr.msk.bf16.gmra.mrb[4].mxu1 %vm628_vm1, %v1186_v19 }
 0x139   : > { %2010 = vmatprep.mubr.msk.bf16.mxu1 %vm628_vm1, %v695_v47 }
 0x140   : > { %2011 = vmatmul.mubr.msk.bf16.vlgmr.msra.gmra.mrb[0].mxu1 %vm628_vm1, %v696_v51  ;;  %v1864_v51 = vld [vmem:[%s2503_s10] ss:$0 sm:$0xff] }
 0x141   : > { %2019 = vmatpush3.bf16.msra.mxu1 %v1390_v9  ;;  %2014 = vmatprep.mubr.msk.bf16.mxu1 %vm628_vm1, %v697_v55 }
 0x142   : > { %2028 = vmatprep.subr.bf16.mxu1 %v1491_v27 }
 0x148   : > { %2015 = vmatmul.mubr.msk.bf16.gmra.mrb[4].mxu1 %vm628_vm1, %v1288_v29 }
 0x149   : > { %2020 = vmatprep.mubr.msk.bf16.mxu1 %vm628_vm1, %v2362_v17  ;;  %v1490_v17 = vpack.c.bf16 %v1483_v32, %v1179_v16 }
 0x150   : > { %2021 = vmatmul.mubr.msk.bf16.vlgmr.msra.gmra.mrb[0].mxu1 %vm628_vm1, %v2368_v23  ;;  %v1630_v23 = vld [vmem:[%s2504_s11] sm:$0xff] }
 0x151   : > { %2029 = vmatpush3.bf16.msra.mxu1 %v1491_v27  ;;  %2024 = vmatprep.mubr.msk.bf16.mxu1 %vm628_vm1, %v2380_v38  ;;  %v1636_v33 = vpack.c.bf16 %v1631_v8, %v1630_v23 }
 0x153   : > { %2038 = vmatprep.subr.bf16.mxu0 %v1636_v33 }
 0x154   : > { %2039 = vmatpush3.bf16.msra.mxu0 %v1636_v33 }
 0x158   : > { %2025 = vmatmul.mubr.msk.bf16.gmra.mrb[4].mxu1 %vm628_vm1, %v1389_v31 }
 0x159   : > { %2030 = vmatprep.mubr.msk.bf16.mxu1 %vm628_vm1, %v881_v1 }
 0x160   : > { %2031 = vmatmul.mubr.msk.bf16.vlgmr.msra.gmra.mrb[0].mxu1 %vm628_vm1, %v882_v5 }
 0x161   : > { %2034 = vmatprep.mubr.msk.bf16.mxu1 %vm628_vm1, %v883_v12 }
 0x168   : > { %2035 = vmatmul.mubr.msk.bf16.gmra.mrb[4].mxu1 %vm628_vm1, %v1490_v17 }
 0x1fd   : > { %v1972_v34 = vpop.f32.mrb[8].mxu0 }
 0x1fe   : > { %v931_v35 = vpop.f32.mrb[9].mxu0 }
 0x1ff   : > { %v1973_v36 = vpop.f32.mrb[10].mxu0 }
 0x200   : > { %v934_v37 = vpop.f32.mrb[11].mxu0 }
 0x205   : > { %v1976_v38 = vpop.f32.mrb[12].mxu0 }
 0x206   : > { %v947_v39 = vpop.f32.mrb[13].mxu0 }
 0x207   : > { %v1977_v40 = vpop.f32.mrb[14].mxu0 }
 0x208   : > { %v950_v61 = vpop.f32.mrb[15].mxu0 }
 0x233   : > { %v2032_v41 = vpop.f32.mrb[0].mxu1 }
 0x234   : > { %v2048_v43 = vadd.f32 %v2032_v41, %v1972_v34  ;;  %v1538_v44 = vpop.f32.mrb[1].mxu1 }
 0x235   : > { %v2049_v45 = vadd.f32 %v1538_v44, %v931_v35  ;;  %v2033_v46 = vpop.f32.mrb[2].mxu1 }
 0x236   : > { %v1586_v47 = vadd.f32 %v2048_v43, %v1862_v42  ;;  %v2050_v48 = vadd.f32 %v2033_v46, %v1973_v36  ;;  %v1541_v50 = vpop.f32.mrb[3].mxu1 }
 0x237   : > { %v1584_v49 = vadd.f32 %v2049_v45, %v1862_v42  ;;  %v2051_v52 = vadd.f32 %v1541_v50, %v934_v37 }
 0x238   : > { %v1601_v53 = vmul.f32 %v1863_v58, %v1586_v47  ;;  %v1587_v54 = vadd.f32 %v2050_v48, %v1862_v42 }
 0x239   : > { %v1599_v55 = vmul.f32 %v1863_v58, %v1584_v49  ;;  %v1585_v56 = vadd.f32 %v2051_v52, %v1862_v42 }
 0x23a   : > { %v1616_v57 = vadd.f32 %v1864_v51, %v1601_v53  ;;  %v1602_v59 = vmul.f32 %v1863_v58, %v1587_v54 }
 0x23b   : > { %v1614_v60 = vadd.f32 %v1864_v51, %v1599_v55  ;;  %v1600_v62 = vmul.f32 %v1863_v58, %v1585_v56  ;;  %v2036_v63 = vpop.f32.mrb[4].mxu1 }
 0x23c   : > { %v1617_v0 = vadd.f32 %v1864_v51, %v1602_v59  ;;  %v2052_v1 = vadd.f32 %v2036_v63, %v1976_v38  ;;  %v1554_v2 = vpop.f32.mrb[5].mxu1  ;;  %v1624_v6 = vmax.f32 %v1616_v57, 0.0 }
 0x23d   : > { %v1615_v3 = vadd.f32 %v1864_v51, %v1600_v62  ;;  %v2053_v4 = vadd.f32 %v1554_v2, %v947_v39  ;;  %v2037_v5 = vpop.f32.mrb[6].mxu1  ;;  %v1622_v12 = vmax.f32 %v1614_v60, 0.0 }
 0x23e   : > { %v1625_v7 = vmax.f32 %v1617_v0, 0.0  ;;  %v1590_v9 = vadd.f32 %v2052_v1, %v1862_v42  ;;  %v2054_v10 = vadd.f32 %v2037_v5, %v1977_v40  ;;  %v1557_v11 = vpop.f32.mrb[7].mxu1 }
 0x23f   : > { %v1623_v16 = vmax.f32 %v1615_v3, 0.0  ;;  %v1588_v19 = vadd.f32 %v2053_v4, %v1862_v42  ;;  %v2055_v22 = vadd.f32 %v1557_v11, %v950_v61  ;;  %v1865_v61 = vld [vmem:[%s2505_s12] ss:$0 sm:$0xff] }
 0x240   : > { %v1633_v24 = vpack.c.bf16 %v1625_v7, %v1624_v6  ;;  %v1605_v27 = vmul.f32 %v1863_v58, %v1590_v9  ;;  %v1591_v28 = vadd.f32 %v2054_v10, %v1862_v42 }
 0x241   : > { %v1603_v29 = vmul.f32 %v1863_v58, %v1588_v19  ;;  %v1589_v30 = vadd.f32 %v2055_v22, %v1862_v42  ;;  %v1632_v31 = vpack.c.bf16 %v1623_v16, %v1622_v12 }
 0x242   : > { %v1620_v32 = vadd.f32 %v1864_v51, %v1605_v27  ;;  %v1606_v17 = vmul.f32 %v1863_v58, %v1591_v28 }
 0x243   : > { %v1618_v23 = vadd.f32 %v1864_v51, %v1603_v29  ;;  %v1604_v8 = vmul.f32 %v1863_v58, %v1589_v30  ;;  %2040 = vmatprep.mubr.msk.bf16.mxu0 %vm628_vm1, %v1632_v31 }
 0x244   : > { %v1621_v33 = vadd.f32 %v1864_v51, %v1606_v17  ;;  %2041 = vmatmul.mubr.msk.bf16.vlgmr.msra.gmra.mrb[16].mxu0 %vm628_vm1, %v1633_v24  ;;  %v1628_v35 = vmax.f32 %v1620_v32, 0.0 }
 0x245   : > { %v1619_v34 = vadd.f32 %v1864_v51, %v1604_v8  ;;  %v1626_v37 = vmax.f32 %v1618_v23, 0.0 }
 0x246   : > { %v1629_v36 = vmax.f32 %v1621_v33, 0.0 }
 0x247   : > { %v1627_v38 = vmax.f32 %v1619_v34, 0.0 }
 0x248   : > { %v1635_v39 = vpack.c.bf16 %v1629_v36, %v1628_v35 }
 0x249   : > { %v1634_v40 = vpack.c.bf16 %v1627_v38, %v1626_v37 }
 0x24b   : > { %2044 = vmatprep.mubr.msk.bf16.mxu0 %vm628_vm1, %v1634_v40 }
 0x24c   : > { %2045 = vmatmul.mubr.msk.bf16.gmra.mrb[20].mxu0 %vm628_vm1, %v1635_v39 }
 0x317   : > { %v2042_v41 = vpop.f32.mrb[16].mxu0 }
 0x318   : > { %v1699_v42 = vadd.f32 %v2042_v41, %v1865_v61  ;;  %v1690_v43 = vpop.f32.mrb[17].mxu0 }
 0x319   : > { %v1691_v44 = vadd.f32 %v1865_v61, %v1690_v43  ;;  %v2043_v58 = vpop.f32.mrb[18].mxu0 }
 0x31a   : > { %v1723_v45 = vadd.f32 %v1699_v42, %v2248_v15  ;;  %v1702_v46 = vadd.f32 %v2043_v58, %v1865_v61  ;;  %v1693_v47 = vpop.f32.mrb[19].mxu0 }
 0x31b   : > { %v1721_v48 = vadd.f32 %v1691_v44, %v2244_v13  ;;  %v1694_v50 = vadd.f32 %v1865_v61, %v1693_v47 }
 0x31c   : > { %1731 = vst.msk [vmem:[%s440_s19 + $0x10] sm:$0xff] %vm511_vm0, %v1723_v45  ;;  %v1724_v51 = vadd.f32 %v1702_v46, %v2252_v18 }
 0x31d   : > { %1729 = vst.msk [vmem:[%s440_s19] sm:$0xff] %vm511_vm0, %v1721_v48  ;;  %v1722_v49 = vadd.f32 %v1694_v50, %v2246_v14 }
 0x31e   : > { %1732 = vst.msk [vmem:[%s440_s19 + $0x18] sm:$0xff] %vm511_vm0, %v1724_v51 }
 0x31f   : > { %1730 = vst.msk [vmem:[%s440_s19 + $0x8] sm:$0xff] %vm511_vm0, %v1722_v49  ;;  %v2046_v52 = vpop.f32.mrb[20].mxu0 }
 0x320   : > { %v1715_v53 = vadd.f32 %v2046_v52, %v1865_v61  ;;  %v1706_v15 = vpop.f32.mrb[21].mxu0 }
 0x321   : > { %v1707_v54 = vadd.f32 %v1865_v61, %v1706_v15  ;;  %v2047_v55 = vpop.f32.mrb[22].mxu0 }
 0x322   : > { %v1727_v13 = vadd.f32 %v1715_v53, %v2262_v25  ;;  %v1718_v56 = vadd.f32 %v2047_v55, %v1865_v61  ;;  %v1709_v57 = vpop.f32.mrb[23].mxu0 }
 0x323   : > { %v1725_v59 = vadd.f32 %v1707_v54, %v2255_v20  ;;  %v1710_v18 = vadd.f32 %v1865_v61, %v1709_v57 }
 0x324   : > { %1735 = vst.msk [vmem:[%s440_s19 + $0x30] sm:$0xff] %vm511_vm0, %v1727_v13  ;;  %v1728_v14 = vadd.f32 %v1718_v56, %v2264_v26 }
 0x325   : > { %1733 = vst.msk [vmem:[%s440_s19 + $0x20] sm:$0xff] %vm511_vm0, %v1725_v59  ;;  %v1726_v60 = vadd.f32 %v1710_v18, %v2257_v21 }
 0x326   : > { %1736 = vst.msk [vmem:[%s440_s19 + $0x38] sm:$0xff] %vm511_vm0, %v1728_v14 }
 0x327   : > { %1734 = vst.msk [vmem:[%s440_s19 + $0x28] sm:$0xff] %vm511_vm0, %v1726_v60 }
 0x328 PF: > { %s23_s25 = sadd.s32 1, %s2126_s25  }
 0x329   : > { %p20_p4 = scmp.ge.s32.totalorder %s23_s25, 4  }
 0x32b   :  { %22 = sbr.rel (!%p20_p4) target bundleno = 1 (0x1), region = 114 }

// kernel: _lambda_.10
= control target key start
LH: loop header
LB: loop body
LE: loop exit
PB: predicated region body
PF: predicated region fallthrough
CT: control target
= control target key end

     0   :  { %s1648_s25 = smov 0   ;;  %s1953_s0 = inlined_call_operand.vmem [shape: f32[2,16,128], index: 0, kind: input, shape index: {}]   ;;  %s1954_s1 = inlined_call_operand.vmem [shape: f32[1,128], index: 1, kind: input, shape index: {}]   ;;  %s1955_s2 = inlined_call_operand.vmem [shape: f32[1,128], index: 2, kind: input, shape index: {}]   ;;  %s1956_s3 = inlined_call_operand.vmem [shape: f32[128,32], index: 3, kind: input, shape index: {}]   ;;  %s1957_s4 = inlined_call_operand.vmem [shape: f32[1,32], index: 4, kind: input, shape index: {}]   ;;  %s1958_s5 = inlined_call_operand.vmem [shape: f32[1,32], index: 5, kind: input, shape index: {}]   ;;  %s1959_s6 = inlined_call_operand.vmem [shape: f32[1,32], index: 6, kind: input, shape index: {}]   ;;  %s1960_s7 = inlined_call_operand.vmem [shape: f32[3,3,32,32], index: 7, kind: input, shape index: {}]   ;;  %s1961_s8 = inlined_call_operand.vmem [shape: f32[1,32], index: 8, kind: input, shape index: {}]   ;;  %s1962_s9 = inlined_call_operand.vmem [shape: f32[1,32], index: 9, kind: input, shape index: {}]   ;;  %s1963_s10 = inlined_call_operand.vmem [shape: f32[1,32], index: 10, kind: input, shape index: {}]   ;;  %s1964_s11 = inlined_call_operand.vmem [shape: f32[32,128], index: 11, kind: input, shape index: {}]   ;;  %s1965_s12 = inlined_call_operand.vmem [shape: f32[1,128], index: 12, kind: input, shape index: {}]   ;;  %s1966_s13 = inlined_call_operand.vmem [shape: f32[2,16,128], index: 13, kind: output, shape index: {}]  }
   0x1 LB: > { %s1337_s26 = sadd.s32 4294967295, %s1574_s25   ;;  %p1341_p0 = scmp.ge.s32.totalorder %s1574_s25, 1  ;;  %s1574_s25 = sphi %s1648_s25, %s23_s25  }
   0x2   : > { %p387_p1 = scmp.lt.s32.totalorder %s1574_s25, 3 }
   0x4   : > { %p388_p2 = pnand %p1341_p0, %p387_p1 }
   0x5   : > { %v464_v0 = vld [vmem:[%s1956_s3] sm:$0xff] (!%p388_p2)  ;;  %v465_v1 = vld [vmem:[%s1956_s3 + $0x8] sm:$0xff] (!%p388_p2)  ;;  %v466_v2 = vld [vmem:[%s1956_s3 + $0x10] sm:$0xff] (!%p388_p2)  ;;  %v1576_v3 = vmov (!%p388_p2), 0.0   ;;  %vm1577_vm0 = vmmov (!%p388_p2), 0   ;;  %p431_p3 = scmp.lt.s32.totalorder (!%p388_p2), %s1337_s26, 1 }
   0x6   : > { %391 = sbr.rel (%p388_p2) target bundleno = 765 (0x2fd), region = 72  ;;  %1440 = vmatprep.subr.bf16.mxu0 (!%p388_p2), %v1576_v3  ;;  %v481_v4 = vpack.c.bf16 (!%p388_p2), %v465_v1, %v464_v0  ;;  %v467_v5 = vld [vmem:[%s1956_s3 + $0x18] sm:$0xff] (!%p388_p2)  ;;  %1456 = vmatprep.mubr.msk.bf16.mxu0 (!%p388_p2), %vm1577_vm0, %v1576_v3  ;;  %v468_v7 = vld [vmem:[%s1956_s3 + $0x20] sm:$0xff] (!%p388_p2)  ;;  %v469_v8 = vld [vmem:[%s1956_s3 + $0x28] sm:$0xff] (!%p388_p2)  ;;  %vm564_vm1 = vcmask (!%p388_p2), 257024   ;;  %vm581_vm2 = vcmask (!%p388_p2), 253952  }
   0x7   : > { %1460 = vmatprep.subr.bf16.mxu1 (!%p388_p2), %v1576_v3  ;;  %1464 = vmatprep.mubr.msk.bf16.mxu1 (!%p388_p2), %vm1577_vm0, %v1576_v3  ;;  %v482_v6 = vpack.c.bf16 (!%p388_p2), %v467_v5, %v466_v2  ;;  %v483_v9 = vpack.c.bf16 (!%p388_p2), %v469_v8, %v468_v7  ;;  %v470_v10 = vld [vmem:[%s1956_s3 + $0x30] sm:$0xff] (!%p388_p2)  ;;  %v471_v11 = vld [vmem:[%s1956_s3 + $0x38] sm:$0xff] (!%p388_p2)  ;;  %v472_v13 = vld [vmem:[%s1956_s3 + $0x40] sm:$0xff] (!%p388_p2)  ;;  %vm639_vm3 = vcmask (!%p388_p2), 261120  }
   0x8   : > { %1441 = vmatpush3.bf16.msra.mxu0 (!%p388_p2), %v481_v4  ;;  %v484_v12 = vpack.c.bf16 (!%p388_p2), %v471_v11, %v470_v10  ;;  %v473_v14 = vld [vmem:[%s1956_s3 + $0x48] sm:$0xff] (!%p388_p2)  ;;  %v1346_v18 = vld [vmem:[%s1954_s1] ss:$0 sm:$0xff] (!%p388_p2)  ;;  %v474_v19 = vld [vmem:[%s1956_s3 + $0x50] sm:$0xff] (!%p388_p2) }
   0x9   : > { %1442 = vmatprep.subr.bf16.mxu0 (!%p388_p2), %v1576_v3  ;;  %v485_v15 = vpack.c.bf16 (!%p388_p2), %v473_v14, %v472_v13  ;;  %v475_v20 = vld [vmem:[%s1956_s3 + $0x58] sm:$0xff] (!%p388_p2)  ;;  %v1347_v24 = vld [vmem:[%s1955_s2] ss:$0 sm:$0xff] (!%p388_p2)  ;;  %v477_v26 = vld [vmem:[%s1956_s3 + $0x68] sm:$0xff] (!%p388_p2) }
   0xa   : > { %v486_v23 = vpack.c.bf16 (!%p388_p2), %v475_v20, %v474_v19  ;;  %v476_v25 = vld [vmem:[%s1956_s3 + $0x60] sm:$0xff] (!%p388_p2)  ;;  %v478_v30 = vld [vmem:[%s1956_s3 + $0x70] sm:$0xff] (!%p388_p2)  ;;  %v479_v31 = vld [vmem:[%s1956_s3 + $0x78] sm:$0xff] (!%p388_p2) }
   0xb   : > { %v487_v29 = vpack.c.bf16 (!%p388_p2), %v477_v26, %v476_v25  ;;  %v488_v34 = vpack.c.bf16 (!%p388_p2), %v479_v31, %v478_v30  ;;  %v1367_v36 = vld [vmem:[%s1960_s7 + $0x80] sm:$0xff] (!%p388_p2)  ;;  %v1368_v37 = vld [vmem:[%s1960_s7 + $0x88] sm:$0xff] (!%p388_p2)  ;;  %v1369_v41 = vld [vmem:[%s1960_s7 + $0x90] sm:$0xff] (!%p388_p2) }
   0xc   : > { %1443 = vmatpush3.bf16.msra.mxu0 (!%p388_p2), %v482_v6  ;;  %v878_v38 = vpack.c.bf16 (!%p388_p2), %v1368_v37, %v1367_v36  ;;  %v1351_v39 = vld [vmem:[%s1960_s7 + $0x20] sm:$0xff] (!%p388_p2)  ;;  %v1352_v40 = vld [vmem:[%s1960_s7 + $0x28] sm:$0xff] (!%p388_p2)  ;;  %v1370_v43 = vld [vmem:[%s1960_s7 + $0x98] sm:$0xff] (!%p388_p2) }
   0xd   : > { %s1968_s26 = smov (!%p431_p3, %s1337_s26), 1  ;;  %1444 = vmatprep.subr.bf16.mxu0 %v1576_v3  ;;  %v637_v42 = vpack.c.bf16 %v1352_v40, %v1351_v39  ;;  %v879_v44 = vpack.c.bf16 %v1370_v43, %v1369_v41  ;;  %v1353_v45 = vld [vmem:[%s1960_s7 + $0x30] sm:$0xff]  ;;  %v1354_v46 = vld [vmem:[%s1960_s7 + $0x38] sm:$0xff]  ;;  %v1348_v48 = vld [vmem:[%s1957_s4] ss:$0 sm:$0xff] }
   0xe   : > { %s1399_s28 = sshll.u32 %s1968_s26, 4  ;;  %v638_v47 = vpack.c.bf16 %v1354_v46, %v1353_v45  ;;  %v1349_v50 = vld [vmem:[%s1958_s5] ss:$0 sm:$0xff]  ;;  %v1378_v6 = vld [vmem:[%s1960_s7 + $0xc8] sm:$0xff]  ;;  %v1379_v20 = vld [vmem:[%s1960_s7 + $0xd0] sm:$0xff] }
   0xf   : > { %s435_s18 = scalar_lea.vmem %s1953_s0, %s1399_s28  ;;  %1461 = vmatpush3.bf16.msra.mxu1 %v637_v42  ;;  %v1350_v53 = vld [vmem:[%s1959_s6] ss:$0 sm:$0xff]  ;;  %v606_v26 = vld [vmem:[%s1960_s7 + $0x10] sm:$0xff]  ;;  %v607_v31 = vld [vmem:[%s1960_s7 + $0x18] sm:$0xff]  ;;  %s440_s19 = scalar_lea.vmem %s1966_s13, %s1399_s28 }
  0x10   : > { %1445 = vmatpush3.bf16.msra.mxu0 %v483_v9  ;;  %v1703_v16 = vld [vmem:[%s435_s18] sm:$0xff]  ;;  %v1705_v17 = vld [vmem:[%s435_s18 + $0x8] sm:$0xff]  ;;  %1462 = vmatprep.subr.bf16.mxu1 %v1576_v3  ;;  %v1359_v40 = vld [vmem:[%s1960_s7 + $0x50] sm:$0xff] }
  0x11   : > { %1446 = vmatprep.subr.bf16.mxu0 %v1576_v3  ;;  %v451_v21 = vmul.f32 %v1346_v18, %v1703_v16  ;;  %v452_v22 = vmul.f32 %v1346_v18, %v1705_v17  ;;  %v1377_v5 = vld [vmem:[%s1960_s7 + $0xc0] sm:$0xff]  ;;  %v1358_v36 = vld [vmem:[%s1960_s7 + $0x48] sm:$0xff]  ;;  %v1360_v42 = vld [vmem:[%s1960_s7 + $0x58] sm:$0xff] }
  0x12   : > { %v604_v14 = vld [vmem:[%s1960_s7] sm:$0xff]  ;;  %v1388_v45 = vld [vmem:[%s1960_s7 + $0x108] sm:$0xff] }
  0x13   : > { %v460_v27 = vadd.f32 %v1347_v24, %v451_v21  ;;  %v461_v28 = vadd.f32 %v1347_v24, %v452_v22  ;;  %1463 = vmatpush3.bf16.msra.mxu1 %v638_v47  ;;  %v1380_v21 = vld [vmem:[%s1960_s7 + $0xd8] sm:$0xff] }
  0x14   : > { %1447 = vmatpush3.bf16.msra.mxu0 %v484_v12  ;;  %1468 = vmatprep.subr.bf16.mxu1 %v1576_v3 }
  0x15   : > { %1448 = vmatprep.subr.bf16.mxu0 %v1576_v3  ;;  %v462_v32 = vmax.f32 %v460_v27, 0.0  ;;  %v463_v33 = vmax.f32 %v461_v28, 0.0 }
  0x17   : > { %v480_v35 = vpack.c.bf16 %v463_v33, %v462_v32  ;;  %v1012_v32 = vpack.c.bf16 %v1380_v21, %v1379_v20  ;;  %v1357_v33 = vld [vmem:[%s1960_s7 + $0x40] sm:$0xff]  ;;  %v1384_v20 = vld [vmem:[%s1960_s7 + $0xf0] sm:$0xff]  ;;  %v1385_v21 = vld [vmem:[%s1960_s7 + $0xf8] sm:$0xff] }
  0x18   : > { %1449 = vmatpush3.bf16.msra.mxu0 %v485_v15  ;;  %v605_v15 = vld [vmem:[%s1960_s7 + $0x8] sm:$0xff]  ;;  %v746_v41 = vpack.c.bf16 %v1358_v36, %v1357_v33 }
  0x19   : > { %1450 = vmatprep.subr.bf16.mxu0 %v1576_v3  ;;  %v617_v28 = vpack.c.bf16 %v605_v15, %v604_v14  ;;  %v1383_v14 = vld [vmem:[%s1960_s7 + $0xe8] sm:$0xff] }
  0x1c   : > { %1451 = vmatpush3.bf16.msra.mxu0 %v486_v23  ;;  %v1011_v23 = vpack.c.bf16 %v1378_v6, %v1377_v5  ;;  %v1373_v5 = vld [vmem:[%s1960_s7 + $0xa8] sm:$0xff] }
  0x1d   : > { %1452 = vmatprep.subr.bf16.mxu0 %v1576_v3 }
  0x20   : > { %1453 = vmatpush3.bf16.msra.mxu0 %v487_v29 }
  0x21   : > { %1454 = vmatprep.subr.bf16.mxu0 %v1576_v3 }
  0x24   : > { %1455 = vmatpush3.bf16.msra.mxu0 %v488_v34 }
  0x25   : > { %1492 = vmatprep.subr.bf16.mxu0 %v1576_v3 }
  0x27   : > { %1457 = vmatmul.mubr.bf16.vlgmr.msra.gmra.mrb[0].mxu0 %v480_v35  ;;  %v618_v35 = vpack.c.bf16 %v607_v31, %v606_v26  ;;  %v1220_v26 = vld [vmem:[%s1964_s11] sm:$0xff] }
  0x28   : > { %1496 = vmatprep.mubr.msk.bf16.mxu0 %vm1577_vm0, %v1576_v3  ;;  %1493 = vmatpush3.bf16.msra.mxu0 %v878_v38 }
  0x29   : > { %1494 = vmatprep.subr.bf16.mxu0 %v1576_v3 }
  0x2c   : > { %1495 = vmatpush3.bf16.msra.mxu0 %v879_v44  ;;  %v1387_v44 = vld [vmem:[%s1960_s7 + $0x100] sm:$0xff] }
  0x2d   : > { %1508 = vmatprep.subr.bf16.mxu0 %v1576_v3 }
  0xfa   : > { %v530_v49 = vpop.f32.mrb[0].mxu0 }
  0xfb   : > { %v531_v51 = vadd.f32 %v1348_v48, %v530_v49  ;;  %v1458_v52 = vpop.f32.mrb[1].mxu0  ;;  %v747_v49 = vpack.c.bf16 %v1360_v42, %v1359_v40 }
  0xfc   : > { %v533_v54 = vpop.f32.mrb[2].mxu0  ;;  %v1389_v52 = vld [vmem:[%s1960_s7 + $0x110] sm:$0xff] }
  0xfd   : > { %v544_v55 = vmul.f32 %v1349_v50, %v531_v51  ;;  %v534_v56 = vadd.f32 %v1348_v48, %v533_v54  ;;  %v1459_v57 = vpop.f32.mrb[3].mxu0  ;;  %v1362_v48 = vld [vmem:[%s1960_s7 + $0x60] sm:$0xff]  ;;  %v1363_v51 = vld [vmem:[%s1960_s7 + $0x68] sm:$0xff] }
  0xfe   : > { %v812_v57 = vpack.c.bf16 %v1363_v51, %v1362_v48 }
  0xff   : > { %v553_v58 = vadd.f32 %v1350_v53, %v544_v55  ;;  %v545_v59 = vmul.f32 %v1349_v50, %v534_v56  ;;  %v1143_v50 = vpack.c.bf16 %v1388_v45, %v1387_v44  ;;  %v1390_v55 = vld [vmem:[%s1960_s7 + $0x118] sm:$0xff] }
 0x101   : > { %v555_v60 = vmax.f32 %v553_v58, 0.0  ;;  %v554_v61 = vadd.f32 %v1350_v53, %v545_v59  ;;  %v1144_v58 = vpack.c.bf16 %v1390_v55, %v1389_v52 }
 0x103   : > { %v559_v62 = vcombine.high %v555_v60, %v555_v60  ;;  %565 = vst.msk [vmem:[#allocation2 + $0x9] sm:$0xf] %vm564_vm1, %v555_v60  ;;  %v556_v63 = vmax.f32 %v554_v61, 0.0  ;;  %v1364_v60 = vld [vmem:[%s1960_s7 + $0x70] sm:$0xff]  ;;  %v1365_v61 = vld [vmem:[%s1960_s7 + $0x78] sm:$0xff] }
 0x105   : > { %566 = vst.msk [vmem:[#allocation2 + $0x11] sm:$0xf] %vm564_vm1, %v559_v62  ;;  %v560_v0 = vcombine.high %v556_v63, %v556_v63  ;;  %567 = vst.msk [vmem:[#allocation2 + $0x19] sm:$0xf] %vm564_vm1, %v556_v63 }
 0x107   : > { %568 = vst.msk [vmem:[#allocation2 + $0x21] sm:$0xf] %vm564_vm1, %v560_v0  ;;  %v813_v0 = vpack.c.bf16 %v1365_v61, %v1364_v60 }
 0x10a   : > { %v569_v1 = vld [vmem:[#allocation2 + $0x9] sm:$0xf] }
 0x10b   : > { %v576_v2 = vld [vmem:[#allocation2 + $0x9] sm:$0x1]  ;;  %v589_v4 = vld [vmem:[#allocation2 + $0xc] sm:$0x1]  ;;  %570 = vst.msk [vmem:[#allocation2 + $0x1] sm:$0xf] %vm564_vm1, %v569_v1 }
 0x10c   : > { %583 = vst.msk [vmem:[#allocation2 + $0x8] sm:$0x1] %vm581_vm2, %v576_v2  ;;  %595 = vst.msk [vmem:[#allocation2 + $0xd] sm:$0x1] %vm581_vm2, %v589_v4  ;;  %v577_v7 = vld [vmem:[#allocation2 + $0x11] sm:$0x1] }
 0x10d   : > { %v590_v8 = vld [vmem:[#allocation2 + $0x14] sm:$0x1]  ;;  %v578_v9 = vld [vmem:[#allocation2 + $0x19] sm:$0x1]  ;;  %584 = vst.msk [vmem:[#allocation2 + $0x10] sm:$0x1] %vm581_vm2, %v577_v7 }
 0x10e   : > { %596 = vst.msk [vmem:[#allocation2 + $0x15] sm:$0x1] %vm581_vm2, %v590_v8  ;;  %585 = vst.msk [vmem:[#allocation2 + $0x18] sm:$0x1] %vm581_vm2, %v578_v9  ;;  %v591_v10 = vld [vmem:[#allocation2 + $0x1c] sm:$0x1] }
 0x10f   : > { %v572_v11 = vld [vmem:[#allocation2 + $0x21] sm:$0xf]  ;;  %597 = vst.msk [vmem:[#allocation2 + $0x1d] sm:$0x1] %vm581_vm2, %v591_v10  ;;  %v1550_v18 = vld [vmem:[#allocation2 + $0x9] ss:$8 sps:$4 sm:$0xff]  }
 0x110   : > { %v579_v12 = vld [vmem:[#allocation2 + $0x21] sm:$0x1]  ;;  %v592_v13 = vld [vmem:[#allocation2 + $0x24] sm:$0x1]  ;;  %574 = vst.msk [vmem:[#allocation2 + $0x29] sm:$0xf] %vm564_vm1, %v572_v11 }
 0x111   : > { %586 = vst.msk [vmem:[#allocation2 + $0x20] sm:$0x1] %vm581_vm2, %v579_v12  ;;  %598 = vst.msk [vmem:[#allocation2 + $0x25] sm:$0x1] %vm581_vm2, %v592_v13  ;;  %v1551_v19 = vld [vmem:[#allocation2 + $0x19] ss:$8 sps:$4 sm:$0xff]  }
 0x112   : > { %v1553_v22 = vld [vmem:[#allocation2 + $0x11] ss:$8 sps:$4 sm:$0xff]   ;;  %v877_v24 = vpack.c.bf16 %v1551_v19, %v1550_v18  ;;  %v1552_v25 = vld [vmem:[#allocation2 + $0x1] ss:$8 sps:$4 sm:$0xff]  }
 0x113   : > { %v575_v27 = vld [vmem:[#allocation2 + $0x1] sm:$0x1]  ;;  %v588_v29 = vld [vmem:[#allocation2 + $0x4] sm:$0x1]  ;;  %v636_v30 = vpack.c.bf16 %v1553_v22, %v1552_v25  ;;  %v1374_v9 = vld [vmem:[%s1960_s7 + $0xb0] sm:$0xff]  ;;  %v1078_v22 = vpack.c.bf16 %v1385_v21, %v1384_v20 }
 0x114   : > { %1497 = vmatmul.mubr.msk.bf16.vlgmr.msra.gmra.mrb[4].mxu0 %vm639_vm3, %v877_v24  ;;  %582 = vst.msk [vmem:[#allocation2] sm:$0x1] %vm581_vm2, %v575_v27  ;;  %594 = vst.msk [vmem:[#allocation2 + $0x5] sm:$0x1] %vm581_vm2, %v588_v29  ;;  %v1372_v4 = vld [vmem:[%s1960_s7 + $0xa0] sm:$0xff]  ;;  %v1375_v10 = vld [vmem:[%s1960_s7 + $0xb8] sm:$0xff] }
 0x115   : > { %1509 = vmatpush3.bf16.msra.mxu0 %v1011_v23  ;;  %1512 = vmatprep.mubr.msk.bf16.mxu0 %vm1577_vm0, %v1576_v3  ;;  %v1555_v38 = vld [vmem:[#allocation2 + $0x10] ss:$8 sps:$4 sm:$0xff]   ;;  %v944_v7 = vpack.c.bf16 %v1373_v5, %v1372_v4  ;;  %v945_v11 = vpack.c.bf16 %v1375_v10, %v1374_v9  ;;  %v1382_v13 = vld [vmem:[%s1960_s7 + $0xe0] sm:$0xff]  ;;  %v1221_v27 = vld [vmem:[%s1964_s11 + $0x8] sm:$0xff] }
 0x116   : > { %1510 = vmatprep.subr.bf16.mxu0 %v1576_v3  ;;  %1465 = vmatmul.mubr.msk.bf16.vlgmr.msra.gmra.mrb[0].mxu1 %vm639_vm3, %v636_v30  ;;  %v1556_v46 = vld [vmem:[#allocation2 + $0x10] ss:$8 sps:$4 sm:$0xff]   ;;  %v1077_v18 = vpack.c.bf16 %v1383_v14, %v1382_v13  ;;  %v1225_v29 = vpack.c.bf16 %v1221_v27, %v1220_v26 }
 0x117   : > { %v580_v34 = vld [vmem:[#allocation2 + $0x29] sm:$0x1]  ;;  %1469 = vmatpush3.bf16.msra.mxu1 %v617_v28  ;;  %1472 = vmatprep.mubr.msk.bf16.mxu1 %vm1577_vm0, %v1576_v3  ;;  %v593_v37 = vld [vmem:[#allocation2 + $0x2c] sm:$0x1]  ;;  %v1559_v56 = vld [vmem:[#allocation2 + $0x12] ss:$8 sps:$4 sm:$0xff]  }
 0x118   : > { %587 = vst.msk [vmem:[#allocation2 + $0x28] sm:$0x1] %vm581_vm2, %v580_v34  ;;  %1470 = vmatprep.subr.bf16.mxu1 %v1576_v3  ;;  %599 = vst.msk [vmem:[#allocation2 + $0x2d] sm:$0x1] %vm581_vm2, %v593_v37  ;;  %v1560_v63 = vld [vmem:[#allocation2 + $0x12] ss:$8 sps:$4 sm:$0xff]  }
 0x119   : > { %1511 = vmatpush3.bf16.msra.mxu0 %v1012_v32  ;;  %v1563_v2 = vld [vmem:[#allocation2 + $0x18] ss:$8 sps:$4 sm:$0xff]   ;;  %v1562_v6 = vld [vmem:[#allocation2 + $0x8] ss:$8 sps:$4 sm:$0xff]  }
 0x11a   : > { %1524 = vmatprep.subr.bf16.mxu0 %v1576_v3  ;;  %v811_v8 = vpack.c.bf16 %v1563_v2, %v1562_v6  ;;  %v1565_v12 = vld [vmem:[#allocation2 + $0x1a] ss:$8 sps:$4 sm:$0xff]   ;;  %v1564_v15 = vld [vmem:[#allocation2 + $0xa] ss:$8 sps:$4 sm:$0xff]  }
 0x11b   : > { %v1554_v39 = vld [vmem:[#allocation2] ss:$8 sps:$4 sm:$0xff]   ;;  %1471 = vmatpush3.bf16.msra.mxu1 %v618_v35  ;;  %v943_v19 = vpack.c.bf16 %v1565_v12, %v1564_v15  ;;  %v1566_v24 = vld [vmem:[#allocation2 + $0x11] ss:$8 sps:$4 sm:$0xff]  }
 0x11c   : > { %1476 = vmatprep.subr.bf16.mxu1 %v1576_v3  ;;  %v616_v43 = vpack.c.bf16 %v1555_v38, %v1554_v39  ;;  %v1558_v54 = vld [vmem:[#allocation2 + $0x2] ss:$8 sps:$4 sm:$0xff]   ;;  %v1222_v28 = vld [vmem:[%s1964_s11 + $0x10] sm:$0xff]  ;;  %v1223_v30 = vld [vmem:[%s1964_s11 + $0x18] sm:$0xff] }
 0x11d   : > { %v745_v59 = vpack.c.bf16 %v1559_v56, %v1558_v54  ;;  %v1567_v23 = vld [vmem:[#allocation2 + $0x21] ss:$8 sps:$4 sm:$0xff]   ;;  %v1226_v31 = vpack.c.bf16 %v1223_v30, %v1222_v28  ;;  %v1392_v15 = vld [vmem:[%s1961_s8] ss:$0 sm:$0xff] }
 0x11e   : > { %1473 = vmatmul.mubr.msk.bf16.vlgmr.msra.gmra.mrb[4].mxu1 %vm639_vm3, %v616_v43  ;;  %v1076_v25 = vpack.c.bf16 %v1567_v23, %v1566_v24 }
 0x11f   : > { %v1557_v47 = vld [vmem:[#allocation2 + $0x20] ss:$8 sps:$4 sm:$0xff]   ;;  %1477 = vmatpush3.bf16.msra.mxu1 %v746_v41  ;;  %1480 = vmatprep.mubr.msk.bf16.mxu1 %vm1577_vm0, %v1576_v3 }
 0x120   : > { %1478 = vmatprep.subr.bf16.mxu1 %v1576_v3  ;;  %v1010_v53 = vpack.c.bf16 %v1557_v47, %v1556_v46  ;;  %v1561_v62 = vld [vmem:[#allocation2 + $0x22] ss:$8 sps:$4 sm:$0xff]  }
 0x121   : > { %v1142_v1 = vpack.c.bf16 %v1561_v62, %v1560_v63 }
 0x122   : > { %1513 = vmatmul.mubr.msk.bf16.vlgmr.msra.gmra.mrb[8].mxu0 %vm639_vm3, %v1010_v53 }
 0x123   : > { %1479 = vmatpush3.bf16.msra.mxu1 %v747_v49  ;;  %1525 = vmatpush3.bf16.msra.mxu0 %v1143_v50 }
 0x124   : > { %1484 = vmatprep.subr.bf16.mxu1 %v1576_v3  ;;  %1526 = vmatprep.subr.bf16.mxu0 %v1576_v3 }
 0x125   : > { %1528 = vmatprep.mubr.msk.bf16.mxu0 %vm1577_vm0, %v1576_v3 }
 0x126   : > { %1481 = vmatmul.mubr.msk.bf16.vlgmr.msra.gmra.mrb[8].mxu1 %vm639_vm3, %v745_v59 }
 0x127   : > { %1485 = vmatpush3.bf16.msra.mxu1 %v812_v57  ;;  %1527 = vmatpush3.bf16.msra.mxu0 %v1144_v58 }
 0x128   : > { %1486 = vmatprep.subr.bf16.mxu1 %v1576_v3  ;;  %1488 = vmatprep.mubr.msk.bf16.mxu1 %vm1577_vm0, %v1576_v3 }
 0x12a   : > { %1529 = vmatmul.mubr.msk.bf16.vlgmr.msra.gmra.mrb[12].mxu0 %vm639_vm3, %v1142_v1 }
 0x12b   : > { %1487 = vmatpush3.bf16.msra.mxu1 %v813_v0 }
 0x12c   : > { %1500 = vmatprep.subr.bf16.mxu1 %v1576_v3 }
 0x12e   : > { %1489 = vmatmul.mubr.msk.bf16.vlgmr.msra.gmra.mrb[12].mxu1 %vm639_vm3, %v811_v8 }
 0x12f   : > { %1501 = vmatpush3.bf16.msra.mxu1 %v944_v7  ;;  %1504 = vmatprep.mubr.msk.bf16.mxu1 %vm1577_vm0, %v1576_v3 }
 0x130   : > { %1502 = vmatprep.subr.bf16.mxu1 %v1576_v3 }
 0x133   : > { %1503 = vmatpush3.bf16.msra.mxu1 %v945_v11 }
 0x134   : > { %1516 = vmatprep.subr.bf16.mxu1 %v1576_v3 }
 0x136   : > { %1505 = vmatmul.mubr.msk.bf16.vlgmr.msra.gmra.mrb[16].mxu1 %vm639_vm3, %v943_v19 }
 0x137   : > { %1517 = vmatpush3.bf16.msra.mxu1 %v1077_v18  ;;  %1520 = vmatprep.mubr.msk.bf16.mxu1 %vm1577_vm0, %v1576_v3 }
 0x138   : > { %1518 = vmatprep.subr.bf16.mxu1 %v1576_v3 }
 0x13b   : > { %1519 = vmatpush3.bf16.msra.mxu1 %v1078_v22  ;;  %v1393_v22 = vld [vmem:[%s1962_s9] ss:$0 sm:$0xff] }
 0x13c   : > { %1532 = vmatprep.subr.bf16.mxu1 %v1576_v3 }
 0x13e   : > { %1521 = vmatmul.mubr.msk.bf16.vlgmr.msra.gmra.mrb[20].mxu1 %vm639_vm3, %v1076_v25  ;;  %v1394_v25 = vld [vmem:[%s1963_s10] ss:$0 sm:$0xff] }
 0x13f   : > { %1536 = vmatprep.mubr.msk.bf16.mxu1 %vm1577_vm0, %v1576_v3  ;;  %1533 = vmatpush3.bf16.msra.mxu1 %v1225_v29 }
 0x140   : > { %1534 = vmatprep.subr.bf16.mxu1 %v1576_v3 }
 0x143   : > { %1535 = vmatpush3.bf16.msra.mxu1 %v1226_v31 }
 0x1e7   : > { %v917_v32 = vpop.f32.mrb[4].mxu0 }
 0x1e8   : > { %v1498_v33 = vpop.f32.mrb[5].mxu0 }
 0x1e9   : > { %v920_v34 = vpop.f32.mrb[6].mxu0  ;;  %v677_v36 = vpop.f32.mrb[0].mxu1 }
 0x1ea   : > { %v1499_v35 = vpop.f32.mrb[7].mxu0  ;;  %v1466_v37 = vpop.f32.mrb[1].mxu1 }
 0x1eb   : > { %v680_v38 = vpop.f32.mrb[2].mxu1 }
 0x1ec   : > { %v1467_v39 = vpop.f32.mrb[3].mxu1 }
 0x1f1   : > { %v721_v40 = vpop.f32.mrb[4].mxu1 }
 0x1f2   : > { %v722_v41 = vadd.f32 %v721_v40, %v677_v36  ;;  %v1474_v42 = vpop.f32.mrb[5].mxu1 }
 0x1f3   : > { %v724_v43 = vpop.f32.mrb[6].mxu1 }
 0x1f4   : > { %v725_v44 = vadd.f32 %v724_v43, %v680_v38  ;;  %v1475_v45 = vpop.f32.mrb[7].mxu1 }
 0x1f5   : > { %v1050_v46 = vpop.f32.mrb[8].mxu0 }
 0x1f6   : > { %v1514_v47 = vpop.f32.mrb[9].mxu0 }
 0x1f7   : > { %v1053_v48 = vpop.f32.mrb[10].mxu0 }
 0x1f8   : > { %v1515_v49 = vpop.f32.mrb[11].mxu0 }
 0x1f9   : > { %v785_v3 = vpop.f32.mrb[8].mxu1 }
 0x1fa   : > { %v792_v50 = vadd.f32 %v785_v3, %v722_v41  ;;  %v1482_v51 = vpop.f32.mrb[9].mxu1 }
 0x1fb   : > { %v788_v52 = vpop.f32.mrb[10].mxu1 }
 0x1fc   : > { %v793_v53 = vadd.f32 %v788_v52, %v725_v44  ;;  %v1483_v54 = vpop.f32.mrb[11].mxu1 }
 0x1fd   : > { %v1182_v55 = vpop.f32.mrb[12].mxu0 }
 0x1fe   : > { %v1530_v56 = vpop.f32.mrb[13].mxu0 }
 0x1ff   : > { %v1185_v57 = vpop.f32.mrb[14].mxu0 }
 0x200   : > { %v1531_v58 = vpop.f32.mrb[15].mxu0 }
 0x201   : > { %v851_v59 = vpop.f32.mrb[12].mxu1 }
 0x202   : > { %v858_v60 = vadd.f32 %v851_v59, %v792_v50  ;;  %v1490_v61 = vpop.f32.mrb[13].mxu1 }
 0x203   : > { %v854_v62 = vpop.f32.mrb[14].mxu1 }
 0x204   : > { %v859_v63 = vadd.f32 %v854_v62, %v793_v53  ;;  %v1491_v0 = vpop.f32.mrb[15].mxu1  ;;  %v924_v1 = vadd.f32 %v917_v32, %v858_v60 }
 0x206   : > { %v925_v2 = vadd.f32 %v920_v34, %v859_v63  ;;  %v1395_v34 = vld [vmem:[%s1965_s12] ss:$0 sm:$0xff] }
 0x209   : > { %v983_v4 = vpop.f32.mrb[16].mxu1 }
 0x20a   : > { %v990_v5 = vadd.f32 %v983_v4, %v924_v1  ;;  %v1506_v6 = vpop.f32.mrb[17].mxu1 }
 0x20b   : > { %v986_v7 = vpop.f32.mrb[18].mxu1 }
 0x20c   : > { %v991_v8 = vadd.f32 %v986_v7, %v925_v2  ;;  %v1507_v9 = vpop.f32.mrb[19].mxu1  ;;  %v1057_v10 = vadd.f32 %v1050_v46, %v990_v5 }
 0x20e   : > { %v1058_v11 = vadd.f32 %v1053_v48, %v991_v8 }
 0x211   : > { %v1116_v12 = vpop.f32.mrb[20].mxu1 }
 0x212   : > { %v1123_v13 = vadd.f32 %v1116_v12, %v1057_v10  ;;  %v1522_v14 = vpop.f32.mrb[21].mxu1 }
 0x213   : > { %v1119_v18 = vpop.f32.mrb[22].mxu1 }
 0x214   : > { %v1189_v19 = vadd.f32 %v1182_v55, %v1123_v13  ;;  %v1124_v20 = vadd.f32 %v1119_v18, %v1058_v11  ;;  %v1523_v21 = vpop.f32.mrb[23].mxu1 }
 0x216   : > { %v1198_v23 = vadd.f32 %v1392_v15, %v1189_v19  ;;  %v1190_v24 = vadd.f32 %v1185_v57, %v1124_v20 }
 0x218   : > { %v1207_v26 = vmul.f32 %v1393_v22, %v1198_v23  ;;  %v1199_v27 = vadd.f32 %v1392_v15, %v1190_v24 }
 0x21a   : > { %v1216_v28 = vadd.f32 %v1394_v25, %v1207_v26  ;;  %v1208_v29 = vmul.f32 %v1393_v22, %v1199_v27 }
 0x21c   : > { %v1217_v30 = vadd.f32 %v1394_v25, %v1208_v29  ;;  %v1218_v31 = vmax.f32 %v1216_v28, 0.0 }
 0x21e   : > { %v1219_v32 = vmax.f32 %v1217_v30, 0.0 }
 0x220   : > { %v1224_v33 = vpack.c.bf16 %v1219_v32, %v1218_v31 }
 0x222   : > { %1537 = vmatmul.mubr.msk.bf16.vlgmr.msra.gmra.mrb[24].mxu1 %vm639_vm3, %v1224_v33 }
 0x2f5   : > { %v1271_v35 = vpop.f32.mrb[24].mxu1 }
 0x2f6   : > { %v1272_v36 = vadd.f32 %v1395_v34, %v1271_v35  ;;  %v1538_v37 = vpop.f32.mrb[25].mxu1 }
 0x2f7   : > { %v1274_v38 = vpop.f32.mrb[26].mxu1 }
 0x2f8   : > { %v1278_v39 = vadd.f32 %v1272_v36, %v1703_v16  ;;  %v1275_v40 = vadd.f32 %v1395_v34, %v1274_v38  ;;  %v1539_v41 = vpop.f32.mrb[27].mxu1 }
 0x2fa   : > { %1280 = vst [vmem:[%s440_s19] sm:$0xff] %v1278_v39  ;;  %v1279_v42 = vadd.f32 %v1275_v40, %v1705_v17 }
 0x2fc   : > { %1281 = vst [vmem:[%s440_s19 + $0x8] sm:$0xff] %v1279_v42 }
 0x2fd PF: > { %s23_s25 = sadd.s32 1, %s1574_s25  }
 0x2fe   : > { %p20_p4 = scmp.ge.s32.totalorder %s23_s25, 4  }
 0x300   :  { %22 = sbr.rel (!%p20_p4) target bundleno = 1 (0x1), region = 114 }

// kernel: _lambda_.6
= control target key start
LH: loop header
LB: loop body
LE: loop exit
PB: predicated region body
PF: predicated region fallthrough
CT: control target
= control target key end

     0   :  { %s2883_s0 = inlined_call_operand.hbm [shape: f32[2,64,16], index: 0, kind: input, shape index: {}]   ;;  %s2884_s1 = inlined_call_operand.vmem [shape: f32[1,16], index: 1, kind: input, shape index: {}]   ;;  %s2885_s2 = inlined_call_operand.vmem [shape: f32[1,16], index: 2, kind: input, shape index: {}]   ;;  %s2886_s3 = inlined_call_operand.vmem [shape: f32[16,16], index: 3, kind: input, shape index: {}]   ;;  %s2887_s4 = inlined_call_operand.vmem [shape: f32[1,16], index: 4, kind: input, shape index: {}]   ;;  %s2888_s5 = inlined_call_operand.vmem [shape: f32[1,16], index: 5, kind: input, shape index: {}]   ;;  %s2889_s6 = inlined_call_operand.vmem [shape: f32[1,16], index: 6, kind: input, shape index: {}]   ;;  %s2890_s7 = inlined_call_operand.vmem [shape: f32[3,3,16,16], index: 7, kind: input, shape index: {}]   ;;  %s2891_s8 = inlined_call_operand.vmem [shape: f32[1,16], index: 8, kind: input, shape index: {}]   ;;  %s2892_s9 = inlined_call_operand.vmem [shape: f32[1,16], index: 9, kind: input, shape index: {}]   ;;  %s2893_s10 = inlined_call_operand.vmem [shape: f32[1,16], index: 10, kind: input, shape index: {}]   ;;  %s2894_s11 = inlined_call_operand.vmem [shape: f32[16,64], index: 11, kind: input, shape index: {}]   ;;  %s2895_s12 = inlined_call_operand.vmem [shape: f32[1,64], index: 12, kind: input, shape index: {}]   ;;  %s2896_s13 = inlined_call_operand.vmem [shape: f32[16,64], index: 13, kind: input, shape index: {}]   ;;  %s2897_s14 = inlined_call_operand.vmem [shape: f32[1,64], index: 14, kind: input, shape index: {}]   ;;  %s2898_s15 = inlined_call_operand.vmem [shape: f32[2,64,64], index: 15, kind: output, shape index: {}]  }
   0x1   :  { %2902 = sst [smem:[#allocation9_spill]] %s2883_s0 }
   0x2   :  { %20 = vsyncpa [#allocation4], 0 }
   0x3   :  { %22 = vsyncpa [#allocation4 + $0x1], 0  ;;  %s2506_s18 = smov 0   ;;  %s2508_s19 = smov 0  }
   0x4   :  { %s2510_s20 = smov 0   ;;  %s2512_s21 = smov 0  }
   0x5 LB: > { %2903 = sst [smem:[#allocation6_spill]] %s2417_s20  ;;  %s2525_s22 = sadd.s32 4294967295, %s2421_s21   ;;  %s2421_s21 = sphi %s2512_s21, %s2910_s21   ;;  %s2417_s20 = sphi %s2510_s20, %s2912_s20   ;;  %s2413_s19 = sphi %s2508_s19, %s2914_s19   ;;  %s2409_s18 = sphi %s2506_s18, %s2913_s18  }
   0x6   : > { %s2528_s23 = sadd.s32 1, %s2421_s21   ;;  %s35_s25 = sadd.s32 1, %s2417_s20 }
   0x7   : > { %2904 = sst [smem:[#allocation7_spill]] %s2528_s23  ;;  %s32_s24 = ssub.s32 %s2421_s21, %s2528_s23 }
   0x8   : > { %p33_p0 = scmp.eq.s32.totalorder %s32_s24, 0  ;;  %p42_p1 = scmp.ne.s32.totalorder %s2417_s20, %s2413_s19 }
   0x9   : > { %p43_p2 = scmp.eq.s32.totalorder %s2421_s21, 0  ;;  %p48_p3 = scmp.ne.s32.totalorder %s2413_s19, %s2409_s18 }
   0xa   : > { %s2538_s26 = scalar_select %p33_p0, %s2417_s20, %s35_s25  }
   0xb   : > { %p44_p4 = por %p43_p2, %p42_p1  ;;  %p49_p5 = scmp.eq.s32.totalorder %s2525_s22, 0 }
   0xc   : > { %2905 = sst [smem:[#allocation8_spill]] %s2538_s26  ;;  %p2322_p6 = scmp.lt.s32.totalorder %s2421_s21, 2 }
   0xd   : > { %p2542_p7 = por %p49_p5, %p48_p3  ;;  %s434_s28 = sand.u32 1, %s2417_s20  }
   0xe   : > { %s1971_s29 = sshll.u32 %s434_s28, 6  ;;  %s2054_s30 = sshll.u32 %s2421_s21, 10 }
   0xf   : > { %s2907_s0 = sld [smem:[#allocation9_spill]]  ;;  %s438_s18 = scalar_lea.vmem [#allocation3], %s1971_s29 }
  0x10   : > { %s445_s25 = sshll.u32 %s438_s18, 4  ;;  %p2555_p8 = pnand %p2322_p6, %p44_p4  ;;  %s2553_s25 = int_to_ptr.vmem [resolvable:$true] %s445_s25 }
  0x11   : > { %s2560_s20 = scalar_lea.sflag [#allocation4], %s434_s28 }
  0x12   : > { %p2359_p11 = pneg %p2555_p8 }
  0x15   : > { %s2551_s24 = scalar_lea.hbm %s2907_s0, %s2054_s30  ;;  %s2362_s17 = scalar_lea.hbm %s2907_s0, 2048 }
  0x16   : > { %s2357_s16 = scalar_lea.hbm %s2551_s24, 1024  ;;  %p2363_p0 = scmp.lt.u32.totalorder %s2551_s24, %s2907_s0 }
  0x17   : > { %p2358_p10 = scmp.ne.s32.totalorder %s2551_s24, %s2357_s16  ;;  %p2364_p1 = scmp.lt.u32.totalorder %s2362_s17, %s2357_s16 }
  0x18   : > { %p2366_p3 = scmp.lt.u32.totalorder %s2357_s16, %s2551_s24 }
  0x19   : > { %p2360_p12 = pnand %p2359_p11, %p2358_p10  ;;  %p2365_p2 = por %p2364_p1, %p2363_p0 }
  0x1b   : > { %p2361_p13 = pneg %p2360_p12  ;;  %p2367_p4 = por %p2366_p3, %p2365_p2 }
  0x1d   : > { %p2368_p5 = pnand %p2367_p4, %p2361_p13 }
  0x1f   : > { %2371 = shalt.err (!%p2368_p5)
}
  0x20   : > { %s2372_s28 = scalar_lea.vmem %s2553_s25, 1024  ;;  %s2423_s29 = smov [#allocation3]  }
  0x21   : > { %p2373_p6 = scmp.ne.s32.totalorder %s2553_s25, %s2372_s28  ;;  %s2377_s30 = sshll.u32 %s2423_s29, 4  ;;  %s2378_s30 = int_to_ptr.vmem [resolvable:$false] %s2377_s30 }
  0x22   : > { %s2379_s23 = scalar_lea.vmem %s2378_s30, 2048  ;;  %p2380_p9 = scmp.lt.s32.totalorder %s2553_s25, %s2378_s30 }
  0x23   : > { %p2375_p10 = pnand %p2373_p6, %p2359_p11  ;;  %p2381_p0 = scmp.lt.s32.totalorder %s2379_s23, %s2372_s28 }
  0x25   : > { %p2376_p12 = pneg %p2375_p10  ;;  %p2382_p1 = por %p2381_p0, %p2380_p9 }
  0x27   : > { %p2383_p2 = pnand %p2382_p1, %p2376_p12 }
  0x29   : > { %2386 = shalt.err (!%p2383_p2)
}
  0x2a   : > { %s2424_s16 = smov 128   ;;  %s2425_s17 = smov 8  }
  0x2b   : > { %2321 = dma.hbm_to_vmem [thread:$0]  (!%p2555_p8), %s2551_s24, 1024, %s2553_s25, %s2560_s20, %s2424_s16, %s2424_s16, %s2425_s17  }
  0x2c   : > { %p453_p11 = scmp.lt.s32.totalorder %s2421_s21, 3  ;;  %p2909_p13 = scmp.ge.s32.totalorder %s2421_s21, 1 }
  0x2e   : > { %p454_p3 = pnand %p2909_p13, %p453_p11 }
  0x2f   : > { %s459_s18 = sand.u32 (!%p454_p3), 1, %s2413_s19  }
  0x30   : > { %457 = sbr.rel (%p454_p3) target bundleno = 866 (0x362), region = 80  ;;  %s1975_s28 = sshll.u32 (!%p454_p3), %s459_s18, 6 }
  0x31   : > { %s460_s29 = scalar_lea.sflag (!%p454_p3), [#allocation4], %s459_s18  ;;  %s463_s30 = scalar_lea.vmem (!%p454_p3), [#allocation3], %s1975_s28 }
  0x37   : > { %2404 = dma.done.wait (%p2542_p7), %s460_s29, 1024  }
  0x38   : > { %2406 = vsyncadd (%p2542_p7), %s460_s29, 4294966272  ;;  %v562_v0 = vld [vmem:[%s2886_s3] sm:$0xff]  ;;  %v563_v1 = vld [vmem:[%s2886_s3 + $0x8] sm:$0xff]  ;;  %vm576_vm0 = vcmask 130048   ;;  %vm717_vm1 = vcmask 122880   ;;  %p510_p7 = scmp.lt.s32.totalorder %s2525_s22, 1 }
  0x39   : > { %v2602_v2 = vld [vmem:[%s463_s30] sm:$0xff]  ;;  %v568_v3 = vpack.c.bf16 %v563_v1, %v562_v0  ;;  %v2604_v4 = vld [vmem:[%s463_s30 + $0x8] sm:$0xff]  ;;  %v2614_v9 = vld [vmem:[%s463_s30 + $0x10] sm:$0xff]  ;;  %vm1892_vm2 = vcmask 523264  }
  0x3a   : > { %v1978_v5 = vld [vmem:[%s2884_s1] ss:$0 sm:$0xff]  ;;  %v2616_v10 = vld [vmem:[%s463_s30 + $0x18] sm:$0xff]  ;;  %v2624_v15 = vld [vmem:[%s463_s30 + $0x28] sm:$0xff]  ;;  %s2916_s22 = smov (!%p510_p7, %s2525_s22), 1 }
  0x3b   : > { %v1979_v6 = vld [vmem:[%s2885_s2] ss:$0 sm:$0xff]  ;;  %v531_v7 = vmul.f32 %v1978_v5, %v2602_v2  ;;  %v532_v8 = vmul.f32 %v1978_v5, %v2604_v4  ;;  %2116 = vmatprep.subr.bf16.mxu0 %v568_v3  ;;  %v533_v12 = vmul.f32 %v1978_v5, %v2614_v9  ;;  %v534_v13 = vmul.f32 %v1978_v5, %v2616_v10  ;;  %v2627_v17 = vld [vmem:[%s463_s30 + $0x30] sm:$0xff]  ;;  %v2629_v18 = vld [vmem:[%s463_s30 + $0x38] sm:$0xff]  ;;  %s2055_s17 = sshll.u32 %s2916_s22, 6 }
  0x3c   : > { %v2618_v11 = vld [vmem:[%s463_s30 + $0x20] sm:$0xff]  ;;  %v1788_v14 = vpack.c.bf16 %v2616_v10, %v2614_v9  ;;  %2117 = vmatpush3.bf16.msra.mxu0 %v568_v3  ;;  %v536_v21 = vmul.f32 %v1978_v5, %v2624_v15  ;;  %v537_v22 = vmul.f32 %v1978_v5, %v2627_v17  ;;  %v538_v26 = vmul.f32 %v1978_v5, %v2629_v18  ;;  %v1987_v42 = vld [vmem:[%s2890_s7 + $0x10] sm:$0xff]  ;;  %v1988_v43 = vld [vmem:[%s2890_s7 + $0x18] sm:$0xff]  ;;  %s514_s23 = scalar_lea.vmem %s2898_s15, %s2055_s17 }
  0x3d   : > { %v535_v16 = vmul.f32 %v1978_v5, %v2618_v11  ;;  %v546_v19 = vadd.f32 %v1979_v6, %v531_v7  ;;  %v547_v20 = vadd.f32 %v1979_v6, %v532_v8  ;;  %v548_v23 = vadd.f32 %v1979_v6, %v533_v12  ;;  %v2003_v45 = vld [vmem:[%s2890_s7 + $0x30] sm:$0xff]  ;;  %v2004_v46 = vld [vmem:[%s2890_s7 + $0x38] sm:$0xff]  ;;  %v2009_v48 = vld [vmem:[%s2890_s7 + $0x40] sm:$0xff] }
  0x3e   : > { %v549_v24 = vadd.f32 %v1979_v6, %v534_v13  ;;  %v551_v29 = vadd.f32 %v1979_v6, %v536_v21  ;;  %v552_v30 = vadd.f32 %v1979_v6, %v537_v22  ;;  %v553_v34 = vadd.f32 %v1979_v6, %v538_v26  ;;  %v2010_v49 = vld [vmem:[%s2890_s7 + $0x48] sm:$0xff]  ;;  %v756_v51 = vld [vmem:[%s2890_s7] sm:$0xff] }
  0x3f   : > { %v550_v25 = vadd.f32 %v1979_v6, %v535_v16  ;;  %v554_v27 = vmax.f32 %v546_v19, 0.0  ;;  %v555_v28 = vmax.f32 %v547_v20, 0.0  ;;  %v556_v31 = vmax.f32 %v548_v23, 0.0  ;;  %v757_v52 = vld [vmem:[%s2890_s7 + $0x8] sm:$0xff]  ;;  %v1980_v54 = vld [vmem:[%s2887_s4] ss:$0 sm:$0xff] }
  0x40   : > { %v557_v32 = vmax.f32 %v549_v24, 0.0  ;;  %v559_v36 = vmax.f32 %v551_v29, 0.0  ;;  %v560_v39 = vmax.f32 %v552_v30, 0.0  ;;  %v561_v40 = vmax.f32 %v553_v34, 0.0  ;;  %v1985_v56 = vld [vmem:[%s2888_s5] ss:$0 sm:$0xff] }
  0x41   : > { %v558_v33 = vmax.f32 %v550_v25, 0.0  ;;  %v564_v35 = vpack.c.bf16 %v555_v28, %v554_v27  ;;  %v778_v44 = vpack.c.bf16 %v1988_v43, %v1987_v42  ;;  %v1049_v47 = vpack.c.bf16 %v2004_v46, %v2003_v45  ;;  %v1986_v59 = vld [vmem:[%s2889_s6] ss:$0 sm:$0xff] }
  0x42   : > { %v565_v37 = vpack.c.bf16 %v557_v32, %v556_v31  ;;  %v567_v41 = vpack.c.bf16 %v561_v40, %v560_v39  ;;  %v2656_v50 = vpack.c.bf16 %v2010_v49, %v2009_v48  ;;  %v2665_v53 = vpack.c.bf16 %v757_v52, %v756_v51  ;;  %v1997_v52 = vld [vmem:[%s2890_s7 + $0x20] sm:$0xff] }
  0x43   : > { %2118 = vmatprep.mubr.msk.bf16.mxu0 %vm576_vm0, %v564_v35  ;;  %v566_v38 = vpack.c.bf16 %v559_v36, %v558_v33  ;;  %2126 = vmatprep.subr.bf16.mxu0 %v778_v44  ;;  %v2051_v9 = vld [vmem:[%s2897_s14] ss:$0 sm:$0xff] }
  0x44   : > { %2119 = vmatmul.mubr.msk.bf16.vlgmr.msra.gmra.mrb[0].mxu0 %vm576_vm0, %v565_v37  ;;  %2156 = vmatprep.subr.bf16.mxu1 %v1049_v47 }
  0x45   : > { %2122 = vmatprep.mubr.msk.bf16.mxu0 %vm576_vm0, %v566_v38  ;;  %2127 = vmatpush3.bf16.msra.mxu0 %v778_v44 }
  0x46   : > { %2157 = vmatpush3.bf16.msra.mxu1 %v1049_v47  ;;  %2136 = vmatprep.subr.bf16.mxu0 %v2665_v53 }
  0x47   : > { %2166 = vmatprep.subr.bf16.mxu1 %v2656_v50 }
  0x4c   : > { %2123 = vmatmul.mubr.msk.bf16.gmra.mrb[4].mxu0 %vm576_vm0, %v567_v41 }
 0x117   : > { %v2120_v55 = vpop.f32.mrb[0].mxu0 }
 0x118   : > { %v632_v57 = vadd.f32 %v2120_v55, %v1980_v54  ;;  %v623_v58 = vpop.f32.mrb[1].mxu0 }
 0x119   : > { %v624_v60 = vadd.f32 %v1980_v54, %v623_v58  ;;  %v2121_v61 = vpop.f32.mrb[2].mxu0 }
 0x11a   : > { %v663_v62 = vmul.f32 %v1985_v56, %v632_v57  ;;  %v635_v63 = vadd.f32 %v2121_v61, %v1980_v54  ;;  %v626_v0 = vpop.f32.mrb[3].mxu0 }
 0x11b   : > { %v661_v1 = vmul.f32 %v1985_v56, %v624_v60  ;;  %v627_v3 = vadd.f32 %v1980_v54, %v626_v0  ;;  %v2016_v0 = vld [vmem:[%s2890_s7 + $0x58] sm:$0xff] }
 0x11c   : > { %v678_v5 = vadd.f32 %v1986_v59, %v663_v62  ;;  %v664_v6 = vmul.f32 %v1985_v56, %v635_v63  ;;  %v2015_v63 = vld [vmem:[%s2890_s7 + $0x50] sm:$0xff] }
 0x11d   : > { %v676_v7 = vadd.f32 %v1986_v59, %v661_v1  ;;  %v662_v8 = vmul.f32 %v1985_v56, %v627_v3 }
 0x11e   : > { %v686_v12 = vmax.f32 %v678_v5, 0.0  ;;  %v679_v13 = vadd.f32 %v1986_v59, %v664_v6 }
 0x11f   : > { %v684_v16 = vmax.f32 %v676_v7, 0.0  ;;  %v677_v19 = vadd.f32 %v1986_v59, %v662_v8  ;;  %v2124_v20 = vpop.f32.mrb[4].mxu0 }
 0x120   : > { %695 = vst.msk [vmem:[#allocation2 + $0x31] sm:$0xff] %vm576_vm0, %v686_v12  ;;  %v687_v21 = vmax.f32 %v679_v13, 0.0  ;;  %v648_v22 = vadd.f32 %v2124_v20, %v1980_v54  ;;  %v639_v23 = vpop.f32.mrb[5].mxu0 }
 0x121   : > { %693 = vst.msk [vmem:[#allocation2 + $0x11] sm:$0xff] %vm576_vm0, %v684_v16  ;;  %v685_v24 = vmax.f32 %v677_v19, 0.0  ;;  %v640_v25 = vadd.f32 %v1980_v54, %v639_v23  ;;  %v2125_v26 = vpop.f32.mrb[6].mxu0 }
 0x122   : > { %696 = vst.msk [vmem:[#allocation2 + $0x41] sm:$0xff] %vm576_vm0, %v687_v21  ;;  %v667_v27 = vmul.f32 %v1985_v56, %v648_v22  ;;  %v651_v28 = vadd.f32 %v2125_v26, %v1980_v54  ;;  %v642_v29 = vpop.f32.mrb[7].mxu0 }
 0x123   : > { %694 = vst.msk [vmem:[#allocation2 + $0x21] sm:$0xff] %vm576_vm0, %v685_v24  ;;  %v665_v30 = vmul.f32 %v1985_v56, %v640_v25  ;;  %v643_v31 = vadd.f32 %v1980_v54, %v642_v29  ;;  %v1998_v54 = vld [vmem:[%s2890_s7 + $0x28] sm:$0xff] }
 0x124   : > { %v682_v32 = vadd.f32 %v1986_v59, %v667_v27  ;;  %v668_v33 = vmul.f32 %v1985_v56, %v651_v28  ;;  %v948_v16 = vpack.c.bf16 %v1998_v54, %v1997_v52  ;;  %v1251_v27 = vpack.c.bf16 %v2016_v0, %v2015_v63 }
 0x125   : > { %v680_v34 = vadd.f32 %v1986_v59, %v665_v30  ;;  %v666_v35 = vmul.f32 %v1985_v56, %v643_v31 }
 0x126   : > { %v690_v36 = vmax.f32 %v682_v32, 0.0  ;;  %v683_v37 = vadd.f32 %v1986_v59, %v668_v33 }
 0x127   : > { %v710_v38 = vld [vmem:[#allocation2 + $0x31] sm:$0x1]  ;;  %v731_v39 = vld [vmem:[#allocation2 + $0x38] sm:$0x1]  ;;  %v688_v40 = vmax.f32 %v680_v34, 0.0  ;;  %v681_v41 = vadd.f32 %v1986_v59, %v666_v35 }
 0x128   : > { %741 = vst.msk [vmem:[#allocation2 + $0x39] sm:$0x1] %vm717_vm1, %v731_v39  ;;  %721 = vst.msk [vmem:[#allocation2 + $0x30] sm:$0x1] %vm717_vm1, %v710_v38  ;;  %v2683_v42 = vld [vmem:[#allocation2 + $0x11] sm:$0xff]  ;;  %v691_v44 = vmax.f32 %v683_v37, 0.0 }
 0x129   : > { %v729_v43 = vld [vmem:[#allocation2 + $0x18] sm:$0x1]  ;;  %699 = vst.msk [vmem:[#allocation2 + $0x71] sm:$0xff] %vm576_vm0, %v690_v36  ;;  %v708_v45 = vld [vmem:[#allocation2 + $0x11] sm:$0x1]  ;;  %702 = vst.msk [vmem:[#allocation2 + $0x1] sm:$0xff] %vm576_vm0, %v2683_v42 }
 0x12a   : > { %739 = vst.msk [vmem:[#allocation2 + $0x19] sm:$0x1] %vm717_vm1, %v729_v43  ;;  %v711_v46 = vld [vmem:[#allocation2 + $0x41] sm:$0x1]  ;;  %v732_v47 = vld [vmem:[#allocation2 + $0x48] sm:$0x1] }
 0x12b   : > { %697 = vst.msk [vmem:[#allocation2 + $0x51] sm:$0xff] %vm576_vm0, %v688_v40  ;;  %v689_v48 = vmax.f32 %v681_v41, 0.0  ;;  %v730_v49 = vld [vmem:[#allocation2 + $0x28] sm:$0x1]  ;;  %700 = vst.msk [vmem:[#allocation2 + $0x81] sm:$0xff] %vm576_vm0, %v691_v44  ;;  %v2705_v58 = vld [vmem:[#allocation2 + $0x31] sm:$0xff] }
 0x12c   : > { %719 = vst.msk [vmem:[#allocation2 + $0x10] sm:$0x1] %vm717_vm1, %v708_v45  ;;  %722 = vst.msk [vmem:[#allocation2 + $0x40] sm:$0x1] %vm717_vm1, %v711_v46  ;;  %v709_v51 = vld [vmem:[#allocation2 + $0x21] sm:$0x1] }
 0x12d   : > { %742 = vst.msk [vmem:[#allocation2 + $0x49] sm:$0x1] %vm717_vm1, %v732_v47  ;;  %740 = vst.msk [vmem:[#allocation2 + $0x29] sm:$0x1] %vm717_vm1, %v730_v49  ;;  %v2703_v57 = vld [vmem:[#allocation2 + $0x21] sm:$0xff] }
 0x12e   : > { %698 = vst.msk [vmem:[#allocation2 + $0x61] sm:$0xff] %vm576_vm0, %v689_v48  ;;  %v2709_v62 = vld [vmem:[#allocation2 + $0x41] sm:$0xff]  ;;  %v2728_v12 = vpack.c.bf16 %v2705_v58, %v2703_v57  ;;  %v1146_v40 = vpack.c.bf16 %v2703_v57, %v2683_v42 }
 0x12f   : > { %720 = vst.msk [vmem:[#allocation2 + $0x20] sm:$0x1] %vm717_vm1, %v709_v51  ;;  %v1036_v24 = vld [vmem:[#allocation2 + $0x30] sm:$0xff]  ;;  %v2021_v43 = vld [vmem:[%s2890_s7 + $0x60] sm:$0xff]  ;;  %v2022_v44 = vld [vmem:[%s2890_s7 + $0x68] sm:$0xff] }
 0x130   : > { %v714_v55 = vld [vmem:[#allocation2 + $0x71] sm:$0x1]  ;;  %v735_v56 = vld [vmem:[#allocation2 + $0x78] sm:$0x1]  ;;  %v763_v61 = vld [vmem:[#allocation2 + $0x1] sm:$0xff]  ;;  %v1353_v46 = vpack.c.bf16 %v2022_v44, %v2021_v43 }
 0x131   : > { %725 = vst.msk [vmem:[#allocation2 + $0x70] sm:$0x1] %vm717_vm1, %v714_v55  ;;  %745 = vst.msk [vmem:[#allocation2 + $0x79] sm:$0x1] %vm717_vm1, %v735_v56  ;;  %v774_v6 = vpack.c.bf16 %v2683_v42, %v763_v61  ;;  %v707_v25 = vld [vmem:[#allocation2 + $0x1] sm:$0x1]  ;;  %v1147_v42 = vpack.c.bf16 %v2709_v62, %v2705_v58 }
 0x132   : > { %v712_v59 = vld [vmem:[#allocation2 + $0x51] sm:$0x1]  ;;  %v733_v60 = vld [vmem:[#allocation2 + $0x58] sm:$0x1]  ;;  %v2719_v1 = vld [vmem:[#allocation2 + $0x81] sm:$0xff] }
 0x133   : > { %723 = vst.msk [vmem:[#allocation2 + $0x50] sm:$0x1] %vm717_vm1, %v712_v59  ;;  %743 = vst.msk [vmem:[#allocation2 + $0x59] sm:$0x1] %vm717_vm1, %v733_v60  ;;  %v715_v3 = vld [vmem:[#allocation2 + $0x81] sm:$0x1]  ;;  %2128 = vmatprep.mubr.msk.bf16.mxu0 %vm576_vm0, %v774_v6 }
 0x134   : > { %v736_v5 = vld [vmem:[#allocation2 + $0x88] sm:$0x1]  ;;  %706 = vst.msk [vmem:[#allocation2 + $0x91] sm:$0xff] %vm576_vm0, %v2719_v1  ;;  %v768_v13 = vld [vmem:[#allocation2 + $0x51] sm:$0xff]  ;;  %v1037_v22 = vld [vmem:[#allocation2 + $0x40] sm:$0xff]  ;;  %2129 = vmatmul.mubr.msk.bf16.vlgmr.msra.gmra.mrb[8].mxu0 %vm576_vm0, %v2728_v12 }
 0x135   : > { %726 = vst.msk [vmem:[#allocation2 + $0x80] sm:$0x1] %vm717_vm1, %v715_v3  ;;  %746 = vst.msk [vmem:[#allocation2 + $0x89] sm:$0x1] %vm717_vm1, %v736_v5  ;;  %v713_v7 = vld [vmem:[#allocation2 + $0x61] sm:$0x1]  ;;  %v2734_v19 = vpack.c.bf16 %v768_v13, %v2709_v62  ;;  %v1046_v26 = vpack.c.bf16 %v1037_v22, %v1036_v24  ;;  %2137 = vmatpush3.bf16.msra.mxu0 %v2665_v53 }
 0x136   : > { %v734_v8 = vld [vmem:[#allocation2 + $0x68] sm:$0x1]  ;;  %724 = vst.msk [vmem:[#allocation2 + $0x60] sm:$0x1] %vm717_vm1, %v713_v7  ;;  %v1034_v20 = vld [vmem:[#allocation2 + $0x10] sm:$0xff]  ;;  %v1035_v21 = vld [vmem:[#allocation2 + $0x20] sm:$0xff]  ;;  %2146 = vmatprep.subr.bf16.mxu0 %v948_v16 }
 0x137   : > { %744 = vst.msk [vmem:[#allocation2 + $0x69] sm:$0x1] %vm717_vm1, %v734_v8  ;;  %v1045_v23 = vpack.c.bf16 %v1035_v21, %v1034_v20  ;;  %2132 = vmatprep.mubr.msk.bf16.mxu0 %vm576_vm0, %v2734_v19  ;;  %718 = vst.msk [vmem:[#allocation2] sm:$0x1] %vm717_vm1, %v707_v25  ;;  %v728_v28 = vld [vmem:[#allocation2 + $0x8] sm:$0x1]  ;;  %v759_v41 = vpack.c.bf16 %v1036_v24, %v1035_v21 }
 0x138   : > { %738 = vst.msk [vmem:[#allocation2 + $0x9] sm:$0x1] %vm717_vm1, %v728_v28  ;;  %v769_v29 = vld [vmem:[#allocation2 + $0x61] sm:$0xff]  ;;  %v770_v30 = vld [vmem:[#allocation2 + $0x71] sm:$0xff]  ;;  %v2040_v43 = vld [vmem:[%s2892_s9] ss:$0 sm:$0xff] }
 0x139   : > { %2158 = vmatprep.mubr.msk.bf16.mxu1 %vm576_vm0, %v1045_v23  ;;  %v2746_v32 = vpack.c.bf16 %v770_v30, %v769_v29  ;;  %v1040_v38 = vld [vmem:[#allocation2 + $0x70] sm:$0xff]  ;;  %v1148_v47 = vpack.c.bf16 %v769_v29, %v768_v13  ;;  %v1237_v54 = vld [vmem:[#allocation2 + $0x22] sm:$0xff]  ;;  %v1149_v55 = vpack.c.bf16 %v2719_v1, %v770_v30  ;;  %v2028_v62 = vld [vmem:[%s2890_s7 + $0x78] sm:$0xff] }
 0x13a   : > { %2159 = vmatmul.mubr.msk.bf16.vlgmr.msra.gmra.mrb[0].mxu1 %vm576_vm0, %v1046_v26  ;;  %v1038_v33 = vld [vmem:[#allocation2 + $0x50] sm:$0xff]  ;;  %v937_v60 = vld [vmem:[#allocation2 + $0x42] sm:$0xff] }
 0x13b   : > { %2167 = vmatpush3.bf16.msra.mxu1 %v2656_v50  ;;  %v716_v31 = vld [vmem:[#allocation2 + $0x91] sm:$0x1]  ;;  %v737_v36 = vld [vmem:[#allocation2 + $0x98] sm:$0x1]  ;;  %v760_v45 = vpack.c.bf16 %v1038_v33, %v1037_v22  ;;  %v2034_v21 = vld [vmem:[%s2890_s7 + $0x88] sm:$0xff] }
 0x13c   : > { %2176 = vmatprep.subr.bf16.mxu1 %v1251_v27  ;;  %v2748_v53 = vld [vmem:[#allocation2 + $0x80] sm:$0xff]  ;;  %727 = vst.msk [vmem:[#allocation2 + $0x90] sm:$0x1] %vm717_vm1, %v716_v31  ;;  %2133 = vmatmul.mubr.msk.bf16.gmra.mrb[12].mxu0 %vm576_vm0, %v2746_v32  ;;  %747 = vst.msk [vmem:[#allocation2 + $0x99] sm:$0x1] %vm717_vm1, %v737_v36  ;;  %v934_v51 = vld [vmem:[#allocation2 + $0x12] sm:$0xff] }
 0x13d   : > { %v1039_v34 = vld [vmem:[#allocation2 + $0x60] sm:$0xff]  ;;  %v1048_v39 = vpack.c.bf16 %v2748_v53, %v1040_v38  ;;  %v1247_v56 = vpack.c.bf16 %v1237_v54, %v934_v51  ;;  %v938_v57 = vld [vmem:[#allocation2 + $0x52] sm:$0xff]  ;;  %v1786_v30 = vld [vmem:[%s2896_s13 + $0x8] sm:$0xff] }
 0x13e   : > { %v1047_v35 = vpack.c.bf16 %v1039_v34, %v1038_v33  ;;  %v748_v37 = vld [vmem:[#allocation2] sm:$0xff]  ;;  %v761_v49 = vpack.c.bf16 %v1040_v38, %v1039_v34  ;;  %v936_v58 = vld [vmem:[#allocation2 + $0x32] sm:$0xff]  ;;  %v946_v63 = vpack.c.bf16 %v938_v57, %v937_v60 }
 0x13f   : > { %v758_v50 = vpack.c.bf16 %v1034_v20, %v748_v37  ;;  %v933_v48 = vld [vmem:[#allocation2 + $0x2] sm:$0xff]  ;;  %v945_v59 = vpack.c.bf16 %v936_v58, %v1237_v54  ;;  %v2027_v61 = vld [vmem:[%s2890_s7 + $0x70] sm:$0xff]  ;;  %v1248_v3 = vpack.c.bf16 %v937_v60, %v936_v58 }
 0x140   : > { %2162 = vmatprep.mubr.msk.bf16.mxu1 %vm576_vm0, %v1047_v35  ;;  %v944_v52 = vpack.c.bf16 %v934_v51, %v933_v48  ;;  %v1241_v0 = vld [vmem:[#allocation2 + $0x62] sm:$0xff]  ;;  %v1454_v5 = vpack.c.bf16 %v2028_v62, %v2027_v61  ;;  %v940_v7 = vld [vmem:[#allocation2 + $0x72] sm:$0xff]  ;;  %v2041_v48 = vld [vmem:[%s2893_s10] ss:$0 sm:$0xff] }
 0x141   : > { %2138 = vmatprep.mubr.msk.bf16.mxu0 %vm576_vm0, %v758_v50  ;;  %v1249_v6 = vpack.c.bf16 %v1241_v0, %v938_v57  ;;  %v947_v8 = vpack.c.bf16 %v940_v7, %v1241_v0  ;;  %v1243_v13 = vld [vmem:[#allocation2 + $0x82] sm:$0xff]  ;;  %v1446_v25 = vld [vmem:[#allocation2 + $0x91] sm:$0xff] }
 0x142   : > { %2163 = vmatmul.mubr.msk.bf16.gmra.mrb[4].mxu1 %vm576_vm0, %v1048_v39  ;;  %v2033_v20 = vld [vmem:[%s2890_s7 + $0x80] sm:$0xff]  ;;  %v1453_v26 = vpack.c.bf16 %v1446_v25, %v2719_v1  ;;  %v1695_v1 = vld [vmem:[%s2894_s11 + $0x8] sm:$0xff] }
 0x143   : > { %2168 = vmatprep.mubr.msk.bf16.mxu1 %vm576_vm0, %v1146_v40  ;;  %v1555_v22 = vpack.c.bf16 %v2034_v21, %v2033_v20  ;;  %v1345_v23 = vld [vmem:[#allocation2 + $0x90] sm:$0xff]  ;;  %v1785_v29 = vld [vmem:[%s2896_s13] sm:$0xff] }
 0x144   : > { %2139 = vmatmul.mubr.msk.bf16.vlgmr.msra.gmra.mrb[8].mxu0 %vm576_vm0, %v759_v41  ;;  %v1352_v24 = vpack.c.bf16 %v1345_v23, %v2748_v53  ;;  %v1791_v31 = vpack.c.bf16 %v1786_v30, %v1785_v29  ;;  %v2039_v39 = vld [vmem:[%s2891_s8] ss:$0 sm:$0xff] }
 0x145   : > { %2142 = vmatprep.mubr.msk.bf16.mxu0 %vm576_vm0, %v760_v45  ;;  %2147 = vmatpush3.bf16.msra.mxu0 %v948_v16  ;;  %v1250_v16 = vpack.c.bf16 %v1243_v13, %v940_v7 }
 0x14a   : > { %2169 = vmatmul.mubr.msk.bf16.vlgmr.msra.gmra.mrb[0].mxu1 %vm576_vm0, %v1147_v42 }
 0x14b   : > { %2177 = vmatpush3.bf16.msra.mxu1 %v1251_v27  ;;  %2172 = vmatprep.mubr.msk.bf16.mxu1 %vm576_vm0, %v1148_v47  ;;  %v1547_v27 = vld [vmem:[#allocation2 + $0x92] sm:$0xff] }
 0x14c   : > { %2186 = vmatprep.subr.bf16.mxu1 %v1353_v46  ;;  %2143 = vmatmul.mubr.msk.bf16.gmra.mrb[12].mxu0 %vm576_vm0, %v761_v49 }
 0x14d   : > { %2148 = vmatprep.mubr.msk.bf16.mxu0 %vm576_vm0, %v944_v52 }
 0x152   : > { %2173 = vmatmul.mubr.msk.bf16.gmra.mrb[4].mxu1 %vm576_vm0, %v1149_v55 }
 0x153   : > { %2178 = vmatprep.mubr.msk.bf16.mxu1 %vm576_vm0, %v1247_v56 }
 0x154   : > { %2149 = vmatmul.mubr.msk.bf16.vlgmr.msra.gmra.mrb[8].mxu0 %vm576_vm0, %v945_v59 }
 0x155   : > { %2152 = vmatprep.mubr.msk.bf16.mxu0 %vm576_vm0, %v946_v63 }
 0x15a   : > { %2179 = vmatmul.mubr.msk.bf16.vlgmr.msra.gmra.mrb[0].mxu1 %vm576_vm0, %v1248_v3 }
 0x15b   : > { %2187 = vmatpush3.bf16.msra.mxu1 %v1353_v46  ;;  %2182 = vmatprep.mubr.msk.bf16.mxu1 %vm576_vm0, %v1249_v6 }
 0x15c   : > { %2196 = vmatprep.subr.bf16.mxu1 %v1454_v5  ;;  %2153 = vmatmul.mubr.msk.bf16.gmra.mrb[12].mxu0 %vm576_vm0, %v947_v8 }
 0x162   : > { %2183 = vmatmul.mubr.msk.bf16.gmra.mrb[4].mxu1 %vm576_vm0, %v1250_v16 }
 0x163   : > { %2188 = vmatprep.mubr.msk.bf16.mxu1 %vm576_vm0, %v759_v41 }
 0x16a   : > { %2189 = vmatmul.mubr.msk.bf16.vlgmr.msra.gmra.mrb[0].mxu1 %vm576_vm0, %v760_v45 }
 0x16b   : > { %2197 = vmatpush3.bf16.msra.mxu1 %v1454_v5  ;;  %2192 = vmatprep.mubr.msk.bf16.mxu1 %vm576_vm0, %v761_v49 }
 0x16c   : > { %2206 = vmatprep.subr.bf16.mxu1 %v1555_v22 }
 0x172   : > { %2193 = vmatmul.mubr.msk.bf16.gmra.mrb[4].mxu1 %vm576_vm0, %v1352_v24 }
 0x173   : > { %2198 = vmatprep.mubr.msk.bf16.mxu1 %vm576_vm0, %v2728_v12  ;;  %v1554_v12 = vpack.c.bf16 %v1547_v27, %v1243_v13 }
 0x17a   : > { %2199 = vmatmul.mubr.msk.bf16.vlgmr.msra.gmra.mrb[0].mxu1 %vm576_vm0, %v2734_v19  ;;  %v1694_v19 = vld [vmem:[%s2894_s11] sm:$0xff] }
 0x17b   : > { %2207 = vmatpush3.bf16.msra.mxu1 %v1555_v22  ;;  %2202 = vmatprep.mubr.msk.bf16.mxu1 %vm576_vm0, %v2746_v32  ;;  %v1700_v28 = vpack.c.bf16 %v1695_v1, %v1694_v19 }
 0x17d   : > { %2216 = vmatprep.subr.bf16.mxu0 %v1700_v28 }
 0x17e   : > { %2217 = vmatpush3.bf16.msra.mxu0 %v1700_v28 }
 0x17f   : > { %2226 = vmatprep.subr.bf16.mxu0 %v1791_v31 }
 0x182   : > { %2203 = vmatmul.mubr.msk.bf16.gmra.mrb[4].mxu1 %vm576_vm0, %v1453_v26 }
 0x183   : > { %2208 = vmatprep.mubr.msk.bf16.mxu1 %vm576_vm0, %v945_v59 }
 0x18a   : > { %2209 = vmatmul.mubr.msk.bf16.vlgmr.msra.gmra.mrb[0].mxu1 %vm576_vm0, %v946_v63 }
 0x18b   : > { %2212 = vmatprep.mubr.msk.bf16.mxu1 %vm576_vm0, %v947_v8 }
 0x192   : > { %2213 = vmatmul.mubr.msk.bf16.gmra.mrb[4].mxu1 %vm576_vm0, %v1554_v12 }
 0x227   : > { %v2150_v32 = vpop.f32.mrb[8].mxu0 }
 0x228   : > { %v995_v33 = vpop.f32.mrb[9].mxu0 }
 0x229   : > { %v2151_v34 = vpop.f32.mrb[10].mxu0 }
 0x22a   : > { %v998_v53 = vpop.f32.mrb[11].mxu0 }
 0x22f   : > { %v2154_v35 = vpop.f32.mrb[12].mxu0 }
 0x230   : > { %v1011_v36 = vpop.f32.mrb[13].mxu0 }
 0x231   : > { %v2155_v37 = vpop.f32.mrb[14].mxu0 }
 0x232   : > { %v1014_v38 = vpop.f32.mrb[15].mxu0 }
 0x25d   : > { %v2210_v50 = vpop.f32.mrb[0].mxu1 }
 0x25e   : > { %v2236_v40 = vadd.f32 %v2210_v50, %v2150_v32  ;;  %v1602_v41 = vpop.f32.mrb[1].mxu1 }
 0x25f   : > { %v2237_v44 = vadd.f32 %v1602_v41, %v995_v33  ;;  %v2211_v45 = vpop.f32.mrb[2].mxu1 }
 0x260   : > { %v1650_v42 = vadd.f32 %v2236_v40, %v2039_v39  ;;  %v2238_v46 = vadd.f32 %v2211_v45, %v2151_v34  ;;  %v1605_v47 = vpop.f32.mrb[3].mxu1  ;;  %v1790_v40 = vpack.c.bf16 %v2629_v18, %v2627_v17 }
 0x261   : > { %v1648_v49 = vadd.f32 %v2237_v44, %v2039_v39  ;;  %v2239_v51 = vadd.f32 %v1605_v47, %v998_v53 }
 0x262   : > { %v1665_v52 = vmul.f32 %v2040_v43, %v1650_v42  ;;  %v1651_v54 = vadd.f32 %v2238_v46, %v2039_v39 }
 0x263   : > { %v1663_v55 = vmul.f32 %v2040_v43, %v1648_v49  ;;  %v1649_v56 = vadd.f32 %v2239_v51, %v2039_v39 }
 0x264   : > { %v1680_v57 = vadd.f32 %v2041_v48, %v1665_v52  ;;  %v1666_v58 = vmul.f32 %v2040_v43, %v1651_v54 }
 0x265   : > { %v1678_v59 = vadd.f32 %v2041_v48, %v1663_v55  ;;  %v1664_v60 = vmul.f32 %v2040_v43, %v1649_v56  ;;  %v2214_v61 = vpop.f32.mrb[4].mxu1 }
 0x266   : > { %v1681_v62 = vadd.f32 %v2041_v48, %v1666_v58  ;;  %v2240_v63 = vadd.f32 %v2214_v61, %v2154_v35  ;;  %v1618_v0 = vpop.f32.mrb[5].mxu1  ;;  %v1688_v7 = vmax.f32 %v1680_v57, 0.0 }
 0x267   : > { %v1679_v3 = vadd.f32 %v2041_v48, %v1664_v60  ;;  %v2241_v5 = vadd.f32 %v1618_v0, %v1011_v36  ;;  %v2215_v6 = vpop.f32.mrb[6].mxu1  ;;  %v1686_v21 = vmax.f32 %v1678_v59, 0.0 }
 0x268   : > { %v1689_v8 = vmax.f32 %v1681_v62, 0.0  ;;  %v1654_v13 = vadd.f32 %v2240_v63, %v2039_v39  ;;  %v2242_v16 = vadd.f32 %v2215_v6, %v2155_v37  ;;  %v1621_v20 = vpop.f32.mrb[7].mxu1 }
 0x269   : > { %v1687_v22 = vmax.f32 %v1679_v3, 0.0  ;;  %v1652_v23 = vadd.f32 %v2241_v5, %v2039_v39  ;;  %v2243_v24 = vadd.f32 %v1621_v20, %v1014_v38 }
 0x26a   : > { %v1697_v25 = vpack.c.bf16 %v1689_v8, %v1688_v7  ;;  %v1669_v26 = vmul.f32 %v2040_v43, %v1654_v13  ;;  %v1655_v27 = vadd.f32 %v2242_v16, %v2039_v39 }
 0x26b   : > { %v1667_v12 = vmul.f32 %v2040_v43, %v1652_v23  ;;  %v1653_v19 = vadd.f32 %v2243_v24, %v2039_v39  ;;  %v1696_v1 = vpack.c.bf16 %v1687_v22, %v1686_v21  ;;  %v1787_v39 = vpack.c.bf16 %v2604_v4, %v2602_v2  ;;  %v2042_v2 = vld [vmem:[%s2895_s12] ss:$0 sm:$0xff] }
 0x26c   : > { %v1684_v28 = vadd.f32 %v2041_v48, %v1669_v26  ;;  %v1670_v29 = vmul.f32 %v2040_v43, %v1655_v27 }
 0x26d   : > { %v1682_v30 = vadd.f32 %v2041_v48, %v1667_v12  ;;  %v1668_v32 = vmul.f32 %v2040_v43, %v1653_v19  ;;  %2218 = vmatprep.mubr.msk.bf16.mxu0 %vm576_vm0, %v1696_v1 }
 0x26e   : > { %v1685_v33 = vadd.f32 %v2041_v48, %v1670_v29  ;;  %2219 = vmatmul.mubr.msk.bf16.vlgmr.msra.gmra.mrb[16].mxu0 %vm576_vm0, %v1697_v25  ;;  %v1692_v53 = vmax.f32 %v1684_v28, 0.0 }
 0x26f   : > { %v1683_v34 = vadd.f32 %v2041_v48, %v1668_v32  ;;  %2227 = vmatpush3.bf16.msra.mxu0 %v1791_v31  ;;  %v1690_v36 = vmax.f32 %v1682_v30, 0.0  ;;  %v1789_v31 = vpack.c.bf16 %v2624_v15, %v2618_v11 }
 0x270   : > { %v1693_v35 = vmax.f32 %v1685_v33, 0.0 }
 0x271   : > { %v1691_v37 = vmax.f32 %v1683_v34, 0.0 }
 0x272   : > { %v1699_v38 = vpack.c.bf16 %v1693_v35, %v1692_v53 }
 0x273   : > { %v1698_v50 = vpack.c.bf16 %v1691_v37, %v1690_v36 }
 0x275   : > { %2222 = vmatprep.mubr.msk.bf16.mxu0 %vm576_vm0, %v1698_v50 }
 0x276   : > { %2223 = vmatmul.mubr.msk.bf16.gmra.mrb[20].mxu0 %vm576_vm0, %v1699_v38 }
 0x277   : > { %2228 = vmatprep.mubr.msk.bf16.mxu0 %vm576_vm0, %v1787_v39 }
 0x27e   : > { %2229 = vmatmul.mubr.msk.bf16.vlgmr.msra.gmra.mrb[16].mxu0 %vm576_vm0, %v1788_v14 }
 0x27f   : > { %2232 = vmatprep.mubr.msk.bf16.mxu0 %vm576_vm0, %v1789_v31 }
 0x286   : > { %2233 = vmatmul.mubr.msk.bf16.gmra.mrb[20].mxu0 %vm576_vm0, %v1790_v40 }
 0x351   : > { %v2230_v4 = vpop.f32.mrb[16].mxu0 }
 0x352   : > { %v2244_v10 = vadd.f32 %v2230_v4, %v2042_v2  ;;  %v1838_v11 = vpop.f32.mrb[17].mxu0 }
 0x353   : > { %v2245_v14 = vadd.f32 %v2042_v2, %v1838_v11  ;;  %v2231_v15 = vpop.f32.mrb[18].mxu0 }
 0x354   : > { %v1886_v17 = vadd.f32 %v2244_v10, %v2051_v9  ;;  %v2246_v18 = vadd.f32 %v2231_v15, %v2042_v2  ;;  %v1841_v41 = vpop.f32.mrb[19].mxu0 }
 0x355   : > { %v1884_v43 = vadd.f32 %v2245_v14, %v2051_v9  ;;  %v2247_v44 = vadd.f32 %v2042_v2, %v1841_v41 }
 0x356   : > { %1895 = vst.msk [vmem:[%s514_s23 + $0x10] sm:$0xff] %vm1892_vm2, %v1886_v17  ;;  %v1887_v45 = vadd.f32 %v2246_v18, %v2051_v9 }
 0x357   : > { %1893 = vst.msk [vmem:[%s514_s23] sm:$0xff] %vm1892_vm2, %v1884_v43  ;;  %v1885_v42 = vadd.f32 %v2247_v44, %v2051_v9 }
 0x358   : > { %1896 = vst.msk [vmem:[%s514_s23 + $0x18] sm:$0xff] %vm1892_vm2, %v1887_v45 }
 0x359   : > { %1894 = vst.msk [vmem:[%s514_s23 + $0x8] sm:$0xff] %vm1892_vm2, %v1885_v42  ;;  %v2234_v46 = vpop.f32.mrb[20].mxu0 }
 0x35a   : > { %v2248_v47 = vadd.f32 %v2234_v46, %v2042_v2  ;;  %v1854_v48 = vpop.f32.mrb[21].mxu0 }
 0x35b   : > { %v2249_v49 = vadd.f32 %v2042_v2, %v1854_v48  ;;  %v2235_v51 = vpop.f32.mrb[22].mxu0 }
 0x35c   : > { %v1890_v52 = vadd.f32 %v2248_v47, %v2051_v9  ;;  %v2250_v54 = vadd.f32 %v2235_v51, %v2042_v2  ;;  %v1857_v55 = vpop.f32.mrb[23].mxu0 }
 0x35d   : > { %v1888_v56 = vadd.f32 %v2249_v49, %v2051_v9  ;;  %v2251_v57 = vadd.f32 %v2042_v2, %v1857_v55 }
 0x35e   : > { %1899 = vst.msk [vmem:[%s514_s23 + $0x30] sm:$0xff] %vm1892_vm2, %v1890_v52  ;;  %v1891_v58 = vadd.f32 %v2250_v54, %v2051_v9 }
 0x35f   : > { %1897 = vst.msk [vmem:[%s514_s23 + $0x20] sm:$0xff] %vm1892_vm2, %v1888_v56  ;;  %v1889_v59 = vadd.f32 %v2251_v57, %v2051_v9 }
 0x360   : > { %1900 = vst.msk [vmem:[%s514_s23 + $0x38] sm:$0xff] %vm1892_vm2, %v1891_v58 }
 0x361   : > { %1898 = vst.msk [vmem:[%s514_s23 + $0x28] sm:$0xff] %vm1892_vm2, %v1889_v59 }
 0x362 PF: > { %s2910_s21 = sld [smem:[#allocation7_spill]]  ;;  %s2911_s22 = sld [smem:[#allocation6_spill]] }
 0x363   : > { %s2912_s20 = sld [smem:[#allocation8_spill]]  ;;  %s2913_s18 = smov %s2413_s19 }
 0x368   : > { %p25_p8 = scmp.ge.s32.totalorder %s2910_s21, 4   ;;  %s2914_s19 = smov %s2911_s22 }
 0x36a   :  { %27 = sbr.rel (!%p25_p8) target bundleno = 5 (0x5), region = 132 }
 0x371   :  { %1922 = vsyncpa [#allocation4], 1 }
 0x372   :  { %1924 = vsyncpa [#allocation4 + $0x1], 1 }

// kernel: _lambda_.9
= control target key start
LH: loop header
LB: loop body
LE: loop exit
PB: predicated region body
PF: predicated region fallthrough
CT: control target
= control target key end

     0   :  { %s2635_s21 = smov 0   ;;  %s3076_s0 = inlined_call_operand.vmem [shape: f32[2,64,64], index: 0, kind: input, shape index: {}]   ;;  %s3077_s1 = inlined_call_operand.vmem [shape: f32[16,64], index: 1, kind: input, shape index: {}]   ;;  %s3078_s2 = inlined_call_operand.vmem [shape: f32[1,64], index: 2, kind: input, shape index: {}]   ;;  %s3079_s3 = inlined_call_operand.vmem [shape: f32[1,64], index: 3, kind: input, shape index: {}]   ;;  %s3080_s4 = inlined_call_operand.vmem [shape: f32[64,32], index: 4, kind: input, shape index: {}]   ;;  %s3081_s5 = inlined_call_operand.vmem [shape: f32[1,32], index: 5, kind: input, shape index: {}]   ;;  %s3082_s6 = inlined_call_operand.vmem [shape: f32[1,32], index: 6, kind: input, shape index: {}]   ;;  %s3083_s7 = inlined_call_operand.vmem [shape: f32[1,32], index: 7, kind: input, shape index: {}]   ;;  %s3084_s8 = inlined_call_operand.vmem [shape: f32[3,3,32,32], index: 8, kind: input, shape index: {}]   ;;  %s3085_s9 = inlined_call_operand.vmem [shape: f32[1,32], index: 9, kind: input, shape index: {}]   ;;  %s3086_s10 = inlined_call_operand.vmem [shape: f32[1,32], index: 10, kind: input, shape index: {}]   ;;  %s3087_s11 = inlined_call_operand.vmem [shape: f32[1,32], index: 11, kind: input, shape index: {}]   ;;  %s3088_s12 = inlined_call_operand.vmem [shape: f32[32,128], index: 12, kind: input, shape index: {}]   ;;  %s3089_s13 = inlined_call_operand.vmem [shape: f32[1,128], index: 13, kind: input, shape index: {}]   ;;  %s3090_s14 = inlined_call_operand.vmem [shape: f32[64,128], index: 14, kind: input, shape index: {}]   ;;  %s3091_s15 = inlined_call_operand.vmem [shape: f32[1,128], index: 15, kind: input, shape index: {}]   ;;  %s3092_s16 = inlined_call_operand.vmem [shape: f32[2,16,128], index: 16, kind: output, shape index: {}]  }
   0x1   :  { %3093 = sst [smem:[#allocation3_spill]] %s3076_s0 }
   0x2 LB: > { %s2061_s22 = sadd.s32 4294967295, %s2546_s21   ;;  %p2065_p0 = scmp.ge.s32.totalorder %s2546_s21, 1  ;;  %s2546_s21 = sphi %s2635_s21, %s26_s21  }
   0x3   : > { %p462_p1 = scmp.lt.s32.totalorder %s2546_s21, 3 }
   0x5   : > { %p463_p2 = pnand %p2065_p0, %p462_p1 }
   0x6   : > { %v571_v0 = vld [vmem:[%s3080_s4] sm:$0xff] (!%p463_p2)  ;;  %v572_v1 = vld [vmem:[%s3080_s4 + $0x8] sm:$0xff] (!%p463_p2)  ;;  %v573_v2 = vld [vmem:[%s3080_s4 + $0x10] sm:$0xff] (!%p463_p2)  ;;  %p512_p3 = scmp.lt.s32.totalorder (!%p463_p2), %s2061_s22, 1  ;;  %s3094_s0 = sld [smem:[#allocation3_spill]] (!%p463_p2)  ;;  %vm594_vm0 = vcmask (!%p463_p2), 523264  }
   0x7   : > { %466 = sbr.rel (%p463_p2) target bundleno = 1282 (0x502), region = 84  ;;  %v583_v3 = vpack.c.bf16 (!%p463_p2), %v572_v1, %v571_v0  ;;  %v574_v4 = vld [vmem:[%s3080_s4 + $0x18] sm:$0xff] (!%p463_p2)  ;;  %v575_v6 = vld [vmem:[%s3080_s4 + $0x20] sm:$0xff] (!%p463_p2)  ;;  %v576_v7 = vld [vmem:[%s3080_s4 + $0x28] sm:$0xff] (!%p463_p2)  ;;  %vm711_vm1 = vcmask (!%p463_p2), 261120   ;;  %vm736_vm2 = vcmask (!%p463_p2), 253952  }
   0x8   : > { %v584_v5 = vpack.c.bf16 (!%p463_p2), %v574_v4, %v573_v2  ;;  %v2070_v8 = vld [vmem:[%s3078_s2] ss:$0 sm:$0xff] (!%p463_p2)  ;;  %v585_v9 = vpack.c.bf16 (!%p463_p2), %v576_v7, %v575_v6  ;;  %v577_v10 = vld [vmem:[%s3080_s4 + $0x30] sm:$0xff] (!%p463_p2)  ;;  %v578_v11 = vld [vmem:[%s3080_s4 + $0x38] sm:$0xff] (!%p463_p2)  ;;  %vm2549_vm3 = vmmov (!%p463_p2), 0  }
   0x9   : > { %2252 = vmatprep.subr.bf16.mxu0 (!%p463_p2), %v583_v3  ;;  %v2071_v12 = vld [vmem:[%s3079_s3] ss:$0 sm:$0xff] (!%p463_p2)  ;;  %v586_v27 = vpack.c.bf16 (!%p463_p2), %v578_v11, %v577_v10  ;;  %v2080_v51 = vld [vmem:[%s3084_s8 + $0x28] sm:$0xff] (!%p463_p2)  ;;  %v2081_v53 = vld [vmem:[%s3084_s8 + $0x30] sm:$0xff] (!%p463_p2) }
   0xa   : > { %2253 = vmatpush3.bf16.msra.mxu0 (!%p463_p2), %v583_v3  ;;  %v2079_v50 = vld [vmem:[%s3084_s8 + $0x20] sm:$0xff] (!%p463_p2)  ;;  %v2082_v54 = vld [vmem:[%s3084_s8 + $0x38] sm:$0xff] (!%p463_p2)  ;;  %v2092_v57 = vld [vmem:[%s3084_s8 + $0x48] sm:$0xff] (!%p463_p2) }
   0xb   : > { %2254 = vmatprep.subr.bf16.mxu0 (!%p463_p2), %v584_v5  ;;  %v802_v52 = vpack.c.bf16 (!%p463_p2), %v2080_v51, %v2079_v50  ;;  %v803_v55 = vpack.c.bf16 (!%p463_p2), %v2082_v54, %v2081_v53  ;;  %v2091_v56 = vld [vmem:[%s3084_s8 + $0x40] sm:$0xff] (!%p463_p2)  ;;  %v2093_v59 = vld [vmem:[%s3084_s8 + $0x50] sm:$0xff] (!%p463_p2)  ;;  %v2094_v60 = vld [vmem:[%s3084_s8 + $0x58] sm:$0xff] (!%p463_p2) }
   0xc   : > { %v975_v58 = vpack.c.bf16 (!%p463_p2), %v2092_v57, %v2091_v56  ;;  %v976_v61 = vpack.c.bf16 (!%p463_p2), %v2094_v60, %v2093_v59  ;;  %v775_v62 = vld [vmem:[%s3084_s8] sm:$0xff] (!%p463_p2)  ;;  %v776_v63 = vld [vmem:[%s3084_s8 + $0x8] sm:$0xff] (!%p463_p2) }
   0xd   : > { %v2737_v0 = vpack.c.bf16 (!%p463_p2), %v776_v63, %v775_v62  ;;  %v2099_v1 = vld [vmem:[%s3084_s8 + $0x60] sm:$0xff] (!%p463_p2)  ;;  %v2100_v2 = vld [vmem:[%s3084_s8 + $0x68] sm:$0xff] (!%p463_p2) }
   0xe   : > { %s3096_s22 = smov (!%p512_p3, %s2061_s22), 1  ;;  %2255 = vmatpush3.bf16.msra.mxu0 %v584_v5  ;;  %2292 = vmatprep.subr.bf16.mxu1 %v975_v58  ;;  %v2746_v3 = vpack.c.bf16 %v2100_v2, %v2099_v1  ;;  %v2072_v4 = vld [vmem:[%s3081_s5] ss:$0 sm:$0xff]  ;;  %v777_v1 = vld [vmem:[%s3084_s8 + $0x10] sm:$0xff]  ;;  %v778_v2 = vld [vmem:[%s3084_s8 + $0x18] sm:$0xff] }
   0xf   : > { %s2160_s20 = sshll.u32 %s3096_s22, 6  ;;  %2256 = vmatprep.subr.bf16.mxu0 %v585_v9  ;;  %2293 = vmatpush3.bf16.msra.mxu1 %v975_v58  ;;  %v2077_v6 = vld [vmem:[%s3082_s6] ss:$0 sm:$0xff] }
  0x10   : > { %s516_s17 = scalar_lea.vmem %s3094_s0, %s2160_s20  ;;  %2294 = vmatprep.subr.bf16.mxu1 %v976_v61 }
  0x11   : > { %v2679_v13 = vld [vmem:[%s516_s17] sm:$0xff]  ;;  %v2681_v14 = vld [vmem:[%s516_s17 + $0x8] sm:$0xff]  ;;  %v2683_v15 = vld [vmem:[%s516_s17 + $0x10] sm:$0xff] }
  0x12   : > { %v540_v16 = vmul.f32 %v2070_v8, %v2679_v13  ;;  %v541_v17 = vmul.f32 %v2070_v8, %v2681_v14  ;;  %v2687_v18 = vld [vmem:[%s516_s17 + $0x18] sm:$0xff]  ;;  %v542_v19 = vmul.f32 %v2070_v8, %v2683_v15  ;;  %v2690_v20 = vld [vmem:[%s516_s17 + $0x20] sm:$0xff]  ;;  %v2692_v21 = vld [vmem:[%s516_s17 + $0x28] sm:$0xff]  ;;  %2257 = vmatpush3.bf16.msra.mxu0 %v585_v9 }
  0x13   : > { %v543_v22 = vmul.f32 %v2070_v8, %v2687_v18  ;;  %v544_v23 = vmul.f32 %v2070_v8, %v2690_v20  ;;  %v545_v24 = vmul.f32 %v2070_v8, %v2692_v21  ;;  %v2697_v25 = vld [vmem:[%s516_s17 + $0x30] sm:$0xff]  ;;  %v2699_v26 = vld [vmem:[%s516_s17 + $0x38] sm:$0xff]  ;;  %2258 = vmatprep.subr.bf16.mxu0 %v586_v27  ;;  %2295 = vmatpush3.bf16.msra.mxu1 %v976_v61  ;;  %v2078_v9 = vld [vmem:[%s3083_s7] ss:$0 sm:$0xff]  ;;  %s2161_s17 = sshll.u32 %s3096_s22, 4 }
  0x14   : > { %v555_v28 = vadd.f32 %v2071_v12, %v540_v16  ;;  %v556_v29 = vadd.f32 %v2071_v12, %v541_v17  ;;  %v557_v30 = vadd.f32 %v2071_v12, %v542_v19  ;;  %v546_v34 = vmul.f32 %v2070_v8, %v2697_v25  ;;  %2304 = vmatprep.subr.bf16.mxu1 %v2746_v3  ;;  %s521_s24 = scalar_lea.vmem %s3092_s16, %s2161_s17 }
  0x15   : > { %v558_v31 = vadd.f32 %v2071_v12, %v543_v22  ;;  %v559_v32 = vadd.f32 %v2071_v12, %v544_v23  ;;  %v560_v33 = vadd.f32 %v2071_v12, %v545_v24  ;;  %v547_v38 = vmul.f32 %v2070_v8, %v2699_v26 }
  0x16   : > { %v563_v35 = vmax.f32 %v555_v28, 0.0  ;;  %v564_v36 = vmax.f32 %v556_v29, 0.0  ;;  %v565_v37 = vmax.f32 %v557_v30, 0.0  ;;  %v561_v44 = vadd.f32 %v2071_v12, %v546_v34  ;;  %2259 = vmatpush3.bf16.msra.mxu0 %v586_v27 }
  0x17   : > { %v566_v39 = vmax.f32 %v558_v31, 0.0  ;;  %v567_v40 = vmax.f32 %v559_v32, 0.0  ;;  %v568_v41 = vmax.f32 %v560_v33, 0.0  ;;  %v562_v45 = vadd.f32 %v2071_v12, %v547_v38  ;;  %2268 = vmatprep.subr.bf16.mxu0 %v802_v52 }
  0x18   : > { %v579_v42 = vpack.c.bf16 %v564_v36, %v563_v35  ;;  %v569_v47 = vmax.f32 %v561_v44, 0.0 }
  0x19   : > { %v580_v43 = vpack.c.bf16 %v566_v39, %v565_v37  ;;  %v581_v46 = vpack.c.bf16 %v568_v41, %v567_v40  ;;  %v570_v48 = vmax.f32 %v562_v45, 0.0 }
  0x1a   : > { %2260 = vmatprep.mubr.msk.bf16.mxu0 %vm594_vm0, %v579_v42 }
  0x1b   : > { %2261 = vmatmul.mubr.msk.bf16.vlgmr.msra.gmra.mrb[0].mxu0 %vm594_vm0, %v580_v43  ;;  %v582_v49 = vpack.c.bf16 %v570_v48, %v569_v47 }
  0x1c   : > { %2264 = vmatprep.mubr.msk.bf16.mxu0 %vm594_vm0, %v581_v46  ;;  %2269 = vmatpush3.bf16.msra.mxu0 %v802_v52 }
  0x1d   : > { %2270 = vmatprep.subr.bf16.mxu0 %v803_v55 }
  0x20   : > { %2271 = vmatpush3.bf16.msra.mxu0 %v803_v55 }
  0x21   : > { %2280 = vmatprep.subr.bf16.mxu0 %v2737_v0 }
  0x23   : > { %2265 = vmatmul.mubr.msk.bf16.gmra.mrb[4].mxu0 %vm594_vm0, %v582_v49 }
  0xee   : > { %v2262_v5 = vpop.f32.mrb[0].mxu0 }
  0xef   : > { %v650_v7 = vadd.f32 %v2262_v5, %v2072_v4  ;;  %v641_v8 = vpop.f32.mrb[1].mxu0 }
  0xf0   : > { %v642_v10 = vadd.f32 %v2072_v4, %v641_v8  ;;  %v2263_v11 = vpop.f32.mrb[2].mxu0 }
  0xf1   : > { %v681_v12 = vmul.f32 %v2077_v6, %v650_v7  ;;  %v653_v16 = vadd.f32 %v2263_v11, %v2072_v4  ;;  %v644_v17 = vpop.f32.mrb[3].mxu0 }
  0xf2   : > { %v679_v19 = vmul.f32 %v2077_v6, %v642_v10  ;;  %v645_v22 = vadd.f32 %v2072_v4, %v644_v17 }
  0xf3   : > { %v696_v23 = vadd.f32 %v2078_v9, %v681_v12  ;;  %v682_v24 = vmul.f32 %v2077_v6, %v653_v16 }
  0xf4   : > { %v694_v27 = vadd.f32 %v2078_v9, %v679_v19  ;;  %v680_v28 = vmul.f32 %v2077_v6, %v645_v22 }
  0xf5   : > { %v704_v29 = vmax.f32 %v696_v23, 0.0  ;;  %v697_v30 = vadd.f32 %v2078_v9, %v682_v24 }
  0xf6   : > { %v702_v31 = vmax.f32 %v694_v27, 0.0  ;;  %v695_v32 = vadd.f32 %v2078_v9, %v680_v28  ;;  %v2266_v33 = vpop.f32.mrb[4].mxu0  ;;  %v784_v28 = vpack.c.bf16 %v778_v2, %v777_v1 }
  0xf7   : > { %714 = vst.msk [vmem:[#allocation2 + $0x31] sm:$0xff] %vm711_vm1, %v704_v29  ;;  %v705_v34 = vmax.f32 %v697_v30, 0.0  ;;  %v666_v35 = vadd.f32 %v2266_v33, %v2072_v4  ;;  %v657_v36 = vpop.f32.mrb[5].mxu0 }
  0xf8   : > { %712 = vst.msk [vmem:[#allocation2 + $0x11] sm:$0xff] %vm711_vm1, %v702_v31  ;;  %v703_v37 = vmax.f32 %v695_v32, 0.0  ;;  %v658_v38 = vadd.f32 %v2072_v4, %v657_v36  ;;  %v2267_v39 = vpop.f32.mrb[6].mxu0 }
  0xf9   : > { %715 = vst.msk [vmem:[#allocation2 + $0x41] sm:$0xff] %vm711_vm1, %v705_v34  ;;  %v685_v40 = vmul.f32 %v2077_v6, %v666_v35  ;;  %v669_v41 = vadd.f32 %v2267_v39, %v2072_v4  ;;  %v660_v42 = vpop.f32.mrb[7].mxu0  ;;  %v2101_v34 = vld [vmem:[%s3084_s8 + $0x70] sm:$0xff] }
  0xfa   : > { %713 = vst.msk [vmem:[#allocation2 + $0x21] sm:$0xff] %vm711_vm1, %v703_v37  ;;  %v683_v43 = vmul.f32 %v2077_v6, %v658_v38  ;;  %v661_v44 = vadd.f32 %v2072_v4, %v660_v42  ;;  %v2102_v38 = vld [vmem:[%s3084_s8 + $0x78] sm:$0xff] }
  0xfb   : > { %v700_v45 = vadd.f32 %v2078_v9, %v685_v40  ;;  %v686_v46 = vmul.f32 %v2077_v6, %v669_v41 }
  0xfc   : > { %v698_v47 = vadd.f32 %v2078_v9, %v683_v43  ;;  %v684_v48 = vmul.f32 %v2077_v6, %v661_v44 }
  0xfd   : > { %v708_v49 = vmax.f32 %v700_v45, 0.0  ;;  %v701_v50 = vadd.f32 %v2078_v9, %v686_v46 }
  0xfe   : > { %v729_v51 = vld [vmem:[#allocation2 + $0x31] sm:$0x1]  ;;  %v750_v52 = vld [vmem:[#allocation2 + $0x38] sm:$0x1]  ;;  %v706_v53 = vmax.f32 %v698_v47, 0.0  ;;  %v699_v54 = vadd.f32 %v2078_v9, %v684_v48 }
  0xff   : > { %740 = vst.msk [vmem:[#allocation2 + $0x30] sm:$0x1] %vm736_vm2, %v729_v51  ;;  %760 = vst.msk [vmem:[#allocation2 + $0x39] sm:$0x1] %vm736_vm2, %v750_v52  ;;  %v2764_v55 = vld [vmem:[#allocation2 + $0x11] sm:$0xff]  ;;  %v709_v57 = vmax.f32 %v701_v50, 0.0 }
 0x100   : > { %v727_v56 = vld [vmem:[#allocation2 + $0x11] sm:$0x1]  ;;  %718 = vst.msk [vmem:[#allocation2 + $0x71] sm:$0xff] %vm711_vm1, %v708_v49  ;;  %v748_v58 = vld [vmem:[#allocation2 + $0x18] sm:$0x1]  ;;  %721 = vst.msk [vmem:[#allocation2 + $0x1] sm:$0xff] %vm711_vm1, %v2764_v55  ;;  %v1080_v49 = vpack.c.bf16 %v2102_v38, %v2101_v34 }
 0x101   : > { %738 = vst.msk [vmem:[#allocation2 + $0x10] sm:$0x1] %vm736_vm2, %v727_v56  ;;  %v730_v59 = vld [vmem:[#allocation2 + $0x41] sm:$0x1]  ;;  %v751_v60 = vld [vmem:[#allocation2 + $0x48] sm:$0x1] }
 0x102   : > { %716 = vst.msk [vmem:[#allocation2 + $0x51] sm:$0xff] %vm711_vm1, %v706_v53  ;;  %v707_v61 = vmax.f32 %v699_v54, 0.0  ;;  %v728_v62 = vld [vmem:[#allocation2 + $0x21] sm:$0x1]  ;;  %v749_v63 = vld [vmem:[#allocation2 + $0x28] sm:$0x1] }
 0x103   : > { %758 = vst.msk [vmem:[#allocation2 + $0x19] sm:$0x1] %vm736_vm2, %v748_v58  ;;  %741 = vst.msk [vmem:[#allocation2 + $0x40] sm:$0x1] %vm736_vm2, %v730_v59  ;;  %v2784_v6 = vld [vmem:[#allocation2 + $0x21] sm:$0xff]  ;;  %v2786_v7 = vld [vmem:[#allocation2 + $0x31] sm:$0xff] }
 0x104   : > { %761 = vst.msk [vmem:[#allocation2 + $0x49] sm:$0x1] %vm736_vm2, %v751_v60  ;;  %739 = vst.msk [vmem:[#allocation2 + $0x20] sm:$0x1] %vm736_vm2, %v728_v62  ;;  %v2790_v11 = vld [vmem:[#allocation2 + $0x41] sm:$0xff]  ;;  %v2803_v24 = vpack.c.bf16 %v2786_v7, %v2784_v6  ;;  %v2118_v34 = vld [vmem:[%s3084_s8 + $0xb8] sm:$0xff] }
 0x105   : > { %719 = vst.msk [vmem:[#allocation2 + $0x81] sm:$0xff] %vm711_vm1, %v709_v57  ;;  %717 = vst.msk [vmem:[#allocation2 + $0x61] sm:$0xff] %vm711_vm1, %v707_v61  ;;  %v2107_v51 = vld [vmem:[%s3084_s8 + $0x80] sm:$0xff]  ;;  %v2108_v52 = vld [vmem:[%s3084_s8 + $0x88] sm:$0xff] }
 0x106   : > { %759 = vst.msk [vmem:[#allocation2 + $0x29] sm:$0x1] %vm736_vm2, %v749_v63  ;;  %v2845_v43 = vld [vmem:[#allocation2 + $0x32] sm:$0xff]  ;;  %v1183_v57 = vpack.c.bf16 %v2108_v52, %v2107_v51  ;;  %v2139_v51 = vld [vmem:[%s3084_s8 + $0x100] sm:$0xff]  ;;  %v2140_v52 = vld [vmem:[%s3084_s8 + $0x108] sm:$0xff] }
 0x107   : > { %v733_v4 = vld [vmem:[#allocation2 + $0x71] sm:$0x1]  ;;  %v754_v5 = vld [vmem:[#allocation2 + $0x78] sm:$0x1]  ;;  %v785_v10 = vld [vmem:[#allocation2 + $0x1] sm:$0xff] }
 0x108   : > { %744 = vst.msk [vmem:[#allocation2 + $0x70] sm:$0x1] %vm736_vm2, %v733_v4  ;;  %764 = vst.msk [vmem:[#allocation2 + $0x79] sm:$0x1] %vm736_vm2, %v754_v5  ;;  %v798_v19 = vpack.c.bf16 %v2764_v55, %v785_v10  ;;  %v747_v30 = vld [vmem:[#allocation2 + $0x8] sm:$0x1] }
 0x109   : > { %v731_v8 = vld [vmem:[#allocation2 + $0x51] sm:$0x1]  ;;  %v752_v9 = vld [vmem:[#allocation2 + $0x58] sm:$0x1]  ;;  %757 = vst.msk [vmem:[#allocation2 + $0x9] sm:$0x1] %vm736_vm2, %v747_v30  ;;  %v1179_v30 = vpack.c.bf16 %v2784_v6, %v2764_v55 }
 0x10a   : > { %742 = vst.msk [vmem:[#allocation2 + $0x50] sm:$0x1] %vm736_vm2, %v731_v8  ;;  %762 = vst.msk [vmem:[#allocation2 + $0x59] sm:$0x1] %vm736_vm2, %v752_v9  ;;  %v2805_v27 = vld [vmem:[#allocation2 + $0x51] sm:$0xff]  ;;  %2272 = vmatprep.mubr.msk.bf16.mxu0 %vm711_vm1, %v798_v19  ;;  %v771_v60 = vld [vmem:[#allocation2 + $0x40] sm:$0xff] }
 0x10b   : > { %v2812_v29 = vpack.c.bf16 %v2805_v27, %v2790_v11  ;;  %2273 = vmatmul.mubr.msk.bf16.vlgmr.msra.gmra.mrb[8].mxu0 %vm711_vm1, %v2803_v24  ;;  %v726_v31 = vld [vmem:[#allocation2 + $0x1] sm:$0x1]  ;;  %v2823_v33 = vld [vmem:[#allocation2 + $0x71] sm:$0xff]  ;;  %v2852_v48 = vld [vmem:[#allocation2 + $0x42] sm:$0xff] }
 0x10c   : > { %v2794_v12 = vld [vmem:[#allocation2 + $0x81] sm:$0xff]  ;;  %2281 = vmatpush3.bf16.msra.mxu0 %v2737_v0  ;;  %737 = vst.msk [vmem:[#allocation2] sm:$0x1] %vm736_vm2, %v726_v31  ;;  %v2828_v36 = vld [vmem:[#allocation2 + $0x12] sm:$0xff] }
 0x10d   : > { %v734_v16 = vld [vmem:[#allocation2 + $0x81] sm:$0x1]  ;;  %v755_v17 = vld [vmem:[#allocation2 + $0x88] sm:$0x1]  ;;  %725 = vst.msk [vmem:[#allocation2 + $0x91] sm:$0xff] %vm711_vm1, %v2794_v12  ;;  %2276 = vmatprep.mubr.msk.bf16.mxu0 %vm711_vm1, %v2812_v29  ;;  %2282 = vmatprep.subr.bf16.mxu0 %v784_v28  ;;  %v768_v45 = vld [vmem:[#allocation2 + $0x10] sm:$0xff] }
 0x10e   : > { %745 = vst.msk [vmem:[#allocation2 + $0x80] sm:$0x1] %vm736_vm2, %v734_v16  ;;  %765 = vst.msk [vmem:[#allocation2 + $0x89] sm:$0x1] %vm736_vm2, %v755_v17  ;;  %v732_v22 = vld [vmem:[#allocation2 + $0x61] sm:$0x1] }
 0x10f   : > { %v753_v23 = vld [vmem:[#allocation2 + $0x68] sm:$0x1]  ;;  %743 = vst.msk [vmem:[#allocation2 + $0x60] sm:$0x1] %vm736_vm2, %v732_v22  ;;  %v769_v53 = vld [vmem:[#allocation2 + $0x20] sm:$0xff]  ;;  %v770_v56 = vld [vmem:[#allocation2 + $0x30] sm:$0xff] }
 0x110   : > { %763 = vst.msk [vmem:[#allocation2 + $0x69] sm:$0x1] %vm736_vm2, %v753_v23  ;;  %v2821_v32 = vld [vmem:[#allocation2 + $0x61] sm:$0xff]  ;;  %2283 = vmatpush3.bf16.msra.mxu0 %v784_v28  ;;  %v2871_v58 = vpack.c.bf16 %v770_v56, %v769_v53  ;;  %v2877_v62 = vld [vmem:[#allocation2 + $0x72] sm:$0xff]  ;;  %v1076_v9 = vpack.c.bf16 %v771_v60, %v770_v56 }
 0x111   : > { %v2832_v37 = vpack.c.bf16 %v2823_v33, %v2821_v32  ;;  %v2834_v0 = vld [vmem:[#allocation2 + $0x22] sm:$0xff]  ;;  %v2840_v40 = vld [vmem:[#allocation2 + $0x52] sm:$0xff] }
 0x112   : > { %v958_v39 = vld [vmem:[#allocation2 + $0x2] sm:$0xff]  ;;  %v2850_v46 = vpack.c.bf16 %v2845_v43, %v2834_v0  ;;  %v2857_v50 = vpack.c.bf16 %v2840_v40, %v2852_v48  ;;  %v772_v54 = vld [vmem:[#allocation2 + $0x50] sm:$0xff]  ;;  %v2110_v8 = vld [vmem:[%s3084_s8 + $0x98] sm:$0xff] }
 0x113   : > { %v971_v42 = vpack.c.bf16 %v2828_v36, %v958_v39  ;;  %2277 = vmatmul.mubr.msk.bf16.gmra.mrb[12].mxu0 %vm711_vm1, %v2832_v37  ;;  %v767_v44 = vld [vmem:[#allocation2] sm:$0xff]  ;;  %v2873_v61 = vpack.c.bf16 %v772_v54, %v771_v60  ;;  %v774_v2 = vld [vmem:[#allocation2 + $0x70] sm:$0xff]  ;;  %v2116_v19 = vld [vmem:[%s3084_s8 + $0xa8] sm:$0xff]  ;;  %v1181_v39 = vpack.c.bf16 %v2821_v32, %v2805_v27 }
 0x114   : > { %v735_v35 = vld [vmem:[#allocation2 + $0x91] sm:$0x1]  ;;  %v756_v41 = vld [vmem:[#allocation2 + $0x98] sm:$0x1]  ;;  %v779_v47 = vpack.c.bf16 %v768_v45, %v767_v44  ;;  %v2115_v17 = vld [vmem:[%s3084_s8 + $0xa0] sm:$0xff] }
 0x115   : > { %746 = vst.msk [vmem:[#allocation2 + $0x90] sm:$0x1] %vm736_vm2, %v735_v35  ;;  %766 = vst.msk [vmem:[#allocation2 + $0x99] sm:$0x1] %vm736_vm2, %v756_v41  ;;  %2296 = vmatprep.mubr.msk.bf16.mxu1 %vm711_vm1, %v971_v42  ;;  %v2109_v5 = vld [vmem:[%s3084_s8 + $0x90] sm:$0xff]  ;;  %v1287_v22 = vpack.c.bf16 %v2116_v19, %v2115_v17  ;;  %v1069_v23 = vld [vmem:[#allocation2 + $0x80] sm:$0xff]  ;;  %v1180_v35 = vpack.c.bf16 %v2790_v11, %v2786_v7  ;;  %v1182_v7 = vpack.c.bf16 %v2794_v12, %v2823_v33 }
 0x116   : > { %2297 = vmatmul.mubr.msk.bf16.vlgmr.msra.gmra.mrb[0].mxu1 %vm711_vm1, %v2850_v46  ;;  %2284 = vmatprep.mubr.msk.bf16.mxu0 %vm711_vm1, %v779_v47  ;;  %v773_v1 = vld [vmem:[#allocation2 + $0x60] sm:$0xff]  ;;  %v1184_v10 = vpack.c.bf16 %v2110_v8, %v2109_v5  ;;  %v1078_v28 = vpack.c.bf16 %v1069_v23, %v774_v2  ;;  %v2117_v31 = vld [vmem:[%s3084_s8 + $0xb0] sm:$0xff]  ;;  %v2124_v6 = vld [vmem:[%s3084_s8 + $0xc8] sm:$0xff]  ;;  %v1283_v11 = vpack.c.bf16 %v2834_v0, %v2828_v36 }
 0x117   : > { %2300 = vmatprep.mubr.msk.bf16.mxu1 %vm711_vm1, %v2857_v50  ;;  %2305 = vmatpush3.bf16.msra.mxu1 %v2746_v3  ;;  %v964_v59 = vld [vmem:[#allocation2 + $0x62] sm:$0xff]  ;;  %v1075_v3 = vpack.c.bf16 %v769_v53, %v768_v45  ;;  %v2887_v4 = vpack.c.bf16 %v774_v2, %v773_v1  ;;  %v1077_v16 = vpack.c.bf16 %v773_v1, %v772_v54  ;;  %v2125_v27 = vld [vmem:[%s3084_s8 + $0xd0] sm:$0xff]  ;;  %v2126_v32 = vld [vmem:[%s3084_s8 + $0xd8] sm:$0xff] }
 0x118   : > { %2306 = vmatprep.subr.bf16.mxu1 %v1080_v49  ;;  %v2880_v63 = vpack.c.bf16 %v2877_v62, %v964_v59  ;;  %v1288_v38 = vpack.c.bf16 %v2118_v34, %v2117_v31  ;;  %v2123_v55 = vld [vmem:[%s3084_s8 + $0xc0] sm:$0xff]  ;;  %v1284_v42 = vpack.c.bf16 %v2852_v48, %v2845_v43  ;;  %v1393_v33 = vpack.c.bf16 %v2126_v32, %v2125_v27  ;;  %v2132_v0 = vld [vmem:[%s3084_s8 + $0xe8] sm:$0xff]  ;;  %v2134_v48 = vld [vmem:[%s3084_s8 + $0xf8] sm:$0xff] }
 0x119   : > { %v1392_v41 = vpack.c.bf16 %v2124_v6, %v2123_v55  ;;  %v1285_v44 = vpack.c.bf16 %v964_v59, %v2840_v40  ;;  %v2131_v36 = vld [vmem:[%s3084_s8 + $0xe0] sm:$0xff]  ;;  %v2133_v40 = vld [vmem:[%s3084_s8 + $0xf0] sm:$0xff]  ;;  %v1600_v53 = vpack.c.bf16 %v2140_v52, %v2139_v51  ;;  %v1806_v51 = vld [vmem:[%s3088_s12 + $0x18] sm:$0xff] }
 0x11a   : > { %v1496_v45 = vpack.c.bf16 %v2132_v0, %v2131_v36  ;;  %v1277_v47 = vld [vmem:[#allocation2 + $0x82] sm:$0xff]  ;;  %v1486_v60 = vld [vmem:[#allocation2 + $0x91] sm:$0xff] }
 0x11b   : > { %2285 = vmatmul.mubr.msk.bf16.vlgmr.msra.gmra.mrb[8].mxu0 %vm711_vm1, %v2871_v58  ;;  %2307 = vmatpush3.bf16.msra.mxu1 %v1080_v49  ;;  %v1286_v43 = vpack.c.bf16 %v1277_v47, %v2877_v62  ;;  %v1497_v49 = vpack.c.bf16 %v2134_v48, %v2133_v40  ;;  %v2548_v48 = vmov 0.0  }
 0x11c   : > { %2288 = vmatprep.mubr.msk.bf16.mxu0 %vm711_vm1, %v2873_v61  ;;  %2316 = vmatprep.subr.bf16.mxu1 %v1183_v57  ;;  %v1382_v54 = vld [vmem:[#allocation2 + $0x90] sm:$0xff] }
 0x11d   : > { %v1391_v56 = vpack.c.bf16 %v1382_v54, %v1069_v23  ;;  %v2150_v54 = vld [vmem:[%s3086_s10] ss:$0 sm:$0xff] }
 0x11e   : > { %2301 = vmatmul.mubr.msk.bf16.gmra.mrb[4].mxu1 %vm711_vm1, %v2880_v63 }
 0x11f   : > { %2308 = vmatprep.mubr.msk.bf16.mxu1 %vm711_vm1, %v1075_v3 }
 0x123   : > { %2289 = vmatmul.mubr.msk.bf16.gmra.mrb[12].mxu0 %vm711_vm1, %v2887_v4 }
 0x126   : > { %2309 = vmatmul.mubr.msk.bf16.vlgmr.msra.gmra.mrb[0].mxu1 %vm711_vm1, %v1076_v9  ;;  %v2147_v9 = vld [vmem:[%s3085_s9] ss:$0 sm:$0xff] }
 0x127   : > { %2312 = vmatprep.mubr.msk.bf16.mxu1 %vm711_vm1, %v1077_v16  ;;  %2317 = vmatpush3.bf16.msra.mxu1 %v1183_v57  ;;  %v2141_v57 = vld [vmem:[%s3084_s8 + $0x110] sm:$0xff] }
 0x128   : > { %2318 = vmatprep.subr.bf16.mxu1 %v1184_v10 }
 0x12b   : > { %2319 = vmatpush3.bf16.msra.mxu1 %v1184_v10 }
 0x12c   : > { %2328 = vmatprep.subr.bf16.mxu1 %v1287_v22 }
 0x12e   : > { %2313 = vmatmul.mubr.msk.bf16.gmra.mrb[4].mxu1 %vm711_vm1, %v1078_v28 }
 0x12f   : > { %2320 = vmatprep.mubr.msk.bf16.mxu1 %vm711_vm1, %v1179_v30 }
 0x136   : > { %2321 = vmatmul.mubr.msk.bf16.vlgmr.msra.gmra.mrb[0].mxu1 %vm711_vm1, %v1180_v35 }
 0x137   : > { %2324 = vmatprep.mubr.msk.bf16.mxu1 %vm711_vm1, %v1181_v39  ;;  %2329 = vmatpush3.bf16.msra.mxu1 %v1287_v22 }
 0x138   : > { %2330 = vmatprep.subr.bf16.mxu1 %v1288_v38 }
 0x13b   : > { %2331 = vmatpush3.bf16.msra.mxu1 %v1288_v38 }
 0x13c   : > { %2340 = vmatprep.subr.bf16.mxu1 %v1392_v41 }
 0x13e   : > { %2325 = vmatmul.mubr.msk.bf16.gmra.mrb[4].mxu1 %vm711_vm1, %v1182_v7 }
 0x13f   : > { %2332 = vmatprep.mubr.msk.bf16.mxu1 %vm711_vm1, %v1283_v11 }
 0x146   : > { %2333 = vmatmul.mubr.msk.bf16.vlgmr.msra.gmra.mrb[0].mxu1 %vm711_vm1, %v1284_v42 }
 0x147   : > { %2336 = vmatprep.mubr.msk.bf16.mxu1 %vm711_vm1, %v1285_v44  ;;  %2341 = vmatpush3.bf16.msra.mxu1 %v1392_v41 }
 0x148   : > { %2342 = vmatprep.subr.bf16.mxu1 %v1393_v33 }
 0x14b   : > { %2343 = vmatpush3.bf16.msra.mxu1 %v1393_v33 }
 0x14c   : > { %2352 = vmatprep.subr.bf16.mxu1 %v1496_v45 }
 0x14e   : > { %2337 = vmatmul.mubr.msk.bf16.gmra.mrb[4].mxu1 %vm711_vm1, %v1286_v43  ;;  %v1804_v43 = vld [vmem:[%s3088_s12 + $0x8] sm:$0xff] }
 0x14f   : > { %2344 = vmatprep.mubr.msk.bf16.mxu1 %vm711_vm1, %v2871_v58  ;;  %v2142_v58 = vld [vmem:[%s3084_s8 + $0x118] sm:$0xff] }
 0x150   : > { %v1601_v59 = vpack.c.bf16 %v2142_v58, %v2141_v57  ;;  %v2151_v57 = vld [vmem:[%s3087_s11] ss:$0 sm:$0xff] }
 0x156   : > { %2345 = vmatmul.mubr.msk.bf16.vlgmr.msra.gmra.mrb[0].mxu1 %vm711_vm1, %v2873_v61 }
 0x157   : > { %2348 = vmatprep.mubr.msk.bf16.mxu1 %vm711_vm1, %v2887_v4  ;;  %2353 = vmatpush3.bf16.msra.mxu1 %v1496_v45  ;;  %v524_v45 = vld [vmem:[%s3077_s1 + $0x8] sm:$0xff] }
 0x158   : > { %2354 = vmatprep.subr.bf16.mxu1 %v1497_v49 }
 0x15b   : > { %2355 = vmatpush3.bf16.msra.mxu1 %v1497_v49  ;;  %v1805_v49 = vld [vmem:[%s3088_s12 + $0x10] sm:$0xff] }
 0x15c   : > { %2364 = vmatprep.subr.bf16.mxu1 %v1600_v53  ;;  %v1809_v52 = vpack.c.bf16 %v1806_v51, %v1805_v49 }
 0x15e   : > { %2349 = vmatmul.mubr.msk.bf16.gmra.mrb[4].mxu1 %vm711_vm1, %v1391_v56 }
 0x15f   : > { %2356 = vmatprep.mubr.msk.bf16.mxu1 %vm711_vm1, %v2803_v24  ;;  %v1495_v24 = vpack.c.bf16 %v1486_v60, %v2794_v12 }
 0x166   : > { %2357 = vmatmul.mubr.msk.bf16.vlgmr.msra.gmra.mrb[0].mxu1 %vm711_vm1, %v2812_v29  ;;  %v1590_v29 = vld [vmem:[#allocation2 + $0x92] sm:$0xff] }
 0x167   : > { %2360 = vmatprep.mubr.msk.bf16.mxu1 %vm711_vm1, %v2832_v37  ;;  %2365 = vmatpush3.bf16.msra.mxu1 %v1600_v53  ;;  %v1599_v61 = vpack.c.bf16 %v1590_v29, %v1277_v47  ;;  %v2995_v37 = vld [vmem:[%s3077_s1] sm:$0xff]  ;;  %v2450_v53 = vpack.c.bf16 %v2681_v14, %v2679_v13 }
 0x168   : > { %2366 = vmatprep.subr.bf16.mxu1 %v1601_v59  ;;  %2392 = vmatprep.mubr.msk.f32.mxu0 %vm594_vm0, %v2995_v37  ;;  %v1803_v47 = vld [vmem:[%s3088_s12] sm:$0xff] }
 0x169   : > { %v1808_v40 = vpack.c.bf16 %v1804_v43, %v1803_v47 }
 0x16b   : > { %2367 = vmatpush3.bf16.msra.mxu1 %v1601_v59 }
 0x16e   : > { %2361 = vmatmul.mubr.msk.bf16.gmra.mrb[4].mxu1 %vm711_vm1, %v1495_v24 }
 0x16f   : > { %2368 = vmatprep.mubr.msk.bf16.mxu1 %vm711_vm1, %v2850_v46 }
 0x176   : > { %2369 = vmatmul.mubr.msk.bf16.vlgmr.msra.gmra.mrb[0].mxu1 %vm711_vm1, %v2857_v50 }
 0x177   : > { %2372 = vmatprep.mubr.msk.bf16.mxu1 %vm711_vm1, %v2880_v63 }
 0x17e   : > { %2373 = vmatmul.mubr.msk.bf16.gmra.mrb[4].mxu1 %vm711_vm1, %v1599_v61 }
 0x1ee   : > { %v2286_v12 = vpop.f32.mrb[8].mxu0 }
 0x1ef   : > { %v927_v46 = vpop.f32.mrb[9].mxu0 }
 0x1f0   : > { %v2287_v62 = vpop.f32.mrb[10].mxu0 }
 0x1f1   : > { %v930_v3 = vpop.f32.mrb[11].mxu0 }
 0x1f6   : > { %v2290_v50 = vpop.f32.mrb[12].mxu0 }
 0x1f7   : > { %v943_v1 = vpop.f32.mrb[13].mxu0 }
 0x1f8   : > { %v2291_v2 = vpop.f32.mrb[14].mxu0 }
 0x1f9   : > { %v946_v63 = vpop.f32.mrb[15].mxu0 }
 0x249   : > { %v2370_v4 = vpop.f32.mrb[0].mxu1 }
 0x24a   : > { %v2466_v5 = vadd.f32 %v2370_v4, %v2286_v12  ;;  %v1648_v8 = vpop.f32.mrb[1].mxu1  ;;  %v2454_v12 = vpack.c.bf16 %v2687_v18, %v2683_v15  ;;  %v1936_v15 = vld [vmem:[%s3090_s14] sm:$0xff]  ;;  %v1937_v18 = vld [vmem:[%s3090_s14 + $0x8] sm:$0xff] }
 0x24b   : > { %v2467_v10 = vadd.f32 %v1648_v8, %v927_v46  ;;  %v2371_v16 = vpop.f32.mrb[2].mxu1  ;;  %v2458_v46 = vpack.c.bf16 %v2692_v21, %v2690_v20  ;;  %v1938_v20 = vld [vmem:[%s3090_s14 + $0x10] sm:$0xff]  ;;  %v1945_v21 = vpack.c.bf16 %v1937_v18, %v1936_v15 }
 0x24c   : > { %v2468_v17 = vadd.f32 %v2371_v16, %v2287_v62  ;;  %v1651_v19 = vpop.f32.mrb[3].mxu1  ;;  %v1696_v23 = vadd.f32 %v2466_v5, %v2147_v9  ;;  %v2462_v62 = vpack.c.bf16 %v2699_v26, %v2697_v25  ;;  %v1939_v25 = vld [vmem:[%s3090_s14 + $0x18] sm:$0xff] }
 0x24d   : > { %v2469_v22 = vadd.f32 %v1651_v19, %v930_v3  ;;  %v1694_v30 = vadd.f32 %v2467_v10, %v2147_v9  ;;  %v1946_v26 = vpack.c.bf16 %v1939_v25, %v1938_v20  ;;  %v1941_v3 = vld [vmem:[%s3090_s14 + $0x28] sm:$0xff]  ;;  %v2152_v19 = vld [vmem:[%s3089_s13] ss:$0 sm:$0xff] }
 0x24e   : > { %v1697_v28 = vadd.f32 %v2468_v17, %v2147_v9 }
 0x24f   : > { %v1695_v31 = vadd.f32 %v2469_v22, %v2147_v9 }
 0x250   : > { %v2438_v34 = vpack.c.bf16 %v1697_v28, %v1696_v23  ;;  %v2157_v28 = vld [vmem:[%s3091_s15] ss:$0 sm:$0xff] }
 0x251   : > { %v2374_v35 = vpop.f32.mrb[4].mxu1  ;;  %v2434_v38 = vpack.c.bf16 %v1695_v31, %v1694_v30 }
 0x252   : > { %v2470_v39 = vadd.f32 %v2374_v35, %v2290_v50  ;;  %v1664_v55 = vpop.f32.mrb[5].mxu1 }
 0x253   : > { %v2471_v6 = vadd.f32 %v1664_v55, %v943_v1  ;;  %v2375_v41 = vpop.f32.mrb[6].mxu1  ;;  %2435 = vmatprep.subr.bf16.mxu0 %v2434_v38  ;;  %v1942_v1 = vld [vmem:[%s3090_s14 + $0x30] sm:$0xff] }
 0x254   : > { %v2472_v7 = vadd.f32 %v2375_v41, %v2291_v2  ;;  %v1667_v11 = vpop.f32.mrb[7].mxu1  ;;  %2437 = vmatpush3.bf16.msra.mxu0 %v2434_v38  ;;  %v1700_v32 = vadd.f32 %v2470_v39, %v2147_v9  ;;  %v1943_v2 = vld [vmem:[%s3090_s14 + $0x38] sm:$0xff] }
 0x255   : > { %v2473_v27 = vadd.f32 %v1667_v11, %v946_v63  ;;  %2439 = vmatprep.subr.bf16.mxu0 %v2438_v34  ;;  %v1698_v33 = vadd.f32 %v2471_v6, %v2147_v9  ;;  %v1948_v63 = vpack.c.bf16 %v1943_v2, %v1942_v1 }
 0x256   : > { %v1701_v42 = vadd.f32 %v2472_v7, %v2147_v9 }
 0x257   : > { %v1699_v44 = vadd.f32 %v2473_v27, %v2147_v9 }
 0x258   : > { %2441 = vmatpush3.bf16.msra.mxu0 %v2438_v34  ;;  %v2446_v36 = vpack.c.bf16 %v1701_v42, %v1700_v32 }
 0x259   : > { %v2442_v0 = vpack.c.bf16 %v1699_v44, %v1698_v33 }
 0x25b   : > { %2443 = vmatprep.subr.bf16.mxu0 %v2442_v0 }
 0x25c   : > { %2445 = vmatpush3.bf16.msra.mxu0 %v2442_v0 }
 0x25d   : > { %2447 = vmatprep.subr.bf16.mxu0 %v2446_v36 }
 0x260   : > { %2449 = vmatpush3.bf16.msra.mxu0 %v2446_v36 }
 0x261   : > { %2395 = vmatprep.subr.bf16.mxu0 %v2548_v48 }
 0x263   : > { %2393 = vmatmul.mubr.msk.f32.vlgmr.msra.gmra.mrb[16].mxu0 %vm594_vm0, %v524_v45 }
 0x264   : > { %2396 = vmatpush3.bf16.msra.mxu0 %v1808_v40  ;;  %2399 = vmatprep.mubr.msk.bf16.mxu0 %vm2549_vm3, %v2548_v48 }
 0x265   : > { %2397 = vmatprep.subr.bf16.mxu0 %v2548_v48 }
 0x268   : > { %2398 = vmatpush3.bf16.msra.mxu0 %v1809_v52 }
 0x269   : > { %2451 = vmatprep.subr.bf16.mxu0 %v2450_v53 }
 0x336   : > { %v2394_v56 = vpop.f32.mrb[16].mxu0 }
 0x337   : > { %v1791_v58 = vmul.f32 %v2394_v56, %v2150_v54  ;;  %v1774_v59 = vpop.f32.mrb[17].mxu0 }
 0x338   : > { %v1790_v60 = vmul.f32 %v2150_v54, %v1774_v59 }
 0x339   : > { %v1800_v24 = vadd.f32 %v2151_v57, %v1791_v58 }
 0x33a   : > { %v1799_v29 = vadd.f32 %v2151_v57, %v1790_v60 }
 0x33b   : > { %v1802_v13 = vmax.f32 %v1800_v24, 0.0 }
 0x33c   : > { %v1801_v14 = vmax.f32 %v1799_v29, 0.0 }
 0x33e   : > { %v1807_v61 = vpack.c.bf16 %v1802_v13, %v1801_v14 }
 0x340   : > { %2400 = vmatmul.mubr.msk.bf16.vlgmr.msra.gmra.mrb[20].mxu0 %vm711_vm1, %v1807_v61 }
 0x341   : > { %2453 = vmatpush3.bf16.msra.mxu0 %v2450_v53  ;;  %2419 = vmatprep.mubr.msk.f32.mxu0 %vm594_vm0, %v2995_v37  ;;  %v1940_v37 = vld [vmem:[%s3090_s14 + $0x20] sm:$0xff] }
 0x342   : > { %2455 = vmatprep.subr.bf16.mxu0 %v2454_v12  ;;  %v1947_v50 = vpack.c.bf16 %v1941_v3, %v1940_v37 }
 0x345   : > { %2457 = vmatpush3.bf16.msra.mxu0 %v2454_v12 }
 0x346   : > { %2459 = vmatprep.subr.bf16.mxu0 %v2458_v46 }
 0x349   : > { %2461 = vmatpush3.bf16.msra.mxu0 %v2458_v46 }
 0x34a   : > { %2463 = vmatprep.subr.bf16.mxu0 %v2462_v62 }
 0x34d   : > { %2465 = vmatpush3.bf16.msra.mxu0 %v2462_v62 }
 0x34e   : > { %2422 = vmatprep.subr.bf16.mxu0 %v2548_v48 }
 0x350   : > { %2420 = vmatmul.mubr.msk.f32.vlgmr.msra.gmra.mrb[18].mxu0 %vm594_vm0, %v524_v45 }
 0x351   : > { %2430 = vmatprep.mubr.msk.bf16.mxu0 %vm2549_vm3, %v2548_v48  ;;  %2423 = vmatpush3.bf16.msra.mxu0 %v1945_v21 }
 0x352   : > { %2424 = vmatprep.subr.bf16.mxu0 %v2548_v48 }
 0x355   : > { %2425 = vmatpush3.bf16.msra.mxu0 %v1946_v26 }
 0x356   : > { %2426 = vmatprep.subr.bf16.mxu0 %v2548_v48 }
 0x359   : > { %2427 = vmatpush3.bf16.msra.mxu0 %v1947_v50 }
 0x35a   : > { %2428 = vmatprep.subr.bf16.mxu0 %v2548_v48 }
 0x35d   : > { %2429 = vmatpush3.bf16.msra.mxu0 %v1948_v63 }
 0x413   : > { %v1854_v4 = vpop.f32.mrb[20].mxu0 }
 0x414   : > { %v2401_v5 = vpop.f32.mrb[21].mxu0  ;;  %v1855_v22 = vadd.f32 %v2152_v19, %v1854_v4 }
 0x415   : > { %v1857_v8 = vpop.f32.mrb[22].mxu0 }
 0x416   : > { %v2402_v9 = vpop.f32.mrb[23].mxu0  ;;  %v1858_v30 = vadd.f32 %v2152_v19, %v1857_v8 }
 0x423   : > { %v2421_v10 = vpop.f32.mrb[18].mxu0 }
 0x424   : > { %v1927_v16 = vpop.f32.mrb[19].mxu0 }
 0x425   : > { %v1944_v17 = vpack.c.bf16 %v2421_v10, %v1927_v16 }
 0x427   : > { %2431 = vmatmul.mubr.msk.bf16.vlgmr.msra.gmra.mrb[24].mxu0 %vm594_vm0, %v1944_v17 }
 0x4fa   : > { %v1986_v23 = vpop.f32.mrb[24].mxu0 }
 0x4fb   : > { %v1993_v31 = vadd.f32 %v1986_v23, %v1855_v22  ;;  %v2432_v34 = vpop.f32.mrb[25].mxu0 }
 0x4fc   : > { %v1989_v35 = vpop.f32.mrb[26].mxu0 }
 0x4fd   : > { %v2002_v38 = vadd.f32 %v2157_v28, %v1993_v31  ;;  %v1994_v39 = vadd.f32 %v1989_v35, %v1858_v30  ;;  %v2433_v55 = vpop.f32.mrb[27].mxu0 }
 0x4ff   : > { %2004 = vst [vmem:[%s521_s24] sm:$0xff] %v2002_v38  ;;  %v2003_v6 = vadd.f32 %v2157_v28, %v1994_v39 }
 0x501   : > { %2005 = vst [vmem:[%s521_s24 + $0x8] sm:$0xff] %v2003_v6 }
 0x502 PF: > { %s26_s21 = sadd.s32 1, %s2546_s21  }
 0x503   : > { %p23_p4 = scmp.ge.s32.totalorder %s26_s21, 4  }
 0x505   :  { %25 = sbr.rel (!%p23_p4) target bundleno = 2 (0x2), region = 126 }

// kernel: _lambda_.11
= control target key start
LH: loop header
LB: loop body
LE: loop exit
PB: predicated region body
PF: predicated region fallthrough
CT: control target
= control target key end

     0   :  { %18 = vsyncpa [#allocation4], 0  ;;  %s2144_s0 = inlined_call_operand.vmem [shape: f32[2,16,128], index: 0, kind: input, shape index: {}]   ;;  %s2145_s1 = inlined_call_operand.vmem [shape: f32[1,128], index: 1, kind: input, shape index: {}]   ;;  %s2146_s2 = inlined_call_operand.vmem [shape: f32[1,128], index: 2, kind: input, shape index: {}]   ;;  %s2147_s3 = inlined_call_operand.vmem [shape: f32[128,32], index: 3, kind: input, shape index: {}]   ;;  %s2148_s4 = inlined_call_operand.vmem [shape: f32[1,32], index: 4, kind: input, shape index: {}]   ;;  %s2149_s5 = inlined_call_operand.vmem [shape: f32[1,32], index: 5, kind: input, shape index: {}]   ;;  %s2150_s6 = inlined_call_operand.vmem [shape: f32[1,32], index: 6, kind: input, shape index: {}]   ;;  %s2151_s7 = inlined_call_operand.vmem [shape: f32[3,3,32,32], index: 7, kind: input, shape index: {}]   ;;  %s2152_s8 = inlined_call_operand.vmem [shape: f32[1,32], index: 8, kind: input, shape index: {}]   ;;  %s2153_s9 = inlined_call_operand.vmem [shape: f32[1,32], index: 9, kind: input, shape index: {}]   ;;  %s2154_s10 = inlined_call_operand.vmem [shape: f32[1,32], index: 10, kind: input, shape index: {}]   ;;  %s2155_s11 = inlined_call_operand.vmem [shape: f32[32,128], index: 11, kind: input, shape index: {}]   ;;  %s2156_s12 = inlined_call_operand.vmem [shape: f32[1,128], index: 12, kind: input, shape index: {}]   ;;  %s2157_s13 = inlined_call_operand.hbm [shape: f32[2,16,128], index: 13, kind: output, shape index: {}]  }
   0x1   :  { %20 = vsyncpa [#allocation4 + $0x1], 0  ;;  %s1760_s25 = smov 0   ;;  %s1762_s26 = smov 0  }
   0x2   :  { %s1764_s27 = smov 0   ;;  %s1766_s28 = smov 0  }
   0x3 LB: > { %2161 = sst [smem:[#allocation6_spill]] %s1679_s27  ;;  %s1781_s29 = sadd.s32 4294967295, %s1683_s28   ;;  %s1683_s28 = sphi %s1766_s28, %s2166_s28   ;;  %s1679_s27 = sphi %s1764_s27, %s2168_s27   ;;  %s1675_s26 = sphi %s1762_s26, %s2170_s26   ;;  %s1671_s25 = sphi %s1760_s25, %s2169_s25  }
   0x4   : > { %s1356_s30 = sadd.s32 4294967294, %s1683_s28   ;;  %s1785_s14 = sadd.s32 1, %s1683_s28  }
   0x5   : > { %2162 = sst [smem:[#allocation7_spill]] %s1785_s14  ;;  %s311_s15 = sadd.s32 1, %s1679_s27 }
   0x6   : > { %s308_s16 = ssub.s32 %s1683_s28, %s1785_s14  ;;  %p321_p0 = scmp.ne.s32.totalorder %s1679_s27, %s1675_s26 }
   0x7   : > { %p309_p1 = scmp.eq.s32.totalorder %s308_s16, 0  ;;  %p322_p2 = scmp.eq.s32.totalorder %s1781_s29, 1 }
   0x8   : > { %p327_p3 = scmp.ne.s32.totalorder %s1675_s26, %s1671_s25  ;;  %p328_p4 = scmp.eq.s32.totalorder %s1356_s30, 1 }
   0x9   : > { %s1796_s17 = scalar_select %p309_p1, %s1679_s27, %s311_s15  }
   0xa   : > { %p1798_p5 = por %p322_p2, %p321_p0  ;;  %p1802_p6 = por %p328_p4, %p327_p3 }
   0xb   : > { %2163 = sst [smem:[#allocation8_spill]] %s1796_s17  ;;  %p1359_p7 = scmp.ge.s32.totalorder %s1683_s28, 1 }
   0xc   : > { %p390_p8 = scmp.lt.s32.totalorder %s1683_s28, 3 }
   0xe   : > { %p391_p9 = pnand %p1359_p7, %p390_p8 }
   0xf   : > { %v462_v0 = vld [vmem:[%s2147_s3] sm:$0xff] (!%p391_p9)  ;;  %v463_v1 = vld [vmem:[%s2147_s3 + $0x8] sm:$0xff] (!%p391_p9)  ;;  %v464_v2 = vld [vmem:[%s2147_s3 + $0x10] sm:$0xff] (!%p391_p9)  ;;  %v1685_v3 = vmov (!%p391_p9), 0.0   ;;  %vm1686_vm0 = vmmov (!%p391_p9), 0   ;;  %p434_p10 = scmp.lt.s32.totalorder (!%p391_p9), %s1781_s29, 1 }
  0x10   : > { %394 = sbr.rel (%p391_p9) target bundleno = 789 (0x315), region = 72  ;;  %1460 = vmatprep.subr.bf16.mxu0 (!%p391_p9), %v1685_v3  ;;  %v479_v4 = vpack.c.bf16 (!%p391_p9), %v463_v1, %v462_v0  ;;  %v465_v5 = vld [vmem:[%s2147_s3 + $0x18] sm:$0xff] (!%p391_p9)  ;;  %1476 = vmatprep.mubr.msk.bf16.mxu0 (!%p391_p9), %vm1686_vm0, %v1685_v3  ;;  %v466_v7 = vld [vmem:[%s2147_s3 + $0x20] sm:$0xff] (!%p391_p9)  ;;  %v467_v8 = vld [vmem:[%s2147_s3 + $0x28] sm:$0xff] (!%p391_p9)  ;;  %vm562_vm1 = vcmask (!%p391_p9), 257024   ;;  %vm579_vm2 = vcmask (!%p391_p9), 253952  }
  0x11   : > { %1480 = vmatprep.subr.bf16.mxu1 (!%p391_p9), %v1685_v3  ;;  %1484 = vmatprep.mubr.msk.bf16.mxu1 (!%p391_p9), %vm1686_vm0, %v1685_v3  ;;  %v480_v6 = vpack.c.bf16 (!%p391_p9), %v465_v5, %v464_v2  ;;  %v481_v9 = vpack.c.bf16 (!%p391_p9), %v467_v8, %v466_v7  ;;  %v468_v10 = vld [vmem:[%s2147_s3 + $0x30] sm:$0xff] (!%p391_p9)  ;;  %v469_v11 = vld [vmem:[%s2147_s3 + $0x38] sm:$0xff] (!%p391_p9)  ;;  %v470_v13 = vld [vmem:[%s2147_s3 + $0x40] sm:$0xff] (!%p391_p9)  ;;  %vm637_vm3 = vcmask (!%p391_p9), 261120   ;;  %s431_s30 = sand.u32 (!%p391_p9), 1, %s1675_s26   ;;  %s1420_s21 = sshll.u32 (!%p391_p9), %s1781_s29, 8 }
  0x12   : > { %1461 = vmatpush3.bf16.msra.mxu0 (!%p391_p9), %v479_v4  ;;  %v482_v12 = vpack.c.bf16 (!%p391_p9), %v469_v11, %v468_v10  ;;  %v471_v14 = vld [vmem:[%s2147_s3 + $0x48] sm:$0xff] (!%p391_p9)  ;;  %v1363_v18 = vld [vmem:[%s2145_s1] ss:$0 sm:$0xff] (!%p391_p9)  ;;  %v472_v19 = vld [vmem:[%s2147_s3 + $0x50] sm:$0xff] (!%p391_p9)  ;;  %s2101_s14 = scalar_lea.hbm (!%p391_p9), %s2157_s13, %s1420_s21  ;;  %s2103_s23 = scalar_lea.sflag (!%p391_p9), [#allocation4], %s431_s30 }
  0x13   : > { %1462 = vmatprep.subr.bf16.mxu0 (!%p391_p9), %v1685_v3  ;;  %v483_v15 = vpack.c.bf16 (!%p391_p9), %v471_v14, %v470_v13  ;;  %v473_v20 = vld [vmem:[%s2147_s3 + $0x58] sm:$0xff] (!%p391_p9)  ;;  %v1364_v24 = vld [vmem:[%s2146_s2] ss:$0 sm:$0xff] (!%p391_p9)  ;;  %v475_v26 = vld [vmem:[%s2147_s3 + $0x68] sm:$0xff] (!%p391_p9) }
  0x14   : > { %v484_v23 = vpack.c.bf16 (!%p391_p9), %v473_v20, %v472_v19  ;;  %v474_v25 = vld [vmem:[%s2147_s3 + $0x60] sm:$0xff] (!%p391_p9)  ;;  %v476_v30 = vld [vmem:[%s2147_s3 + $0x70] sm:$0xff] (!%p391_p9)  ;;  %v477_v31 = vld [vmem:[%s2147_s3 + $0x78] sm:$0xff] (!%p391_p9) }
  0x15   : > { %v485_v29 = vpack.c.bf16 (!%p391_p9), %v475_v26, %v474_v25  ;;  %v486_v34 = vpack.c.bf16 (!%p391_p9), %v477_v31, %v476_v30  ;;  %v1384_v36 = vld [vmem:[%s2151_s7 + $0x80] sm:$0xff] (!%p391_p9)  ;;  %v1385_v37 = vld [vmem:[%s2151_s7 + $0x88] sm:$0xff] (!%p391_p9)  ;;  %v1386_v41 = vld [vmem:[%s2151_s7 + $0x90] sm:$0xff] (!%p391_p9) }
  0x16   : > { %1463 = vmatpush3.bf16.msra.mxu0 (!%p391_p9), %v480_v6  ;;  %v876_v38 = vpack.c.bf16 (!%p391_p9), %v1385_v37, %v1384_v36  ;;  %v1368_v39 = vld [vmem:[%s2151_s7 + $0x20] sm:$0xff] (!%p391_p9)  ;;  %v1369_v40 = vld [vmem:[%s2151_s7 + $0x28] sm:$0xff] (!%p391_p9)  ;;  %v1387_v43 = vld [vmem:[%s2151_s7 + $0x98] sm:$0xff] (!%p391_p9) }
  0x17   : > { %s435_s24 = scalar_select %p434_p10, %s1781_s29, 1  ;;  %1464 = vmatprep.subr.bf16.mxu0 %v1685_v3  ;;  %v635_v42 = vpack.c.bf16 %v1369_v40, %v1368_v39  ;;  %v877_v44 = vpack.c.bf16 %v1387_v43, %v1386_v41  ;;  %v1370_v45 = vld [vmem:[%s2151_s7 + $0x30] sm:$0xff]  ;;  %v1371_v46 = vld [vmem:[%s2151_s7 + $0x38] sm:$0xff]  ;;  %v1365_v48 = vld [vmem:[%s2148_s4] ss:$0 sm:$0xff] }
  0x18   : > { %v636_v47 = vpack.c.bf16 %v1371_v46, %v1370_v45  ;;  %v1366_v50 = vld [vmem:[%s2149_s5] ss:$0 sm:$0xff]  ;;  %v1395_v6 = vld [vmem:[%s2151_s7 + $0xc8] sm:$0xff]  ;;  %v1396_v20 = vld [vmem:[%s2151_s7 + $0xd0] sm:$0xff] }
  0x19   : > { %s1419_s27 = sshll.u32 %s435_s24, 4  ;;  %1481 = vmatpush3.bf16.msra.mxu1 %v635_v42  ;;  %v1367_v53 = vld [vmem:[%s2150_s6] ss:$0 sm:$0xff]  ;;  %v604_v26 = vld [vmem:[%s2151_s7 + $0x10] sm:$0xff]  ;;  %v605_v31 = vld [vmem:[%s2151_s7 + $0x18] sm:$0xff] }
  0x1a   : > { %1465 = vmatpush3.bf16.msra.mxu0 %v481_v9  ;;  %s438_s15 = scalar_lea.vmem %s2144_s0, %s1419_s27  ;;  %1482 = vmatprep.subr.bf16.mxu1 %v1685_v3  ;;  %v1394_v5 = vld [vmem:[%s2151_s7 + $0xc0] sm:$0xff]  ;;  %v1375_v36 = vld [vmem:[%s2151_s7 + $0x48] sm:$0xff]  ;;  %v1376_v40 = vld [vmem:[%s2151_s7 + $0x50] sm:$0xff] }
  0x1b   : > { %1466 = vmatprep.subr.bf16.mxu0 %v1685_v3  ;;  %v1852_v16 = vld [vmem:[%s438_s15] sm:$0xff]  ;;  %v1854_v17 = vld [vmem:[%s438_s15 + $0x8] sm:$0xff]  ;;  %v1377_v42 = vld [vmem:[%s2151_s7 + $0x58] sm:$0xff]  ;;  %s1360_s15 = sshll.u32 %s431_s30, 4 }
  0x1c   : > { %v449_v21 = vmul.f32 %v1363_v18, %v1852_v16  ;;  %v450_v22 = vmul.f32 %v1363_v18, %v1854_v17  ;;  %v602_v14 = vld [vmem:[%s2151_s7] sm:$0xff]  ;;  %v1405_v45 = vld [vmem:[%s2151_s7 + $0x108] sm:$0xff]  ;;  %s433_s16 = scalar_lea.vmem [#allocation3], %s1360_s15  ;;  %s1687_s15 = smov [#allocation3]  }
  0x1d   : > { %1483 = vmatpush3.bf16.msra.mxu1 %v636_v47  ;;  %s1294_s20 = sshll.u32 %s433_s16, 4  ;;  %s1625_s17 = sshll.u32 %s1687_s15, 4  ;;  %s2095_s20 = int_to_ptr.vmem [resolvable:$true] %s1294_s20  ;;  %s1626_s17 = int_to_ptr.vmem [resolvable:$false] %s1625_s17 }
  0x1e   : > { %1467 = vmatpush3.bf16.msra.mxu0 %v482_v12  ;;  %v458_v27 = vadd.f32 %v1364_v24, %v449_v21  ;;  %v459_v28 = vadd.f32 %v1364_v24, %v450_v22  ;;  %1488 = vmatprep.subr.bf16.mxu1 %v1685_v3  ;;  %v1397_v21 = vld [vmem:[%s2151_s7 + $0xd8] sm:$0xff]  ;;  %s1621_s29 = scalar_lea.vmem %s2095_s20, 256  ;;  %s1627_s24 = scalar_lea.vmem %s1626_s17, 512 }
  0x1f   : > { %1468 = vmatprep.subr.bf16.mxu0 %v1685_v3  ;;  %p1622_p11 = scmp.ne.s32.totalorder %s2095_s20, %s1621_s29  ;;  %p1628_p0 = scmp.lt.s32.totalorder %s2095_s20, %s1626_s17 }
  0x20   : > { %v460_v32 = vmax.f32 %v458_v27, 0.0  ;;  %v461_v33 = vmax.f32 %v459_v28, 0.0  ;;  %p1629_p1 = scmp.lt.s32.totalorder %s1627_s24, %s1621_s29 }
  0x21   : > { %p1623_p12 = pnand %p1622_p11, %p1798_p5 }
  0x22   : > { %1469 = vmatpush3.bf16.msra.mxu0 %v483_v15  ;;  %v478_v35 = vpack.c.bf16 %v461_v33, %v460_v32  ;;  %v603_v15 = vld [vmem:[%s2151_s7 + $0x8] sm:$0xff]  ;;  %v1010_v32 = vpack.c.bf16 %v1397_v21, %v1396_v20  ;;  %v1374_v33 = vld [vmem:[%s2151_s7 + $0x40] sm:$0xff]  ;;  %v1401_v20 = vld [vmem:[%s2151_s7 + $0xf0] sm:$0xff]  ;;  %p1630_p2 = por %p1629_p1, %p1628_p0 }
  0x23   : > { %1470 = vmatprep.subr.bf16.mxu0 %v1685_v3  ;;  %v615_v28 = vpack.c.bf16 %v603_v15, %v602_v14  ;;  %v744_v41 = vpack.c.bf16 %v1375_v36, %v1374_v33  ;;  %v1400_v14 = vld [vmem:[%s2151_s7 + $0xe8] sm:$0xff]  ;;  %v1402_v21 = vld [vmem:[%s2151_s7 + $0xf8] sm:$0xff]  ;;  %p1624_p13 = pneg %p1623_p12 }
  0x25   : > { %p1631_p3 = pnand %p1630_p2, %p1624_p13 }
  0x26   : > { %1471 = vmatpush3.bf16.msra.mxu0 %v484_v23  ;;  %v1009_v23 = vpack.c.bf16 %v1395_v6, %v1394_v5  ;;  %v1390_v5 = vld [vmem:[%s2151_s7 + $0xa8] sm:$0xff] }
  0x27   : > { %1472 = vmatprep.subr.bf16.mxu0 %v1685_v3 }
  0x2a   : > { %1473 = vmatpush3.bf16.msra.mxu0 %v485_v29 }
  0x2b   : > { %1474 = vmatprep.subr.bf16.mxu0 %v1685_v3 }
  0x2e   : > { %1475 = vmatpush3.bf16.msra.mxu0 %v486_v34 }
  0x2f   : > { %1512 = vmatprep.subr.bf16.mxu0 %v1685_v3 }
  0x31   : > { %1477 = vmatmul.mubr.bf16.vlgmr.msra.gmra.mrb[0].mxu0 %v478_v35  ;;  %v616_v35 = vpack.c.bf16 %v605_v31, %v604_v26  ;;  %v1218_v26 = vld [vmem:[%s2155_s11] sm:$0xff] }
  0x32   : > { %1516 = vmatprep.mubr.msk.bf16.mxu0 %vm1686_vm0, %v1685_v3  ;;  %1513 = vmatpush3.bf16.msra.mxu0 %v876_v38 }
  0x33   : > { %1514 = vmatprep.subr.bf16.mxu0 %v1685_v3 }
  0x36   : > { %1515 = vmatpush3.bf16.msra.mxu0 %v877_v44  ;;  %v1404_v44 = vld [vmem:[%s2151_s7 + $0x100] sm:$0xff] }
  0x37   : > { %1528 = vmatprep.subr.bf16.mxu0 %v1685_v3 }
 0x104   : > { %v528_v49 = vpop.f32.mrb[0].mxu0 }
 0x105   : > { %v529_v51 = vadd.f32 %v1365_v48, %v528_v49  ;;  %v1478_v52 = vpop.f32.mrb[1].mxu0  ;;  %v745_v49 = vpack.c.bf16 %v1377_v42, %v1376_v40 }
 0x106   : > { %v531_v54 = vpop.f32.mrb[2].mxu0  ;;  %v1406_v52 = vld [vmem:[%s2151_s7 + $0x110] sm:$0xff] }
 0x107   : > { %v542_v55 = vmul.f32 %v1366_v50, %v529_v51  ;;  %v532_v56 = vadd.f32 %v1365_v48, %v531_v54  ;;  %v1479_v57 = vpop.f32.mrb[3].mxu0  ;;  %v1379_v48 = vld [vmem:[%s2151_s7 + $0x60] sm:$0xff]  ;;  %v1380_v51 = vld [vmem:[%s2151_s7 + $0x68] sm:$0xff] }
 0x108   : > { %v810_v57 = vpack.c.bf16 %v1380_v51, %v1379_v48 }
 0x109   : > { %v551_v58 = vadd.f32 %v1367_v53, %v542_v55  ;;  %v543_v59 = vmul.f32 %v1366_v50, %v532_v56  ;;  %v1141_v50 = vpack.c.bf16 %v1405_v45, %v1404_v44  ;;  %v1407_v55 = vld [vmem:[%s2151_s7 + $0x118] sm:$0xff] }
 0x10b   : > { %v553_v60 = vmax.f32 %v551_v58, 0.0  ;;  %v552_v61 = vadd.f32 %v1367_v53, %v543_v59  ;;  %v1142_v58 = vpack.c.bf16 %v1407_v55, %v1406_v52 }
 0x10d   : > { %v557_v62 = vcombine.high %v553_v60, %v553_v60  ;;  %563 = vst.msk [vmem:[#allocation2 + $0x9] sm:$0xf] %vm562_vm1, %v553_v60  ;;  %v554_v63 = vmax.f32 %v552_v61, 0.0  ;;  %v1381_v60 = vld [vmem:[%s2151_s7 + $0x70] sm:$0xff]  ;;  %v1382_v61 = vld [vmem:[%s2151_s7 + $0x78] sm:$0xff] }
 0x10f   : > { %564 = vst.msk [vmem:[#allocation2 + $0x11] sm:$0xf] %vm562_vm1, %v557_v62  ;;  %v558_v0 = vcombine.high %v554_v63, %v554_v63  ;;  %565 = vst.msk [vmem:[#allocation2 + $0x19] sm:$0xf] %vm562_vm1, %v554_v63 }
 0x111   : > { %566 = vst.msk [vmem:[#allocation2 + $0x21] sm:$0xf] %vm562_vm1, %v558_v0  ;;  %v811_v0 = vpack.c.bf16 %v1382_v61, %v1381_v60 }
 0x114   : > { %v567_v1 = vld [vmem:[#allocation2 + $0x9] sm:$0xf] }
 0x115   : > { %v574_v2 = vld [vmem:[#allocation2 + $0x9] sm:$0x1]  ;;  %v587_v4 = vld [vmem:[#allocation2 + $0xc] sm:$0x1]  ;;  %568 = vst.msk [vmem:[#allocation2 + $0x1] sm:$0xf] %vm562_vm1, %v567_v1 }
 0x116   : > { %581 = vst.msk [vmem:[#allocation2 + $0x8] sm:$0x1] %vm579_vm2, %v574_v2  ;;  %593 = vst.msk [vmem:[#allocation2 + $0xd] sm:$0x1] %vm579_vm2, %v587_v4  ;;  %v575_v7 = vld [vmem:[#allocation2 + $0x11] sm:$0x1] }
 0x117   : > { %v588_v8 = vld [vmem:[#allocation2 + $0x14] sm:$0x1]  ;;  %v576_v9 = vld [vmem:[#allocation2 + $0x19] sm:$0x1]  ;;  %582 = vst.msk [vmem:[#allocation2 + $0x10] sm:$0x1] %vm579_vm2, %v575_v7 }
 0x118   : > { %594 = vst.msk [vmem:[#allocation2 + $0x15] sm:$0x1] %vm579_vm2, %v588_v8  ;;  %583 = vst.msk [vmem:[#allocation2 + $0x18] sm:$0x1] %vm579_vm2, %v576_v9  ;;  %v589_v10 = vld [vmem:[#allocation2 + $0x1c] sm:$0x1] }
 0x119   : > { %v570_v11 = vld [vmem:[#allocation2 + $0x21] sm:$0xf]  ;;  %595 = vst.msk [vmem:[#allocation2 + $0x1d] sm:$0x1] %vm579_vm2, %v589_v10  ;;  %v1603_v18 = vld [vmem:[#allocation2 + $0x9] ss:$8 sps:$4 sm:$0xff]  }
 0x11a   : > { %v577_v12 = vld [vmem:[#allocation2 + $0x21] sm:$0x1]  ;;  %v590_v13 = vld [vmem:[#allocation2 + $0x24] sm:$0x1]  ;;  %572 = vst.msk [vmem:[#allocation2 + $0x29] sm:$0xf] %vm562_vm1, %v570_v11 }
 0x11b   : > { %584 = vst.msk [vmem:[#allocation2 + $0x20] sm:$0x1] %vm579_vm2, %v577_v12  ;;  %596 = vst.msk [vmem:[#allocation2 + $0x25] sm:$0x1] %vm579_vm2, %v590_v13  ;;  %v1604_v19 = vld [vmem:[#allocation2 + $0x19] ss:$8 sps:$4 sm:$0xff]  }
 0x11c   : > { %v1606_v22 = vld [vmem:[#allocation2 + $0x11] ss:$8 sps:$4 sm:$0xff]   ;;  %v875_v24 = vpack.c.bf16 %v1604_v19, %v1603_v18  ;;  %v1605_v25 = vld [vmem:[#allocation2 + $0x1] ss:$8 sps:$4 sm:$0xff]  }
 0x11d   : > { %v573_v27 = vld [vmem:[#allocation2 + $0x1] sm:$0x1]  ;;  %v586_v29 = vld [vmem:[#allocation2 + $0x4] sm:$0x1]  ;;  %v634_v30 = vpack.c.bf16 %v1606_v22, %v1605_v25  ;;  %v1391_v9 = vld [vmem:[%s2151_s7 + $0xb0] sm:$0xff]  ;;  %v1076_v22 = vpack.c.bf16 %v1402_v21, %v1401_v20 }
 0x11e   : > { %1517 = vmatmul.mubr.msk.bf16.vlgmr.msra.gmra.mrb[4].mxu0 %vm637_vm3, %v875_v24  ;;  %580 = vst.msk [vmem:[#allocation2] sm:$0x1] %vm579_vm2, %v573_v27  ;;  %592 = vst.msk [vmem:[#allocation2 + $0x5] sm:$0x1] %vm579_vm2, %v586_v29  ;;  %v1389_v4 = vld [vmem:[%s2151_s7 + $0xa0] sm:$0xff]  ;;  %v1392_v10 = vld [vmem:[%s2151_s7 + $0xb8] sm:$0xff] }
 0x11f   : > { %1529 = vmatpush3.bf16.msra.mxu0 %v1009_v23  ;;  %1532 = vmatprep.mubr.msk.bf16.mxu0 %vm1686_vm0, %v1685_v3  ;;  %v1608_v38 = vld [vmem:[#allocation2 + $0x10] ss:$8 sps:$4 sm:$0xff]   ;;  %v942_v7 = vpack.c.bf16 %v1390_v5, %v1389_v4  ;;  %v943_v11 = vpack.c.bf16 %v1392_v10, %v1391_v9  ;;  %v1399_v13 = vld [vmem:[%s2151_s7 + $0xe0] sm:$0xff]  ;;  %v1219_v27 = vld [vmem:[%s2155_s11 + $0x8] sm:$0xff] }
 0x120   : > { %1530 = vmatprep.subr.bf16.mxu0 %v1685_v3  ;;  %1485 = vmatmul.mubr.msk.bf16.vlgmr.msra.gmra.mrb[0].mxu1 %vm637_vm3, %v634_v30  ;;  %v1609_v46 = vld [vmem:[#allocation2 + $0x10] ss:$8 sps:$4 sm:$0xff]   ;;  %v1075_v18 = vpack.c.bf16 %v1400_v14, %v1399_v13  ;;  %v1223_v29 = vpack.c.bf16 %v1219_v27, %v1218_v26 }
 0x121   : > { %v578_v34 = vld [vmem:[#allocation2 + $0x29] sm:$0x1]  ;;  %1489 = vmatpush3.bf16.msra.mxu1 %v615_v28  ;;  %1492 = vmatprep.mubr.msk.bf16.mxu1 %vm1686_vm0, %v1685_v3  ;;  %v591_v37 = vld [vmem:[#allocation2 + $0x2c] sm:$0x1]  ;;  %v1612_v56 = vld [vmem:[#allocation2 + $0x12] ss:$8 sps:$4 sm:$0xff]  }
 0x122   : > { %585 = vst.msk [vmem:[#allocation2 + $0x28] sm:$0x1] %vm579_vm2, %v578_v34  ;;  %1490 = vmatprep.subr.bf16.mxu1 %v1685_v3  ;;  %597 = vst.msk [vmem:[#allocation2 + $0x2d] sm:$0x1] %vm579_vm2, %v591_v37  ;;  %v1613_v63 = vld [vmem:[#allocation2 + $0x12] ss:$8 sps:$4 sm:$0xff]  }
 0x123   : > { %1531 = vmatpush3.bf16.msra.mxu0 %v1010_v32  ;;  %v1616_v2 = vld [vmem:[#allocation2 + $0x18] ss:$8 sps:$4 sm:$0xff]   ;;  %v1615_v6 = vld [vmem:[#allocation2 + $0x8] ss:$8 sps:$4 sm:$0xff]  }
 0x124   : > { %1544 = vmatprep.subr.bf16.mxu0 %v1685_v3  ;;  %v809_v8 = vpack.c.bf16 %v1616_v2, %v1615_v6  ;;  %v1618_v12 = vld [vmem:[#allocation2 + $0x1a] ss:$8 sps:$4 sm:$0xff]   ;;  %v1617_v15 = vld [vmem:[#allocation2 + $0xa] ss:$8 sps:$4 sm:$0xff]  }
 0x125   : > { %v1607_v39 = vld [vmem:[#allocation2] ss:$8 sps:$4 sm:$0xff]   ;;  %1491 = vmatpush3.bf16.msra.mxu1 %v616_v35  ;;  %v941_v19 = vpack.c.bf16 %v1618_v12, %v1617_v15  ;;  %v1619_v24 = vld [vmem:[#allocation2 + $0x11] ss:$8 sps:$4 sm:$0xff]  }
 0x126   : > { %1496 = vmatprep.subr.bf16.mxu1 %v1685_v3  ;;  %v614_v43 = vpack.c.bf16 %v1608_v38, %v1607_v39  ;;  %v1611_v54 = vld [vmem:[#allocation2 + $0x2] ss:$8 sps:$4 sm:$0xff]   ;;  %v1220_v28 = vld [vmem:[%s2155_s11 + $0x10] sm:$0xff]  ;;  %v1221_v30 = vld [vmem:[%s2155_s11 + $0x18] sm:$0xff] }
 0x127   : > { %v743_v59 = vpack.c.bf16 %v1612_v56, %v1611_v54  ;;  %v1620_v23 = vld [vmem:[#allocation2 + $0x21] ss:$8 sps:$4 sm:$0xff]   ;;  %v1224_v31 = vpack.c.bf16 %v1221_v30, %v1220_v28  ;;  %v1409_v15 = vld [vmem:[%s2152_s8] ss:$0 sm:$0xff] }
 0x128   : > { %1493 = vmatmul.mubr.msk.bf16.vlgmr.msra.gmra.mrb[4].mxu1 %vm637_vm3, %v614_v43  ;;  %v1074_v25 = vpack.c.bf16 %v1620_v23, %v1619_v24 }
 0x129   : > { %v1610_v47 = vld [vmem:[#allocation2 + $0x20] ss:$8 sps:$4 sm:$0xff]   ;;  %1497 = vmatpush3.bf16.msra.mxu1 %v744_v41  ;;  %1500 = vmatprep.mubr.msk.bf16.mxu1 %vm1686_vm0, %v1685_v3 }
 0x12a   : > { %1498 = vmatprep.subr.bf16.mxu1 %v1685_v3  ;;  %v1008_v53 = vpack.c.bf16 %v1610_v47, %v1609_v46  ;;  %v1614_v62 = vld [vmem:[#allocation2 + $0x22] ss:$8 sps:$4 sm:$0xff]  }
 0x12b   : > { %v1140_v1 = vpack.c.bf16 %v1614_v62, %v1613_v63 }
 0x12c   : > { %1533 = vmatmul.mubr.msk.bf16.vlgmr.msra.gmra.mrb[8].mxu0 %vm637_vm3, %v1008_v53 }
 0x12d   : > { %1499 = vmatpush3.bf16.msra.mxu1 %v745_v49  ;;  %1545 = vmatpush3.bf16.msra.mxu0 %v1141_v50 }
 0x12e   : > { %1504 = vmatprep.subr.bf16.mxu1 %v1685_v3  ;;  %1546 = vmatprep.subr.bf16.mxu0 %v1685_v3 }
 0x12f   : > { %1548 = vmatprep.mubr.msk.bf16.mxu0 %vm1686_vm0, %v1685_v3 }
 0x130   : > { %1501 = vmatmul.mubr.msk.bf16.vlgmr.msra.gmra.mrb[8].mxu1 %vm637_vm3, %v743_v59 }
 0x131   : > { %1505 = vmatpush3.bf16.msra.mxu1 %v810_v57  ;;  %1547 = vmatpush3.bf16.msra.mxu0 %v1142_v58 }
 0x132   : > { %1506 = vmatprep.subr.bf16.mxu1 %v1685_v3  ;;  %1508 = vmatprep.mubr.msk.bf16.mxu1 %vm1686_vm0, %v1685_v3 }
 0x134   : > { %1549 = vmatmul.mubr.msk.bf16.vlgmr.msra.gmra.mrb[12].mxu0 %vm637_vm3, %v1140_v1 }
 0x135   : > { %1507 = vmatpush3.bf16.msra.mxu1 %v811_v0 }
 0x136   : > { %1520 = vmatprep.subr.bf16.mxu1 %v1685_v3 }
 0x138   : > { %1509 = vmatmul.mubr.msk.bf16.vlgmr.msra.gmra.mrb[12].mxu1 %vm637_vm3, %v809_v8 }
 0x139   : > { %1521 = vmatpush3.bf16.msra.mxu1 %v942_v7  ;;  %1524 = vmatprep.mubr.msk.bf16.mxu1 %vm1686_vm0, %v1685_v3 }
 0x13a   : > { %1522 = vmatprep.subr.bf16.mxu1 %v1685_v3 }
 0x13d   : > { %1523 = vmatpush3.bf16.msra.mxu1 %v943_v11 }
 0x13e   : > { %1536 = vmatprep.subr.bf16.mxu1 %v1685_v3 }
 0x140   : > { %1525 = vmatmul.mubr.msk.bf16.vlgmr.msra.gmra.mrb[16].mxu1 %vm637_vm3, %v941_v19 }
 0x141   : > { %1537 = vmatpush3.bf16.msra.mxu1 %v1075_v18  ;;  %1540 = vmatprep.mubr.msk.bf16.mxu1 %vm1686_vm0, %v1685_v3 }
 0x142   : > { %1538 = vmatprep.subr.bf16.mxu1 %v1685_v3 }
 0x145   : > { %1539 = vmatpush3.bf16.msra.mxu1 %v1076_v22  ;;  %v1410_v22 = vld [vmem:[%s2153_s9] ss:$0 sm:$0xff] }
 0x146   : > { %1552 = vmatprep.subr.bf16.mxu1 %v1685_v3 }
 0x148   : > { %1541 = vmatmul.mubr.msk.bf16.vlgmr.msra.gmra.mrb[20].mxu1 %vm637_vm3, %v1074_v25  ;;  %v1411_v25 = vld [vmem:[%s2154_s10] ss:$0 sm:$0xff] }
 0x149   : > { %1556 = vmatprep.mubr.msk.bf16.mxu1 %vm1686_vm0, %v1685_v3  ;;  %1553 = vmatpush3.bf16.msra.mxu1 %v1223_v29 }
 0x14a   : > { %1554 = vmatprep.subr.bf16.mxu1 %v1685_v3 }
 0x14d   : > { %1555 = vmatpush3.bf16.msra.mxu1 %v1224_v31 }
 0x1f1   : > { %v915_v32 = vpop.f32.mrb[4].mxu0 }
 0x1f2   : > { %v1518_v33 = vpop.f32.mrb[5].mxu0 }
 0x1f3   : > { %v918_v34 = vpop.f32.mrb[6].mxu0  ;;  %v675_v36 = vpop.f32.mrb[0].mxu1 }
 0x1f4   : > { %v1519_v35 = vpop.f32.mrb[7].mxu0  ;;  %v1486_v37 = vpop.f32.mrb[1].mxu1 }
 0x1f5   : > { %v678_v38 = vpop.f32.mrb[2].mxu1 }
 0x1f6   : > { %v1487_v39 = vpop.f32.mrb[3].mxu1 }
 0x1fb   : > { %v719_v40 = vpop.f32.mrb[4].mxu1 }
 0x1fc   : > { %v720_v41 = vadd.f32 %v719_v40, %v675_v36  ;;  %v1494_v42 = vpop.f32.mrb[5].mxu1 }
 0x1fd   : > { %v722_v43 = vpop.f32.mrb[6].mxu1 }
 0x1fe   : > { %v723_v44 = vadd.f32 %v722_v43, %v678_v38  ;;  %v1495_v45 = vpop.f32.mrb[7].mxu1 }
 0x1ff   : > { %v1048_v46 = vpop.f32.mrb[8].mxu0 }
 0x200   : > { %v1534_v47 = vpop.f32.mrb[9].mxu0 }
 0x201   : > { %v1051_v48 = vpop.f32.mrb[10].mxu0 }
 0x202   : > { %v1535_v49 = vpop.f32.mrb[11].mxu0 }
 0x203   : > { %v783_v3 = vpop.f32.mrb[8].mxu1 }
 0x204   : > { %v790_v50 = vadd.f32 %v783_v3, %v720_v41  ;;  %v1502_v51 = vpop.f32.mrb[9].mxu1 }
 0x205   : > { %v786_v52 = vpop.f32.mrb[10].mxu1 }
 0x206   : > { %v791_v53 = vadd.f32 %v786_v52, %v723_v44  ;;  %v1503_v54 = vpop.f32.mrb[11].mxu1 }
 0x207   : > { %v1180_v55 = vpop.f32.mrb[12].mxu0 }
 0x208   : > { %v1550_v56 = vpop.f32.mrb[13].mxu0 }
 0x209   : > { %v1183_v57 = vpop.f32.mrb[14].mxu0 }
 0x20a   : > { %v1551_v58 = vpop.f32.mrb[15].mxu0 }
 0x20b   : > { %v849_v59 = vpop.f32.mrb[12].mxu1 }
 0x20c   : > { %v856_v60 = vadd.f32 %v849_v59, %v790_v50  ;;  %v1510_v61 = vpop.f32.mrb[13].mxu1 }
 0x20d   : > { %v852_v62 = vpop.f32.mrb[14].mxu1 }
 0x20e   : > { %v857_v63 = vadd.f32 %v852_v62, %v791_v53  ;;  %v1511_v0 = vpop.f32.mrb[15].mxu1  ;;  %v922_v1 = vadd.f32 %v915_v32, %v856_v60 }
 0x210   : > { %v923_v2 = vadd.f32 %v918_v34, %v857_v63  ;;  %v1412_v34 = vld [vmem:[%s2156_s12] ss:$0 sm:$0xff] }
 0x213   : > { %v981_v4 = vpop.f32.mrb[16].mxu1 }
 0x214   : > { %v988_v5 = vadd.f32 %v981_v4, %v922_v1  ;;  %v1526_v6 = vpop.f32.mrb[17].mxu1 }
 0x215   : > { %v984_v7 = vpop.f32.mrb[18].mxu1 }
 0x216   : > { %v989_v8 = vadd.f32 %v984_v7, %v923_v2  ;;  %v1527_v9 = vpop.f32.mrb[19].mxu1  ;;  %v1055_v10 = vadd.f32 %v1048_v46, %v988_v5 }
 0x218   : > { %v1056_v11 = vadd.f32 %v1051_v48, %v989_v8 }
 0x21b   : > { %v1114_v12 = vpop.f32.mrb[20].mxu1 }
 0x21c   : > { %v1121_v13 = vadd.f32 %v1114_v12, %v1055_v10  ;;  %v1542_v14 = vpop.f32.mrb[21].mxu1 }
 0x21d   : > { %v1117_v18 = vpop.f32.mrb[22].mxu1 }
 0x21e   : > { %v1187_v19 = vadd.f32 %v1180_v55, %v1121_v13  ;;  %v1122_v20 = vadd.f32 %v1117_v18, %v1056_v11  ;;  %v1543_v21 = vpop.f32.mrb[23].mxu1 }
 0x220   : > { %v1196_v23 = vadd.f32 %v1409_v15, %v1187_v19  ;;  %v1188_v24 = vadd.f32 %v1183_v57, %v1122_v20 }
 0x222   : > { %v1205_v26 = vmul.f32 %v1410_v22, %v1196_v23  ;;  %v1197_v27 = vadd.f32 %v1409_v15, %v1188_v24 }
 0x224   : > { %v1214_v28 = vadd.f32 %v1411_v25, %v1205_v26  ;;  %v1206_v29 = vmul.f32 %v1410_v22, %v1197_v27 }
 0x226   : > { %v1215_v30 = vadd.f32 %v1411_v25, %v1206_v29  ;;  %v1216_v31 = vmax.f32 %v1214_v28, 0.0 }
 0x228   : > { %v1217_v32 = vmax.f32 %v1215_v30, 0.0 }
 0x22a   : > { %v1222_v33 = vpack.c.bf16 %v1217_v32, %v1216_v31 }
 0x22c   : > { %1557 = vmatmul.mubr.msk.bf16.vlgmr.msra.gmra.mrb[24].mxu1 %vm637_vm3, %v1222_v33 }
 0x2ff   : > { %v1269_v35 = vpop.f32.mrb[24].mxu1 }
 0x300   : > { %v1270_v36 = vadd.f32 %v1412_v34, %v1269_v35  ;;  %v1558_v37 = vpop.f32.mrb[25].mxu1 }
 0x301   : > { %v1272_v38 = vpop.f32.mrb[26].mxu1 }
 0x302   : > { %v1276_v39 = vadd.f32 %v1270_v36, %v1852_v16  ;;  %v1273_v40 = vadd.f32 %v1412_v34, %v1272_v38  ;;  %v1559_v41 = vpop.f32.mrb[27].mxu1 }
 0x304   : > { %1278 = vst [vmem:[%s433_s16] sm:$0xff] %v1276_v39  ;;  %v1277_v42 = vadd.f32 %v1273_v40, %v1854_v17 }
 0x306   : > { %1279 = vst [vmem:[%s433_s16 + $0x8] sm:$0xff] %v1277_v42 }
 0x307   : > { %1634 = shalt.err (!%p1631_p3)
}
 0x308   : > { %s1635_s30 = scalar_lea.hbm %s2101_s14, 256  ;;  %s1639_s22 = scalar_lea.hbm %s2157_s13, 512 }
 0x309   : > { %p1636_p4 = scmp.ne.s32.totalorder %s2101_s14, %s1635_s30  ;;  %p1640_p9 = scmp.lt.u32.totalorder %s2101_s14, %s2157_s13 }
 0x30a   : > { %p1641_p10 = scmp.lt.u32.totalorder %s1639_s22, %s1635_s30  ;;  %p1643_p12 = scmp.lt.u32.totalorder %s1635_s30, %s2101_s14 }
 0x30b   : > { %p1637_p7 = pnand %p1636_p4, %p1798_p5 }
 0x30c   : > { %p1642_p11 = por %p1641_p10, %p1640_p9 }
 0x30d   : > { %p1638_p8 = pneg %p1637_p7 }
 0x30e   : > { %p1644_p13 = por %p1643_p12, %p1642_p11 }
 0x310   : > { %p1645_p0 = pnand %p1644_p13, %p1638_p8 }
 0x312   : > { %1648 = shalt.err (!%p1645_p0)
}
 0x313   : > { %s1688_s29 = smov 128   ;;  %s1689_s17 = smov 8  }
 0x314   : > { %1560 = dma.vmem_to_hbm [thread:$0]  (%p1798_p5), %s2095_s20, 256, %s2101_s14, %s2103_s23, %s1688_s29, %s1688_s29, %s1689_s17  }
 0x315 PF: > { %p1566_p1 = scmp.ge.s32.totalorder %s1683_s28, 2  ;;  %s1309_s24 = sand.u32 1, %s1671_s25  }
 0x316   : > { %s1310_s30 = scalar_lea.sflag [#allocation4], %s1309_s24 }
 0x317   : > { %p1563_p2 = pnand %p1566_p1, %p1802_p6 }
 0x319   : > { %1666 = dma.done.wait (!%p1563_p2), %s1310_s30, 256  }
 0x31a   : > { %1668 = vsyncadd (!%p1563_p2), %s1310_s30, 4294967040  ;;  %s2166_s28 = sld [smem:[#allocation7_spill]]  ;;  %s2167_s16 = sld [smem:[#allocation6_spill]] }
 0x31b   : > { %s2168_s27 = sld [smem:[#allocation8_spill]]  ;;  %s2169_s25 = smov %s1675_s26 }
 0x320   : > { %p23_p3 = scmp.ge.s32.totalorder %s2166_s28, 4   ;;  %s2170_s26 = smov %s2167_s16 }
 0x322   :  { %25 = sbr.rel (!%p23_p3) target bundleno = 3 (0x3), region = 119 }
 0x329   :  { %1315 = vsyncpa [#allocation4], 1 }
 0x32a   :  { %1317 = vsyncpa [#allocation4 + $0x1], 1 }

</bundles_post_ra>
